<compile_context>
chip_gen: v7x
topology: tpu7x:2x2x1
jax: 0.10.0
libtpu: 0.0.40
codegen_flags: <defaults>
</compile_context>

<pallas_src>
import jax
import jax.numpy as jnp
from jax.experimental import pallas as pl
from jax.experimental.pallas import tpu as pltpu

# ----------------------------- static net dims -----------------------------
_S0, _C0 = 48, 3             # input spatial / channels
_K1, _C1 = 3, 64             # conv11
_K2, _C2 = 3, 96             # conv21
_K3, _C3 = 4, 128            # conv31
_S1 = _S0 - _K1 + 1          # 46  (conv11 output spatial)
_P1 = (_S1 - 3) // 3 + 1     # 15  (pool1 output spatial)
_S2 = _P1 - _K2 + 1          # 13  (conv21 output spatial)
_P2 = (_S2 - 3) // 3 + 1     # 4   (pool2 output spatial)
_NCLS = 43                   # classes
_NPAD = 128                  # lane-dense logits padding

_TAP1 = _K1 * _K1 * _C0      # 27 conv1 taps
_KP1 = 32                    # conv1 K padded to 32 lanes
_Q1 = 16                     # W-pool windows per conv1 row (15 valid + 1 pad)
_WPAD1 = 3 * _Q1             # 48 im2col rows per conv1 output row
_ROWBLK1 = 3 * _WPAD1        # 144 im2col rows per pool-1 output row
_K2FLAT = _K2 * _K2 * _C1    # 576
_K3FLAT = _K3 * _K3 * _C2    # 1536
_P1STRIDE = 16               # pool1 scratch row stride (cols 0..14 valid)
_POOL1_ROWS = _P1 * _P1STRIDE  # 240


# ------------------------------ fused kernel -------------------------------
def _net_kernel(xcol_ref, w1_ref, t1_ref, w2_ref, t2_ref, w3_ref, b3_ref,
                wip1_ref, bip1_ref, wip2_ref, bip2_ref,
                logits_ref, x1_ref, pool1_ref):
    f32, bf16 = jnp.float32, jnp.bfloat16

    # ---- stage 1: conv11 (as im2col matmul) + BN + ReLU + 3x3/s3 max-pool --
    # xcol M index = 48*h + 16*r + q  (conv row h, output col w = 3q + r)
    w1 = w1_ref[...]                                     # (32, 64) bf16
    t1b = jnp.broadcast_to(t1_ref[...], (_ROWBLK1, _C1))  # hoisted shift
    for po1 in range(_P1):                               # static unroll (15)
        lhs = xcol_ref[0, _ROWBLK1 * po1:_ROWBLK1 * (po1 + 1), :]   # (144, 32)
        y = jnp.dot(lhs, w1, preferred_element_type=f32)            # (144, 64)
        y = jnp.maximum(y + t1b, 0.0)                    # folded BN + ReLU
        # H-pool over the 3 conv rows (dh blocks of 48), then W-pool over r.
        hm = jnp.maximum(jnp.maximum(y[0:_WPAD1], y[_WPAD1:2 * _WPAD1]),
                         y[2 * _WPAD1:3 * _WPAD1])       # (48, 64)
        wm = jnp.maximum(jnp.maximum(hm[0:_Q1], hm[_Q1:2 * _Q1]),
                         hm[2 * _Q1:3 * _Q1])            # (16, 64), cols 0..14 valid
        pool1_ref[_P1STRIDE * po1:_P1STRIDE * po1 + _Q1, :] = wm.astype(bf16)

    # ---- stage 2: conv21 (K-concat 576) + BN + ReLU + 3x3/s3 max-pool ------
    w2 = w2_ref[...]                                     # (576, 96) bf16
    t2b = jnp.broadcast_to(t2_ref[...], (3 * _P1STRIDE, _C2))
    pool2_vals = []
    for po2 in range(_P2):                               # static unroll (4)
        base = 3 * _P1STRIDE * po2
        parts = [pool1_ref[base + _P1STRIDE * kh + kw:
                           base + _P1STRIDE * kh + kw + 3 * _P1STRIDE, :]
                 for kh in range(_K2) for kw in range(_K2)]          # 9x (48,64)
        lhs2 = jnp.concatenate(parts, axis=-1)           # (48, 576) bf16
        y2 = jnp.dot(lhs2, w2, preferred_element_type=f32)           # (48, 96)
        y2 = jnp.maximum(y2 + t2b, 0.0)
        # rows m = 16*dh + w2col ; cols 0..12 valid, 13..15 discarded
        hm2 = jnp.maximum(jnp.maximum(y2[0:_P1STRIDE], y2[_P1STRIDE:2 * _P1STRIDE]),
                          y2[2 * _P1STRIDE:3 * _P1STRIDE])           # (16, 96)
        for p in range(_P2):                             # W-pool: 4 windows of 3
            wmp = jnp.maximum(jnp.maximum(hm2[3 * p:3 * p + 1, :],
                                          hm2[3 * p + 1:3 * p + 2, :]),
                              hm2[3 * p + 2:3 * p + 3, :])           # (1, 96)
            pool2_vals.append(wmp.astype(bf16))

    # ---- stage 3: conv31 (one K=1536 matmul) -> x1 -> ip1 -> ReLU -> ip2 ---
    lhs3 = jnp.concatenate(pool2_vals, axis=-1)          # (1, 1536) bf16
    x1 = jnp.dot(lhs3, w3_ref[...], preferred_element_type=f32) + b3_ref[...]
    x1_ref[0] = x1                                       # (1, 128)

    h = jnp.dot(x1.astype(bf16), wip1_ref[...], preferred_element_type=f32)
    h = jnp.maximum(h + bip1_ref[...], 0.0)
    logits = jnp.dot(h.astype(bf16), wip2_ref[...], preferred_element_type=f32)
    logits_ref[0] = logits + bip2_ref[...]               # (1, 128) lane-dense


# --------------------------------- wrapper ----------------------------------
def _full_spec(a):
    nd = a.ndim
    return pl.BlockSpec(a.shape, lambda n, _nd=nd: (0,) * _nd)


def _im2col_conv1(x_nhwc):
    """(N,48,48,3) f32 -> (N, 46*48, 32) bf16.
    M index = 48*h + 16*r + q for conv output (h, w=3q+r); K = 27 taps + pad."""
    n = x_nhwc.shape[0]
    patches = jnp.concatenate(
        [x_nhwc[:, kh:kh + _S1, kw:kw + _S1, :]
         for kh in range(_K1) for kw in range(_K1)], axis=-1)   # (N,46,46,27)
    patches = jnp.pad(patches,
                      ((0, 0), (0, 0), (0, 3 * _Q1 - _S1), (0, _KP1 - _TAP1)))
    patches = patches.reshape(n, _S1, _Q1, 3, _KP1).transpose(0, 1, 3, 2, 4)
    return patches.reshape(n, _S1 * _WPAD1, _KP1).astype(jnp.bfloat16)


def net_forward(x_nchw, params):
    """Net.forward: returns (logits, x1) like the PyTorch module."""
    n_batch = x_nchw.shape[0]
    x = jnp.transpose(x_nchw, (0, 2, 3, 1)).astype(jnp.float32)   # NCHW -> NHWC
    xcol = _im2col_conv1(x)                                        # (N,2208,32) bf16

    order = ("w1", "t1", "w2", "t2", "w3", "b3", "wip1", "bip1", "wip2", "bip2")
    p_args = [params[k] for k in order]

    logits_pad, x1 = pl.pallas_call(
        _net_kernel,
        out_shape=(jax.ShapeDtypeStruct((n_batch, 1, _NPAD), jnp.float32),
                   jax.ShapeDtypeStruct((n_batch, 1, _C3), jnp.float32)),
        grid=(n_batch,),
        in_specs=[pl.BlockSpec((1, _S1 * _WPAD1, _KP1), lambda n: (n, 0, 0))]
                 + [_full_spec(a) for a in p_args],
        out_specs=(pl.BlockSpec((1, 1, _NPAD), lambda n: (n, 0, 0)),
                   pl.BlockSpec((1, 1, _C3), lambda n: (n, 0, 0))),
        scratch_shapes=[
            pltpu.VMEM((_POOL1_ROWS, _C1), jnp.bfloat16),  # pooled conv11 acts (bf16)
        ],
        compiler_params=pltpu.CompilerParams(
            dimension_semantics=("parallel",)),            # one sample per TC on v7x
    )(xcol, *p_args)

    logits = logits_pad[:, 0, :_NCLS]
    x1 = x1[:, 0, :]
    # TODO(synk): torch's `x1.tolist()[0]` is a host-side conversion with no
    # effect on the returned tensors; intentionally omitted.
    return logits, x1


# ------------------------------ parameter init ------------------------------
def init_params(key):
    """Random params in kernel-ready layout: eval-mode BatchNorm scale folded
    directly into bf16 conv weights, BN shift + scaled conv bias as f32 per-
    channel shifts, conv weights flattened to (K, Cout), linear weights
    (in, out) bf16, ip2 zero-padded to 128 output lanes."""
    ks = jax.random.split(key, 18)
    f32, bf16 = jnp.float32, jnp.bfloat16

    def w_init(k, shape, fan_in):
        return jax.random.normal(k, shape, f32) * (1.0 / jnp.sqrt(fan_in))

    def bn_fold(kg, kb, km, kv, c):
        gamma = 1.0 + 0.1 * jax.random.normal(kg, (c,), f32)
        beta = 0.05 * jax.random.normal(kb, (c,), f32)
        r_mean = 0.05 * jax.random.normal(km, (c,), f32)
        r_var = jax.random.uniform(kv, (c,), f32, 0.5, 1.5)
        scale = gamma / jnp.sqrt(r_var + 1e-5)
        shift = beta - r_mean * scale
        return scale, shift

    w11 = w_init(ks[0], (_K1, _K1, _C0, _C1), _K1 * _K1 * _C0)
    b11 = 0.01 * jax.random.normal(ks[1], (_C1,), f32)
    sc1, sh1 = bn_fold(ks[2], ks[3], ks[4], ks[5], _C1)

    w21 = w_init(ks[6], (_K2, _K2, _C1, _C2), _K2 * _K2 * _C1)
    b21 = 0.01 * jax.random.normal(ks[7], (_C2,), f32)
    sc2, sh2 = bn_fold(ks[8], ks[9], ks[10], ks[11], _C2)

    w31 = w_init(ks[12], (_K3, _K3, _C2, _C3), _K3 * _K3 * _C2)
    b31 = 0.01 * jax.random.normal(ks[13], (_C3,), f32)

    wip1 = w_init(ks[14], (_C3, 128), _C3)
    bip1 = 0.01 * jax.random.normal(ks[15], (128,), f32)
    wip2 = w_init(ks[16], (128, _NCLS), 128)
    bip2 = 0.01 * jax.random.normal(ks[17], (_NCLS,), f32)

    # Fold BN scale into conv weights (conv -> BN, eval mode):
    #   y = (x*W + b)*s + t  ==  x*(W*s) + (s*b + t)
    w1f = (w11 * sc1).reshape(_TAP1, _C1)
    w1f = jnp.zeros((_KP1, _C1), f32).at[:_TAP1].set(w1f)       # pad K 27 -> 32
    w2f = (w21 * sc2).reshape(_K2FLAT, _C2)

    wip2_pad = jnp.zeros((128, _NPAD), f32).at[:, :_NCLS].set(wip2)
    bip2_pad = jnp.zeros((_NPAD,), f32).at[:_NCLS].set(bip2)

    return dict(
        w1=w1f.astype(bf16),
        t1=(sh1 + sc1 * b11).reshape(1, _C1),       # BN shift + scaled conv bias
        w2=w2f.astype(bf16),
        t2=(sh2 + sc2 * b21).reshape(1, _C2),
        w3=w31.reshape(_K3FLAT, _C3).astype(bf16),
        b3=b31.reshape(1, _C3),
        wip1=wip1.astype(bf16),
        bip1=bip1.reshape(1, 128),
        wip2=wip2_pad.astype(bf16),
        bip2=bip2_pad.reshape(1, _NPAD),
    )


if __name__ == "__main__":
    key = jax.random.PRNGKey(0)
    k_in, k_par = jax.random.split(key)
    # batch=2, 3 channels, 48x48 spatial (required so conv31 output is 1x1)
    x = jax.random.normal(k_in, (2, 3, 48, 48), dtype=jnp.float32)
    params = init_params(k_par)

    logits, x1 = jax.jit(net_forward)(x, params)
    jax.block_until_ready((logits, x1))

    assert logits.shape == (2, 43), logits.shape
    assert x1.shape == (2, 128), x1.shape
    assert bool(jnp.all(jnp.isfinite(logits))) and bool(jnp.all(jnp.isfinite(x1)))
    print("KERNEL_OK")
</pallas_src>

<mosaic_0001>
module attributes {stable_mosaic.version = 11 : i64} {
  func.func @_net_kernel(%arg0: i32, %arg1: memref<1x2208x32xbf16, #tpu.memory_space<vmem>>, %arg2: memref<32x64xbf16, #tpu.memory_space<vmem>>, %arg3: memref<1x64xf32, #tpu.memory_space<vmem>>, %arg4: memref<576x96xbf16, #tpu.memory_space<vmem>>, %arg5: memref<1x96xf32, #tpu.memory_space<vmem>>, %arg6: memref<1536x128xbf16, #tpu.memory_space<vmem>>, %arg7: memref<1x128xf32, #tpu.memory_space<vmem>>, %arg8: memref<128x128xbf16, #tpu.memory_space<vmem>>, %arg9: memref<1x128xf32, #tpu.memory_space<vmem>>, %arg10: memref<128x128xbf16, #tpu.memory_space<vmem>>, %arg11: memref<1x128xf32, #tpu.memory_space<vmem>>, %arg12: memref<1x1x128xf32, #tpu.memory_space<vmem>>, %arg13: memref<1x1x128xf32, #tpu.memory_space<vmem>>, %arg14: memref<240x64xbf16, #tpu.memory_space<vmem>>) attributes {dimension_semantics = [#tpu.dimension_semantics<parallel>], iteration_bounds = array<i64: 2>, scalar_prefetch = 0 : i64, scratch_operands = 1 : i64, tpu.core_type = #tpu.core_type<tc>, window_params = [{transform_indices = @transform_0, window_bounds = array<i64: 1, 2208, 32>}, {pipeline_mode = #tpu.pipeline_mode<synchronous>, transform_indices = @transform_1, window_bounds = array<i64: 32, 64>}, {pipeline_mode = #tpu.pipeline_mode<synchronous>, transform_indices = @transform_2, window_bounds = array<i64: 1, 64>}, {pipeline_mode = #tpu.pipeline_mode<synchronous>, transform_indices = @transform_3, window_bounds = array<i64: 576, 96>}, {pipeline_mode = #tpu.pipeline_mode<synchronous>, transform_indices = @transform_4, window_bounds = array<i64: 1, 96>}, {pipeline_mode = #tpu.pipeline_mode<synchronous>, transform_indices = @transform_5, window_bounds = array<i64: 1536, 128>}, {pipeline_mode = #tpu.pipeline_mode<synchronous>, transform_indices = @transform_6, window_bounds = array<i64: 1, 128>}, {pipeline_mode = #tpu.pipeline_mode<synchronous>, transform_indices = @transform_7, window_bounds = array<i64: 128, 128>}, {pipeline_mode = #tpu.pipeline_mode<synchronous>, transform_indices = @transform_8, window_bounds = array<i64: 1, 128>}, {pipeline_mode = #tpu.pipeline_mode<synchronous>, transform_indices = @transform_9, window_bounds = array<i64: 128, 128>}, {pipeline_mode = #tpu.pipeline_mode<synchronous>, transform_indices = @transform_10, window_bounds = array<i64: 1, 128>}, {transform_indices = @transform_11, window_bounds = array<i64: 1, 1, 128>}, {transform_indices = @transform_12, window_bounds = array<i64: 1, 1, 128>}]} {
    %c0 = arith.constant 0 : index
    %c0_0 = arith.constant 0 : index
    %0 = vector.load %arg2[%c0, %c0_0] : memref<32x64xbf16, #tpu.memory_space<vmem>>, vector<32x64xbf16>
    %c0_1 = arith.constant 0 : index
    %c0_2 = arith.constant 0 : index
    %1 = vector.load %arg3[%c0_1, %c0_2] : memref<1x64xf32, #tpu.memory_space<vmem>>, vector<1x64xf32>
    %2 = vector.shape_cast %1 : vector<1x64xf32> to vector<1x64xf32>
    %3 = vector.broadcast %2 : vector<1x64xf32> to vector<144x64xf32>
    %c0_3 = arith.constant 0 : index
    %c0_4 = arith.constant 0 : index
    %c0_5 = arith.constant 0 : index
    %4 = vector.load %arg1[%c0_3, %c0_4, %c0_5] : memref<1x2208x32xbf16, #tpu.memory_space<vmem>>, vector<1x144x32xbf16>
    %5 = vector.shape_cast %4 : vector<1x144x32xbf16> to vector<144x32xbf16>
    %cst = arith.constant dense<0.000000e+00> : vector<144x64xf32>
    %6 = tpu.matmul %5, %0, %cst {dimension_numbers = #tpu.dot_dimension_numbers<[1], [0], [0], [1], [0, 0, 1, 1], [], []>} : vector<144x32xbf16>, vector<32x64xbf16>, vector<144x64xf32> -> vector<144x64xf32>
    %7 = arith.addf %6, %3 : vector<144x64xf32>
    %cst_6 = arith.constant 0.000000e+00 : f32
    %8 = vector.broadcast %cst_6 : f32 to vector<144x64xf32>
    %9 = arith.maximumf %7, %8 : vector<144x64xf32>
    %10 = vector.extract_strided_slice %9 {offsets = [0, 0], sizes = [48, 64], strides = [1, 1]} : vector<144x64xf32> to vector<48x64xf32>
    %11 = vector.extract_strided_slice %9 {offsets = [48, 0], sizes = [48, 64], strides = [1, 1]} : vector<144x64xf32> to vector<48x64xf32>
    %12 = arith.maximumf %10, %11 : vector<48x64xf32>
    %13 = vector.extract_strided_slice %9 {offsets = [96, 0], sizes = [48, 64], strides = [1, 1]} : vector<144x64xf32> to vector<48x64xf32>
    %14 = arith.maximumf %12, %13 : vector<48x64xf32>
    %15 = vector.extract_strided_slice %14 {offsets = [0, 0], sizes = [16, 64], strides = [1, 1]} : vector<48x64xf32> to vector<16x64xf32>
    %16 = vector.extract_strided_slice %14 {offsets = [16, 0], sizes = [16, 64], strides = [1, 1]} : vector<48x64xf32> to vector<16x64xf32>
    %17 = arith.maximumf %15, %16 : vector<16x64xf32>
    %18 = vector.extract_strided_slice %14 {offsets = [32, 0], sizes = [16, 64], strides = [1, 1]} : vector<48x64xf32> to vector<16x64xf32>
    %19 = arith.maximumf %17, %18 : vector<16x64xf32>
    %20 = arith.truncf %19 : vector<16x64xf32> to vector<16x64xbf16>
    %c0_7 = arith.constant 0 : index
    %c0_8 = arith.constant 0 : index
    %21 = vector.load %arg14[%c0_7, %c0_8] : memref<240x64xbf16, #tpu.memory_space<vmem>>, vector<16x64xbf16>
    tpu.vector_store %arg14[%c0_7, %c0_8], %20 {strides = array<i32>} : memref<240x64xbf16, #tpu.memory_space<vmem>>, vector<16x64xbf16>,
    %c0_9 = arith.constant 0 : index
    %c144 = arith.constant 144 : index
    %c0_10 = arith.constant 0 : index
    %22 = vector.load %arg1[%c0_9, %c144, %c0_10] : memref<1x2208x32xbf16, #tpu.memory_space<vmem>>, vector<1x144x32xbf16>
    %23 = vector.shape_cast %22 : vector<1x144x32xbf16> to vector<144x32xbf16>
    %cst_11 = arith.constant dense<0.000000e+00> : vector<144x64xf32>
    %24 = tpu.matmul %23, %0, %cst_11 {dimension_numbers = #tpu.dot_dimension_numbers<[1], [0], [0], [1], [0, 0, 1, 1], [], []>} : vector<144x32xbf16>, vector<32x64xbf16>, vector<144x64xf32> -> vector<144x64xf32>
    %25 = arith.addf %24, %3 : vector<144x64xf32>
    %cst_12 = arith.constant 0.000000e+00 : f32
    %26 = vector.broadcast %cst_12 : f32 to vector<144x64xf32>
    %27 = arith.maximumf %25, %26 : vector<144x64xf32>
    %28 = vector.extract_strided_slice %27 {offsets = [0, 0], sizes = [48, 64], strides = [1, 1]} : vector<144x64xf32> to vector<48x64xf32>
    %29 = vector.extract_strided_slice %27 {offsets = [48, 0], sizes = [48, 64], strides = [1, 1]} : vector<144x64xf32> to vector<48x64xf32>
    %30 = arith.maximumf %28, %29 : vector<48x64xf32>
    %31 = vector.extract_strided_slice %27 {offsets = [96, 0], sizes = [48, 64], strides = [1, 1]} : vector<144x64xf32> to vector<48x64xf32>
    %32 = arith.maximumf %30, %31 : vector<48x64xf32>
    %33 = vector.extract_strided_slice %32 {offsets = [0, 0], sizes = [16, 64], strides = [1, 1]} : vector<48x64xf32> to vector<16x64xf32>
    %34 = vector.extract_strided_slice %32 {offsets = [16, 0], sizes = [16, 64], strides = [1, 1]} : vector<48x64xf32> to vector<16x64xf32>
    %35 = arith.maximumf %33, %34 : vector<16x64xf32>
    %36 = vector.extract_strided_slice %32 {offsets = [32, 0], sizes = [16, 64], strides = [1, 1]} : vector<48x64xf32> to vector<16x64xf32>
    %37 = arith.maximumf %35, %36 : vector<16x64xf32>
    %38 = arith.truncf %37 : vector<16x64xf32> to vector<16x64xbf16>
    %c16 = arith.constant 16 : index
    %c0_13 = arith.constant 0 : index
    %39 = vector.load %arg14[%c16, %c0_13] : memref<240x64xbf16, #tpu.memory_space<vmem>>, vector<16x64xbf16>
    tpu.vector_store %arg14[%c16, %c0_13], %38 {strides = array<i32>} : memref<240x64xbf16, #tpu.memory_space<vmem>>, vector<16x64xbf16>,
    %c0_14 = arith.constant 0 : index
    %c288 = arith.constant 288 : index
    %c0_15 = arith.constant 0 : index
    %40 = vector.load %arg1[%c0_14, %c288, %c0_15] : memref<1x2208x32xbf16, #tpu.memory_space<vmem>>, vector<1x144x32xbf16>
    %41 = vector.shape_cast %40 : vector<1x144x32xbf16> to vector<144x32xbf16>
    %cst_16 = arith.constant dense<0.000000e+00> : vector<144x64xf32>
    %42 = tpu.matmul %41, %0, %cst_16 {dimension_numbers = #tpu.dot_dimension_numbers<[1], [0], [0], [1], [0, 0, 1, 1], [], []>} : vector<144x32xbf16>, vector<32x64xbf16>, vector<144x64xf32> -> vector<144x64xf32>
    %43 = arith.addf %42, %3 : vector<144x64xf32>
    %cst_17 = arith.constant 0.000000e+00 : f32
    %44 = vector.broadcast %cst_17 : f32 to vector<144x64xf32>
    %45 = arith.maximumf %43, %44 : vector<144x64xf32>
    %46 = vector.extract_strided_slice %45 {offsets = [0, 0], sizes = [48, 64], strides = [1, 1]} : vector<144x64xf32> to vector<48x64xf32>
    %47 = vector.extract_strided_slice %45 {offsets = [48, 0], sizes = [48, 64], strides = [1, 1]} : vector<144x64xf32> to vector<48x64xf32>
    %48 = arith.maximumf %46, %47 : vector<48x64xf32>
    %49 = vector.extract_strided_slice %45 {offsets = [96, 0], sizes = [48, 64], strides = [1, 1]} : vector<144x64xf32> to vector<48x64xf32>
    %50 = arith.maximumf %48, %49 : vector<48x64xf32>
    %51 = vector.extract_strided_slice %50 {offsets = [0, 0], sizes = [16, 64], strides = [1, 1]} : vector<48x64xf32> to vector<16x64xf32>
    %52 = vector.extract_strided_slice %50 {offsets = [16, 0], sizes = [16, 64], strides = [1, 1]} : vector<48x64xf32> to vector<16x64xf32>
    %53 = arith.maximumf %51, %52 : vector<16x64xf32>
    %54 = vector.extract_strided_slice %50 {offsets = [32, 0], sizes = [16, 64], strides = [1, 1]} : vector<48x64xf32> to vector<16x64xf32>
    %55 = arith.maximumf %53, %54 : vector<16x64xf32>
    %56 = arith.truncf %55 : vector<16x64xf32> to vector<16x64xbf16>
    %c32 = arith.constant 32 : index
    %c0_18 = arith.constant 0 : index
    %57 = vector.load %arg14[%c32, %c0_18] : memref<240x64xbf16, #tpu.memory_space<vmem>>, vector<16x64xbf16>
    tpu.vector_store %arg14[%c32, %c0_18], %56 {strides = array<i32>} : memref<240x64xbf16, #tpu.memory_space<vmem>>, vector<16x64xbf16>,
    %c0_19 = arith.constant 0 : index
    %c432 = arith.constant 432 : index
    %c0_20 = arith.constant 0 : index
    %58 = vector.load %arg1[%c0_19, %c432, %c0_20] : memref<1x2208x32xbf16, #tpu.memory_space<vmem>>, vector<1x144x32xbf16>
    %59 = vector.shape_cast %58 : vector<1x144x32xbf16> to vector<144x32xbf16>
    %cst_21 = arith.constant dense<0.000000e+00> : vector<144x64xf32>
    %60 = tpu.matmul %59, %0, %cst_21 {dimension_numbers = #tpu.dot_dimension_numbers<[1], [0], [0], [1], [0, 0, 1, 1], [], []>} : vector<144x32xbf16>, vector<32x64xbf16>, vector<144x64xf32> -> vector<144x64xf32>
    %61 = arith.addf %60, %3 : vector<144x64xf32>
    %cst_22 = arith.constant 0.000000e+00 : f32
    %62 = vector.broadcast %cst_22 : f32 to vector<144x64xf32>
    %63 = arith.maximumf %61, %62 : vector<144x64xf32>
    %64 = vector.extract_strided_slice %63 {offsets = [0, 0], sizes = [48, 64], strides = [1, 1]} : vector<144x64xf32> to vector<48x64xf32>
    %65 = vector.extract_strided_slice %63 {offsets = [48, 0], sizes = [48, 64], strides = [1, 1]} : vector<144x64xf32> to vector<48x64xf32>
    %66 = arith.maximumf %64, %65 : vector<48x64xf32>
    %67 = vector.extract_strided_slice %63 {offsets = [96, 0], sizes = [48, 64], strides = [1, 1]} : vector<144x64xf32> to vector<48x64xf32>
    %68 = arith.maximumf %66, %67 : vector<48x64xf32>
    %69 = vector.extract_strided_slice %68 {offsets = [0, 0], sizes = [16, 64], strides = [1, 1]} : vector<48x64xf32> to vector<16x64xf32>
    %70 = vector.extract_strided_slice %68 {offsets = [16, 0], sizes = [16, 64], strides = [1, 1]} : vector<48x64xf32> to vector<16x64xf32>
    %71 = arith.maximumf %69, %70 : vector<16x64xf32>
    %72 = vector.extract_strided_slice %68 {offsets = [32, 0], sizes = [16, 64], strides = [1, 1]} : vector<48x64xf32> to vector<16x64xf32>
    %73 = arith.maximumf %71, %72 : vector<16x64xf32>
    %74 = arith.truncf %73 : vector<16x64xf32> to vector<16x64xbf16>
    %c48 = arith.constant 48 : index
    %c0_23 = arith.constant 0 : index
    %75 = vector.load %arg14[%c48, %c0_23] : memref<240x64xbf16, #tpu.memory_space<vmem>>, vector<16x64xbf16>
    tpu.vector_store %arg14[%c48, %c0_23], %74 {strides = array<i32>} : memref<240x64xbf16, #tpu.memory_space<vmem>>, vector<16x64xbf16>,
    %c0_24 = arith.constant 0 : index
    %c576 = arith.constant 576 : index
    %c0_25 = arith.constant 0 : index
    %76 = vector.load %arg1[%c0_24, %c576, %c0_25] : memref<1x2208x32xbf16, #tpu.memory_space<vmem>>, vector<1x144x32xbf16>
    %77 = vector.shape_cast %76 : vector<1x144x32xbf16> to vector<144x32xbf16>
    %cst_26 = arith.constant dense<0.000000e+00> : vector<144x64xf32>
    %78 = tpu.matmul %77, %0, %cst_26 {dimension_numbers = #tpu.dot_dimension_numbers<[1], [0], [0], [1], [0, 0, 1, 1], [], []>} : vector<144x32xbf16>, vector<32x64xbf16>, vector<144x64xf32> -> vector<144x64xf32>
    %79 = arith.addf %78, %3 : vector<144x64xf32>
    %cst_27 = arith.constant 0.000000e+00 : f32
    %80 = vector.broadcast %cst_27 : f32 to vector<144x64xf32>
    %81 = arith.maximumf %79, %80 : vector<144x64xf32>
    %82 = vector.extract_strided_slice %81 {offsets = [0, 0], sizes = [48, 64], strides = [1, 1]} : vector<144x64xf32> to vector<48x64xf32>
    %83 = vector.extract_strided_slice %81 {offsets = [48, 0], sizes = [48, 64], strides = [1, 1]} : vector<144x64xf32> to vector<48x64xf32>
    %84 = arith.maximumf %82, %83 : vector<48x64xf32>
    %85 = vector.extract_strided_slice %81 {offsets = [96, 0], sizes = [48, 64], strides = [1, 1]} : vector<144x64xf32> to vector<48x64xf32>
    %86 = arith.maximumf %84, %85 : vector<48x64xf32>
    %87 = vector.extract_strided_slice %86 {offsets = [0, 0], sizes = [16, 64], strides = [1, 1]} : vector<48x64xf32> to vector<16x64xf32>
    %88 = vector.extract_strided_slice %86 {offsets = [16, 0], sizes = [16, 64], strides = [1, 1]} : vector<48x64xf32> to vector<16x64xf32>
    %89 = arith.maximumf %87, %88 : vector<16x64xf32>
    %90 = vector.extract_strided_slice %86 {offsets = [32, 0], sizes = [16, 64], strides = [1, 1]} : vector<48x64xf32> to vector<16x64xf32>
    %91 = arith.maximumf %89, %90 : vector<16x64xf32>
    %92 = arith.truncf %91 : vector<16x64xf32> to vector<16x64xbf16>
    %c64 = arith.constant 64 : index
    %c0_28 = arith.constant 0 : index
    %93 = vector.load %arg14[%c64, %c0_28] : memref<240x64xbf16, #tpu.memory_space<vmem>>, vector<16x64xbf16>
    tpu.vector_store %arg14[%c64, %c0_28], %92 {strides = array<i32>} : memref<240x64xbf16, #tpu.memory_space<vmem>>, vector<16x64xbf16>,
    %c0_29 = arith.constant 0 : index
    %c720 = arith.constant 720 : index
    %c0_30 = arith.constant 0 : index
    %94 = vector.load %arg1[%c0_29, %c720, %c0_30] : memref<1x2208x32xbf16, #tpu.memory_space<vmem>>, vector<1x144x32xbf16>
    %95 = vector.shape_cast %94 : vector<1x144x32xbf16> to vector<144x32xbf16>
    %cst_31 = arith.constant dense<0.000000e+00> : vector<144x64xf32>
    %96 = tpu.matmul %95, %0, %cst_31 {dimension_numbers = #tpu.dot_dimension_numbers<[1], [0], [0], [1], [0, 0, 1, 1], [], []>} : vector<144x32xbf16>, vector<32x64xbf16>, vector<144x64xf32> -> vector<144x64xf32>
    %97 = arith.addf %96, %3 : vector<144x64xf32>
    %cst_32 = arith.constant 0.000000e+00 : f32
    %98 = vector.broadcast %cst_32 : f32 to vector<144x64xf32>
    %99 = arith.maximumf %97, %98 : vector<144x64xf32>
    %100 = vector.extract_strided_slice %99 {offsets = [0, 0], sizes = [48, 64], strides = [1, 1]} : vector<144x64xf32> to vector<48x64xf32>
    %101 = vector.extract_strided_slice %99 {offsets = [48, 0], sizes = [48, 64], strides = [1, 1]} : vector<144x64xf32> to vector<48x64xf32>
    %102 = arith.maximumf %100, %101 : vector<48x64xf32>
    %103 = vector.extract_strided_slice %99 {offsets = [96, 0], sizes = [48, 64], strides = [1, 1]} : vector<144x64xf32> to vector<48x64xf32>
    %104 = arith.maximumf %102, %103 : vector<48x64xf32>
    %105 = vector.extract_strided_slice %104 {offsets = [0, 0], sizes = [16, 64], strides = [1, 1]} : vector<48x64xf32> to vector<16x64xf32>
    %106 = vector.extract_strided_slice %104 {offsets = [16, 0], sizes = [16, 64], strides = [1, 1]} : vector<48x64xf32> to vector<16x64xf32>
    %107 = arith.maximumf %105, %106 : vector<16x64xf32>
    %108 = vector.extract_strided_slice %104 {offsets = [32, 0], sizes = [16, 64], strides = [1, 1]} : vector<48x64xf32> to vector<16x64xf32>
    %109 = arith.maximumf %107, %108 : vector<16x64xf32>
    %110 = arith.truncf %109 : vector<16x64xf32> to vector<16x64xbf16>
    %c80 = arith.constant 80 : index
    %c0_33 = arith.constant 0 : index
    %111 = vector.load %arg14[%c80, %c0_33] : memref<240x64xbf16, #tpu.memory_space<vmem>>, vector<16x64xbf16>
    tpu.vector_store %arg14[%c80, %c0_33], %110 {strides = array<i32>} : memref<240x64xbf16, #tpu.memory_space<vmem>>, vector<16x64xbf16>,
    %c0_34 = arith.constant 0 : index
    %c864 = arith.constant 864 : index
    %c0_35 = arith.constant 0 : index
    %112 = vector.load %arg1[%c0_34, %c864, %c0_35] : memref<1x2208x32xbf16, #tpu.memory_space<vmem>>, vector<1x144x32xbf16>
    %113 = vector.shape_cast %112 : vector<1x144x32xbf16> to vector<144x32xbf16>
    %cst_36 = arith.constant dense<0.000000e+00> : vector<144x64xf32>
    %114 = tpu.matmul %113, %0, %cst_36 {dimension_numbers = #tpu.dot_dimension_numbers<[1], [0], [0], [1], [0, 0, 1, 1], [], []>} : vector<144x32xbf16>, vector<32x64xbf16>, vector<144x64xf32> -> vector<144x64xf32>
    %115 = arith.addf %114, %3 : vector<144x64xf32>
    %cst_37 = arith.constant 0.000000e+00 : f32
    %116 = vector.broadcast %cst_37 : f32 to vector<144x64xf32>
    %117 = arith.maximumf %115, %116 : vector<144x64xf32>
    %118 = vector.extract_strided_slice %117 {offsets = [0, 0], sizes = [48, 64], strides = [1, 1]} : vector<144x64xf32> to vector<48x64xf32>
    %119 = vector.extract_strided_slice %117 {offsets = [48, 0], sizes = [48, 64], strides = [1, 1]} : vector<144x64xf32> to vector<48x64xf32>
    %120 = arith.maximumf %118, %119 : vector<48x64xf32>
    %121 = vector.extract_strided_slice %117 {offsets = [96, 0], sizes = [48, 64], strides = [1, 1]} : vector<144x64xf32> to vector<48x64xf32>
    %122 = arith.maximumf %120, %121 : vector<48x64xf32>
    %123 = vector.extract_strided_slice %122 {offsets = [0, 0], sizes = [16, 64], strides = [1, 1]} : vector<48x64xf32> to vector<16x64xf32>
    %124 = vector.extract_strided_slice %122 {offsets = [16, 0], sizes = [16, 64], strides = [1, 1]} : vector<48x64xf32> to vector<16x64xf32>
    %125 = arith.maximumf %123, %124 : vector<16x64xf32>
    %126 = vector.extract_strided_slice %122 {offsets = [32, 0], sizes = [16, 64], strides = [1, 1]} : vector<48x64xf32> to vector<16x64xf32>
    %127 = arith.maximumf %125, %126 : vector<16x64xf32>
    %128 = arith.truncf %127 : vector<16x64xf32> to vector<16x64xbf16>
    %c96 = arith.constant 96 : index
    %c0_38 = arith.constant 0 : index
    %129 = vector.load %arg14[%c96, %c0_38] : memref<240x64xbf16, #tpu.memory_space<vmem>>, vector<16x64xbf16>
    tpu.vector_store %arg14[%c96, %c0_38], %128 {strides = array<i32>} : memref<240x64xbf16, #tpu.memory_space<vmem>>, vector<16x64xbf16>,
    %c0_39 = arith.constant 0 : index
    %c1008 = arith.constant 1008 : index
    %c0_40 = arith.constant 0 : index
    %130 = vector.load %arg1[%c0_39, %c1008, %c0_40] : memref<1x2208x32xbf16, #tpu.memory_space<vmem>>, vector<1x144x32xbf16>
    %131 = vector.shape_cast %130 : vector<1x144x32xbf16> to vector<144x32xbf16>
    %cst_41 = arith.constant dense<0.000000e+00> : vector<144x64xf32>
    %132 = tpu.matmul %131, %0, %cst_41 {dimension_numbers = #tpu.dot_dimension_numbers<[1], [0], [0], [1], [0, 0, 1, 1], [], []>} : vector<144x32xbf16>, vector<32x64xbf16>, vector<144x64xf32> -> vector<144x64xf32>
    %133 = arith.addf %132, %3 : vector<144x64xf32>
    %cst_42 = arith.constant 0.000000e+00 : f32
    %134 = vector.broadcast %cst_42 : f32 to vector<144x64xf32>
    %135 = arith.maximumf %133, %134 : vector<144x64xf32>
    %136 = vector.extract_strided_slice %135 {offsets = [0, 0], sizes = [48, 64], strides = [1, 1]} : vector<144x64xf32> to vector<48x64xf32>
    %137 = vector.extract_strided_slice %135 {offsets = [48, 0], sizes = [48, 64], strides = [1, 1]} : vector<144x64xf32> to vector<48x64xf32>
    %138 = arith.maximumf %136, %137 : vector<48x64xf32>
    %139 = vector.extract_strided_slice %135 {offsets = [96, 0], sizes = [48, 64], strides = [1, 1]} : vector<144x64xf32> to vector<48x64xf32>
    %140 = arith.maximumf %138, %139 : vector<48x64xf32>
    %141 = vector.extract_strided_slice %140 {offsets = [0, 0], sizes = [16, 64], strides = [1, 1]} : vector<48x64xf32> to vector<16x64xf32>
    %142 = vector.extract_strided_slice %140 {offsets = [16, 0], sizes = [16, 64], strides = [1, 1]} : vector<48x64xf32> to vector<16x64xf32>
    %143 = arith.maximumf %141, %142 : vector<16x64xf32>
    %144 = vector.extract_strided_slice %140 {offsets = [32, 0], sizes = [16, 64], strides = [1, 1]} : vector<48x64xf32> to vector<16x64xf32>
    %145 = arith.maximumf %143, %144 : vector<16x64xf32>
    %146 = arith.truncf %145 : vector<16x64xf32> to vector<16x64xbf16>
    %c112 = arith.constant 112 : index
    %c0_43 = arith.constant 0 : index
    %147 = vector.load %arg14[%c112, %c0_43] : memref<240x64xbf16, #tpu.memory_space<vmem>>, vector<16x64xbf16>
    tpu.vector_store %arg14[%c112, %c0_43], %146 {strides = array<i32>} : memref<240x64xbf16, #tpu.memory_space<vmem>>, vector<16x64xbf16>,
    %c0_44 = arith.constant 0 : index
    %c1152 = arith.constant 1152 : index
    %c0_45 = arith.constant 0 : index
    %148 = vector.load %arg1[%c0_44, %c1152, %c0_45] : memref<1x2208x32xbf16, #tpu.memory_space<vmem>>, vector<1x144x32xbf16>
    %149 = vector.shape_cast %148 : vector<1x144x32xbf16> to vector<144x32xbf16>
    %cst_46 = arith.constant dense<0.000000e+00> : vector<144x64xf32>
    %150 = tpu.matmul %149, %0, %cst_46 {dimension_numbers = #tpu.dot_dimension_numbers<[1], [0], [0], [1], [0, 0, 1, 1], [], []>} : vector<144x32xbf16>, vector<32x64xbf16>, vector<144x64xf32> -> vector<144x64xf32>
    %151 = arith.addf %150, %3 : vector<144x64xf32>
    %cst_47 = arith.constant 0.000000e+00 : f32
    %152 = vector.broadcast %cst_47 : f32 to vector<144x64xf32>
    %153 = arith.maximumf %151, %152 : vector<144x64xf32>
    %154 = vector.extract_strided_slice %153 {offsets = [0, 0], sizes = [48, 64], strides = [1, 1]} : vector<144x64xf32> to vector<48x64xf32>
    %155 = vector.extract_strided_slice %153 {offsets = [48, 0], sizes = [48, 64], strides = [1, 1]} : vector<144x64xf32> to vector<48x64xf32>
    %156 = arith.maximumf %154, %155 : vector<48x64xf32>
    %157 = vector.extract_strided_slice %153 {offsets = [96, 0], sizes = [48, 64], strides = [1, 1]} : vector<144x64xf32> to vector<48x64xf32>
    %158 = arith.maximumf %156, %157 : vector<48x64xf32>
    %159 = vector.extract_strided_slice %158 {offsets = [0, 0], sizes = [16, 64], strides = [1, 1]} : vector<48x64xf32> to vector<16x64xf32>
    %160 = vector.extract_strided_slice %158 {offsets = [16, 0], sizes = [16, 64], strides = [1, 1]} : vector<48x64xf32> to vector<16x64xf32>
    %161 = arith.maximumf %159, %160 : vector<16x64xf32>
    %162 = vector.extract_strided_slice %158 {offsets = [32, 0], sizes = [16, 64], strides = [1, 1]} : vector<48x64xf32> to vector<16x64xf32>
    %163 = arith.maximumf %161, %162 : vector<16x64xf32>
    %164 = arith.truncf %163 : vector<16x64xf32> to vector<16x64xbf16>
    %c128 = arith.constant 128 : index
    %c0_48 = arith.constant 0 : index
    %165 = vector.load %arg14[%c128, %c0_48] : memref<240x64xbf16, #tpu.memory_space<vmem>>, vector<16x64xbf16>
    tpu.vector_store %arg14[%c128, %c0_48], %164 {strides = array<i32>} : memref<240x64xbf16, #tpu.memory_space<vmem>>, vector<16x64xbf16>,
    %c0_49 = arith.constant 0 : index
    %c1296 = arith.constant 1296 : index
    %c0_50 = arith.constant 0 : index
    %166 = vector.load %arg1[%c0_49, %c1296, %c0_50] : memref<1x2208x32xbf16, #tpu.memory_space<vmem>>, vector<1x144x32xbf16>
    %167 = vector.shape_cast %166 : vector<1x144x32xbf16> to vector<144x32xbf16>
    %cst_51 = arith.constant dense<0.000000e+00> : vector<144x64xf32>
    %168 = tpu.matmul %167, %0, %cst_51 {dimension_numbers = #tpu.dot_dimension_numbers<[1], [0], [0], [1], [0, 0, 1, 1], [], []>} : vector<144x32xbf16>, vector<32x64xbf16>, vector<144x64xf32> -> vector<144x64xf32>
    %169 = arith.addf %168, %3 : vector<144x64xf32>
    %cst_52 = arith.constant 0.000000e+00 : f32
    %170 = vector.broadcast %cst_52 : f32 to vector<144x64xf32>
    %171 = arith.maximumf %169, %170 : vector<144x64xf32>
    %172 = vector.extract_strided_slice %171 {offsets = [0, 0], sizes = [48, 64], strides = [1, 1]} : vector<144x64xf32> to vector<48x64xf32>
    %173 = vector.extract_strided_slice %171 {offsets = [48, 0], sizes = [48, 64], strides = [1, 1]} : vector<144x64xf32> to vector<48x64xf32>
    %174 = arith.maximumf %172, %173 : vector<48x64xf32>
    %175 = vector.extract_strided_slice %171 {offsets = [96, 0], sizes = [48, 64], strides = [1, 1]} : vector<144x64xf32> to vector<48x64xf32>
    %176 = arith.maximumf %174, %175 : vector<48x64xf32>
    %177 = vector.extract_strided_slice %176 {offsets = [0, 0], sizes = [16, 64], strides = [1, 1]} : vector<48x64xf32> to vector<16x64xf32>
    %178 = vector.extract_strided_slice %176 {offsets = [16, 0], sizes = [16, 64], strides = [1, 1]} : vector<48x64xf32> to vector<16x64xf32>
    %179 = arith.maximumf %177, %178 : vector<16x64xf32>
    %180 = vector.extract_strided_slice %176 {offsets = [32, 0], sizes = [16, 64], strides = [1, 1]} : vector<48x64xf32> to vector<16x64xf32>
    %181 = arith.maximumf %179, %180 : vector<16x64xf32>
    %182 = arith.truncf %181 : vector<16x64xf32> to vector<16x64xbf16>
    %c144_53 = arith.constant 144 : index
    %c0_54 = arith.constant 0 : index
    %183 = vector.load %arg14[%c144_53, %c0_54] : memref<240x64xbf16, #tpu.memory_space<vmem>>, vector<16x64xbf16>
    tpu.vector_store %arg14[%c144_53, %c0_54], %182 {strides = array<i32>} : memref<240x64xbf16, #tpu.memory_space<vmem>>, vector<16x64xbf16>,
    %c0_55 = arith.constant 0 : index
    %c1440 = arith.constant 1440 : index
    %c0_56 = arith.constant 0 : index
    %184 = vector.load %arg1[%c0_55, %c1440, %c0_56] : memref<1x2208x32xbf16, #tpu.memory_space<vmem>>, vector<1x144x32xbf16>
    %185 = vector.shape_cast %184 : vector<1x144x32xbf16> to vector<144x32xbf16>
    %cst_57 = arith.constant dense<0.000000e+00> : vector<144x64xf32>
    %186 = tpu.matmul %185, %0, %cst_57 {dimension_numbers = #tpu.dot_dimension_numbers<[1], [0], [0], [1], [0, 0, 1, 1], [], []>} : vector<144x32xbf16>, vector<32x64xbf16>, vector<144x64xf32> -> vector<144x64xf32>
    %187 = arith.addf %186, %3 : vector<144x64xf32>
    %cst_58 = arith.constant 0.000000e+00 : f32
    %188 = vector.broadcast %cst_58 : f32 to vector<144x64xf32>
    %189 = arith.maximumf %187, %188 : vector<144x64xf32>
    %190 = vector.extract_strided_slice %189 {offsets = [0, 0], sizes = [48, 64], strides = [1, 1]} : vector<144x64xf32> to vector<48x64xf32>
    %191 = vector.extract_strided_slice %189 {offsets = [48, 0], sizes = [48, 64], strides = [1, 1]} : vector<144x64xf32> to vector<48x64xf32>
    %192 = arith.maximumf %190, %191 : vector<48x64xf32>
    %193 = vector.extract_strided_slice %189 {offsets = [96, 0], sizes = [48, 64], strides = [1, 1]} : vector<144x64xf32> to vector<48x64xf32>
    %194 = arith.maximumf %192, %193 : vector<48x64xf32>
    %195 = vector.extract_strided_slice %194 {offsets = [0, 0], sizes = [16, 64], strides = [1, 1]} : vector<48x64xf32> to vector<16x64xf32>
    %196 = vector.extract_strided_slice %194 {offsets = [16, 0], sizes = [16, 64], strides = [1, 1]} : vector<48x64xf32> to vector<16x64xf32>
    %197 = arith.maximumf %195, %196 : vector<16x64xf32>
    %198 = vector.extract_strided_slice %194 {offsets = [32, 0], sizes = [16, 64], strides = [1, 1]} : vector<48x64xf32> to vector<16x64xf32>
    %199 = arith.maximumf %197, %198 : vector<16x64xf32>
    %200 = arith.truncf %199 : vector<16x64xf32> to vector<16x64xbf16>
    %c160 = arith.constant 160 : index
    %c0_59 = arith.constant 0 : index
    %201 = vector.load %arg14[%c160, %c0_59] : memref<240x64xbf16, #tpu.memory_space<vmem>>, vector<16x64xbf16>
    tpu.vector_store %arg14[%c160, %c0_59], %200 {strides = array<i32>} : memref<240x64xbf16, #tpu.memory_space<vmem>>, vector<16x64xbf16>,
    %c0_60 = arith.constant 0 : index
    %c1584 = arith.constant 1584 : index
    %c0_61 = arith.constant 0 : index
    %202 = vector.load %arg1[%c0_60, %c1584, %c0_61] : memref<1x2208x32xbf16, #tpu.memory_space<vmem>>, vector<1x144x32xbf16>
    %203 = vector.shape_cast %202 : vector<1x144x32xbf16> to vector<144x32xbf16>
    %cst_62 = arith.constant dense<0.000000e+00> : vector<144x64xf32>
    %204 = tpu.matmul %203, %0, %cst_62 {dimension_numbers = #tpu.dot_dimension_numbers<[1], [0], [0], [1], [0, 0, 1, 1], [], []>} : vector<144x32xbf16>, vector<32x64xbf16>, vector<144x64xf32> -> vector<144x64xf32>
    %205 = arith.addf %204, %3 : vector<144x64xf32>
    %cst_63 = arith.constant 0.000000e+00 : f32
    %206 = vector.broadcast %cst_63 : f32 to vector<144x64xf32>
    %207 = arith.maximumf %205, %206 : vector<144x64xf32>
    %208 = vector.extract_strided_slice %207 {offsets = [0, 0], sizes = [48, 64], strides = [1, 1]} : vector<144x64xf32> to vector<48x64xf32>
    %209 = vector.extract_strided_slice %207 {offsets = [48, 0], sizes = [48, 64], strides = [1, 1]} : vector<144x64xf32> to vector<48x64xf32>
    %210 = arith.maximumf %208, %209 : vector<48x64xf32>
    %211 = vector.extract_strided_slice %207 {offsets = [96, 0], sizes = [48, 64], strides = [1, 1]} : vector<144x64xf32> to vector<48x64xf32>
    %212 = arith.maximumf %210, %211 : vector<48x64xf32>
    %213 = vector.extract_strided_slice %212 {offsets = [0, 0], sizes = [16, 64], strides = [1, 1]} : vector<48x64xf32> to vector<16x64xf32>
    %214 = vector.extract_strided_slice %212 {offsets = [16, 0], sizes = [16, 64], strides = [1, 1]} : vector<48x64xf32> to vector<16x64xf32>
    %215 = arith.maximumf %213, %214 : vector<16x64xf32>
    %216 = vector.extract_strided_slice %212 {offsets = [32, 0], sizes = [16, 64], strides = [1, 1]} : vector<48x64xf32> to vector<16x64xf32>
    %217 = arith.maximumf %215, %216 : vector<16x64xf32>
    %218 = arith.truncf %217 : vector<16x64xf32> to vector<16x64xbf16>
    %c176 = arith.constant 176 : index
    %c0_64 = arith.constant 0 : index
    %219 = vector.load %arg14[%c176, %c0_64] : memref<240x64xbf16, #tpu.memory_space<vmem>>, vector<16x64xbf16>
    tpu.vector_store %arg14[%c176, %c0_64], %218 {strides = array<i32>} : memref<240x64xbf16, #tpu.memory_space<vmem>>, vector<16x64xbf16>,
    %c0_65 = arith.constant 0 : index
    %c1728 = arith.constant 1728 : index
    %c0_66 = arith.constant 0 : index
    %220 = vector.load %arg1[%c0_65, %c1728, %c0_66] : memref<1x2208x32xbf16, #tpu.memory_space<vmem>>, vector<1x144x32xbf16>
    %221 = vector.shape_cast %220 : vector<1x144x32xbf16> to vector<144x32xbf16>
    %cst_67 = arith.constant dense<0.000000e+00> : vector<144x64xf32>
    %222 = tpu.matmul %221, %0, %cst_67 {dimension_numbers = #tpu.dot_dimension_numbers<[1], [0], [0], [1], [0, 0, 1, 1], [], []>} : vector<144x32xbf16>, vector<32x64xbf16>, vector<144x64xf32> -> vector<144x64xf32>
    %223 = arith.addf %222, %3 : vector<144x64xf32>
    %cst_68 = arith.constant 0.000000e+00 : f32
    %224 = vector.broadcast %cst_68 : f32 to vector<144x64xf32>
    %225 = arith.maximumf %223, %224 : vector<144x64xf32>
    %226 = vector.extract_strided_slice %225 {offsets = [0, 0], sizes = [48, 64], strides = [1, 1]} : vector<144x64xf32> to vector<48x64xf32>
    %227 = vector.extract_strided_slice %225 {offsets = [48, 0], sizes = [48, 64], strides = [1, 1]} : vector<144x64xf32> to vector<48x64xf32>
    %228 = arith.maximumf %226, %227 : vector<48x64xf32>
    %229 = vector.extract_strided_slice %225 {offsets = [96, 0], sizes = [48, 64], strides = [1, 1]} : vector<144x64xf32> to vector<48x64xf32>
    %230 = arith.maximumf %228, %229 : vector<48x64xf32>
    %231 = vector.extract_strided_slice %230 {offsets = [0, 0], sizes = [16, 64], strides = [1, 1]} : vector<48x64xf32> to vector<16x64xf32>
    %232 = vector.extract_strided_slice %230 {offsets = [16, 0], sizes = [16, 64], strides = [1, 1]} : vector<48x64xf32> to vector<16x64xf32>
    %233 = arith.maximumf %231, %232 : vector<16x64xf32>
    %234 = vector.extract_strided_slice %230 {offsets = [32, 0], sizes = [16, 64], strides = [1, 1]} : vector<48x64xf32> to vector<16x64xf32>
    %235 = arith.maximumf %233, %234 : vector<16x64xf32>
    %236 = arith.truncf %235 : vector<16x64xf32> to vector<16x64xbf16>
    %c192 = arith.constant 192 : index
    %c0_69 = arith.constant 0 : index
    %237 = vector.load %arg14[%c192, %c0_69] : memref<240x64xbf16, #tpu.memory_space<vmem>>, vector<16x64xbf16>
    tpu.vector_store %arg14[%c192, %c0_69], %236 {strides = array<i32>} : memref<240x64xbf16, #tpu.memory_space<vmem>>, vector<16x64xbf16>,
    %c0_70 = arith.constant 0 : index
    %c1872 = arith.constant 1872 : index
    %c0_71 = arith.constant 0 : index
    %238 = vector.load %arg1[%c0_70, %c1872, %c0_71] : memref<1x2208x32xbf16, #tpu.memory_space<vmem>>, vector<1x144x32xbf16>
    %239 = vector.shape_cast %238 : vector<1x144x32xbf16> to vector<144x32xbf16>
    %cst_72 = arith.constant dense<0.000000e+00> : vector<144x64xf32>
    %240 = tpu.matmul %239, %0, %cst_72 {dimension_numbers = #tpu.dot_dimension_numbers<[1], [0], [0], [1], [0, 0, 1, 1], [], []>} : vector<144x32xbf16>, vector<32x64xbf16>, vector<144x64xf32> -> vector<144x64xf32>
    %241 = arith.addf %240, %3 : vector<144x64xf32>
    %cst_73 = arith.constant 0.000000e+00 : f32
    %242 = vector.broadcast %cst_73 : f32 to vector<144x64xf32>
    %243 = arith.maximumf %241, %242 : vector<144x64xf32>
    %244 = vector.extract_strided_slice %243 {offsets = [0, 0], sizes = [48, 64], strides = [1, 1]} : vector<144x64xf32> to vector<48x64xf32>
    %245 = vector.extract_strided_slice %243 {offsets = [48, 0], sizes = [48, 64], strides = [1, 1]} : vector<144x64xf32> to vector<48x64xf32>
    %246 = arith.maximumf %244, %245 : vector<48x64xf32>
    %247 = vector.extract_strided_slice %243 {offsets = [96, 0], sizes = [48, 64], strides = [1, 1]} : vector<144x64xf32> to vector<48x64xf32>
    %248 = arith.maximumf %246, %247 : vector<48x64xf32>
    %249 = vector.extract_strided_slice %248 {offsets = [0, 0], sizes = [16, 64], strides = [1, 1]} : vector<48x64xf32> to vector<16x64xf32>
    %250 = vector.extract_strided_slice %248 {offsets = [16, 0], sizes = [16, 64], strides = [1, 1]} : vector<48x64xf32> to vector<16x64xf32>
    %251 = arith.maximumf %249, %250 : vector<16x64xf32>
    %252 = vector.extract_strided_slice %248 {offsets = [32, 0], sizes = [16, 64], strides = [1, 1]} : vector<48x64xf32> to vector<16x64xf32>
    %253 = arith.maximumf %251, %252 : vector<16x64xf32>
    %254 = arith.truncf %253 : vector<16x64xf32> to vector<16x64xbf16>
    %c208 = arith.constant 208 : index
    %c0_74 = arith.constant 0 : index
    %255 = vector.load %arg14[%c208, %c0_74] : memref<240x64xbf16, #tpu.memory_space<vmem>>, vector<16x64xbf16>
    tpu.vector_store %arg14[%c208, %c0_74], %254 {strides = array<i32>} : memref<240x64xbf16, #tpu.memory_space<vmem>>, vector<16x64xbf16>,
    %c0_75 = arith.constant 0 : index
    %c2016 = arith.constant 2016 : index
    %c0_76 = arith.constant 0 : index
    %256 = vector.load %arg1[%c0_75, %c2016, %c0_76] : memref<1x2208x32xbf16, #tpu.memory_space<vmem>>, vector<1x144x32xbf16>
    %257 = vector.shape_cast %256 : vector<1x144x32xbf16> to vector<144x32xbf16>
    %cst_77 = arith.constant dense<0.000000e+00> : vector<144x64xf32>
    %258 = tpu.matmul %257, %0, %cst_77 {dimension_numbers = #tpu.dot_dimension_numbers<[1], [0], [0], [1], [0, 0, 1, 1], [], []>} : vector<144x32xbf16>, vector<32x64xbf16>, vector<144x64xf32> -> vector<144x64xf32>
    %259 = arith.addf %258, %3 : vector<144x64xf32>
    %cst_78 = arith.constant 0.000000e+00 : f32
    %260 = vector.broadcast %cst_78 : f32 to vector<144x64xf32>
    %261 = arith.maximumf %259, %260 : vector<144x64xf32>
    %262 = vector.extract_strided_slice %261 {offsets = [0, 0], sizes = [48, 64], strides = [1, 1]} : vector<144x64xf32> to vector<48x64xf32>
    %263 = vector.extract_strided_slice %261 {offsets = [48, 0], sizes = [48, 64], strides = [1, 1]} : vector<144x64xf32> to vector<48x64xf32>
    %264 = arith.maximumf %262, %263 : vector<48x64xf32>
    %265 = vector.extract_strided_slice %261 {offsets = [96, 0], sizes = [48, 64], strides = [1, 1]} : vector<144x64xf32> to vector<48x64xf32>
    %266 = arith.maximumf %264, %265 : vector<48x64xf32>
    %267 = vector.extract_strided_slice %266 {offsets = [0, 0], sizes = [16, 64], strides = [1, 1]} : vector<48x64xf32> to vector<16x64xf32>
    %268 = vector.extract_strided_slice %266 {offsets = [16, 0], sizes = [16, 64], strides = [1, 1]} : vector<48x64xf32> to vector<16x64xf32>
    %269 = arith.maximumf %267, %268 : vector<16x64xf32>
    %270 = vector.extract_strided_slice %266 {offsets = [32, 0], sizes = [16, 64], strides = [1, 1]} : vector<48x64xf32> to vector<16x64xf32>
    %271 = arith.maximumf %269, %270 : vector<16x64xf32>
    %272 = arith.truncf %271 : vector<16x64xf32> to vector<16x64xbf16>
    %c224 = arith.constant 224 : index
    %c0_79 = arith.constant 0 : index
    %273 = vector.load %arg14[%c224, %c0_79] : memref<240x64xbf16, #tpu.memory_space<vmem>>, vector<16x64xbf16>
    tpu.vector_store %arg14[%c224, %c0_79], %272 {strides = array<i32>} : memref<240x64xbf16, #tpu.memory_space<vmem>>, vector<16x64xbf16>,
    %c0_80 = arith.constant 0 : index
    %c0_81 = arith.constant 0 : index
    %274 = vector.load %arg4[%c0_80, %c0_81] : memref<576x96xbf16, #tpu.memory_space<vmem>>, vector<576x96xbf16>
    %c0_82 = arith.constant 0 : index
    %c0_83 = arith.constant 0 : index
    %275 = vector.load %arg5[%c0_82, %c0_83] : memref<1x96xf32, #tpu.memory_space<vmem>>, vector<1x96xf32>
    %276 = vector.shape_cast %275 : vector<1x96xf32> to vector<1x96xf32>
    %277 = vector.broadcast %276 : vector<1x96xf32> to vector<48x96xf32>
    %c0_84 = arith.constant 0 : index
    %c0_85 = arith.constant 0 : index
    %278 = vector.load %arg14[%c0_84, %c0_85] : memref<240x64xbf16, #tpu.memory_space<vmem>>, vector<48x64xbf16>
    %c1 = arith.constant 1 : index
    %c0_86 = arith.constant 0 : index
    %279 = vector.load %arg14[%c1, %c0_86] : memref<240x64xbf16, #tpu.memory_space<vmem>>, vector<48x64xbf16>
    %c2 = arith.constant 2 : index
    %c0_87 = arith.constant 0 : index
    %280 = vector.load %arg14[%c2, %c0_87] : memref<240x64xbf16, #tpu.memory_space<vmem>>, vector<48x64xbf16>
    %c16_88 = arith.constant 16 : index
    %c0_89 = arith.constant 0 : index
    %281 = vector.load %arg14[%c16_88, %c0_89] : memref<240x64xbf16, #tpu.memory_space<vmem>>, vector<48x64xbf16>
    %c17 = arith.constant 17 : index
    %c0_90 = arith.constant 0 : index
    %282 = vector.load %arg14[%c17, %c0_90] : memref<240x64xbf16, #tpu.memory_space<vmem>>, vector<48x64xbf16>
    %c18 = arith.constant 18 : index
    %c0_91 = arith.constant 0 : index
    %283 = vector.load %arg14[%c18, %c0_91] : memref<240x64xbf16, #tpu.memory_space<vmem>>, vector<48x64xbf16>
    %c32_92 = arith.constant 32 : index
    %c0_93 = arith.constant 0 : index
    %284 = vector.load %arg14[%c32_92, %c0_93] : memref<240x64xbf16, #tpu.memory_space<vmem>>, vector<48x64xbf16>
    %c33 = arith.constant 33 : index
    %c0_94 = arith.constant 0 : index
    %285 = vector.load %arg14[%c33, %c0_94] : memref<240x64xbf16, #tpu.memory_space<vmem>>, vector<48x64xbf16>
    %c34 = arith.constant 34 : index
    %c0_95 = arith.constant 0 : index
    %286 = vector.load %arg14[%c34, %c0_95] : memref<240x64xbf16, #tpu.memory_space<vmem>>, vector<48x64xbf16>
    %287 = tpu.concatenate %278, %279, %280, %281, %282, %283, %284, %285, %286 in 1 : vector<48x64xbf16>, vector<48x64xbf16>, vector<48x64xbf16>, vector<48x64xbf16>, vector<48x64xbf16>, vector<48x64xbf16>, vector<48x64xbf16>, vector<48x64xbf16>, vector<48x64xbf16> -> vector<48x576xbf16>
    %cst_96 = arith.constant dense<0.000000e+00> : vector<48x96xf32>
    %288 = tpu.matmul %287, %274, %cst_96 {dimension_numbers = #tpu.dot_dimension_numbers<[1], [0], [0], [1], [0, 0, 1, 1], [], []>} : vector<48x576xbf16>, vector<576x96xbf16>, vector<48x96xf32> -> vector<48x96xf32>
    %289 = arith.addf %288, %277 : vector<48x96xf32>
    %cst_97 = arith.constant 0.000000e+00 : f32
    %290 = vector.broadcast %cst_97 : f32 to vector<48x96xf32>
    %291 = arith.maximumf %289, %290 : vector<48x96xf32>
    %292 = vector.extract_strided_slice %291 {offsets = [0, 0], sizes = [16, 96], strides = [1, 1]} : vector<48x96xf32> to vector<16x96xf32>
    %293 = vector.extract_strided_slice %291 {offsets = [16, 0], sizes = [16, 96], strides = [1, 1]} : vector<48x96xf32> to vector<16x96xf32>
    %294 = arith.maximumf %292, %293 : vector<16x96xf32>
    %295 = vector.extract_strided_slice %291 {offsets = [32, 0], sizes = [16, 96], strides = [1, 1]} : vector<48x96xf32> to vector<16x96xf32>
    %296 = arith.maximumf %294, %295 : vector<16x96xf32>
    %297 = vector.extract_strided_slice %296 {offsets = [0, 0], sizes = [1, 96], strides = [1, 1]} : vector<16x96xf32> to vector<1x96xf32>
    %298 = vector.extract_strided_slice %296 {offsets = [1, 0], sizes = [1, 96], strides = [1, 1]} : vector<16x96xf32> to vector<1x96xf32>
    %299 = arith.maximumf %297, %298 : vector<1x96xf32>
    %300 = vector.extract_strided_slice %296 {offsets = [2, 0], sizes = [1, 96], strides = [1, 1]} : vector<16x96xf32> to vector<1x96xf32>
    %301 = arith.maximumf %299, %300 : vector<1x96xf32>
    %302 = arith.truncf %301 : vector<1x96xf32> to vector<1x96xbf16>
    %303 = vector.extract_strided_slice %296 {offsets = [3, 0], sizes = [1, 96], strides = [1, 1]} : vector<16x96xf32> to vector<1x96xf32>
    %304 = vector.extract_strided_slice %296 {offsets = [4, 0], sizes = [1, 96], strides = [1, 1]} : vector<16x96xf32> to vector<1x96xf32>
    %305 = arith.maximumf %303, %304 : vector<1x96xf32>
    %306 = vector.extract_strided_slice %296 {offsets = [5, 0], sizes = [1, 96], strides = [1, 1]} : vector<16x96xf32> to vector<1x96xf32>
    %307 = arith.maximumf %305, %306 : vector<1x96xf32>
    %308 = arith.truncf %307 : vector<1x96xf32> to vector<1x96xbf16>
    %309 = vector.extract_strided_slice %296 {offsets = [6, 0], sizes = [1, 96], strides = [1, 1]} : vector<16x96xf32> to vector<1x96xf32>
    %310 = vector.extract_strided_slice %296 {offsets = [7, 0], sizes = [1, 96], strides = [1, 1]} : vector<16x96xf32> to vector<1x96xf32>
    %311 = arith.maximumf %309, %310 : vector<1x96xf32>
    %312 = vector.extract_strided_slice %296 {offsets = [8, 0], sizes = [1, 96], strides = [1, 1]} : vector<16x96xf32> to vector<1x96xf32>
    %313 = arith.maximumf %311, %312 : vector<1x96xf32>
    %314 = arith.truncf %313 : vector<1x96xf32> to vector<1x96xbf16>
    %315 = vector.extract_strided_slice %296 {offsets = [9, 0], sizes = [1, 96], strides = [1, 1]} : vector<16x96xf32> to vector<1x96xf32>
    %316 = vector.extract_strided_slice %296 {offsets = [10, 0], sizes = [1, 96], strides = [1, 1]} : vector<16x96xf32> to vector<1x96xf32>
    %317 = arith.maximumf %315, %316 : vector<1x96xf32>
    %318 = vector.extract_strided_slice %296 {offsets = [11, 0], sizes = [1, 96], strides = [1, 1]} : vector<16x96xf32> to vector<1x96xf32>
    %319 = arith.maximumf %317, %318 : vector<1x96xf32>
    %320 = arith.truncf %319 : vector<1x96xf32> to vector<1x96xbf16>
    %c48_98 = arith.constant 48 : index
    %c0_99 = arith.constant 0 : index
    %321 = vector.load %arg14[%c48_98, %c0_99] : memref<240x64xbf16, #tpu.memory_space<vmem>>, vector<48x64xbf16>
    %c49 = arith.constant 49 : index
    %c0_100 = arith.constant 0 : index
    %322 = vector.load %arg14[%c49, %c0_100] : memref<240x64xbf16, #tpu.memory_space<vmem>>, vector<48x64xbf16>
    %c50 = arith.constant 50 : index
    %c0_101 = arith.constant 0 : index
    %323 = vector.load %arg14[%c50, %c0_101] : memref<240x64xbf16, #tpu.memory_space<vmem>>, vector<48x64xbf16>
    %c64_102 = arith.constant 64 : index
    %c0_103 = arith.constant 0 : index
    %324 = vector.load %arg14[%c64_102, %c0_103] : memref<240x64xbf16, #tpu.memory_space<vmem>>, vector<48x64xbf16>
    %c65 = arith.constant 65 : index
    %c0_104 = arith.constant 0 : index
    %325 = vector.load %arg14[%c65, %c0_104] : memref<240x64xbf16, #tpu.memory_space<vmem>>, vector<48x64xbf16>
    %c66 = arith.constant 66 : index
    %c0_105 = arith.constant 0 : index
    %326 = vector.load %arg14[%c66, %c0_105] : memref<240x64xbf16, #tpu.memory_space<vmem>>, vector<48x64xbf16>
    %c80_106 = arith.constant 80 : index
    %c0_107 = arith.constant 0 : index
    %327 = vector.load %arg14[%c80_106, %c0_107] : memref<240x64xbf16, #tpu.memory_space<vmem>>, vector<48x64xbf16>
    %c81 = arith.constant 81 : index
    %c0_108 = arith.constant 0 : index
    %328 = vector.load %arg14[%c81, %c0_108] : memref<240x64xbf16, #tpu.memory_space<vmem>>, vector<48x64xbf16>
    %c82 = arith.constant 82 : index
    %c0_109 = arith.constant 0 : index
    %329 = vector.load %arg14[%c82, %c0_109] : memref<240x64xbf16, #tpu.memory_space<vmem>>, vector<48x64xbf16>
    %330 = tpu.concatenate %321, %322, %323, %324, %325, %326, %327, %328, %329 in 1 : vector<48x64xbf16>, vector<48x64xbf16>, vector<48x64xbf16>, vector<48x64xbf16>, vector<48x64xbf16>, vector<48x64xbf16>, vector<48x64xbf16>, vector<48x64xbf16>, vector<48x64xbf16> -> vector<48x576xbf16>
    %cst_110 = arith.constant dense<0.000000e+00> : vector<48x96xf32>
    %331 = tpu.matmul %330, %274, %cst_110 {dimension_numbers = #tpu.dot_dimension_numbers<[1], [0], [0], [1], [0, 0, 1, 1], [], []>} : vector<48x576xbf16>, vector<576x96xbf16>, vector<48x96xf32> -> vector<48x96xf32>
    %332 = arith.addf %331, %277 : vector<48x96xf32>
    %cst_111 = arith.constant 0.000000e+00 : f32
    %333 = vector.broadcast %cst_111 : f32 to vector<48x96xf32>
    %334 = arith.maximumf %332, %333 : vector<48x96xf32>
    %335 = vector.extract_strided_slice %334 {offsets = [0, 0], sizes = [16, 96], strides = [1, 1]} : vector<48x96xf32> to vector<16x96xf32>
    %336 = vector.extract_strided_slice %334 {offsets = [16, 0], sizes = [16, 96], strides = [1, 1]} : vector<48x96xf32> to vector<16x96xf32>
    %337 = arith.maximumf %335, %336 : vector<16x96xf32>
    %338 = vector.extract_strided_slice %334 {offsets = [32, 0], sizes = [16, 96], strides = [1, 1]} : vector<48x96xf32> to vector<16x96xf32>
    %339 = arith.maximumf %337, %338 : vector<16x96xf32>
    %340 = vector.extract_strided_slice %339 {offsets = [0, 0], sizes = [1, 96], strides = [1, 1]} : vector<16x96xf32> to vector<1x96xf32>
    %341 = vector.extract_strided_slice %339 {offsets = [1, 0], sizes = [1, 96], strides = [1, 1]} : vector<16x96xf32> to vector<1x96xf32>
    %342 = arith.maximumf %340, %341 : vector<1x96xf32>
    %343 = vector.extract_strided_slice %339 {offsets = [2, 0], sizes = [1, 96], strides = [1, 1]} : vector<16x96xf32> to vector<1x96xf32>
    %344 = arith.maximumf %342, %343 : vector<1x96xf32>
    %345 = arith.truncf %344 : vector<1x96xf32> to vector<1x96xbf16>
    %346 = vector.extract_strided_slice %339 {offsets = [3, 0], sizes = [1, 96], strides = [1, 1]} : vector<16x96xf32> to vector<1x96xf32>
    %347 = vector.extract_strided_slice %339 {offsets = [4, 0], sizes = [1, 96], strides = [1, 1]} : vector<16x96xf32> to vector<1x96xf32>
    %348 = arith.maximumf %346, %347 : vector<1x96xf32>
    %349 = vector.extract_strided_slice %339 {offsets = [5, 0], sizes = [1, 96], strides = [1, 1]} : vector<16x96xf32> to vector<1x96xf32>
    %350 = arith.maximumf %348, %349 : vector<1x96xf32>
    %351 = arith.truncf %350 : vector<1x96xf32> to vector<1x96xbf16>
    %352 = vector.extract_strided_slice %339 {offsets = [6, 0], sizes = [1, 96], strides = [1, 1]} : vector<16x96xf32> to vector<1x96xf32>
    %353 = vector.extract_strided_slice %339 {offsets = [7, 0], sizes = [1, 96], strides = [1, 1]} : vector<16x96xf32> to vector<1x96xf32>
    %354 = arith.maximumf %352, %353 : vector<1x96xf32>
    %355 = vector.extract_strided_slice %339 {offsets = [8, 0], sizes = [1, 96], strides = [1, 1]} : vector<16x96xf32> to vector<1x96xf32>
    %356 = arith.maximumf %354, %355 : vector<1x96xf32>
    %357 = arith.truncf %356 : vector<1x96xf32> to vector<1x96xbf16>
    %358 = vector.extract_strided_slice %339 {offsets = [9, 0], sizes = [1, 96], strides = [1, 1]} : vector<16x96xf32> to vector<1x96xf32>
    %359 = vector.extract_strided_slice %339 {offsets = [10, 0], sizes = [1, 96], strides = [1, 1]} : vector<16x96xf32> to vector<1x96xf32>
    %360 = arith.maximumf %358, %359 : vector<1x96xf32>
    %361 = vector.extract_strided_slice %339 {offsets = [11, 0], sizes = [1, 96], strides = [1, 1]} : vector<16x96xf32> to vector<1x96xf32>
    %362 = arith.maximumf %360, %361 : vector<1x96xf32>
    %363 = arith.truncf %362 : vector<1x96xf32> to vector<1x96xbf16>
    %c96_112 = arith.constant 96 : index
    %c0_113 = arith.constant 0 : index
    %364 = vector.load %arg14[%c96_112, %c0_113] : memref<240x64xbf16, #tpu.memory_space<vmem>>, vector<48x64xbf16>
    %c97 = arith.constant 97 : index
    %c0_114 = arith.constant 0 : index
    %365 = vector.load %arg14[%c97, %c0_114] : memref<240x64xbf16, #tpu.memory_space<vmem>>, vector<48x64xbf16>
    %c98 = arith.constant 98 : index
    %c0_115 = arith.constant 0 : index
    %366 = vector.load %arg14[%c98, %c0_115] : memref<240x64xbf16, #tpu.memory_space<vmem>>, vector<48x64xbf16>
    %c112_116 = arith.constant 112 : index
    %c0_117 = arith.constant 0 : index
    %367 = vector.load %arg14[%c112_116, %c0_117] : memref<240x64xbf16, #tpu.memory_space<vmem>>, vector<48x64xbf16>
    %c113 = arith.constant 113 : index
    %c0_118 = arith.constant 0 : index
    %368 = vector.load %arg14[%c113, %c0_118] : memref<240x64xbf16, #tpu.memory_space<vmem>>, vector<48x64xbf16>
    %c114 = arith.constant 114 : index
    %c0_119 = arith.constant 0 : index
    %369 = vector.load %arg14[%c114, %c0_119] : memref<240x64xbf16, #tpu.memory_space<vmem>>, vector<48x64xbf16>
    %c128_120 = arith.constant 128 : index
    %c0_121 = arith.constant 0 : index
    %370 = vector.load %arg14[%c128_120, %c0_121] : memref<240x64xbf16, #tpu.memory_space<vmem>>, vector<48x64xbf16>
    %c129 = arith.constant 129 : index
    %c0_122 = arith.constant 0 : index
    %371 = vector.load %arg14[%c129, %c0_122] : memref<240x64xbf16, #tpu.memory_space<vmem>>, vector<48x64xbf16>
    %c130 = arith.constant 130 : index
    %c0_123 = arith.constant 0 : index
    %372 = vector.load %arg14[%c130, %c0_123] : memref<240x64xbf16, #tpu.memory_space<vmem>>, vector<48x64xbf16>
    %373 = tpu.concatenate %364, %365, %366, %367, %368, %369, %370, %371, %372 in 1 : vector<48x64xbf16>, vector<48x64xbf16>, vector<48x64xbf16>, vector<48x64xbf16>, vector<48x64xbf16>, vector<48x64xbf16>, vector<48x64xbf16>, vector<48x64xbf16>, vector<48x64xbf16> -> vector<48x576xbf16>
    %cst_124 = arith.constant dense<0.000000e+00> : vector<48x96xf32>
    %374 = tpu.matmul %373, %274, %cst_124 {dimension_numbers = #tpu.dot_dimension_numbers<[1], [0], [0], [1], [0, 0, 1, 1], [], []>} : vector<48x576xbf16>, vector<576x96xbf16>, vector<48x96xf32> -> vector<48x96xf32>
    %375 = arith.addf %374, %277 : vector<48x96xf32>
    %cst_125 = arith.constant 0.000000e+00 : f32
    %376 = vector.broadcast %cst_125 : f32 to vector<48x96xf32>
    %377 = arith.maximumf %375, %376 : vector<48x96xf32>
    %378 = vector.extract_strided_slice %377 {offsets = [0, 0], sizes = [16, 96], strides = [1, 1]} : vector<48x96xf32> to vector<16x96xf32>
    %379 = vector.extract_strided_slice %377 {offsets = [16, 0], sizes = [16, 96], strides = [1, 1]} : vector<48x96xf32> to vector<16x96xf32>
    %380 = arith.maximumf %378, %379 : vector<16x96xf32>
    %381 = vector.extract_strided_slice %377 {offsets = [32, 0], sizes = [16, 96], strides = [1, 1]} : vector<48x96xf32> to vector<16x96xf32>
    %382 = arith.maximumf %380, %381 : vector<16x96xf32>
    %383 = vector.extract_strided_slice %382 {offsets = [0, 0], sizes = [1, 96], strides = [1, 1]} : vector<16x96xf32> to vector<1x96xf32>
    %384 = vector.extract_strided_slice %382 {offsets = [1, 0], sizes = [1, 96], strides = [1, 1]} : vector<16x96xf32> to vector<1x96xf32>
    %385 = arith.maximumf %383, %384 : vector<1x96xf32>
    %386 = vector.extract_strided_slice %382 {offsets = [2, 0], sizes = [1, 96], strides = [1, 1]} : vector<16x96xf32> to vector<1x96xf32>
    %387 = arith.maximumf %385, %386 : vector<1x96xf32>
    %388 = arith.truncf %387 : vector<1x96xf32> to vector<1x96xbf16>
    %389 = vector.extract_strided_slice %382 {offsets = [3, 0], sizes = [1, 96], strides = [1, 1]} : vector<16x96xf32> to vector<1x96xf32>
    %390 = vector.extract_strided_slice %382 {offsets = [4, 0], sizes = [1, 96], strides = [1, 1]} : vector<16x96xf32> to vector<1x96xf32>
    %391 = arith.maximumf %389, %390 : vector<1x96xf32>
    %392 = vector.extract_strided_slice %382 {offsets = [5, 0], sizes = [1, 96], strides = [1, 1]} : vector<16x96xf32> to vector<1x96xf32>
    %393 = arith.maximumf %391, %392 : vector<1x96xf32>
    %394 = arith.truncf %393 : vector<1x96xf32> to vector<1x96xbf16>
    %395 = vector.extract_strided_slice %382 {offsets = [6, 0], sizes = [1, 96], strides = [1, 1]} : vector<16x96xf32> to vector<1x96xf32>
    %396 = vector.extract_strided_slice %382 {offsets = [7, 0], sizes = [1, 96], strides = [1, 1]} : vector<16x96xf32> to vector<1x96xf32>
    %397 = arith.maximumf %395, %396 : vector<1x96xf32>
    %398 = vector.extract_strided_slice %382 {offsets = [8, 0], sizes = [1, 96], strides = [1, 1]} : vector<16x96xf32> to vector<1x96xf32>
    %399 = arith.maximumf %397, %398 : vector<1x96xf32>
    %400 = arith.truncf %399 : vector<1x96xf32> to vector<1x96xbf16>
    %401 = vector.extract_strided_slice %382 {offsets = [9, 0], sizes = [1, 96], strides = [1, 1]} : vector<16x96xf32> to vector<1x96xf32>
    %402 = vector.extract_strided_slice %382 {offsets = [10, 0], sizes = [1, 96], strides = [1, 1]} : vector<16x96xf32> to vector<1x96xf32>
    %403 = arith.maximumf %401, %402 : vector<1x96xf32>
    %404 = vector.extract_strided_slice %382 {offsets = [11, 0], sizes = [1, 96], strides = [1, 1]} : vector<16x96xf32> to vector<1x96xf32>
    %405 = arith.maximumf %403, %404 : vector<1x96xf32>
    %406 = arith.truncf %405 : vector<1x96xf32> to vector<1x96xbf16>
    %c144_126 = arith.constant 144 : index
    %c0_127 = arith.constant 0 : index
    %407 = vector.load %arg14[%c144_126, %c0_127] : memref<240x64xbf16, #tpu.memory_space<vmem>>, vector<48x64xbf16>
    %c145 = arith.constant 145 : index
    %c0_128 = arith.constant 0 : index
    %408 = vector.load %arg14[%c145, %c0_128] : memref<240x64xbf16, #tpu.memory_space<vmem>>, vector<48x64xbf16>
    %c146 = arith.constant 146 : index
    %c0_129 = arith.constant 0 : index
    %409 = vector.load %arg14[%c146, %c0_129] : memref<240x64xbf16, #tpu.memory_space<vmem>>, vector<48x64xbf16>
    %c160_130 = arith.constant 160 : index
    %c0_131 = arith.constant 0 : index
    %410 = vector.load %arg14[%c160_130, %c0_131] : memref<240x64xbf16, #tpu.memory_space<vmem>>, vector<48x64xbf16>
    %c161 = arith.constant 161 : index
    %c0_132 = arith.constant 0 : index
    %411 = vector.load %arg14[%c161, %c0_132] : memref<240x64xbf16, #tpu.memory_space<vmem>>, vector<48x64xbf16>
    %c162 = arith.constant 162 : index
    %c0_133 = arith.constant 0 : index
    %412 = vector.load %arg14[%c162, %c0_133] : memref<240x64xbf16, #tpu.memory_space<vmem>>, vector<48x64xbf16>
    %c176_134 = arith.constant 176 : index
    %c0_135 = arith.constant 0 : index
    %413 = vector.load %arg14[%c176_134, %c0_135] : memref<240x64xbf16, #tpu.memory_space<vmem>>, vector<48x64xbf16>
    %c177 = arith.constant 177 : index
    %c0_136 = arith.constant 0 : index
    %414 = vector.load %arg14[%c177, %c0_136] : memref<240x64xbf16, #tpu.memory_space<vmem>>, vector<48x64xbf16>
    %c178 = arith.constant 178 : index
    %c0_137 = arith.constant 0 : index
    %415 = vector.load %arg14[%c178, %c0_137] : memref<240x64xbf16, #tpu.memory_space<vmem>>, vector<48x64xbf16>
    %416 = tpu.concatenate %407, %408, %409, %410, %411, %412, %413, %414, %415 in 1 : vector<48x64xbf16>, vector<48x64xbf16>, vector<48x64xbf16>, vector<48x64xbf16>, vector<48x64xbf16>, vector<48x64xbf16>, vector<48x64xbf16>, vector<48x64xbf16>, vector<48x64xbf16> -> vector<48x576xbf16>
    %cst_138 = arith.constant dense<0.000000e+00> : vector<48x96xf32>
    %417 = tpu.matmul %416, %274, %cst_138 {dimension_numbers = #tpu.dot_dimension_numbers<[1], [0], [0], [1], [0, 0, 1, 1], [], []>} : vector<48x576xbf16>, vector<576x96xbf16>, vector<48x96xf32> -> vector<48x96xf32>
    %418 = arith.addf %417, %277 : vector<48x96xf32>
    %cst_139 = arith.constant 0.000000e+00 : f32
    %419 = vector.broadcast %cst_139 : f32 to vector<48x96xf32>
    %420 = arith.maximumf %418, %419 : vector<48x96xf32>
    %421 = vector.extract_strided_slice %420 {offsets = [0, 0], sizes = [16, 96], strides = [1, 1]} : vector<48x96xf32> to vector<16x96xf32>
    %422 = vector.extract_strided_slice %420 {offsets = [16, 0], sizes = [16, 96], strides = [1, 1]} : vector<48x96xf32> to vector<16x96xf32>
    %423 = arith.maximumf %421, %422 : vector<16x96xf32>
    %424 = vector.extract_strided_slice %420 {offsets = [32, 0], sizes = [16, 96], strides = [1, 1]} : vector<48x96xf32> to vector<16x96xf32>
    %425 = arith.maximumf %423, %424 : vector<16x96xf32>
    %426 = vector.extract_strided_slice %425 {offsets = [0, 0], sizes = [1, 96], strides = [1, 1]} : vector<16x96xf32> to vector<1x96xf32>
    %427 = vector.extract_strided_slice %425 {offsets = [1, 0], sizes = [1, 96], strides = [1, 1]} : vector<16x96xf32> to vector<1x96xf32>
    %428 = arith.maximumf %426, %427 : vector<1x96xf32>
    %429 = vector.extract_strided_slice %425 {offsets = [2, 0], sizes = [1, 96], strides = [1, 1]} : vector<16x96xf32> to vector<1x96xf32>
    %430 = arith.maximumf %428, %429 : vector<1x96xf32>
    %431 = arith.truncf %430 : vector<1x96xf32> to vector<1x96xbf16>
    %432 = vector.extract_strided_slice %425 {offsets = [3, 0], sizes = [1, 96], strides = [1, 1]} : vector<16x96xf32> to vector<1x96xf32>
    %433 = vector.extract_strided_slice %425 {offsets = [4, 0], sizes = [1, 96], strides = [1, 1]} : vector<16x96xf32> to vector<1x96xf32>
    %434 = arith.maximumf %432, %433 : vector<1x96xf32>
    %435 = vector.extract_strided_slice %425 {offsets = [5, 0], sizes = [1, 96], strides = [1, 1]} : vector<16x96xf32> to vector<1x96xf32>
    %436 = arith.maximumf %434, %435 : vector<1x96xf32>
    %437 = arith.truncf %436 : vector<1x96xf32> to vector<1x96xbf16>
    %438 = vector.extract_strided_slice %425 {offsets = [6, 0], sizes = [1, 96], strides = [1, 1]} : vector<16x96xf32> to vector<1x96xf32>
    %439 = vector.extract_strided_slice %425 {offsets = [7, 0], sizes = [1, 96], strides = [1, 1]} : vector<16x96xf32> to vector<1x96xf32>
    %440 = arith.maximumf %438, %439 : vector<1x96xf32>
    %441 = vector.extract_strided_slice %425 {offsets = [8, 0], sizes = [1, 96], strides = [1, 1]} : vector<16x96xf32> to vector<1x96xf32>
    %442 = arith.maximumf %440, %441 : vector<1x96xf32>
    %443 = arith.truncf %442 : vector<1x96xf32> to vector<1x96xbf16>
    %444 = vector.extract_strided_slice %425 {offsets = [9, 0], sizes = [1, 96], strides = [1, 1]} : vector<16x96xf32> to vector<1x96xf32>
    %445 = vector.extract_strided_slice %425 {offsets = [10, 0], sizes = [1, 96], strides = [1, 1]} : vector<16x96xf32> to vector<1x96xf32>
    %446 = arith.maximumf %444, %445 : vector<1x96xf32>
    %447 = vector.extract_strided_slice %425 {offsets = [11, 0], sizes = [1, 96], strides = [1, 1]} : vector<16x96xf32> to vector<1x96xf32>
    %448 = arith.maximumf %446, %447 : vector<1x96xf32>
    %449 = arith.truncf %448 : vector<1x96xf32> to vector<1x96xbf16>
    %450 = tpu.concatenate %302, %308, %314, %320, %345, %351, %357, %363, %388, %394, %400, %406, %431, %437, %443, %449 in 1 : vector<1x96xbf16>, vector<1x96xbf16>, vector<1x96xbf16>, vector<1x96xbf16>, vector<1x96xbf16>, vector<1x96xbf16>, vector<1x96xbf16>, vector<1x96xbf16>, vector<1x96xbf16>, vector<1x96xbf16>, vector<1x96xbf16>, vector<1x96xbf16>, vector<1x96xbf16>, vector<1x96xbf16>, vector<1x96xbf16>, vector<1x96xbf16> -> vector<1x1536xbf16>
    %c0_140 = arith.constant 0 : index
    %c0_141 = arith.constant 0 : index
    %451 = vector.load %arg6[%c0_140, %c0_141] : memref<1536x128xbf16, #tpu.memory_space<vmem>>, vector<1536x128xbf16>
    %cst_142 = arith.constant dense<0.000000e+00> : vector<1x128xf32>
    %452 = tpu.matmul %450, %451, %cst_142 {dimension_numbers = #tpu.dot_dimension_numbers<[1], [0], [0], [1], [0, 0, 1, 1], [], []>} : vector<1x1536xbf16>, vector<1536x128xbf16>, vector<1x128xf32> -> vector<1x128xf32>
    %c0_143 = arith.constant 0 : index
    %c0_144 = arith.constant 0 : index
    %453 = vector.load %arg7[%c0_143, %c0_144] : memref<1x128xf32, #tpu.memory_space<vmem>>, vector<1x128xf32>
    %454 = arith.addf %452, %453 : vector<1x128xf32>
    %c0_145 = arith.constant 0 : index
    %c0_146 = arith.constant 0 : index
    %c0_147 = arith.constant 0 : index
    %455 = vector.load %arg13[%c0_145, %c0_146, %c0_147] : memref<1x1x128xf32, #tpu.memory_space<vmem>>, vector<1x1x128xf32>
    %456 = vector.shape_cast %455 : vector<1x1x128xf32> to vector<1x128xf32>
    %457 = vector.shape_cast %454 : vector<1x128xf32> to vector<1x1x128xf32>
    tpu.vector_store %arg13[%c0_145, %c0_146, %c0_147], %457 {strides = array<i32>} : memref<1x1x128xf32, #tpu.memory_space<vmem>>, vector<1x1x128xf32>,
    %458 = arith.truncf %454 : vector<1x128xf32> to vector<1x128xbf16>
    %c0_148 = arith.constant 0 : index
    %c0_149 = arith.constant 0 : index
    %459 = vector.load %arg8[%c0_148, %c0_149] : memref<128x128xbf16, #tpu.memory_space<vmem>>, vector<128x128xbf16>
    %cst_150 = arith.constant dense<0.000000e+00> : vector<1x128xf32>
    %460 = tpu.matmul %458, %459, %cst_150 {dimension_numbers = #tpu.dot_dimension_numbers<[1], [0], [0], [1], [0, 0, 1, 1], [], []>} : vector<1x128xbf16>, vector<128x128xbf16>, vector<1x128xf32> -> vector<1x128xf32>
    %c0_151 = arith.constant 0 : index
    %c0_152 = arith.constant 0 : index
    %461 = vector.load %arg9[%c0_151, %c0_152] : memref<1x128xf32, #tpu.memory_space<vmem>>, vector<1x128xf32>
    %462 = arith.addf %460, %461 : vector<1x128xf32>
    %cst_153 = arith.constant 0.000000e+00 : f32
    %463 = vector.broadcast %cst_153 : f32 to vector<1x128xf32>
    %464 = arith.maximumf %462, %463 : vector<1x128xf32>
    %465 = arith.truncf %464 : vector<1x128xf32> to vector<1x128xbf16>
    %c0_154 = arith.constant 0 : index
    %c0_155 = arith.constant 0 : index
    %466 = vector.load %arg10[%c0_154, %c0_155] : memref<128x128xbf16, #tpu.memory_space<vmem>>, vector<128x128xbf16>
    %cst_156 = arith.constant dense<0.000000e+00> : vector<1x128xf32>
    %467 = tpu.matmul %465, %466, %cst_156 {dimension_numbers = #tpu.dot_dimension_numbers<[1], [0], [0], [1], [0, 0, 1, 1], [], []>} : vector<1x128xbf16>, vector<128x128xbf16>, vector<1x128xf32> -> vector<1x128xf32>
    %c0_157 = arith.constant 0 : index
    %c0_158 = arith.constant 0 : index
    %468 = vector.load %arg11[%c0_157, %c0_158] : memref<1x128xf32, #tpu.memory_space<vmem>>, vector<1x128xf32>
    %469 = arith.addf %467, %468 : vector<1x128xf32>
    %c0_159 = arith.constant 0 : index
    %c0_160 = arith.constant 0 : index
    %c0_161 = arith.constant 0 : index
    %470 = vector.load %arg12[%c0_159, %c0_160, %c0_161] : memref<1x1x128xf32, #tpu.memory_space<vmem>>, vector<1x1x128xf32>
    %471 = vector.shape_cast %470 : vector<1x1x128xf32> to vector<1x128xf32>
    %472 = vector.shape_cast %469 : vector<1x128xf32> to vector<1x1x128xf32>
    tpu.vector_store %arg12[%c0_159, %c0_160, %c0_161], %472 {strides = array<i32>} : memref<1x1x128xf32, #tpu.memory_space<vmem>>, vector<1x1x128xf32>,
    return
  }
  func.func @transform_0(%arg0: i32) -> (i32, i32, i32) {
    %c0_i32 = arith.constant 0 : i32
    %c0_i32_0 = arith.constant 0 : i32
    %c0_i32_1 = arith.constant 0 : i32
    return %arg0, %c0_i32, %c0_i32_0 : i32, i32, i32
  }
  func.func @transform_1(%arg0: i32) -> (i32, i32) {
    %c0_i32 = arith.constant 0 : i32
    %c0_i32_0 = arith.constant 0 : i32
    %c0_i32_1 = arith.constant 0 : i32
    return %c0_i32, %c0_i32_0 : i32, i32
  }
  func.func @transform_2(%arg0: i32) -> (i32, i32) {
    %c0_i32 = arith.constant 0 : i32
    %c0_i32_0 = arith.constant 0 : i32
    %c0_i32_1 = arith.constant 0 : i32
    return %c0_i32, %c0_i32_0 : i32, i32
  }
  func.func @transform_3(%arg0: i32) -> (i32, i32) {
    %c0_i32 = arith.constant 0 : i32
    %c0_i32_0 = arith.constant 0 : i32
    %c0_i32_1 = arith.constant 0 : i32
    return %c0_i32, %c0_i32_0 : i32, i32
  }
  func.func @transform_4(%arg0: i32) -> (i32, i32) {
    %c0_i32 = arith.constant 0 : i32
    %c0_i32_0 = arith.constant 0 : i32
    %c0_i32_1 = arith.constant 0 : i32
    return %c0_i32, %c0_i32_0 : i32, i32
  }
  func.func @transform_5(%arg0: i32) -> (i32, i32) {
    %c0_i32 = arith.constant 0 : i32
    %c0_i32_0 = arith.constant 0 : i32
    %c0_i32_1 = arith.constant 0 : i32
    return %c0_i32, %c0_i32_0 : i32, i32
  }
  func.func @transform_6(%arg0: i32) -> (i32, i32) {
    %c0_i32 = arith.constant 0 : i32
    %c0_i32_0 = arith.constant 0 : i32
    %c0_i32_1 = arith.constant 0 : i32
    return %c0_i32, %c0_i32_0 : i32, i32
  }
  func.func @transform_7(%arg0: i32) -> (i32, i32) {
    %c0_i32 = arith.constant 0 : i32
    %c0_i32_0 = arith.constant 0 : i32
    %c0_i32_1 = arith.constant 0 : i32
    return %c0_i32, %c0_i32_0 : i32, i32
  }
  func.func @transform_8(%arg0: i32) -> (i32, i32) {
    %c0_i32 = arith.constant 0 : i32
    %c0_i32_0 = arith.constant 0 : i32
    %c0_i32_1 = arith.constant 0 : i32
    return %c0_i32, %c0_i32_0 : i32, i32
  }
  func.func @transform_9(%arg0: i32) -> (i32, i32) {
    %c0_i32 = arith.constant 0 : i32
    %c0_i32_0 = arith.constant 0 : i32
    %c0_i32_1 = arith.constant 0 : i32
    return %c0_i32, %c0_i32_0 : i32, i32
  }
  func.func @transform_10(%arg0: i32) -> (i32, i32) {
    %c0_i32 = arith.constant 0 : i32
    %c0_i32_0 = arith.constant 0 : i32
    %c0_i32_1 = arith.constant 0 : i32
    return %c0_i32, %c0_i32_0 : i32, i32
  }
  func.func @transform_11(%arg0: i32) -> (i32, i32, i32) {
    %c0_i32 = arith.constant 0 : i32
    %c0_i32_0 = arith.constant 0 : i32
    %c0_i32_1 = arith.constant 0 : i32
    return %arg0, %c0_i32, %c0_i32_0 : i32, i32, i32
  }
  func.func @transform_12(%arg0: i32) -> (i32, i32, i32) {
    %c0_i32 = arith.constant 0 : i32
    %c0_i32_0 = arith.constant 0 : i32
    %c0_i32_1 = arith.constant 0 : i32
    return %arg0, %c0_i32, %c0_i32_0 : i32, i32, i32
  }
}

</mosaic_0001>

<bundles_post_ra>
// kernel: net_forward.1
= control target key start
LH: loop header
LB: loop body
LE: loop exit
PB: predicated region body
PF: predicated region fallthrough
CT: control target
= control target key end

     0   :  { %s12640_s0 = inlined_call_operand.vmem [shape: bf16[2,2208,32], index: 0, kind: input, shape index: {}]   ;;  %s12641_s1 = inlined_call_operand.vmem [shape: bf16[32,64], index: 1, kind: input, shape index: {}]   ;;  %s12642_s2 = inlined_call_operand.vmem [shape: f32[1,64], index: 2, kind: input, shape index: {}]   ;;  %s12643_s3 = inlined_call_operand.vmem [shape: bf16[576,96], index: 3, kind: input, shape index: {}]   ;;  %s12644_s4 = inlined_call_operand.vmem [shape: f32[1,96], index: 4, kind: input, shape index: {}]   ;;  %s12645_s5 = inlined_call_operand.vmem [shape: bf16[1536,128], index: 5, kind: input, shape index: {}]   ;;  %s12646_s6 = inlined_call_operand.vmem [shape: f32[1,128], index: 6, kind: input, shape index: {}]   ;;  %s12647_s7 = inlined_call_operand.vmem [shape: bf16[128,128], index: 7, kind: input, shape index: {}]   ;;  %s12648_s8 = inlined_call_operand.vmem [shape: f32[1,128], index: 8, kind: input, shape index: {}]   ;;  %s12649_s9 = inlined_call_operand.vmem [shape: bf16[128,128], index: 9, kind: input, shape index: {}]   ;;  %s12650_s10 = inlined_call_operand.vmem [shape: f32[1,128], index: 10, kind: input, shape index: {}]   ;;  %s12651_s11 = inlined_call_operand.hbm [shape: f32[2,1,128], index: 11, kind: output, shape index: {0}]   ;;  %s12652_s12 = inlined_call_operand.hbm [shape: f32[2,1,128], index: 12, kind: output, shape index: {1}]  }
   0x1   :  { %12677 = sst [smem:[#allocation25_spill]] %s12640_s0 }
   0x2   :  { %12678 = sst [smem:[#allocation26_spill]] %s12641_s1 }
   0x3   :  { %12679 = sst [smem:[#allocation27_spill]] %s12642_s2 }
   0x4   :  { %18 = vsyncpa [#allocation4], 0 }
   0x5   :  { %20 = vsyncpa [#allocation4 + $0x1], 0 }
   0x6   :  { %21 = vsyncpa [#allocation6], 0 }
   0x7   :  { %23 = vsyncpa [#allocation6 + $0x1], 0  ;;  %s9455_s21 = smov 0   ;;  %s9457_s22 = smov 0  }
   0x8   :  { %s9459_s23 = smov 0   ;;  %s9461_s24 = smov 0  }
   0x9 LB: > { %s9476_s25 = sadd.s32 4294967295, %s9381_s24   ;;  %s7115_s26 = sadd.s32 4294967294, %s9381_s24   ;;  %s9381_s24 = sphi %s9461_s24, %s12725_s24   ;;  %s9377_s23 = sphi %s9459_s23, %s12724_s23   ;;  %s9373_s22 = sphi %s9457_s22, %s12723_s22   ;;  %s9369_s21 = sphi %s9455_s21, %s12722_s21  }
   0xa   : > { %s9480_s27 = sadd.s32 1, %s9381_s24   ;;  %s272_s28 = sadd.s32 1, %s9377_s23 }
   0xb   : > { %s269_s29 = ssub.s32 %s9381_s24, %s9480_s27  ;;  %p282_p0 = scmp.ne.s32.totalorder %s9377_s23, %s9373_s22 }
   0xc   : > { %p270_p1 = scmp.eq.s32.totalorder %s269_s29, 0  ;;  %p283_p2 = scmp.eq.s32.totalorder %s9476_s25, 1 }
   0xd   : > { %p288_p3 = scmp.ne.s32.totalorder %s9373_s22, %s9369_s21  ;;  %p289_p4 = scmp.eq.s32.totalorder %s7115_s26, 1 }
   0xe   : > { %s9491_s30 = scalar_select %p270_p1, %s9377_s23, %s272_s28  }
   0xf   : > { %p9493_p5 = por %p283_p2, %p282_p0  ;;  %p9497_p6 = por %p289_p4, %p288_p3 }
  0x10   : > { %p7118_p7 = scmp.ge.s32.totalorder %s9381_s24, 1  ;;  %p371_p8 = scmp.lt.s32.totalorder %s9381_s24, 3 }
  0x12   : > { %p372_p9 = pnand %p7118_p7, %p371_p8 }
  0x14   : > { %375 = sbr.rel (%p372_p9) target bundleno = 1985 (0x7c1), region = 64 }
  0x1b   : > { %s12682_s1 = sld [smem:[#allocation26_spill]]  ;;  %v12653_v1 = vmov 0.0   ;;  %p416_p10 = scmp.lt.s32.totalorder %s9476_s25, 1  ;;  %vm9384_vm0 = vmmov 0   ;;  %vm508_vm1 = vcmask 261120   ;;  %vm676_vm2 = vcmask 523264  }
  0x1c   : > { %8173 = vmatprep.subr.bf16.mxu0 %v12653_v1  ;;  %8213 = vmatprep.subr.bf16.mxu1 %v12653_v1  ;;  %s12683_s0 = sld [smem:[#allocation25_spill]]  ;;  %s12684_s2 = sld [smem:[#allocation27_spill]]  ;;  %vm4002_vm3 = vsmask.f32 7424  ;;  %vm4041_vm4 = vcmask 1046528   ;;  %vm5741_vm5 = vcmask 785408  }
  0x1d   : > { %8177 = vmatprep.mubr.msk.bf16.mxu0 %vm9384_vm0, %v12653_v1  ;;  %8217 = vmatprep.mubr.msk.bf16.mxu1 %vm9384_vm0, %v12653_v1  ;;  %s417_s19 = scalar_select %p416_p10, %s9476_s25, 1 }
  0x1e   : > { %s12670_s26 = smov 64   ;;  %s12672_s18 = smov 96  }
  0x1f   : > { %s8893_s20 = smul.u32 1104, %s417_s19  ;;  %s12674_s19 = smov 32  }
  0x20   : > { %s12718_s15 = smov 32   ;;  %s12719_s17 = smov 96  }
  0x21   : > { %v9506_v0 = vld [vmem:[%s12682_s1] sm:$0xff]   ;;  %v9515_v2 = vld [vmem:[%s12682_s1 + $0x8] sm:$0xff]   ;;  %s12676_s28 = sshll.u32 %s9476_s25, 4 }
  0x22   : > { %8174 = vmatpush3.bf16.msra.mxu0 %v9506_v0  ;;  %8214 = vmatpush3.bf16.msra.mxu1 %v9506_v0  ;;  %s9532_s29 = scalar_lea.vmem %s12683_s0, %s8893_s20  ;;  %v9701_v41 = vld [vmem:[%s12682_s1] sm:$0xff]   ;;  %v9716_v44 = vld [vmem:[%s12682_s1 + $0x8] sm:$0xff]   ;;  %s12720_s20 = smov 64  }
  0x23   : > { %8175 = vmatprep.subr.bf16.mxu0 %v12653_v1  ;;  %8215 = vmatprep.subr.bf16.mxu1 %v12653_v1  ;;  %v8945_v3 = vld [vmem:[%s9532_s29] sm:$0xff]   ;;  %v8946_v4 = vld [vmem:[%s9532_s29 + $0x48] sm:$0xff]   ;;  %v8948_v6 = vld [vmem:[%s9532_s29 + $0x50] sm:$0xff]   ;;  %s12549_s0 = sand.u32 1, %s9373_s22  }
  0x24   : > { %v8947_v5 = vld [vmem:[%s9532_s29 + $0x8] sm:$0xff]   ;;  %v8949_v7 = vld [vmem:[%s9532_s29 + $0x10] sm:$0xff]   ;;  %v8950_v8 = vld [vmem:[%s9532_s29 + $0x58] sm:$0xff]  }
  0x25   : > { %v8951_v9 = vld [vmem:[%s9532_s29 + $0x18] sm:$0xff]   ;;  %v8952_v10 = vld [vmem:[%s9532_s29 + $0x60] sm:$0xff]   ;;  %v8954_v12 = vld [vmem:[%s9532_s29 + $0x68] sm:$0xff]  }
  0x26   : > { %8176 = vmatpush3.bf16.msra.mxu0 %v9515_v2  ;;  %8216 = vmatpush3.bf16.msra.mxu1 %v9515_v2  ;;  %v8953_v11 = vld [vmem:[%s9532_s29 + $0x20] sm:$0xff]   ;;  %v8955_v13 = vld [vmem:[%s9532_s29 + $0x28] sm:$0xff]   ;;  %v8956_v14 = vld [vmem:[%s9532_s29 + $0x70] sm:$0xff]  }
  0x27   : > { %8253 = vmatprep.subr.bf16.mxu0 %v12653_v1  ;;  %8293 = vmatprep.subr.bf16.mxu1 %v12653_v1  ;;  %v8957_v15 = vld [vmem:[%s9532_s29 + $0x30] sm:$0xff]   ;;  %v8958_v16 = vld [vmem:[%s9532_s29 + $0x78] sm:$0xff]   ;;  %v8960_v18 = vld [vmem:[%s9532_s29 + $0x80] sm:$0xff]  }
  0x28   : > { %v8959_v17 = vld [vmem:[%s9532_s29 + $0x38] sm:$0xff]   ;;  %v8961_v19 = vld [vmem:[%s9532_s29 + $0x40] sm:$0xff]   ;;  %v8962_v20 = vld [vmem:[%s9532_s29 + $0x88] sm:$0xff]  }
  0x29   : > { %8178 = vmatmul.mubr.msk.bf16.vlgmr.msra.gmra.mrb[0].mxu0 %vm508_vm1, %v8945_v3  ;;  %8218 = vmatmul.mubr.msk.bf16.vlgmr.msra.gmra.mrb[0].mxu1 %vm508_vm1, %v8946_v4  ;;  %v8963_v21 = vld [vmem:[%s9532_s29 + $0x90] sm:$0xff]   ;;  %v8964_v22 = vld [vmem:[%s9532_s29 + $0xd8] sm:$0xff]   ;;  %v8966_v24 = vld [vmem:[%s9532_s29 + $0xe0] sm:$0xff]  }
  0x2a   : > { %8254 = vmatpush3.bf16.msra.mxu0 %v9506_v0  ;;  %8181 = vmatprep.mubr.msk.bf16.mxu0 %vm9384_vm0, %v12653_v1  ;;  %v8965_v23 = vld [vmem:[%s9532_s29 + $0x98] sm:$0xff]   ;;  %v8967_v25 = vld [vmem:[%s9532_s29 + $0xa0] sm:$0xff]   ;;  %v8968_v26 = vld [vmem:[%s9532_s29 + $0xe8] sm:$0xff]  }
  0x2b   : > { %8221 = vmatprep.mubr.msk.bf16.mxu1 %vm9384_vm0, %v12653_v1  ;;  %8255 = vmatprep.subr.bf16.mxu0 %v12653_v1  ;;  %v8969_v27 = vld [vmem:[%s9532_s29 + $0xa8] sm:$0xff]   ;;  %v8970_v28 = vld [vmem:[%s9532_s29 + $0xf0] sm:$0xff]   ;;  %v8972_v30 = vld [vmem:[%s9532_s29 + $0xf8] sm:$0xff]  }
  0x2c   : > { %8294 = vmatpush3.bf16.msra.mxu1 %v9506_v0  ;;  %v8971_v29 = vld [vmem:[%s9532_s29 + $0xb0] sm:$0xff]   ;;  %v8973_v31 = vld [vmem:[%s9532_s29 + $0xb8] sm:$0xff]   ;;  %v8974_v32 = vld [vmem:[%s9532_s29 + $0x100] sm:$0xff]  }
  0x2d   : > { %8295 = vmatprep.subr.bf16.mxu1 %v12653_v1  ;;  %v8975_v33 = vld [vmem:[%s9532_s29 + $0xc0] sm:$0xff]   ;;  %v8976_v34 = vld [vmem:[%s9532_s29 + $0x108] sm:$0xff]   ;;  %v8978_v36 = vld [vmem:[%s9532_s29 + $0x110] sm:$0xff]  }
  0x2e   : > { %8256 = vmatpush3.bf16.msra.mxu0 %v9515_v2  ;;  %v8977_v35 = vld [vmem:[%s9532_s29 + $0xc8] sm:$0xff]   ;;  %v8979_v37 = vld [vmem:[%s9532_s29 + $0xd0] sm:$0xff]   ;;  %v8980_v38 = vld [vmem:[%s9532_s29 + $0x118] sm:$0xff]  }
  0x2f   : > { %8333 = vmatprep.subr.bf16.mxu0 %v12653_v1  ;;  %v8981_v39 = vld [vmem:[%s9532_s29 + $0x120] sm:$0xff]   ;;  %v8982_v40 = vld [vmem:[%s9532_s29 + $0x168] sm:$0xff]   ;;  %v8984_v43 = vld [vmem:[%s9532_s29 + $0x170] sm:$0xff]  }
  0x30   : > { %8296 = vmatpush3.bf16.msra.mxu1 %v9515_v2  ;;  %v8983_v42 = vld [vmem:[%s9532_s29 + $0x128] sm:$0xff]   ;;  %v8985_v45 = vld [vmem:[%s9532_s29 + $0x130] sm:$0xff]   ;;  %v8986_v46 = vld [vmem:[%s9532_s29 + $0x178] sm:$0xff]  }
  0x31   : > { %8182 = vmatmul.mubr.msk.bf16.gmra.mrb[4].mxu0 %vm508_vm1, %v8947_v5  ;;  %8373 = vmatprep.subr.bf16.mxu1 %v12653_v1  ;;  %v8987_v47 = vld [vmem:[%s9532_s29 + $0x138] sm:$0xff]   ;;  %v8988_v48 = vld [vmem:[%s9532_s29 + $0x180] sm:$0xff]   ;;  %v8990_v50 = vld [vmem:[%s9532_s29 + $0x188] sm:$0xff]  }
  0x32   : > { %8222 = vmatmul.mubr.msk.bf16.gmra.mrb[4].mxu1 %vm508_vm1, %v8948_v6  ;;  %8185 = vmatprep.mubr.msk.bf16.mxu0 %vm9384_vm0, %v12653_v1  ;;  %v8989_v49 = vld [vmem:[%s9532_s29 + $0x140] sm:$0xff]   ;;  %v8991_v51 = vld [vmem:[%s9532_s29 + $0x148] sm:$0xff]   ;;  %v8992_v52 = vld [vmem:[%s9532_s29 + $0x190] sm:$0xff]  }
  0x33   : > { %8225 = vmatprep.mubr.msk.bf16.mxu1 %vm9384_vm0, %v12653_v1  ;;  %v8993_v53 = vld [vmem:[%s9532_s29 + $0x150] sm:$0xff]   ;;  %v8994_v54 = vld [vmem:[%s9532_s29 + $0x198] sm:$0xff]   ;;  %v8996_v56 = vld [vmem:[%s9532_s29 + $0x1a0] sm:$0xff]  }
  0x34   : > { %v8995_v55 = vld [vmem:[%s9532_s29 + $0x158] sm:$0xff]   ;;  %v8997_v57 = vld [vmem:[%s9532_s29 + $0x160] sm:$0xff]   ;;  %v8998_v58 = vld [vmem:[%s9532_s29 + $0x1a8] sm:$0xff]  }
  0x35   : > { %v8999_v61 = vld [vmem:[%s9532_s29 + $0x1b0] sm:$0xff]  }
  0x39   : > { %8186 = vmatmul.mubr.msk.bf16.gmra.mrb[8].mxu0 %vm508_vm1, %v8949_v7 }
  0x3a   : > { %8226 = vmatmul.mubr.msk.bf16.gmra.mrb[8].mxu1 %vm508_vm1, %v8950_v8  ;;  %8189 = vmatprep.mubr.msk.bf16.mxu0 %vm9384_vm0, %v12653_v1  ;;  %v9001_v8 = vld [vmem:[%s9532_s29 + $0x1b8] sm:$0xff]  }
  0x3b   : > { %8229 = vmatprep.mubr.msk.bf16.mxu1 %vm9384_vm0, %v12653_v1 }
  0x41   : > { %8190 = vmatmul.mubr.msk.bf16.gmra.mrb[12].mxu0 %vm508_vm1, %v8951_v9 }
  0x42   : > { %8230 = vmatmul.mubr.msk.bf16.gmra.mrb[12].mxu1 %vm508_vm1, %v8952_v10  ;;  %8193 = vmatprep.mubr.msk.bf16.mxu0 %vm9384_vm0, %v12653_v1 }
  0x43   : > { %8233 = vmatprep.mubr.msk.bf16.mxu1 %vm9384_vm0, %v12653_v1 }
  0x49   : > { %8194 = vmatmul.mubr.msk.bf16.gmra.mrb[16].mxu0 %vm508_vm1, %v8953_v11  ;;  %v9002_v11 = vld [vmem:[%s9532_s29 + $0x200] sm:$0xff]  }
  0x4a   : > { %8234 = vmatmul.mubr.msk.bf16.gmra.mrb[16].mxu1 %vm508_vm1, %v8954_v12  ;;  %8197 = vmatprep.mubr.msk.bf16.mxu0 %vm9384_vm0, %v12653_v1 }
  0x4b   : > { %8237 = vmatprep.mubr.msk.bf16.mxu1 %vm9384_vm0, %v12653_v1 }
  0x51   : > { %8198 = vmatmul.mubr.msk.bf16.gmra.mrb[20].mxu0 %vm508_vm1, %v8955_v13 }
  0x52   : > { %8238 = vmatmul.mubr.msk.bf16.gmra.mrb[20].mxu1 %vm508_vm1, %v8956_v14  ;;  %8201 = vmatprep.mubr.msk.bf16.mxu0 %vm9384_vm0, %v12653_v1 }
  0x53   : > { %8241 = vmatprep.mubr.msk.bf16.mxu1 %vm9384_vm0, %v12653_v1 }
  0x59   : > { %8202 = vmatmul.mubr.msk.bf16.gmra.mrb[24].mxu0 %vm508_vm1, %v8957_v15 }
  0x5a   : > { %8242 = vmatmul.mubr.msk.bf16.gmra.mrb[24].mxu1 %vm508_vm1, %v8958_v16  ;;  %8205 = vmatprep.mubr.msk.bf16.mxu0 %vm9384_vm0, %v12653_v1 }
  0x5b   : > { %8245 = vmatprep.mubr.msk.bf16.mxu1 %vm9384_vm0, %v12653_v1 }
  0x61   : > { %8206 = vmatmul.mubr.msk.bf16.gmra.mrb[28].mxu0 %vm508_vm1, %v8959_v17 }
  0x62   : > { %8246 = vmatmul.mubr.msk.bf16.gmra.mrb[28].mxu1 %vm508_vm1, %v8960_v18  ;;  %8209 = vmatprep.mubr.msk.bf16.mxu0 %vm9384_vm0, %v12653_v1  ;;  %v9003_v18 = vld [vmem:[%s9532_s29 + $0x1c0] sm:$0xff]  }
  0x63   : > { %8249 = vmatprep.mubr.msk.bf16.mxu1 %vm9384_vm0, %v12653_v1 }
  0x69   : > { %8210 = vmatmul.mubr.msk.bf16.gmra.mrb[32].mxu0 %vm508_vm1, %v8961_v19 }
  0x6a   : > { %8250 = vmatmul.mubr.msk.bf16.gmra.mrb[32].mxu1 %vm508_vm1, %v8962_v20  ;;  %8257 = vmatprep.mubr.msk.bf16.mxu0 %vm9384_vm0, %v12653_v1 }
  0x6b   : > { %8297 = vmatprep.mubr.msk.bf16.mxu1 %vm9384_vm0, %v12653_v1 }
  0x71   : > { %8258 = vmatmul.mubr.msk.bf16.vlgmr.msra.gmra.mrb[36].mxu0 %vm508_vm1, %v8963_v21  ;;  %v9004_v21 = vld [vmem:[%s9532_s29 + $0x208] sm:$0xff]  }
  0x72   : > { %8298 = vmatmul.mubr.msk.bf16.vlgmr.msra.gmra.mrb[36].mxu1 %vm508_vm1, %v8964_v22  ;;  %8334 = vmatpush3.bf16.msra.mxu0 %v9506_v0 }
  0x73   : > { %8261 = vmatprep.mubr.msk.bf16.mxu0 %vm9384_vm0, %v12653_v1  ;;  %8301 = vmatprep.mubr.msk.bf16.mxu1 %vm9384_vm0, %v12653_v1 }
  0x74   : > { %8335 = vmatprep.subr.bf16.mxu0 %v12653_v1  ;;  %8374 = vmatpush3.bf16.msra.mxu1 %v9506_v0  ;;  %v9000_v0 = vld [vmem:[%s9532_s29 + $0x1f8] sm:$0xff]  }
  0x75   : > { %8375 = vmatprep.subr.bf16.mxu1 %v12653_v1 }
  0x76   : > { %8336 = vmatpush3.bf16.msra.mxu0 %v9515_v2 }
  0x77   : > { %8413 = vmatprep.subr.bf16.mxu0 %v12653_v1 }
  0x78   : > { %8376 = vmatpush3.bf16.msra.mxu1 %v9515_v2 }
  0x79   : > { %8262 = vmatmul.mubr.msk.bf16.gmra.mrb[40].mxu0 %vm508_vm1, %v8965_v23  ;;  %8453 = vmatprep.subr.bf16.mxu1 %v12653_v1 }
  0x7a   : > { %8302 = vmatmul.mubr.msk.bf16.gmra.mrb[40].mxu1 %vm508_vm1, %v8966_v24  ;;  %8265 = vmatprep.mubr.msk.bf16.mxu0 %vm9384_vm0, %v12653_v1 }
  0x7b   : > { %8305 = vmatprep.mubr.msk.bf16.mxu1 %vm9384_vm0, %v12653_v1 }
  0x81   : > { %8266 = vmatmul.mubr.msk.bf16.gmra.mrb[44].mxu0 %vm508_vm1, %v8967_v25  ;;  %v9825_v25 = vld [vmem:[%s12684_s2] ss:$0 sm:$0xff] }
  0x82   : > { %8306 = vmatmul.mubr.msk.bf16.gmra.mrb[44].mxu1 %vm508_vm1, %v8968_v26  ;;  %8269 = vmatprep.mubr.msk.bf16.mxu0 %vm9384_vm0, %v12653_v1 }
  0x83   : > { %8309 = vmatprep.mubr.msk.bf16.mxu1 %vm9384_vm0, %v12653_v1 }
  0x89   : > { %8270 = vmatmul.mubr.msk.bf16.gmra.mrb[48].mxu0 %vm508_vm1, %v8969_v27 }
  0x8a   : > { %8310 = vmatmul.mubr.msk.bf16.gmra.mrb[48].mxu1 %vm508_vm1, %v8970_v28  ;;  %8273 = vmatprep.mubr.msk.bf16.mxu0 %vm9384_vm0, %v12653_v1 }
  0x8b   : > { %8313 = vmatprep.mubr.msk.bf16.mxu1 %vm9384_vm0, %v12653_v1 }
  0x91   : > { %8274 = vmatmul.mubr.msk.bf16.gmra.mrb[52].mxu0 %vm508_vm1, %v8971_v29 }
  0x92   : > { %8314 = vmatmul.mubr.msk.bf16.gmra.mrb[52].mxu1 %vm508_vm1, %v8972_v30  ;;  %8277 = vmatprep.mubr.msk.bf16.mxu0 %vm9384_vm0, %v12653_v1 }
  0x93   : > { %8317 = vmatprep.mubr.msk.bf16.mxu1 %vm9384_vm0, %v12653_v1 }
  0x99   : > { %8278 = vmatmul.mubr.msk.bf16.gmra.mrb[56].mxu0 %vm508_vm1, %v8973_v31 }
  0x9a   : > { %8318 = vmatmul.mubr.msk.bf16.gmra.mrb[56].mxu1 %vm508_vm1, %v8974_v32  ;;  %8281 = vmatprep.mubr.msk.bf16.mxu0 %vm9384_vm0, %v12653_v1 }
  0x9b   : > { %8321 = vmatprep.mubr.msk.bf16.mxu1 %vm9384_vm0, %v12653_v1 }
  0xa1   : > { %8282 = vmatmul.mubr.msk.bf16.gmra.mrb[60].mxu0 %vm508_vm1, %v8975_v33 }
  0xa2   : > { %8322 = vmatmul.mubr.msk.bf16.gmra.mrb[60].mxu1 %vm508_vm1, %v8976_v34  ;;  %8285 = vmatprep.mubr.msk.bf16.mxu0 %vm9384_vm0, %v12653_v1  ;;  %v9005_v34 = vld [vmem:[%s9532_s29 + $0x1c8] sm:$0xff]  }
  0xa3   : > { %8325 = vmatprep.mubr.msk.bf16.mxu1 %vm9384_vm0, %v12653_v1 }
  0xa9   : > { %8286 = vmatmul.mubr.msk.bf16.gmra.mrb[64].mxu0 %vm508_vm1, %v8977_v35 }
  0xaa   : > { %8326 = vmatmul.mubr.msk.bf16.gmra.mrb[64].mxu1 %vm508_vm1, %v8978_v36  ;;  %8289 = vmatprep.mubr.msk.bf16.mxu0 %vm9384_vm0, %v12653_v1 }
  0xab   : > { %8329 = vmatprep.mubr.msk.bf16.mxu1 %vm9384_vm0, %v12653_v1 }
  0xb1   : > { %8290 = vmatmul.mubr.msk.bf16.gmra.mrb[68].mxu0 %vm508_vm1, %v8979_v37  ;;  %v9006_v37 = vld [vmem:[%s9532_s29 + $0x210] sm:$0xff]  }
  0xb2   : > { %8330 = vmatmul.mubr.msk.bf16.gmra.mrb[68].mxu1 %vm508_vm1, %v8980_v38  ;;  %8337 = vmatprep.mubr.msk.bf16.mxu0 %vm9384_vm0, %v12653_v1 }
  0xb3   : > { %8377 = vmatprep.mubr.msk.bf16.mxu1 %vm9384_vm0, %v12653_v1 }
  0xb9   : > { %8338 = vmatmul.mubr.msk.bf16.vlgmr.msra.gmra.mrb[72].mxu0 %vm508_vm1, %v8981_v39 }
  0xba   : > { %8378 = vmatmul.mubr.msk.bf16.vlgmr.msra.gmra.mrb[72].mxu1 %vm508_vm1, %v8982_v40  ;;  %8414 = vmatpush3.bf16.msra.mxu0 %v9701_v41 }
  0xbb   : > { %8341 = vmatprep.mubr.msk.bf16.mxu0 %vm9384_vm0, %v12653_v1  ;;  %8381 = vmatprep.mubr.msk.bf16.mxu1 %vm9384_vm0, %v12653_v1 }
  0xbc   : > { %8415 = vmatprep.subr.bf16.mxu0 %v12653_v1  ;;  %8454 = vmatpush3.bf16.msra.mxu1 %v9701_v41 }
  0xbd   : > { %8455 = vmatprep.subr.bf16.mxu1 %v12653_v1 }
  0xbe   : > { %8416 = vmatpush3.bf16.msra.mxu0 %v9716_v44 }
  0xbf   : > { %8493 = vmatprep.subr.bf16.mxu0 %v12653_v1 }
  0xc0   : > { %8456 = vmatpush3.bf16.msra.mxu1 %v9716_v44 }
  0xc1   : > { %8342 = vmatmul.mubr.msk.bf16.gmra.mrb[76].mxu0 %vm508_vm1, %v8983_v42  ;;  %8533 = vmatprep.subr.bf16.mxu1 %v12653_v1 }
  0xc2   : > { %8382 = vmatmul.mubr.msk.bf16.gmra.mrb[76].mxu1 %vm508_vm1, %v8984_v43  ;;  %8345 = vmatprep.mubr.msk.bf16.mxu0 %vm9384_vm0, %v12653_v1 }
  0xc3   : > { %8385 = vmatprep.mubr.msk.bf16.mxu1 %vm9384_vm0, %v12653_v1 }
  0xc9   : > { %8346 = vmatmul.mubr.msk.bf16.gmra.mrb[80].mxu0 %vm508_vm1, %v8985_v45 }
  0xca   : > { %8386 = vmatmul.mubr.msk.bf16.gmra.mrb[80].mxu1 %vm508_vm1, %v8986_v46  ;;  %8349 = vmatprep.mubr.msk.bf16.mxu0 %vm9384_vm0, %v12653_v1 }
  0xcb   : > { %8389 = vmatprep.mubr.msk.bf16.mxu1 %vm9384_vm0, %v12653_v1 }
  0xd1   : > { %8350 = vmatmul.mubr.msk.bf16.gmra.mrb[84].mxu0 %vm508_vm1, %v8987_v47 }
  0xd2   : > { %8390 = vmatmul.mubr.msk.bf16.gmra.mrb[84].mxu1 %vm508_vm1, %v8988_v48  ;;  %8353 = vmatprep.mubr.msk.bf16.mxu0 %vm9384_vm0, %v12653_v1 }
  0xd3   : > { %8393 = vmatprep.mubr.msk.bf16.mxu1 %vm9384_vm0, %v12653_v1 }
  0xd9   : > { %8354 = vmatmul.mubr.msk.bf16.gmra.mrb[88].mxu0 %vm508_vm1, %v8989_v49 }
  0xda   : > { %8394 = vmatmul.mubr.msk.bf16.gmra.mrb[88].mxu1 %vm508_vm1, %v8990_v50  ;;  %8357 = vmatprep.mubr.msk.bf16.mxu0 %vm9384_vm0, %v12653_v1 }
  0xdb   : > { %8397 = vmatprep.mubr.msk.bf16.mxu1 %vm9384_vm0, %v12653_v1 }
  0xe1   : > { %8358 = vmatmul.mubr.msk.bf16.gmra.mrb[92].mxu0 %vm508_vm1, %v8991_v51 }
  0xe2   : > { %8398 = vmatmul.mubr.msk.bf16.gmra.mrb[92].mxu1 %vm508_vm1, %v8992_v52  ;;  %8361 = vmatprep.mubr.msk.bf16.mxu0 %vm9384_vm0, %v12653_v1 }
  0xe3   : > { %8401 = vmatprep.mubr.msk.bf16.mxu1 %vm9384_vm0, %v12653_v1 }
  0xe9   : > { %8362 = vmatmul.mubr.msk.bf16.gmra.mrb[96].mxu0 %vm508_vm1, %v8993_v53 }
  0xea   : > { %8402 = vmatmul.mubr.msk.bf16.gmra.mrb[96].mxu1 %vm508_vm1, %v8994_v54  ;;  %8365 = vmatprep.mubr.msk.bf16.mxu0 %vm9384_vm0, %v12653_v1 }
  0xeb   : > { %8405 = vmatprep.mubr.msk.bf16.mxu1 %vm9384_vm0, %v12653_v1 }
  0xf1   : > { %8366 = vmatmul.mubr.msk.bf16.gmra.mrb[100].mxu0 %vm508_vm1, %v8995_v55 }
  0xf2   : > { %8406 = vmatmul.mubr.msk.bf16.gmra.mrb[100].mxu1 %vm508_vm1, %v8996_v56  ;;  %8369 = vmatprep.mubr.msk.bf16.mxu0 %vm9384_vm0, %v12653_v1 }
  0xf3   : > { %8409 = vmatprep.mubr.msk.bf16.mxu1 %vm9384_vm0, %v12653_v1 }
  0xf9   : > { %8370 = vmatmul.mubr.msk.bf16.gmra.mrb[104].mxu0 %vm508_vm1, %v8997_v57 }
  0xfa   : > { %8410 = vmatmul.mubr.msk.bf16.gmra.mrb[104].mxu1 %vm508_vm1, %v8998_v58  ;;  %8417 = vmatprep.mubr.msk.bf16.mxu0 %vm9384_vm0, %v12653_v1 }
  0xfb   : > { %8457 = vmatprep.mubr.msk.bf16.mxu1 %vm9384_vm0, %v12653_v1 }
  0xfc   : > { %v570_v59 = vpop.f32.mrb[0].mxu0  ;;  %v802_v62 = vpop.f32.mrb[0].mxu1 }
  0xfd   : > { %v8179_v60 = vpop.f32.mrb[1].mxu0  ;;  %v8219_v2 = vpop.f32.mrb[1].mxu1  ;;  %v803_v27 = vadd.f32 %v9825_v25, %v802_v62  ;;  %v571_v28 = vadd.f32 %v9825_v25, %v570_v59 }
  0xfe   : > { %v573_v63 = vpop.f32.mrb[2].mxu0  ;;  %v805_v4 = vpop.f32.mrb[2].mxu1 }
  0xff   : > { %v8180_v3 = vpop.f32.mrb[3].mxu0  ;;  %v8220_v5 = vpop.f32.mrb[3].mxu1  ;;  %v806_v30 = vadd.f32 %v9825_v25, %v805_v4  ;;  %v574_v31 = vadd.f32 %v9825_v25, %v573_v63  ;;  %v873_v38 = vmax.f32 %v803_v27, 0.0  ;;  %v641_v42 = vmax.f32 %v571_v28, 0.0 }
 0x100   : > { %v9007_v3 = vld [vmem:[%s9532_s29 + $0x1d0] sm:$0xff]  }
 0x101   : > { %8418 = vmatmul.mubr.msk.bf16.vlgmr.msra.gmra.mrb[108].mxu0 %vm508_vm1, %v8999_v61  ;;  %v874_v48 = vmax.f32 %v806_v30, 0.0  ;;  %v642_v52 = vmax.f32 %v574_v31, 0.0 }
 0x102   : > { %8458 = vmatmul.mubr.msk.bf16.vlgmr.msra.gmra.mrb[108].mxu1 %vm508_vm1, %v9000_v0  ;;  %8494 = vmatpush3.bf16.msra.mxu0 %v9701_v41 }
 0x103   : > { %8421 = vmatprep.mubr.msk.bf16.mxu0 %vm9384_vm0, %v12653_v1  ;;  %8461 = vmatprep.mubr.msk.bf16.mxu1 %vm9384_vm0, %v12653_v1 }
 0x104   : > { %v9793_v6 = vpop.f32.mrb[4].mxu0  ;;  %8495 = vmatprep.subr.bf16.mxu0 %v12653_v1  ;;  %8534 = vmatpush3.bf16.msra.mxu1 %v9701_v41 }
 0x105   : > { %v8183_v7 = vpop.f32.mrb[5].mxu0  ;;  %v810_v9 = vpop.f32.mrb[4].mxu1  ;;  %8535 = vmatprep.subr.bf16.mxu1 %v12653_v1  ;;  %v579_v58 = vadd.f32 %v9825_v25, %v9793_v6 }
 0x106   : > { %v9799_v10 = vpop.f32.mrb[6].mxu0  ;;  %v8223_v12 = vpop.f32.mrb[5].mxu1  ;;  %8496 = vmatpush3.bf16.msra.mxu0 %v9716_v44  ;;  %v811_v55 = vadd.f32 %v9825_v25, %v810_v9  ;;  %v9008_v7 = vld [vmem:[%s9532_s29 + $0x218] sm:$0xff]  }
 0x107   : > { %v8184_v13 = vpop.f32.mrb[7].mxu0  ;;  %v813_v14 = vpop.f32.mrb[6].mxu1  ;;  %8573 = vmatprep.subr.bf16.mxu0 %v12653_v1  ;;  %v582_v63 = vadd.f32 %v9825_v25, %v9799_v10 }
 0x108   : > { %v8224_v15 = vpop.f32.mrb[7].mxu1  ;;  %8536 = vmatpush3.bf16.msra.mxu1 %v9716_v44  ;;  %v814_v61 = vadd.f32 %v9825_v25, %v813_v14  ;;  %v875_v6 = vmax.f32 %v811_v55, 0.0 }
 0x109   : > { %8422 = vmatmul.mubr.msk.bf16.gmra.mrb[112].mxu0 %vm508_vm1, %v9001_v8  ;;  %8613 = vmatprep.subr.bf16.mxu1 %v12653_v1 }
 0x10a   : > { %8462 = vmatmul.mubr.msk.bf16.gmra.mrb[112].mxu1 %vm508_vm1, %v9002_v11  ;;  %8425 = vmatprep.mubr.msk.bf16.mxu0 %vm9384_vm0, %v12653_v1  ;;  %v643_v11 = vmax.f32 %v579_v58, 0.0 }
 0x10b   : > { %8465 = vmatprep.mubr.msk.bf16.mxu1 %vm9384_vm0, %v12653_v1 }
 0x10c   : > { %v9812_v16 = vpop.f32.mrb[8].mxu0 }
 0x10d   : > { %v8187_v17 = vpop.f32.mrb[9].mxu0  ;;  %v9815_v19 = vpop.f32.mrb[8].mxu1  ;;  %v587_v30 = vadd.f32 %v9825_v25, %v9812_v16 }
 0x10e   : > { %v9817_v20 = vpop.f32.mrb[10].mxu0  ;;  %v8227_v22 = vpop.f32.mrb[9].mxu1  ;;  %v876_v17 = vmax.f32 %v814_v61, 0.0  ;;  %v819_v27 = vadd.f32 %v9825_v25, %v9815_v19 }
 0x10f   : > { %v8188_v23 = vpop.f32.mrb[11].mxu0  ;;  %v9820_v24 = vpop.f32.mrb[10].mxu1  ;;  %v644_v22 = vmax.f32 %v582_v63, 0.0 }
 0x110   : > { %v8228_v26 = vpop.f32.mrb[11].mxu1  ;;  %v877_v16 = vmax.f32 %v819_v27, 0.0 }
 0x111   : > { %8426 = vmatmul.mubr.msk.bf16.gmra.mrb[116].mxu0 %vm508_vm1, %v9003_v18 }
 0x112   : > { %8466 = vmatmul.mubr.msk.bf16.gmra.mrb[116].mxu1 %vm508_vm1, %v9004_v21  ;;  %8429 = vmatprep.mubr.msk.bf16.mxu0 %vm9384_vm0, %v12653_v1 }
 0x113   : > { %8469 = vmatprep.mubr.msk.bf16.mxu1 %vm9384_vm0, %v12653_v1 }
 0x114   : > { %v594_v29 = vpop.f32.mrb[12].mxu0 }
 0x115   : > { %v595_v32 = vadd.f32 %v9825_v25, %v594_v29  ;;  %v8191_v33 = vpop.f32.mrb[13].mxu0  ;;  %v826_v35 = vpop.f32.mrb[12].mxu1 }
 0x116   : > { %v597_v36 = vpop.f32.mrb[14].mxu0  ;;  %v827_v39 = vadd.f32 %v9825_v25, %v826_v35  ;;  %v8231_v40 = vpop.f32.mrb[13].mxu1  ;;  %v822_v33 = vadd.f32 %v9825_v25, %v9820_v24 }
 0x117   : > { %v647_v43 = vmax.f32 %v595_v32, 0.0  ;;  %v598_v45 = vadd.f32 %v9825_v25, %v597_v36  ;;  %v8192_v46 = vpop.f32.mrb[15].mxu0  ;;  %v829_v47 = vpop.f32.mrb[14].mxu1  ;;  %v9010_v40 = vld [vmem:[%s9532_s29 + $0x220] sm:$0xff]  }
 0x118   : > { %v879_v49 = vmax.f32 %v827_v39, 0.0  ;;  %v830_v50 = vadd.f32 %v9825_v25, %v829_v47  ;;  %v8232_v51 = vpop.f32.mrb[15].mxu1 }
 0x119   : > { %v9843_v53 = vmax.f32 %v641_v42, %v647_v43  ;;  %v648_v54 = vmax.f32 %v598_v45, 0.0  ;;  %8430 = vmatmul.mubr.msk.bf16.gmra.mrb[120].mxu0 %vm508_vm1, %v9005_v34  ;;  %v590_v34 = vadd.f32 %v9825_v25, %v9817_v20  ;;  %v645_v45 = vmax.f32 %v587_v30, 0.0 }
 0x11a   : > { %8470 = vmatmul.mubr.msk.bf16.gmra.mrb[120].mxu1 %vm508_vm1, %v9006_v37  ;;  %8433 = vmatprep.mubr.msk.bf16.mxu0 %vm9384_vm0, %v12653_v1  ;;  %v9850_v56 = vmax.f32 %v873_v38, %v879_v49  ;;  %v880_v57 = vmax.f32 %v830_v50, 0.0  ;;  %v9009_v37 = vld [vmem:[%s9532_s29 + $0x1d8] sm:$0xff]   ;;  %v878_v49 = vmax.f32 %v822_v33, 0.0 }
 0x11b   : > { %v9854_v59 = vmax.f32 %v642_v52, %v648_v54  ;;  %8473 = vmatprep.mubr.msk.bf16.mxu1 %vm9384_vm0, %v12653_v1  ;;  %v646_v52 = vmax.f32 %v590_v34, 0.0 }
 0x11c   : > { %v602_v60 = vpop.f32.mrb[16].mxu0  ;;  %v9859_v62 = vmax.f32 %v874_v48, %v880_v57 }
 0x11d   : > { %v603_v0 = vadd.f32 %v9825_v25, %v602_v60  ;;  %v8195_v2 = vpop.f32.mrb[17].mxu0  ;;  %v834_v4 = vpop.f32.mrb[16].mxu1 }
 0x11e   : > { %v605_v5 = vpop.f32.mrb[18].mxu0  ;;  %v835_v8 = vadd.f32 %v9825_v25, %v834_v4  ;;  %v8235_v9 = vpop.f32.mrb[17].mxu1 }
 0x11f   : > { %v649_v12 = vmax.f32 %v603_v0, 0.0  ;;  %v606_v13 = vadd.f32 %v9825_v25, %v605_v5  ;;  %v8196_v14 = vpop.f32.mrb[19].mxu0  ;;  %v837_v15 = vpop.f32.mrb[18].mxu1 }
 0x120   : > { %v881_v18 = vmax.f32 %v835_v8, 0.0  ;;  %v838_v10 = vadd.f32 %v9825_v25, %v837_v15  ;;  %v8236_v21 = vpop.f32.mrb[19].mxu1 }
 0x121   : > { %v9869_v23 = vmax.f32 %v643_v11, %v649_v12  ;;  %v650_v26 = vmax.f32 %v606_v13, 0.0  ;;  %8434 = vmatmul.mubr.msk.bf16.gmra.mrb[124].mxu0 %vm508_vm1, %v9007_v3  ;;  %v9011_v3 = vld [vmem:[%s9532_s29 + $0x1e0] sm:$0xff]  }
 0x122   : > { %8474 = vmatmul.mubr.msk.bf16.gmra.mrb[124].mxu1 %vm508_vm1, %v9008_v7  ;;  %8437 = vmatprep.mubr.msk.bf16.mxu0 %vm9384_vm0, %v12653_v1  ;;  %v9877_v28 = vmax.f32 %v875_v6, %v881_v18  ;;  %v882_v29 = vmax.f32 %v838_v10, 0.0  ;;  %v9012_v6 = vld [vmem:[%s9532_s29 + $0x228] sm:$0xff]  }
 0x123   : > { %v9881_v31 = vmax.f32 %v644_v22, %v650_v26  ;;  %8477 = vmatprep.mubr.msk.bf16.mxu1 %vm9384_vm0, %v12653_v1 }
 0x124   : > { %v610_v32 = vpop.f32.mrb[20].mxu0  ;;  %v9887_v19 = vmax.f32 %v876_v17, %v882_v29 }
 0x125   : > { %v611_v35 = vadd.f32 %v9825_v25, %v610_v32  ;;  %v8199_v36 = vpop.f32.mrb[21].mxu0  ;;  %v842_v38 = vpop.f32.mrb[20].mxu1 }
 0x126   : > { %v613_v39 = vpop.f32.mrb[22].mxu0  ;;  %v843_v42 = vadd.f32 %v9825_v25, %v842_v38  ;;  %v8239_v43 = vpop.f32.mrb[21].mxu1  ;;  %v9014_v36 = vld [vmem:[%s9532_s29 + $0x230] sm:$0xff]  }
 0x127   : > { %v651_v46 = vmax.f32 %v611_v35, 0.0  ;;  %v614_v24 = vadd.f32 %v9825_v25, %v613_v39  ;;  %v8200_v47 = vpop.f32.mrb[23].mxu0  ;;  %v845_v48 = vpop.f32.mrb[22].mxu1 }
 0x128   : > { %v883_v50 = vmax.f32 %v843_v42, 0.0  ;;  %v846_v20 = vadd.f32 %v9825_v25, %v845_v48  ;;  %v8240_v51 = vpop.f32.mrb[23].mxu1 }
 0x129   : > { %v9897_v54 = vmax.f32 %v645_v45, %v651_v46  ;;  %v652_v55 = vmax.f32 %v614_v24, 0.0  ;;  %8438 = vmatmul.mubr.msk.bf16.gmra.mrb[128].mxu0 %vm508_vm1, %v9009_v37 }
 0x12a   : > { %8478 = vmatmul.mubr.msk.bf16.gmra.mrb[128].mxu1 %vm508_vm1, %v9010_v40  ;;  %v9901_v57 = vmax.f32 %v877_v16, %v883_v50  ;;  %8441 = vmatprep.mubr.msk.bf16.mxu0 %vm9384_vm0, %v12653_v1  ;;  %v884_v58 = vmax.f32 %v846_v20, 0.0 }
 0x12b   : > { %v9905_v60 = vmax.f32 %v646_v52, %v652_v55  ;;  %8481 = vmatprep.mubr.msk.bf16.mxu1 %vm9384_vm0, %v12653_v1  ;;  %v9015_v52 = vld [vmem:[%s9532_s29 + $0x1f0] sm:$0xff]  }
 0x12c   : > { %v618_v61 = vpop.f32.mrb[24].mxu0  ;;  %v9909_v63 = vmax.f32 %v878_v49, %v884_v58 }
 0x12d   : > { %v619_v0 = vadd.f32 %v9825_v25, %v618_v61  ;;  %v8203_v2 = vpop.f32.mrb[25].mxu0  ;;  %v850_v4 = vpop.f32.mrb[24].mxu1 }
 0x12e   : > { %v621_v5 = vpop.f32.mrb[26].mxu0  ;;  %v851_v7 = vadd.f32 %v9825_v25, %v850_v4  ;;  %v8243_v8 = vpop.f32.mrb[25].mxu1 }
 0x12f   : > { %v653_v9 = vmax.f32 %v619_v0, 0.0  ;;  %v622_v11 = vadd.f32 %v9825_v25, %v621_v5  ;;  %v8204_v12 = vpop.f32.mrb[27].mxu0  ;;  %v853_v13 = vpop.f32.mrb[26].mxu1  ;;  %v9016_v0 = vld [vmem:[%s9532_s29 + $0x238] sm:$0xff]  }
 0x130   : > { %v885_v14 = vmax.f32 %v851_v7, 0.0  ;;  %v854_v15 = vadd.f32 %v9825_v25, %v853_v13  ;;  %v8244_v17 = vpop.f32.mrb[27].mxu1 }
 0x131   : > { %v9918_v18 = vmax.f32 %v9843_v53, %v653_v9  ;;  %v654_v10 = vmax.f32 %v622_v11, 0.0  ;;  %8442 = vmatmul.mubr.msk.bf16.gmra.mrb[132].mxu0 %vm508_vm1, %v9011_v3 }
 0x132   : > { %8482 = vmatmul.mubr.msk.bf16.gmra.mrb[132].mxu1 %vm508_vm1, %v9012_v6  ;;  %v9923_v21 = vmax.f32 %v9850_v56, %v885_v14  ;;  %v886_v22 = vmax.f32 %v854_v15, 0.0  ;;  %8445 = vmatprep.mubr.msk.bf16.mxu0 %vm9384_vm0, %v12653_v1  ;;  %v9013_v56 = vld [vmem:[%s9532_s29 + $0x1e8] sm:$0xff]  }
 0x133   : > { %v9928_v26 = vmax.f32 %v9854_v59, %v654_v10  ;;  %8485 = vmatprep.mubr.msk.bf16.mxu1 %vm9384_vm0, %v12653_v1  ;;  %v9017_v10 = vld [vmem:[%s9532_s29 + $0x240] sm:$0xff]  }
 0x134   : > { %v626_v53 = vpop.f32.mrb[28].mxu0  ;;  %v9933_v27 = vmax.f32 %v9859_v62, %v886_v22 }
 0x135   : > { %v627_v29 = vadd.f32 %v9825_v25, %v626_v53  ;;  %v8207_v30 = vpop.f32.mrb[29].mxu0  ;;  %v858_v32 = vpop.f32.mrb[28].mxu1  ;;  %v9018_v53 = vld [vmem:[%s9532_s29 + $0x288] sm:$0xff]  }
 0x136   : > { %v629_v33 = vpop.f32.mrb[30].mxu0  ;;  %v859_v34 = vadd.f32 %v9825_v25, %v858_v32  ;;  %v8247_v35 = vpop.f32.mrb[29].mxu1 }
 0x137   : > { %v655_v37 = vmax.f32 %v627_v29, 0.0  ;;  %v630_v59 = vadd.f32 %v9825_v25, %v629_v33  ;;  %v8208_v38 = vpop.f32.mrb[31].mxu0  ;;  %v861_v16 = vpop.f32.mrb[30].mxu1 }
 0x138   : > { %v887_v39 = vmax.f32 %v859_v34, 0.0  ;;  %v862_v40 = vadd.f32 %v9825_v25, %v861_v16  ;;  %v8248_v62 = vpop.f32.mrb[31].mxu1  ;;  %v9020_v34 = vld [vmem:[%s9532_s29 + $0x248] sm:$0xff]  }
 0x139   : > { %v667_v42 = vmax.f32 %v9869_v23, %v655_v37  ;;  %v656_v43 = vmax.f32 %v630_v59, 0.0  ;;  %8446 = vmatmul.mubr.msk.bf16.gmra.mrb[136].mxu0 %vm508_vm1, %v9013_v56  ;;  %v9019_v37 = vld [vmem:[%s9532_s29 + $0x290] sm:$0xff]  }
 0x13a   : > { %v899_v45 = vmax.f32 %v9877_v28, %v887_v39  ;;  %8486 = vmatmul.mubr.msk.bf16.gmra.mrb[136].mxu1 %vm508_vm1, %v9014_v36  ;;  %v888_v46 = vmax.f32 %v862_v40, 0.0  ;;  %8449 = vmatprep.mubr.msk.bf16.mxu0 %vm9384_vm0, %v12653_v1 }
 0x13b   : > { %v671_v24 = vmax.f32 %v9918_v18, %v667_v42  ;;  %v668_v47 = vmax.f32 %v9881_v31, %v656_v43  ;;  %8489 = vmatprep.mubr.msk.bf16.mxu1 %vm9384_vm0, %v12653_v1 }
 0x13c   : > { %v903_v23 = vmax.f32 %v9923_v21, %v899_v45  ;;  %v900_v48 = vmax.f32 %v9887_v19, %v888_v46  ;;  %v634_v49 = vpop.f32.mrb[32].mxu0 }
 0x13d   : > { %v672_v28 = vmax.f32 %v9928_v26, %v668_v47  ;;  %v635_v50 = vadd.f32 %v9825_v25, %v634_v49  ;;  %v866_v20 = vpop.f32.mrb[32].mxu1  ;;  %v8211_v51 = vpop.f32.mrb[33].mxu0 }
 0x13e   : > { %v904_v55 = vmax.f32 %v9933_v27, %v900_v48  ;;  %v867_v58 = vadd.f32 %v9825_v25, %v866_v20  ;;  %v8251_v31 = vpop.f32.mrb[33].mxu1  ;;  %v637_v61 = vpop.f32.mrb[34].mxu0 }
 0x13f   : > { %v657_v2 = vmax.f32 %v635_v50, 0.0  ;;  %v638_v3 = vadd.f32 %v9825_v25, %v637_v61  ;;  %v869_v4 = vpop.f32.mrb[34].mxu1  ;;  %v8212_v19 = vpop.f32.mrb[35].mxu0 }
 0x140   : > { %v889_v5 = vmax.f32 %v867_v58, 0.0  ;;  %v870_v6 = vadd.f32 %v9825_v25, %v869_v4  ;;  %v8252_v7 = vpop.f32.mrb[35].mxu1  ;;  %v9023_v19 = vld [vmem:[%s9532_s29 + $0x258] sm:$0xff]  }
 0x141   : > { %v669_v8 = vmax.f32 %v9897_v54, %v657_v2  ;;  %v658_v9 = vmax.f32 %v638_v3, 0.0  ;;  %8450 = vmatmul.mubr.msk.bf16.gmra.mrb[140].mxu0 %vm508_vm1, %v9015_v52  ;;  %v9024_v7 = vld [vmem:[%s9532_s29 + $0x2a0] sm:$0xff]  }
 0x142   : > { %v901_v11 = vmax.f32 %v9901_v57, %v889_v5  ;;  %v890_v12 = vmax.f32 %v870_v6, 0.0  ;;  %8490 = vmatmul.mubr.msk.bf16.gmra.mrb[140].mxu1 %vm508_vm1, %v9016_v0  ;;  %8497 = vmatprep.mubr.msk.bf16.mxu0 %vm9384_vm0, %v12653_v1 }
 0x143   : > { %v673_v13 = vmax.f32 %v671_v24, %v669_v8  ;;  %v670_v14 = vmax.f32 %v9905_v60, %v658_v9  ;;  %8537 = vmatprep.mubr.msk.bf16.mxu1 %vm9384_vm0, %v12653_v1 }
 0x144   : > { %v905_v15 = vmax.f32 %v903_v23, %v901_v11  ;;  %v902_v54 = vmax.f32 %v9909_v63, %v890_v12  ;;  %v9971_v17 = vpop.f32.mrb[36].mxu0  ;;  %v9021_v23 = vld [vmem:[%s9532_s29 + $0x250] sm:$0xff]  }
 0x145   : > { %v674_v18 = vmax.f32 %v672_v28, %v670_v14  ;;  %v8259_v57 = vpop.f32.mrb[37].mxu0  ;;  %v9974_v21 = vpop.f32.mrb[36].mxu1  ;;  %v9022_v28 = vld [vmem:[%s9532_s29 + $0x298] sm:$0xff]   ;;  %v1034_v31 = vadd.f32 %v9825_v25, %v9971_v17 }
 0x146   : > { %v906_v22 = vmax.f32 %v904_v55, %v902_v54  ;;  %v9976_v26 = vpop.f32.mrb[38].mxu0  ;;  %v8299_v27 = vpop.f32.mrb[37].mxu1  ;;  %v1265_v58 = vadd.f32 %v9825_v25, %v9974_v21 }
 0x147   : > { %v675_v60 = vpack.c.bf16 %v674_v18, %v673_v13  ;;  %v8260_v29 = vpop.f32.mrb[39].mxu0  ;;  %v1267_v30 = vpop.f32.mrb[38].mxu1  ;;  %v1037_v2 = vadd.f32 %v9825_v25, %v9976_v26  ;;  %v1104_v12 = vmax.f32 %v1034_v31, 0.0 }
 0x148   : > { %v907_v32 = vpack.c.bf16 %v906_v22, %v905_v15  ;;  %v8300_v56 = vpop.f32.mrb[39].mxu1  ;;  %v1268_v0 = vadd.f32 %v9825_v25, %v1267_v30  ;;  %v1335_v8 = vmax.f32 %v1265_v58, 0.0 }
 0x149   : > { %677 = vst.msk [vmem:[#allocation2] sm:$0xff] %vm676_vm2, %v675_v60  ;;  %8498 = vmatmul.mubr.msk.bf16.vlgmr.msra.gmra.mrb[144].mxu0 %vm508_vm1, %v9017_v10  ;;  %v1105_v21 = vmax.f32 %v1037_v2, 0.0 }
 0x14a   : > { %908 = vst.msk [vmem:[#allocation2 + $0x8] sm:$0xff] %vm676_vm2, %v907_v32  ;;  %8538 = vmatmul.mubr.msk.bf16.vlgmr.msra.gmra.mrb[144].mxu1 %vm508_vm1, %v9018_v53  ;;  %8574 = vmatpush3.bf16.msra.mxu0 %v9701_v41  ;;  %v1336_v17 = vmax.f32 %v1268_v0, 0.0 }
 0x14b   : > { %8501 = vmatprep.mubr.msk.bf16.mxu0 %vm9384_vm0, %v12653_v1  ;;  %8541 = vmatprep.mubr.msk.bf16.mxu1 %vm9384_vm0, %v12653_v1 }
 0x14c   : > { %v9988_v63 = vpop.f32.mrb[40].mxu0  ;;  %8575 = vmatprep.subr.bf16.mxu0 %v12653_v1  ;;  %8614 = vmatpush3.bf16.msra.mxu1 %v9701_v41 }
 0x14d   : > { %v8263_v33 = vpop.f32.mrb[41].mxu0  ;;  %v9993_v35 = vpop.f32.mrb[40].mxu1  ;;  %8615 = vmatprep.subr.bf16.mxu1 %v12653_v1  ;;  %v1042_v29 = vadd.f32 %v9825_v25, %v9988_v63 }
 0x14e   : > { %v9996_v36 = vpop.f32.mrb[42].mxu0  ;;  %v8303_v59 = vpop.f32.mrb[41].mxu1  ;;  %8576 = vmatpush3.bf16.msra.mxu0 %v9716_v44  ;;  %v1273_v53 = vadd.f32 %v9825_v25, %v9993_v35 }
 0x14f   : > { %v8264_v38 = vpop.f32.mrb[43].mxu0  ;;  %v10000_v16 = vpop.f32.mrb[42].mxu1  ;;  %8653 = vmatprep.subr.bf16.mxu0 %v12653_v1  ;;  %v9025_v59 = vld [vmem:[%s9532_s29 + $0x260] sm:$0xff]  }
 0x150   : > { %v3991_v39 = vld [vmem:[#allocation2] sm:$0xff]  ;;  %v8304_v40 = vpop.f32.mrb[43].mxu1  ;;  %8616 = vmatpush3.bf16.msra.mxu1 %v9716_v44  ;;  %v1276_v56 = vadd.f32 %v9825_v25, %v10000_v16 }
 0x151   : > { %v10004_v41 = vld [vmem:[#allocation2 + $0x8] sm:$0xff]  ;;  %8502 = vmatmul.mubr.msk.bf16.gmra.mrb[148].mxu0 %vm508_vm1, %v9020_v34  ;;  %v4006_v62 = vshll.u32 %v3991_v39, 16  ;;  %8693 = vmatprep.subr.bf16.mxu1 %v12653_v1  ;;  %v4004_v44 = vshrl.u32 %v3991_v39, 16  ;;  %v1045_v34 = vadd.f32 %v9825_v25, %v9996_v36  ;;  %v1337_v39 = vmax.f32 %v1273_v53, 0.0 }
 0x152   : > { %8542 = vmatmul.mubr.msk.bf16.gmra.mrb[148].mxu1 %vm508_vm1, %v9019_v37  ;;  %4050 = vrot.lane.b32.xlu0 %v10004_v41, %s12670_s26  ;;  %v4011_v42 = vshll.u32 %v10004_v41, 16  ;;  %v9026_v40 = vld [vmem:[%s9532_s29 + $0x2a8] sm:$0xff]  }
 0x153   : > { %8505 = vmatprep.mubr.msk.bf16.mxu0 %vm9384_vm0, %v12653_v1  ;;  %8545 = vmatprep.mubr.msk.bf16.mxu1 %vm9384_vm0, %v12653_v1  ;;  %v4008_v43 = vrot.slane %v4006_v62, 1 }
 0x154   : > { %v10016_v45 = vpop.f32.mrb[44].mxu0  ;;  %v10018_v47 = vrot.slane %v4011_v42, 1 }
 0x155   : > { %v8267_v46 = vpop.f32.mrb[45].mxu0  ;;  %v4009_v24 = vor.u32 %v4008_v43, %v4004_v44  ;;  %v10021_v48 = vpop.f32.mrb[44].mxu1  ;;  %v1106_v44 = vmax.f32 %v1042_v29, 0.0  ;;  %v1050_v0 = vadd.f32 %v9825_v25, %v10016_v45 }
 0x156   : > { %v10023_v49 = vpop.f32.mrb[46].mxu0  ;;  %v8307_v50 = vpop.f32.mrb[45].mxu1  ;;  %v1281_v58 = vadd.f32 %v9825_v25, %v10021_v48 }
 0x157   : > { %v8268_v20 = vpop.f32.mrb[47].mxu0  ;;  %v4014_v51 = vsel %vm4002_vm3, %v4009_v24, %v10018_v47  ;;  %v10028_v52 = vpop.f32.mrb[46].mxu1 }
 0x158   : > { %4031 = vrot.lane.b32.xlu0 %v4014_v51, %s12670_s26  ;;  %v8308_v55 = vpop.f32.mrb[47].mxu1  ;;  %v1107_v20 = vmax.f32 %v1045_v34, 0.0  ;;  %v1339_v45 = vmax.f32 %v1281_v58, 0.0 }
 0x159   : > { %8506 = vmatmul.mubr.msk.bf16.gmra.mrb[152].mxu0 %vm508_vm1, %v9021_v23  ;;  %v1338_v23 = vmax.f32 %v1276_v56, 0.0 }
 0x15a   : > { %8546 = vmatmul.mubr.msk.bf16.gmra.mrb[152].mxu1 %vm508_vm1, %v9022_v28  ;;  %8509 = vmatprep.mubr.msk.bf16.mxu0 %vm9384_vm0, %v12653_v1 }
 0x15b   : > { %8549 = vmatprep.mubr.msk.bf16.mxu1 %vm9384_vm0, %v12653_v1 }
 0x15c   : > { %v1057_v61 = vpop.f32.mrb[48].mxu0 }
 0x15d   : > { %v1058_v3 = vadd.f32 %v9825_v25, %v1057_v61  ;;  %v8271_v4 = vpop.f32.mrb[49].mxu0  ;;  %v1288_v5 = vpop.f32.mrb[48].mxu1 }
 0x15e   : > { %v1060_v6 = vpop.f32.mrb[50].mxu0  ;;  %v1289_v9 = vadd.f32 %v9825_v25, %v1288_v5  ;;  %v8311_v11 = vpop.f32.mrb[49].mxu1  ;;  %v1284_v4 = vadd.f32 %v9825_v25, %v10028_v52 }
 0x15f   : > { %v1110_v13 = vmax.f32 %v1058_v3, 0.0  ;;  %v1061_v14 = vadd.f32 %v9825_v25, %v1060_v6  ;;  %v8272_v15 = vpop.f32.mrb[51].mxu0  ;;  %v1291_v54 = vpop.f32.mrb[50].mxu1  ;;  %v9028_v11 = vld [vmem:[%s9532_s29 + $0x2b0] sm:$0xff]  }
 0x160   : > { %v1341_v18 = vmax.f32 %v1289_v9, 0.0  ;;  %v1292_v57 = vadd.f32 %v9825_v25, %v1291_v54  ;;  %v8312_v10 = vpop.f32.mrb[51].mxu1 }
 0x161   : > { %v10050_v22 = vmax.f32 %v1104_v12, %v1110_v13  ;;  %v1111_v26 = vmax.f32 %v1061_v14, 0.0  ;;  %8510 = vmatmul.mubr.msk.bf16.gmra.mrb[156].mxu0 %vm508_vm1, %v9023_v19  ;;  %v1053_v19 = vadd.f32 %v9825_v25, %v10023_v49  ;;  %v1108_v14 = vmax.f32 %v1050_v0, 0.0 }
 0x162   : > { %8550 = vmatmul.mubr.msk.bf16.gmra.mrb[156].mxu1 %vm508_vm1, %v9024_v7  ;;  %8513 = vmatprep.mubr.msk.bf16.mxu0 %vm9384_vm0, %v12653_v1  ;;  %v10058_v27 = vmax.f32 %v1335_v8, %v1341_v18  ;;  %v1342_v60 = vmax.f32 %v1292_v57, 0.0  ;;  %v9027_v7 = vld [vmem:[%s9532_s29 + $0x268] sm:$0xff]   ;;  %v1340_v18 = vmax.f32 %v1284_v4, 0.0 }
 0x163   : > { %v10062_v30 = vmax.f32 %v1105_v21, %v1111_v26  ;;  %8553 = vmatprep.mubr.msk.bf16.mxu1 %vm9384_vm0, %v12653_v1  ;;  %v1109_v21 = vmax.f32 %v1053_v19, 0.0 }
 0x164   : > { %v1065_v32 = vpop.f32.mrb[52].mxu0  ;;  %v10068_v33 = vmax.f32 %v1336_v17, %v1342_v60 }
 0x165   : > { %v1066_v35 = vadd.f32 %v9825_v25, %v1065_v32  ;;  %v8275_v37 = vpop.f32.mrb[53].mxu0  ;;  %v1296_v38 = vpop.f32.mrb[52].mxu1 }
 0x166   : > { %v1068_v63 = vpop.f32.mrb[54].mxu0  ;;  %v1297_v62 = vadd.f32 %v9825_v25, %v1296_v38  ;;  %v8315_v42 = vpop.f32.mrb[53].mxu1 }
 0x167   : > { %v1112_v43 = vmax.f32 %v1066_v35, 0.0  ;;  %v1069_v16 = vadd.f32 %v9825_v25, %v1068_v63  ;;  %v8276_v46 = vpop.f32.mrb[55].mxu0  ;;  %v1299_v24 = vpop.f32.mrb[54].mxu1 }
 0x168   : > { %v1343_v28 = vmax.f32 %v1297_v62, 0.0  ;;  %v1300_v36 = vadd.f32 %v9825_v25, %v1299_v24  ;;  %v8316_v50 = vpop.f32.mrb[55].mxu1 }
 0x169   : > { %v10078_v51 = vmax.f32 %v1106_v44, %v1112_v43  ;;  %v1113_v55 = vmax.f32 %v1069_v16, 0.0  ;;  %8514 = vmatmul.mubr.msk.bf16.gmra.mrb[160].mxu0 %vm508_vm1, %v9025_v59  ;;  %v9029_v59 = vld [vmem:[%s9532_s29 + $0x270] sm:$0xff]  }
 0x16a   : > { %8554 = vmatmul.mubr.msk.bf16.gmra.mrb[160].mxu1 %vm508_vm1, %v9026_v40  ;;  %8517 = vmatprep.mubr.msk.bf16.mxu0 %vm9384_vm0, %v12653_v1  ;;  %v10086_v31 = vmax.f32 %v1337_v39, %v1343_v28  ;;  %v1344_v61 = vmax.f32 %v1300_v36, 0.0  ;;  %v9030_v39 = vld [vmem:[%s9532_s29 + $0x2b8] sm:$0xff]  }
 0x16b   : > { %v10090_v2 = vmax.f32 %v1107_v20, %v1113_v55  ;;  %8557 = vmatprep.mubr.msk.bf16.mxu1 %vm9384_vm0, %v12653_v1 }
 0x16c   : > { %v1073_v3 = vpop.f32.mrb[56].mxu0  ;;  %v10096_v48 = vmax.f32 %v1338_v23, %v1344_v61 }
 0x16d   : > { %v1074_v5 = vadd.f32 %v9825_v25, %v1073_v3  ;;  %v8279_v6 = vpop.f32.mrb[57].mxu0  ;;  %v1304_v8 = vpop.f32.mrb[56].mxu1 }
 0x16e   : > { %v1076_v9 = vpop.f32.mrb[58].mxu0  ;;  %v1305_v12 = vadd.f32 %v9825_v25, %v1304_v8  ;;  %v8319_v13 = vpop.f32.mrb[57].mxu1  ;;  %v9032_v6 = vld [vmem:[%s9532_s29 + $0x2c0] sm:$0xff]  }
 0x16f   : > { %v1114_v15 = vmax.f32 %v1074_v5, 0.0  ;;  %v1077_v52 = vadd.f32 %v9825_v25, %v1076_v9  ;;  %v8280_v54 = vpop.f32.mrb[59].mxu0  ;;  %v1307_v17 = vpop.f32.mrb[58].mxu1 }
 0x170   : > { %v1345_v57 = vmax.f32 %v1305_v12, 0.0  ;;  %v1308_v49 = vadd.f32 %v9825_v25, %v1307_v17  ;;  %v8320_v10 = vpop.f32.mrb[59].mxu1 }
 0x171   : > { %v10106_v26 = vmax.f32 %v1108_v14, %v1114_v15  ;;  %v1115_v53 = vmax.f32 %v1077_v52, 0.0  ;;  %8518 = vmatmul.mubr.msk.bf16.gmra.mrb[164].mxu0 %vm508_vm1, %v9027_v7 }
 0x172   : > { %8558 = vmatmul.mubr.msk.bf16.gmra.mrb[164].mxu1 %vm508_vm1, %v9028_v11  ;;  %v10110_v60 = vmax.f32 %v1339_v45, %v1345_v57  ;;  %8521 = vmatprep.mubr.msk.bf16.mxu0 %vm9384_vm0, %v12653_v1  ;;  %v1346_v29 = vmax.f32 %v1308_v49, 0.0 }
 0x173   : > { %v10114_v32 = vmax.f32 %v1109_v21, %v1115_v53  ;;  %8561 = vmatprep.mubr.msk.bf16.mxu1 %vm9384_vm0, %v12653_v1  ;;  %v9033_v21 = vld [vmem:[%s9532_s29 + $0x280] sm:$0xff]  }
 0x174   : > { %v1081_v56 = vpop.f32.mrb[60].mxu0  ;;  %v10118_v34 = vmax.f32 %v1340_v18, %v1346_v29 }
 0x175   : > { %v1082_v35 = vadd.f32 %v9825_v25, %v1081_v56  ;;  %v8283_v37 = vpop.f32.mrb[61].mxu0  ;;  %v1312_v38 = vpop.f32.mrb[60].mxu1 }
 0x176   : > { %v1084_v63 = vpop.f32.mrb[62].mxu0  ;;  %v1313_v40 = vadd.f32 %v9825_v25, %v1312_v38  ;;  %v8323_v62 = vpop.f32.mrb[61].mxu1 }
 0x177   : > { %v1116_v42 = vmax.f32 %v1082_v35, 0.0  ;;  %v1085_v44 = vadd.f32 %v9825_v25, %v1084_v63  ;;  %v8284_v43 = vpop.f32.mrb[63].mxu0  ;;  %v1315_v16 = vpop.f32.mrb[62].mxu1  ;;  %v9034_v35 = vld [vmem:[%s9532_s29 + $0x2c8] sm:$0xff]  }
 0x178   : > { %v1347_v46 = vmax.f32 %v1313_v40, 0.0  ;;  %v1316_v24 = vadd.f32 %v9825_v25, %v1315_v16  ;;  %v8324_v23 = vpop.f32.mrb[63].mxu1 }
 0x179   : > { %v10127_v28 = vmax.f32 %v10050_v22, %v1116_v42  ;;  %v1117_v36 = vmax.f32 %v1085_v44, 0.0  ;;  %8522 = vmatmul.mubr.msk.bf16.gmra.mrb[168].mxu0 %vm508_vm1, %v9029_v59 }
 0x17a   : > { %8562 = vmatmul.mubr.msk.bf16.gmra.mrb[168].mxu1 %vm508_vm1, %v9030_v39  ;;  %v10132_v50 = vmax.f32 %v10058_v27, %v1347_v46  ;;  %v1348_v20 = vmax.f32 %v1316_v24, 0.0  ;;  %8525 = vmatprep.mubr.msk.bf16.mxu0 %vm9384_vm0, %v12653_v1  ;;  %v9031_v27 = vld [vmem:[%s9532_s29 + $0x278] sm:$0xff]  }
 0x17b   : > { %v10137_v55 = vmax.f32 %v10062_v30, %v1117_v36  ;;  %8565 = vmatprep.mubr.msk.bf16.mxu1 %vm9384_vm0, %v12653_v1 }
 0x17c   : > { %v1089_v22 = vpop.f32.mrb[64].mxu0  ;;  %v10142_v58 = vmax.f32 %v10068_v33, %v1348_v20 }
 0x17d   : > { %v1090_v61 = vadd.f32 %v9825_v25, %v1089_v22  ;;  %v8287_v0 = vpop.f32.mrb[65].mxu0  ;;  %v1320_v3 = vpop.f32.mrb[64].mxu1 }
 0x17e   : > { %v1092_v4 = vpop.f32.mrb[66].mxu0  ;;  %v1321_v19 = vadd.f32 %v9825_v25, %v1320_v3  ;;  %v8327_v5 = vpop.f32.mrb[65].mxu1 }
 0x17f   : > { %v1118_v7 = vmax.f32 %v1090_v61, 0.0  ;;  %v1093_v30 = vadd.f32 %v9825_v25, %v1092_v4  ;;  %v8288_v8 = vpop.f32.mrb[67].mxu0  ;;  %v1323_v45 = vpop.f32.mrb[66].mxu1 }
 0x180   : > { %v1349_v9 = vmax.f32 %v1321_v19, 0.0  ;;  %v1324_v11 = vadd.f32 %v9825_v25, %v1323_v45  ;;  %v8328_v33 = vpop.f32.mrb[67].mxu1  ;;  %v9037_v19 = vld [vmem:[%s9532_s29 + $0x2d8] sm:$0xff]   ;;  %v10218_v8 = vld [vmem:[%s12682_s1 + $0x8] sm:$0xff]  }
 0x181   : > { %v1130_v12 = vmax.f32 %v10078_v51, %v1118_v7  ;;  %v1119_v13 = vmax.f32 %v1093_v30, 0.0  ;;  %8526 = vmatmul.mubr.msk.bf16.gmra.mrb[172].mxu0 %vm508_vm1, %v9031_v27  ;;  %v9038_v7 = vld [vmem:[%s9532_s29 + $0x320] sm:$0xff]  }
 0x182   : > { %v1361_v14 = vmax.f32 %v10086_v31, %v1349_v9  ;;  %8566 = vmatmul.mubr.msk.bf16.gmra.mrb[172].mxu1 %vm508_vm1, %v9032_v6  ;;  %v1350_v15 = vmax.f32 %v1324_v11, 0.0  ;;  %8529 = vmatprep.mubr.msk.bf16.mxu0 %vm9384_vm0, %v12653_v1  ;;  %v4015_v9 = vshrl.u32 %v10004_v41, 16 }
 0x183   : > { %v1134_v52 = vmax.f32 %v10127_v28, %v1130_v12  ;;  %v1131_v54 = vmax.f32 %v10090_v2, %v1119_v13  ;;  %8569 = vmatprep.mubr.msk.bf16.mxu1 %vm9384_vm0, %v12653_v1  ;;  %v9035_v28 = vld [vmem:[%s9532_s29 + $0x2d0] sm:$0xff]   ;;  %v10229_v13 = vld [vmem:[%s12643_s3 + $0x40] sm:$0xff]  }
 0x184   : > { %v1365_v51 = vmax.f32 %v10132_v50, %v1361_v14  ;;  %v1362_v17 = vmax.f32 %v10096_v48, %v1350_v15  ;;  %v1097_v18 = vpop.f32.mrb[68].mxu0 }
 0x185   : > { %v1135_v31 = vmax.f32 %v10137_v55, %v1131_v54  ;;  %v1098_v57 = vadd.f32 %v9825_v25, %v1097_v18  ;;  %v1328_v49 = vpop.f32.mrb[68].mxu1  ;;  %v8291_v10 = vpop.f32.mrb[69].mxu0  ;;  %v9036_v55 = vld [vmem:[%s9532_s29 + $0x318] sm:$0xff]  }
 0x186   : > { %v1366_v53 = vmax.f32 %v10142_v58, %v1362_v17  ;;  %v1329_v29 = vadd.f32 %v9825_v25, %v1328_v49  ;;  %v8331_v2 = vpop.f32.mrb[69].mxu1  ;;  %v1100_v56 = vpop.f32.mrb[70].mxu0 }
 0x187   : > { %v1120_v37 = vmax.f32 %v1098_v57, 0.0  ;;  %v1101_v59 = vadd.f32 %v9825_v25, %v1100_v56  ;;  %v1331_v38 = vpop.f32.mrb[70].mxu1  ;;  %v8292_v48 = vpop.f32.mrb[71].mxu0  ;;  %v9040_v56 = vld [vmem:[%s9532_s29 + $0x328] sm:$0xff]  }
 0x188   : > { %v1351_v63 = vmax.f32 %v1329_v29, 0.0  ;;  %v1332_v39 = vadd.f32 %v9825_v25, %v1331_v38  ;;  %v8332_v40 = vpop.f32.mrb[71].mxu1 }
 0x189   : > { %v1132_v62 = vmax.f32 %v10106_v26, %v1120_v37  ;;  %v1121_v42 = vmax.f32 %v1101_v59, 0.0  ;;  %8530 = vmatmul.mubr.msk.bf16.gmra.mrb[176].mxu0 %vm508_vm1, %v9033_v21 }
 0x18a   : > { %v1363_v44 = vmax.f32 %v10110_v60, %v1351_v63  ;;  %v1352_v43 = vmax.f32 %v1332_v39, 0.0  ;;  %8570 = vmatmul.mubr.msk.bf16.gmra.mrb[176].mxu1 %vm508_vm1, %v9034_v35  ;;  %8577 = vmatprep.mubr.msk.bf16.mxu0 %vm9384_vm0, %v12653_v1  ;;  %v3998_v63 = vld [vmem:[#allocation2 + $0x8] sm:$0xfe] }
 0x18b   : > { %v1136_v16 = vmax.f32 %v1134_v52, %v1132_v62  ;;  %v1133_v46 = vmax.f32 %v10114_v32, %v1121_v42  ;;  %8617 = vmatprep.mubr.msk.bf16.mxu1 %vm9384_vm0, %v12653_v1  ;;  %v10277_v42 = vld [vmem:[%s12684_s2] ss:$0 sm:$0xff] }
 0x18c   : > { %v1367_v25 = vmax.f32 %v1365_v51, %v1363_v44  ;;  %v1364_v26 = vmax.f32 %v10118_v34, %v1352_v43  ;;  %v10180_v24 = vpop.f32.mrb[72].mxu0  ;;  %v10197_v34 = vld [vmem:[%s12682_s1] sm:$0xff]   ;;  %v4017_v51 = vor.u32 %v4015_v9, %v10018_v47 }
 0x18d   : > { %v1137_v23 = vmax.f32 %v1135_v31, %v1133_v46  ;;  %v8339_v60 = vpop.f32.mrb[73].mxu0  ;;  %v10183_v36 = vpop.f32.mrb[72].mxu1  ;;  %v9039_v47 = vld [vmem:[%s9532_s29 + $0x2e0] sm:$0xff]   ;;  %v4071_v46 = vrot.slane %v3998_v63, 1 }
 0x18e   : > { %v1368_v50 = vmax.f32 %v1366_v53, %v1364_v26  ;;  %v10185_v20 = vpop.f32.mrb[74].mxu0  ;;  %v8379_v22 = vpop.f32.mrb[73].mxu1  ;;  %v1727_v44 = vadd.f32 %v10277_v42, %v10183_v36  ;;  %v9041_v36 = vld [vmem:[%s9532_s29 + $0x2e8] sm:$0xff]  }
 0x18f   : > { %v1138_v58 = vpack.c.bf16 %v1137_v23, %v1136_v16  ;;  %v8340_v32 = vpop.f32.mrb[75].mxu0  ;;  %v10188_v61 = vpop.f32.mrb[74].mxu1  ;;  %v1496_v16 = vadd.f32 %v10277_v42, %v10180_v24  ;;  %v1499_v23 = vadd.f32 %v10277_v42, %v10185_v20 }
 0x190   : > { %v1369_v0 = vpack.c.bf16 %v1368_v50, %v1367_v25  ;;  %v8380_v3 = vpop.f32.mrb[75].mxu1  ;;  %v1730_v26 = vadd.f32 %v10277_v42, %v10188_v61  ;;  %v1797_v32 = vmax.f32 %v1727_v44, 0.0 }
 0x191   : > { %1139 = vst.msk [vmem:[#allocation2 + $0x10] sm:$0xff] %vm676_vm2, %v1138_v58  ;;  %8578 = vmatmul.mubr.msk.bf16.vlgmr.msra.gmra.mrb[180].mxu0 %vm508_vm1, %v9035_v28  ;;  %v9042_v58 = vld [vmem:[%s9532_s29 + $0x330] sm:$0xff]   ;;  %v1566_v20 = vmax.f32 %v1496_v16, 0.0 }
 0x192   : > { %1370 = vst.msk [vmem:[#allocation2 + $0x18] sm:$0xff] %vm676_vm2, %v1369_v0  ;;  %8618 = vmatmul.mubr.msk.bf16.vlgmr.msra.gmra.mrb[180].mxu1 %vm508_vm1, %v9036_v55  ;;  %8654 = vmatpush3.bf16.msra.mxu0 %v10197_v34 }
 0x193   : > { %8581 = vmatprep.mubr.msk.bf16.mxu0 %vm9384_vm0, %v12653_v1  ;;  %8621 = vmatprep.mubr.msk.bf16.mxu1 %vm9384_vm0, %v12653_v1 }
 0x194   : > { %v10204_v27 = vpop.f32.mrb[76].mxu0  ;;  %8655 = vmatprep.subr.bf16.mxu0 %v12653_v1  ;;  %8694 = vmatpush3.bf16.msra.mxu1 %v10197_v34 }
 0x195   : > { %v8343_v4 = vpop.f32.mrb[77].mxu0  ;;  %v10209_v5 = vpop.f32.mrb[76].mxu1  ;;  %8695 = vmatprep.subr.bf16.mxu1 %v12653_v1 }
 0x196   : > { %v10212_v6 = vpop.f32.mrb[78].mxu0  ;;  %v8383_v30 = vpop.f32.mrb[77].mxu1  ;;  %8656 = vmatpush3.bf16.msra.mxu0 %v10218_v8 }
 0x197   : > { %v8344_v45 = vpop.f32.mrb[79].mxu0  ;;  %v10222_v11 = vpop.f32.mrb[78].mxu1  ;;  %8733 = vmatprep.subr.bf16.mxu0 %v12653_v1  ;;  %v1798_v30 = vmax.f32 %v1730_v26, 0.0 }
 0x198   : > { %v3993_v33 = vld [vmem:[#allocation2 + $0x10] sm:$0xff]  ;;  %v8384_v12 = vpop.f32.mrb[79].mxu1  ;;  %8696 = vmatpush3.bf16.msra.mxu1 %v10218_v8 }
 0x199   : > { %8582 = vmatmul.mubr.msk.bf16.gmra.mrb[184].mxu0 %vm508_vm1, %v9037_v19  ;;  %v10232_v14 = vld [vmem:[#allocation2 + $0x18] sm:$0xff]  ;;  %4052 = vrot.lane.b32.xlu1 %v3993_v33, %s12670_s26  ;;  %v4019_v41 = vshll.u32 %v3993_v33, 16  ;;  %v4023_v18 = vshrl.u32 %v3993_v33, 16  ;;  %v10260_v35 = vrot.slane %v3993_v33, 1  ;;  %v1567_v12 = vmax.f32 %v1499_v23, 0.0 }
 0x19a   : > { %v3994_v15 = vld [vmem:[#allocation2 + $0x18] sm:$0x1]  ;;  %8622 = vmatmul.mubr.msk.bf16.gmra.mrb[184].mxu1 %vm508_vm1, %v9038_v7  ;;  %4054 = vrot.lane.b32.xlu0 %v10232_v14, %s12670_s26  ;;  %v4057_v52 = vshll.u32 %v10232_v14, 16  ;;  %v10300_v50 = vrot.slane %v10232_v14, 1 }
 0x19b   : > { %v4027_v54 = vshll.u32 %v3994_v15, 16  ;;  %v4021_v17 = vrot.slane %v4019_v41, 1  ;;  %8585 = vmatprep.mubr.msk.bf16.mxu0 %vm9384_vm0, %v12653_v1  ;;  %8625 = vmatprep.mubr.msk.bf16.mxu1 %vm9384_vm0, %v12653_v1  ;;  %v4047_v40 = vrot.slane %v3994_v15, 1  ;;  %v4072_v24 = vsel %vm4041_vm4, %v4071_v46, %v10260_v35 }
 0x19c   : > { %v10244_v31 = vpop.f32.mrb[80].mxu0  ;;  %7723 = vmatprep.subr.bf16.mxu1 %v10229_v13  ;;  %v10250_v21 = vrot.slane %v4057_v52, 1  ;;  %v4074_v52 = vsel %vm4041_vm4, %v10260_v35, %v10300_v50 }
 0x19d   : > { %v8347_v57 = vpop.f32.mrb[81].mxu0  ;;  %v10248_v49 = vsel %vm4002_vm3, %v4017_v51, %v4021_v17  ;;  %v4025_v10 = vor.u32 %v4023_v18, %v4021_v17  ;;  %v4029_v53 = vrot.slane %v4027_v54, 1  ;;  %v10253_v29 = vpop.f32.mrb[80].mxu1  ;;  %v10283_v43 = vsel %vm4041_vm4, %v10260_v35, %v4047_v40  ;;  %v9044_v40 = vld [vmem:[%s9532_s29 + $0x338] sm:$0xff]  }
 0x19e   : > { %4033 = vrot.lane.b32.xlu1 %v10248_v49, %s12670_s26  ;;  %v10257_v2 = vpop.f32.mrb[82].mxu0  ;;  %v8387_v37 = vpop.f32.mrb[81].mxu1  ;;  %v1735_v54 = vadd.f32 %v10277_v42, %v10209_v5  ;;  %v1504_v18 = vadd.f32 %v10277_v42, %v10204_v27 }
 0x19f   : > { %v8348_v59 = vpop.f32.mrb[83].mxu0  ;;  %v10264_v38 = vsel %vm4002_vm3, %v4025_v10, %v10250_v21  ;;  %v10266_v48 = vpop.f32.mrb[82].mxu1  ;;  %v4030_v62 = vsel %vm4002_vm3, %v4025_v10, %v4029_v53  ;;  %v1507_v53 = vadd.f32 %v10277_v42, %v10212_v6  ;;  %v9043_v37 = vld [vmem:[%s9532_s29 + $0x2f0] sm:$0xff]  }
 0x1a0   : > { %4096 = vrot.lane.b32.xlu0 %v10264_v38, %s12670_s26  ;;  %v8388_v39 = vpop.f32.mrb[83].mxu1  ;;  %v1568_v16 = vmax.f32 %v1504_v18, 0.0 }
 0x1a1   : > { %8586 = vmatmul.mubr.msk.bf16.gmra.mrb[188].mxu0 %vm508_vm1, %v9039_v47  ;;  %v1738_v47 = vadd.f32 %v10277_v42, %v10222_v11  ;;  %v1799_v39 = vmax.f32 %v1735_v54, 0.0 }
 0x1a2   : > { %8626 = vmatmul.mubr.msk.bf16.gmra.mrb[188].mxu1 %vm508_vm1, %v9040_v56  ;;  %4035 = vrot.lane.b32.xlu1 %v4030_v62, %s12670_s26 }
 0x1a3   : > { %8589 = vmatprep.mubr.msk.bf16.mxu0 %vm9384_vm0, %v12653_v1  ;;  %8629 = vmatprep.mubr.msk.bf16.mxu1 %vm9384_vm0, %v12653_v1  ;;  %v1800_v23 = vmax.f32 %v1738_v47, 0.0 }
 0x1a4   : > { %v1519_v25 = vpop.f32.mrb[84].mxu0 }
 0x1a5   : > { %v1520_v60 = vadd.f32 %v10277_v42, %v1519_v25  ;;  %v8351_v28 = vpop.f32.mrb[85].mxu0  ;;  %v1750_v55 = vpop.f32.mrb[84].mxu1 }
 0x1a6   : > { %4077 = vrot.lane.b32.xlu1 %v4072_v24, %s12670_s26  ;;  %v1522_v22 = vpop.f32.mrb[86].mxu0  ;;  %v1751_v61 = vadd.f32 %v10277_v42, %v1750_v55  ;;  %v8391_v0 = vpop.f32.mrb[85].mxu1  ;;  %v1569_v24 = vmax.f32 %v1507_v53, 0.0 }
 0x1a7   : > { %v1572_v3 = vmax.f32 %v1520_v60, 0.0  ;;  %v1523_v4 = vadd.f32 %v10277_v42, %v1522_v22  ;;  %v8352_v19 = vpop.f32.mrb[87].mxu0  ;;  %v1753_v7 = vpop.f32.mrb[86].mxu1  ;;  %v1743_v22 = vadd.f32 %v10277_v42, %v10253_v29 }
 0x1a8   : > { %v1803_v45 = vmax.f32 %v1751_v61, 0.0  ;;  %v1754_v9 = vadd.f32 %v10277_v42, %v1753_v7  ;;  %v8392_v33 = vpop.f32.mrb[87].mxu1  ;;  %v1512_v61 = vadd.f32 %v10277_v42, %v10244_v31 }
 0x1a9   : > { %v10307_v41 = vmax.f32 %v1566_v20, %v1572_v3  ;;  %v1573_v15 = vmax.f32 %v1523_v4, 0.0  ;;  %8590 = vmatmul.mubr.msk.bf16.gmra.mrb[192].mxu0 %vm508_vm1, %v9041_v36  ;;  %v1746_v3 = vadd.f32 %v10277_v42, %v10266_v48  ;;  %v1515_v4 = vadd.f32 %v10277_v42, %v10257_v2  ;;  %v9046_v33 = vld [vmem:[%s9532_s29 + $0x340] sm:$0xff]  }
 0x1aa   : > { %8630 = vmatmul.mubr.msk.bf16.gmra.mrb[192].mxu1 %vm508_vm1, %v9042_v58  ;;  %4079 = vrot.lane.b32.xlu1 %v4074_v52, %s12670_s26  ;;  %v1804_v51 = vmax.f32 %v1754_v9, 0.0  ;;  %v10317_v17 = vmax.f32 %v1797_v32, %v1803_v45  ;;  %v1801_v31 = vmax.f32 %v1743_v22, 0.0  ;;  %v1570_v52 = vmax.f32 %v1512_v61, 0.0 }
 0x1ab   : > { %v10321_v57 = vmax.f32 %v1567_v12, %v1573_v15  ;;  %8593 = vmatprep.mubr.msk.bf16.mxu0 %vm9384_vm0, %v12653_v1  ;;  %8633 = vmatprep.mubr.msk.bf16.mxu1 %vm9384_vm0, %v12653_v1 }
 0x1ac   : > { %v1527_v10 = vpop.f32.mrb[88].mxu0  ;;  %v10329_v5 = vmax.f32 %v1798_v30, %v1804_v51  ;;  %v9045_v30 = vld [vmem:[%s9532_s29 + $0x2f8] sm:$0xff]  }
 0x1ad   : > { %v1528_v56 = vadd.f32 %v10277_v42, %v1527_v10  ;;  %v8355_v27 = vpop.f32.mrb[89].mxu0  ;;  %v1758_v59 = vpop.f32.mrb[88].mxu1  ;;  %v1802_v10 = vmax.f32 %v1746_v3, 0.0 }
 0x1ae   : > { %v1530_v63 = vpop.f32.mrb[90].mxu0  ;;  %v1759_v62 = vadd.f32 %v10277_v42, %v1758_v59  ;;  %v8395_v44 = vpop.f32.mrb[89].mxu1 }
 0x1af   : > { %v1574_v46 = vmax.f32 %v1528_v56, 0.0  ;;  %v1531_v11 = vadd.f32 %v10277_v42, %v1530_v63  ;;  %v8356_v25 = vpop.f32.mrb[91].mxu0  ;;  %v1761_v26 = vpop.f32.mrb[90].mxu1  ;;  %v1571_v56 = vmax.f32 %v1515_v4, 0.0 }
 0x1b0   : > { %v1805_v60 = vmax.f32 %v1759_v62, 0.0  ;;  %v1762_v6 = vadd.f32 %v10277_v42, %v1761_v26  ;;  %v8396_v28 = vpop.f32.mrb[91].mxu1  ;;  %v9048_v26 = vld [vmem:[%s9532_s29 + $0x348] sm:$0xff]  }
 0x1b1   : > { %v10339_v36 = vmax.f32 %v1568_v16, %v1574_v46  ;;  %v1575_v55 = vmax.f32 %v1531_v11, 0.0  ;;  %8594 = vmatmul.mubr.msk.bf16.gmra.mrb[196].mxu0 %vm508_vm1, %v9043_v37  ;;  %v9047_v46 = vld [vmem:[%s9532_s29 + $0x300] sm:$0xff]  }
 0x1b2   : > { %8634 = vmatmul.mubr.msk.bf16.gmra.mrb[196].mxu1 %vm508_vm1, %v9044_v40  ;;  %8597 = vmatprep.mubr.msk.bf16.mxu0 %vm9384_vm0, %v12653_v1  ;;  %v1806_v58 = vmax.f32 %v1762_v6, 0.0  ;;  %v10347_v32 = vmax.f32 %v1799_v39, %v1805_v60 }
 0x1b3   : > { %v10351_v0 = vmax.f32 %v1569_v24, %v1575_v55  ;;  %8637 = vmatprep.mubr.msk.bf16.mxu1 %vm9384_vm0, %v12653_v1 }
 0x1b4   : > { %v1535_v20 = vpop.f32.mrb[92].mxu0  ;;  %v10357_v29 = vmax.f32 %v1800_v23, %v1806_v58 }
 0x1b5   : > { %v1536_v19 = vadd.f32 %v10277_v42, %v1535_v20  ;;  %v8359_v7 = vpop.f32.mrb[93].mxu0  ;;  %v1766_v45 = vpop.f32.mrb[92].mxu1 }
 0x1b6   : > { %v1538_v9 = vpop.f32.mrb[94].mxu0  ;;  %v1767_v12 = vadd.f32 %v10277_v42, %v1766_v45  ;;  %v8399_v15 = vpop.f32.mrb[93].mxu1 }
 0x1b7   : > { %v1576_v54 = vmax.f32 %v1536_v19, 0.0  ;;  %v1539_v48 = vadd.f32 %v10277_v42, %v1538_v9  ;;  %v8360_v51 = vpop.f32.mrb[95].mxu0  ;;  %v1769_v18 = vpop.f32.mrb[94].mxu1 }
 0x1b8   : > { %v1807_v47 = vmax.f32 %v1767_v12, 0.0  ;;  %v1770_v2 = vadd.f32 %v10277_v42, %v1769_v18  ;;  %v8400_v53 = vpop.f32.mrb[95].mxu1 }
 0x1b9   : > { %v10367_v27 = vmax.f32 %v1570_v52, %v1576_v54  ;;  %v1577_v37 = vmax.f32 %v1539_v48, 0.0  ;;  %8598 = vmatmul.mubr.msk.bf16.gmra.mrb[200].mxu0 %vm508_vm1, %v9045_v30  ;;  %v9050_v52 = vld [vmem:[%s9532_s29 + $0x350] sm:$0xff]  }
 0x1ba   : > { %8638 = vmatmul.mubr.msk.bf16.gmra.mrb[200].mxu1 %vm508_vm1, %v9046_v33  ;;  %8601 = vmatprep.mubr.msk.bf16.mxu0 %vm9384_vm0, %v12653_v1  ;;  %v1808_v59 = vmax.f32 %v1770_v2, 0.0  ;;  %v10373_v63 = vmax.f32 %v1801_v31, %v1807_v47 }
 0x1bb   : > { %v10375_v39 = vmax.f32 %v1571_v56, %v1577_v37  ;;  %8641 = vmatprep.mubr.msk.bf16.mxu1 %vm9384_vm0, %v12653_v1 }
 0x1bc   : > { %v1543_v40 = vpop.f32.mrb[96].mxu0  ;;  %v10379_v62 = vmax.f32 %v1802_v10, %v1808_v59 }
 0x1bd   : > { %v1544_v44 = vadd.f32 %v10277_v42, %v1543_v40  ;;  %v8363_v16 = vpop.f32.mrb[97].mxu0  ;;  %v1774_v11 = vpop.f32.mrb[96].mxu1 }
 0x1be   : > { %v1546_v25 = vpop.f32.mrb[98].mxu0  ;;  %v1775_v23 = vadd.f32 %v10277_v42, %v1774_v11  ;;  %v8403_v60 = vpop.f32.mrb[97].mxu1 }
 0x1bf   : > { %v1578_v6 = vmax.f32 %v1544_v44, 0.0  ;;  %v1547_v28 = vadd.f32 %v10277_v42, %v1546_v25  ;;  %v8364_v24 = vpop.f32.mrb[99].mxu0  ;;  %v1777_v55 = vpop.f32.mrb[98].mxu1  ;;  %v9051_v25 = vld [vmem:[%s9532_s29 + $0x310] sm:$0xff]  }
 0x1c0   : > { %v1809_v22 = vmax.f32 %v1775_v23, 0.0  ;;  %v1778_v58 = vadd.f32 %v10277_v42, %v1777_v55  ;;  %v8404_v61 = vpop.f32.mrb[99].mxu1 }
 0x1c1   : > { %v10388_v20 = vmax.f32 %v10307_v41, %v1578_v6  ;;  %v1579_v3 = vmax.f32 %v1547_v28, 0.0  ;;  %8602 = vmatmul.mubr.msk.bf16.gmra.mrb[204].mxu0 %vm508_vm1, %v9047_v46  ;;  %v9052_v6 = vld [vmem:[%s9532_s29 + $0x358] sm:$0xff]  }
 0x1c2   : > { %8642 = vmatmul.mubr.msk.bf16.gmra.mrb[204].mxu1 %vm508_vm1, %v9048_v26  ;;  %v10393_v4 = vmax.f32 %v10317_v17, %v1809_v22  ;;  %v1810_v19 = vmax.f32 %v1778_v58, 0.0  ;;  %8605 = vmatprep.mubr.msk.bf16.mxu0 %vm9384_vm0, %v12653_v1  ;;  %v9049_v17 = vld [vmem:[%s9532_s29 + $0x308] sm:$0xff]  }
 0x1c3   : > { %v10398_v7 = vmax.f32 %v10321_v57, %v1579_v3  ;;  %8645 = vmatprep.mubr.msk.bf16.mxu1 %vm9384_vm0, %v12653_v1 }
 0x1c4   : > { %v1551_v41 = vpop.f32.mrb[100].mxu0  ;;  %v10403_v30 = vmax.f32 %v10329_v5, %v1810_v19 }
 0x1c5   : > { %v1552_v45 = vadd.f32 %v10277_v42, %v1551_v41  ;;  %v8367_v31 = vpop.f32.mrb[101].mxu0  ;;  %v1782_v9 = vpop.f32.mrb[100].mxu1 }
 0x1c6   : > { %v1554_v33 = vpop.f32.mrb[102].mxu0  ;;  %v1783_v12 = vadd.f32 %v10277_v42, %v1782_v9  ;;  %v8407_v15 = vpop.f32.mrb[101].mxu1  ;;  %v9053_v9 = vld [vmem:[%s9532_s29 + $0x360] sm:$0xff]  }
 0x1c7   : > { %v1580_v54 = vmax.f32 %v1552_v45, 0.0  ;;  %v1555_v57 = vadd.f32 %v10277_v42, %v1554_v33  ;;  %v8368_v48 = vpop.f32.mrb[103].mxu0  ;;  %v1785_v51 = vpop.f32.mrb[102].mxu1  ;;  %v9054_v15 = vld [vmem:[%s9532_s29 + $0x3a8] sm:$0xff]  }
 0x1c8   : > { %v1811_v18 = vmax.f32 %v1783_v12, 0.0  ;;  %v1786_v10 = vadd.f32 %v10277_v42, %v1785_v51  ;;  %v8408_v5 = vpop.f32.mrb[103].mxu1 }
 0x1c9   : > { %v1592_v47 = vmax.f32 %v10339_v36, %v1580_v54  ;;  %v1581_v2 = vmax.f32 %v1555_v57, 0.0  ;;  %8606 = vmatmul.mubr.msk.bf16.gmra.mrb[208].mxu0 %vm508_vm1, %v9049_v17  ;;  %v10477_v5 = vld [vmem:[%s12643_s3 + $0x8] sm:$0xff]  }
 0x1ca   : > { %v1823_v53 = vmax.f32 %v10347_v32, %v1811_v18  ;;  %8646 = vmatmul.mubr.msk.bf16.gmra.mrb[208].mxu1 %vm508_vm1, %v9050_v52  ;;  %v1812_v56 = vmax.f32 %v1786_v10, 0.0  ;;  %8609 = vmatprep.mubr.msk.bf16.mxu0 %vm9384_vm0, %v12653_v1  ;;  %v10461_v18 = vld [vmem:[%s12643_s3 + $0x48] sm:$0xff]  }
 0x1cb   : > { %v1596_v37 = vmax.f32 %v10388_v20, %v1592_v47  ;;  %v1593_v59 = vmax.f32 %v10351_v0, %v1581_v2  ;;  %8649 = vmatprep.mubr.msk.bf16.mxu1 %vm9384_vm0, %v12653_v1  ;;  %v9055_v2 = vld [vmem:[%s9532_s29 + $0x368] sm:$0xff]  }
 0x1cc   : > { %v1827_v36 = vmax.f32 %v10393_v4, %v1823_v53  ;;  %v1824_v40 = vmax.f32 %v10357_v29, %v1812_v56  ;;  %v1559_v44 = vpop.f32.mrb[104].mxu0  ;;  %v10486_v53 = vld [vmem:[%s12643_s3 + $0x50] sm:$0xff]  }
 0x1cd   : > { %v1597_v32 = vmax.f32 %v10398_v7, %v1593_v59  ;;  %v1560_v16 = vadd.f32 %v10277_v42, %v1559_v44  ;;  %v1790_v46 = vpop.f32.mrb[104].mxu1  ;;  %v8371_v11 = vpop.f32.mrb[105].mxu0  ;;  %v4061_v59 = vshrl.u32 %v10232_v14, 16 }
 0x1ce   : > { %v1828_v26 = vmax.f32 %v10403_v30, %v1824_v40  ;;  %v1791_v23 = vadd.f32 %v10277_v42, %v1790_v46  ;;  %v8411_v0 = vpop.f32.mrb[105].mxu1  ;;  %v1562_v60 = vpop.f32.mrb[106].mxu0  ;;  %v10502_v11 = vld [vmem:[%s12643_s3 + $0x10] sm:$0xff]  }
 0x1cf   : > { %v1582_v28 = vmax.f32 %v1560_v16, 0.0  ;;  %v1563_v24 = vadd.f32 %v10277_v42, %v1562_v60  ;;  %v1793_v55 = vpop.f32.mrb[106].mxu1  ;;  %v8372_v29 = vpop.f32.mrb[107].mxu0 }
 0x1d0   : > { %v1813_v22 = vmax.f32 %v1791_v23, 0.0  ;;  %v1794_v58 = vadd.f32 %v10277_v42, %v1793_v55  ;;  %v8412_v61 = vpop.f32.mrb[107].mxu1  ;;  %v10530_v55 = vld [vmem:[%s12643_s3 + $0x18] sm:$0xff]  }
 0x1d1   : > { %v1594_v20 = vmax.f32 %v10367_v27, %v1582_v28  ;;  %v1583_v3 = vmax.f32 %v1563_v24, 0.0  ;;  %8610 = vmatmul.mubr.msk.bf16.gmra.mrb[212].mxu0 %vm508_vm1, %v9051_v25 }
 0x1d2   : > { %v1825_v4 = vmax.f32 %v10373_v63, %v1813_v22  ;;  %v1814_v19 = vmax.f32 %v1794_v58, 0.0  ;;  %8650 = vmatmul.mubr.msk.bf16.gmra.mrb[212].mxu1 %vm508_vm1, %v9052_v6  ;;  %8657 = vmatprep.mubr.msk.bf16.mxu0 %vm9384_vm0, %v12653_v1  ;;  %v9057_v58 = vld [vmem:[%s9532_s29 + $0x370] sm:$0xff]  }
 0x1d3   : > { %v1598_v7 = vmax.f32 %v1596_v37, %v1594_v20  ;;  %v1595_v41 = vmax.f32 %v10375_v39, %v1583_v3  ;;  %8697 = vmatprep.mubr.msk.bf16.mxu1 %vm9384_vm0, %v12653_v1  ;;  %v9056_v37 = vld [vmem:[%s9532_s29 + $0x3b0] sm:$0xff]  }
 0x1d4   : > { %v1829_v30 = vmax.f32 %v1827_v36, %v1825_v4  ;;  %v1826_v27 = vmax.f32 %v10379_v62, %v1814_v19  ;;  %v10441_v45 = vpop.f32.mrb[108].mxu0  ;;  %v10454_v62 = vld [vmem:[%s12643_s3] sm:$0xff]  }
 0x1d5   : > { %v1599_v31 = vmax.f32 %v1597_v32, %v1595_v41  ;;  %v8419_v63 = vpop.f32.mrb[109].mxu0  ;;  %v10444_v17 = vpop.f32.mrb[108].mxu1  ;;  %v10541_v19 = vld [vmem:[%s12643_s3 + $0x60] sm:$0xff]   ;;  %v9058_v41 = vld [vmem:[%s9532_s29 + $0x3b8] sm:$0xff]  }
 0x1d6   : > { %v1830_v33 = vmax.f32 %v1828_v26, %v1826_v27  ;;  %v10446_v12 = vpop.f32.mrb[110].mxu0  ;;  %v8459_v52 = vpop.f32.mrb[109].mxu1  ;;  %v4063_v26 = vor.u32 %v4061_v59, %v10250_v21 }
 0x1d7   : > { %v1600_v54 = vpack.c.bf16 %v1599_v31, %v1598_v7  ;;  %v8420_v39 = vpop.f32.mrb[111].mxu0  ;;  %v10449_v57 = vpop.f32.mrb[110].mxu1 }
 0x1d8   : > { %v1831_v48 = vpack.c.bf16 %v1830_v33, %v1829_v30  ;;  %v8460_v51 = vpop.f32.mrb[111].mxu1  ;;  %v10554_v33 = vld [vmem:[%s12643_s3 + $0x20] sm:$0xff]  }
 0x1d9   : > { %1601 = vst.msk [vmem:[#allocation2 + $0x20] sm:$0xff] %vm676_vm2, %v1600_v54  ;;  %8658 = vmatmul.mubr.msk.bf16.vlgmr.msra.gmra.mrb[216].mxu0 %vm508_vm1, %v9053_v9  ;;  %v10564_v54 = vld [vmem:[%s12643_s3 + $0x68] sm:$0xff]   ;;  %v1958_v51 = vadd.f32 %v10277_v42, %v10441_v45 }
 0x1da   : > { %1832 = vst.msk [vmem:[#allocation2 + $0x28] sm:$0xff] %vm676_vm2, %v1831_v48  ;;  %8698 = vmatmul.mubr.msk.bf16.vlgmr.msra.gmra.mrb[216].mxu1 %vm508_vm1, %v9054_v15  ;;  %8734 = vmatpush3.bf16.msra.mxu0 %v10197_v34  ;;  %v2189_v48 = vadd.f32 %v10277_v42, %v10444_v17  ;;  %v2192_v17 = vadd.f32 %v10277_v42, %v10449_v57  ;;  %v10591_v45 = vld [vmem:[%s12643_s3 + $0x28] sm:$0xff]   ;;  %v10601_v57 = vld [vmem:[%s12643_s3 + $0x70] sm:$0xff]  }
 0x1db   : > { %8661 = vmatprep.mubr.msk.bf16.mxu0 %vm9384_vm0, %v12653_v1  ;;  %8701 = vmatprep.mubr.msk.bf16.mxu1 %vm9384_vm0, %v12653_v1 }
 0x1dc   : > { %v10470_v10 = vpop.f32.mrb[112].mxu0  ;;  %8735 = vmatprep.subr.bf16.mxu0 %v12653_v1  ;;  %7724 = vmatpush3.bf16.msra.mxu1 %v10454_v62 }
 0x1dd   : > { %v8423_v47 = vpop.f32.mrb[113].mxu0  ;;  %v10480_v34 = vpop.f32.mrb[112].mxu1  ;;  %7725 = vmatprep.subr.bf16.mxu1 %v10461_v18 }
 0x1de   : > { %v10488_v56 = vpop.f32.mrb[114].mxu0  ;;  %v8463_v36 = vpop.f32.mrb[113].mxu1  ;;  %8736 = vmatpush3.bf16.msra.mxu0 %v10218_v8 }
 0x1df   : > { %v8424_v40 = vpop.f32.mrb[115].mxu0  ;;  %v10493_v44 = vpop.f32.mrb[114].mxu1  ;;  %7798 = vmatprep.subr.bf16.mxu0 %v10229_v13  ;;  %v10510_v13 = vld [vmem:[%s12643_s3 + $0x58] sm:$0xff]  }
 0x1e0   : > { %v3997_v32 = vld [vmem:[#allocation2 + $0x20] sm:$0x1]  ;;  %v8464_v46 = vpop.f32.mrb[115].mxu1  ;;  %7726 = vmatpush3.bf16.msra.mxu1 %v10477_v5  ;;  %v9059_v40 = vld [vmem:[%s9532_s29 + $0x378] sm:$0xff]  }
 0x1e1   : > { %v10496_v16 = vld [vmem:[#allocation2 + $0x20] sm:$0xff]  ;;  %8662 = vmatmul.mubr.msk.bf16.gmra.mrb[220].mxu0 %vm508_vm1, %v9055_v2  ;;  %v4075_v14 = vrot.slane %v3997_v32, 1  ;;  %v4000_v25 = vld [vmem:[#allocation2 + $0x28] sm:$0x1]  ;;  %7727 = vmatprep.subr.bf16.mxu1 %v10486_v53  ;;  %v4065_v6 = vshll.u32 %v3997_v32, 16 }
 0x1e2   : > { %v4084_v8 = vshll.u32 %v10496_v16, 16  ;;  %8702 = vmatmul.mubr.msk.bf16.gmra.mrb[220].mxu1 %vm508_vm1, %v9056_v37  ;;  %8665 = vmatprep.mubr.msk.bf16.mxu0 %vm9384_vm0, %v12653_v1  ;;  %v4092_v23 = vshll.u32 %v4000_v25, 16  ;;  %v10516_v0 = vld [vmem:[#allocation2 + $0x28] sm:$0xff]  ;;  %v4088_v24 = vshrl.u32 %v10496_v16, 16  ;;  %v1961_v37 = vadd.f32 %v10277_v42, %v10446_v12 }
 0x1e3   : > { %v4076_v60 = vsel %vm4041_vm4, %v10300_v50, %v4075_v14  ;;  %8705 = vmatprep.mubr.msk.bf16.mxu1 %vm9384_vm0, %v12653_v1  ;;  %v4604_v3 = vshll.u32 %v10516_v0, 16  ;;  %v4067_v63 = vrot.slane %v4065_v6, 1  ;;  %v9060_v14 = vld [vmem:[%s9532_s29 + $0x3c0] sm:$0xff]  }
 0x1e4   : > { %v4086_v28 = vrot.slane %v4084_v8, 1  ;;  %4081 = vrot.lane.b32.xlu1 %v4076_v60, %s12670_s26  ;;  %v10524_v21 = vpop.f32.mrb[116].mxu0  ;;  %7728 = vmatpush3.bf16.msra.mxu1 %v10502_v11  ;;  %v4094_v20 = vrot.slane %v4092_v23, 1  ;;  %v2259_v8 = vmax.f32 %v2189_v48, 0.0 }
 0x1e5   : > { %v8427_v29 = vpop.f32.mrb[117].mxu0  ;;  %v10535_v4 = vpop.f32.mrb[116].mxu1  ;;  %7729 = vmatprep.subr.bf16.mxu1 %v10510_v13  ;;  %v10558_v52 = vrot.slane %v4604_v3, 1  ;;  %v10567_v39 = vsel %vm4002_vm3, %v4063_v26, %v4067_v63 }
 0x1e6   : > { %v4087_v22 = vsel %vm4002_vm3, %v4063_v26, %v4086_v28  ;;  %v4090_v61 = vor.u32 %v4088_v24, %v4086_v28  ;;  %v10544_v7 = vpop.f32.mrb[118].mxu0  ;;  %v8467_v30 = vpop.f32.mrb[117].mxu1  ;;  %v2028_v26 = vmax.f32 %v1958_v51, 0.0  ;;  %v2260_v24 = vmax.f32 %v2192_v17, 0.0 }
 0x1e7   : > { %4098 = vrot.lane.b32.xlu0 %v4087_v22, %s12670_s26  ;;  %v8428_v27 = vpop.f32.mrb[119].mxu0  ;;  %v10547_v31 = vpop.f32.mrb[118].mxu1  ;;  %v2197_v30 = vadd.f32 %v10277_v42, %v10480_v34  ;;  %v2200_v51 = vadd.f32 %v10277_v42, %v10493_v44  ;;  %v10657_v44 = vld [vmem:[%s12643_s3 + $0xc0] sm:$0xff]  }
 0x1e8   : > { %4616 = vrot.lane.b32.xlu1 %v4087_v22, %s12670_s26  ;;  %v8468_v9 = vpop.f32.mrb[119].mxu1  ;;  %7730 = vmatpush3.bf16.msra.mxu1 %v10530_v55  ;;  %v4095_v15 = vsel %vm4002_vm3, %v4090_v61, %v4094_v20  ;;  %v10577_v47 = vsel %vm4002_vm3, %v4090_v61, %v10558_v52  ;;  %v2029_v61 = vmax.f32 %v1961_v37, 0.0 }
 0x1e9   : > { %8666 = vmatmul.mubr.msk.bf16.gmra.mrb[224].mxu0 %vm508_vm1, %v9057_v58  ;;  %7731 = vmatprep.subr.bf16.mxu1 %v10541_v19  ;;  %v1966_v9 = vadd.f32 %v10277_v42, %v10470_v10  ;;  %v10647_v10 = vld [vmem:[%s12643_s3 + $0x38] sm:$0xff]  }
 0x1ea   : > { %8706 = vmatmul.mubr.msk.bf16.gmra.mrb[224].mxu1 %vm508_vm1, %v9058_v41  ;;  %8669 = vmatprep.mubr.msk.bf16.mxu0 %vm9384_vm0, %v12653_v1  ;;  %v10622_v41 = vld [vmem:[%s12643_s3 + $0x78] sm:$0xff]  }
 0x1eb   : > { %4100 = vrot.lane.b32.xlu0 %v4095_v15, %s12670_s26  ;;  %8709 = vmatprep.mubr.msk.bf16.mxu1 %vm9384_vm0, %v12653_v1 }
 0x1ec   : > { %4618 = vrot.lane.b32.xlu1 %v10577_v47, %s12670_s26  ;;  %v1981_v2 = vpop.f32.mrb[120].mxu0  ;;  %7732 = vmatpush3.bf16.msra.mxu1 %v10554_v33 }
 0x1ed   : > { %v1982_v59 = vadd.f32 %v10277_v42, %v1981_v2  ;;  %v8431_v36 = vpop.f32.mrb[121].mxu0  ;;  %v2212_v32 = vpop.f32.mrb[120].mxu1  ;;  %7733 = vmatprep.subr.bf16.mxu1 %v10564_v54  ;;  %v1969_v2 = vadd.f32 %v10277_v42, %v10488_v56 }
 0x1ee   : > { %v1984_v46 = vpop.f32.mrb[122].mxu0  ;;  %v2213_v12 = vadd.f32 %v10277_v42, %v2212_v32  ;;  %v8471_v25 = vpop.f32.mrb[121].mxu1  ;;  %v2261_v32 = vmax.f32 %v2197_v30, 0.0 }
 0x1ef   : > { %4634 = vrot.lane.b32.xlu0 %v10496_v16, %s12670_s26  ;;  %v2034_v23 = vmax.f32 %v1982_v59, 0.0  ;;  %v1985_v60 = vadd.f32 %v10277_v42, %v1984_v46  ;;  %v8432_v6 = vpop.f32.mrb[123].mxu0  ;;  %v2215_v28 = vpop.f32.mrb[122].mxu1  ;;  %v10613_v16 = vld [vmem:[%s12643_s3 + $0x30] sm:$0xff]   ;;  %v9061_v59 = vld [vmem:[%s9532_s29 + $0x380] sm:$0xff]   ;;  %v9062_v46 = vld [vmem:[%s9532_s29 + $0x3c8] sm:$0xff]  }
 0x1f0   : > { %v2265_v29 = vmax.f32 %v2213_v12, 0.0  ;;  %v2216_v22 = vadd.f32 %v10277_v42, %v2215_v28  ;;  %v8472_v58 = vpop.f32.mrb[123].mxu1  ;;  %7734 = vmatpush3.bf16.msra.mxu1 %v10591_v45  ;;  %v2030_v12 = vmax.f32 %v1966_v9, 0.0 }
 0x1f1   : > { %v10615_v20 = vmax.f32 %v2028_v26, %v2034_v23  ;;  %v2035_v3 = vmax.f32 %v1985_v60, 0.0  ;;  %8670 = vmatmul.mubr.msk.bf16.gmra.mrb[228].mxu0 %vm508_vm1, %v9059_v40  ;;  %7735 = vmatprep.subr.bf16.mxu1 %v10601_v57  ;;  %v2262_v60 = vmax.f32 %v2200_v51, 0.0  ;;  %v2208_v51 = vadd.f32 %v10277_v42, %v10547_v31 }
 0x1f2   : > { %8710 = vmatmul.mubr.msk.bf16.gmra.mrb[228].mxu1 %vm508_vm1, %v9060_v14  ;;  %v10629_v27 = vmax.f32 %v2259_v8, %v2265_v29  ;;  %v2266_v63 = vmax.f32 %v2216_v22, 0.0  ;;  %8673 = vmatprep.mubr.msk.bf16.mxu0 %vm9384_vm0, %v12653_v1  ;;  %v2031_v29 = vmax.f32 %v1969_v2, 0.0  ;;  %v1977_v2 = vadd.f32 %v10277_v42, %v10544_v7 }
 0x1f3   : > { %4636 = vrot.lane.b32.xlu0 %v10516_v0, %s12670_s26  ;;  %v10633_v15 = vmax.f32 %v2029_v61, %v2035_v3  ;;  %8713 = vmatprep.mubr.msk.bf16.mxu1 %vm9384_vm0, %v12653_v1  ;;  %v2205_v61 = vadd.f32 %v10277_v42, %v10535_v4 }
 0x1f4   : > { %v1989_v48 = vpop.f32.mrb[124].mxu0  ;;  %v10641_v34 = vmax.f32 %v2260_v24, %v2266_v63  ;;  %7736 = vmatpush3.bf16.msra.mxu1 %v10613_v16  ;;  %v1974_v63 = vadd.f32 %v10277_v42, %v10524_v21 }
 0x1f5   : > { %v1990_v17 = vadd.f32 %v10277_v42, %v1989_v48  ;;  %v8435_v37 = vpop.f32.mrb[125].mxu0  ;;  %v2220_v36 = vpop.f32.mrb[124].mxu1  ;;  %7737 = vmatprep.subr.bf16.mxu1 %v10622_v41  ;;  %v2263_v21 = vmax.f32 %v2205_v61, 0.0 }
 0x1f6   : > { %v1992_v40 = vpop.f32.mrb[126].mxu0  ;;  %v2221_v14 = vadd.f32 %v10277_v42, %v2220_v36  ;;  %v8475_v8 = vpop.f32.mrb[125].mxu1 }
 0x1f7   : > { %v2036_v56 = vmax.f32 %v1990_v17, 0.0  ;;  %v1993_v25 = vadd.f32 %v10277_v42, %v1992_v40  ;;  %v8436_v26 = vpop.f32.mrb[127].mxu0  ;;  %v2223_v23 = vpop.f32.mrb[126].mxu1  ;;  %v2032_v8 = vmax.f32 %v1974_v63, 0.0 }
 0x1f8   : > { %v2267_v6 = vmax.f32 %v2221_v14, 0.0  ;;  %v2224_v28 = vadd.f32 %v10277_v42, %v2223_v23  ;;  %v8476_v24 = vpop.f32.mrb[127].mxu1  ;;  %7738 = vmatpush3.bf16.msra.mxu1 %v10647_v10  ;;  %v2264_v26 = vmax.f32 %v2208_v51, 0.0 }
 0x1f9   : > { %v10664_v22 = vmax.f32 %v2030_v12, %v2036_v56  ;;  %v2037_v58 = vmax.f32 %v1993_v25, 0.0  ;;  %8674 = vmatmul.mubr.msk.bf16.gmra.mrb[232].mxu0 %vm508_vm1, %v9061_v59  ;;  %7757 = vmatprep.subr.bf16.mxu1 %v10657_v44  ;;  %v9064_v59 = vld [vmem:[%s9532_s29 + $0x388] sm:$0xff]  }
 0x1fa   : > { %8714 = vmatmul.mubr.msk.bf16.gmra.mrb[232].mxu1 %vm508_vm1, %v9062_v46  ;;  %8677 = vmatprep.mubr.msk.bf16.mxu0 %vm9384_vm0, %v12653_v1  ;;  %v10673_v3 = vmax.f32 %v2261_v32, %v2267_v6  ;;  %v2268_v30 = vmax.f32 %v2224_v28, 0.0  ;;  %v9065_v32 = vld [vmem:[%s9532_s29 + $0x3d0] sm:$0xff]   ;;  %v2033_v6 = vmax.f32 %v1977_v2, 0.0 }
 0x1fb   : > { %v10677_v9 = vmax.f32 %v2031_v29, %v2037_v58  ;;  %8717 = vmatprep.mubr.msk.bf16.mxu1 %vm9384_vm0, %v12653_v1  ;;  %v9070_v2 = vld [vmem:[%s9532_s29 + $0x390] sm:$0xff]  }
 0x1fc   : > { %v1997_v48 = vpop.f32.mrb[128].mxu0  ;;  %v10683_v4 = vmax.f32 %v2262_v60, %v2268_v30 }
 0x1fd   : > { %v1998_v17 = vadd.f32 %v10277_v42, %v1997_v48  ;;  %v8439_v37 = vpop.f32.mrb[129].mxu0  ;;  %v2228_v36 = vpop.f32.mrb[128].mxu1 }
 0x1fe   : > { %v2000_v40 = vpop.f32.mrb[130].mxu0  ;;  %v2229_v46 = vadd.f32 %v10277_v42, %v2228_v36  ;;  %v8479_v14 = vpop.f32.mrb[129].mxu1 }
 0x1ff   : > { %v2038_v12 = vmax.f32 %v1998_v17, 0.0  ;;  %v2001_v31 = vadd.f32 %v10277_v42, %v2000_v40  ;;  %v8440_v56 = vpop.f32.mrb[131].mxu0  ;;  %v2231_v25 = vpop.f32.mrb[130].mxu1 }
 0x200   : > { %v2269_v23 = vmax.f32 %v2229_v46, 0.0  ;;  %v2232_v7 = vadd.f32 %v10277_v42, %v2231_v25  ;;  %v8480_v60 = vpop.f32.mrb[131].mxu1 }
 0x201   : > { %v10693_v28 = vmax.f32 %v2032_v8, %v2038_v12  ;;  %v2039_v24 = vmax.f32 %v2001_v31, 0.0  ;;  %8678 = vmatmul.mubr.msk.bf16.gmra.mrb[236].mxu0 %vm508_vm1, %v9064_v59  ;;  %v9071_v59 = vld [vmem:[%s9532_s29 + $0x3d8] sm:$0xff]  }
 0x202   : > { %8718 = vmatmul.mubr.msk.bf16.gmra.mrb[236].mxu1 %vm508_vm1, %v9065_v32  ;;  %v10697_v29 = vmax.f32 %v2263_v21, %v2269_v23  ;;  %8681 = vmatprep.mubr.msk.bf16.mxu0 %vm9384_vm0, %v12653_v1  ;;  %v2270_v58 = vmax.f32 %v2232_v7, 0.0 }
 0x203   : > { %v10701_v61 = vmax.f32 %v2033_v6, %v2039_v24  ;;  %8721 = vmatprep.mubr.msk.bf16.mxu1 %vm9384_vm0, %v12653_v1 }
 0x204   : > { %v2005_v30 = vpop.f32.mrb[132].mxu0  ;;  %v10705_v63 = vmax.f32 %v2264_v26, %v2270_v58 }
 0x205   : > { %v2006_v48 = vadd.f32 %v10277_v42, %v2005_v30  ;;  %v8443_v51 = vpop.f32.mrb[133].mxu0  ;;  %v2236_v17 = vpop.f32.mrb[132].mxu1 }
 0x206   : > { %v2008_v37 = vpop.f32.mrb[134].mxu0  ;;  %v2237_v36 = vadd.f32 %v10277_v42, %v2236_v17  ;;  %v8483_v21 = vpop.f32.mrb[133].mxu1 }
 0x207   : > { %v2040_v40 = vmax.f32 %v2006_v48, 0.0  ;;  %v2009_v32 = vadd.f32 %v10277_v42, %v2008_v37  ;;  %v8444_v46 = vpop.f32.mrb[135].mxu0  ;;  %v2239_v14 = vpop.f32.mrb[134].mxu1 }
 0x208   : > { %v2271_v8 = vmax.f32 %v2237_v36, 0.0  ;;  %v2240_v12 = vadd.f32 %v10277_v42, %v2239_v14  ;;  %v8484_v31 = vpop.f32.mrb[135].mxu1 }
 0x209   : > { %v10714_v56 = vmax.f32 %v10615_v20, %v2040_v40  ;;  %v2041_v25 = vmax.f32 %v2009_v32, 0.0  ;;  %8682 = vmatmul.mubr.msk.bf16.gmra.mrb[240].mxu0 %vm508_vm1, %v9070_v2  ;;  %v9077_v2 = vld [vmem:[%s9532_s29 + $0x3e0] sm:$0xff]  }
 0x20a   : > { %8722 = vmatmul.mubr.msk.bf16.gmra.mrb[240].mxu1 %vm508_vm1, %v9071_v59  ;;  %v10719_v26 = vmax.f32 %v10629_v27, %v2271_v8  ;;  %v2272_v23 = vmax.f32 %v2240_v12, 0.0  ;;  %8685 = vmatprep.mubr.msk.bf16.mxu0 %vm9384_vm0, %v12653_v1  ;;  %v9076_v27 = vld [vmem:[%s9532_s29 + $0x398] sm:$0xff]   ;;  %v3995_v8 = vld [vmem:[#allocation2] sm:$0xfe] }
 0x20b   : > { %v10724_v7 = vmax.f32 %v10633_v15, %v2041_v25  ;;  %8725 = vmatprep.mubr.msk.bf16.mxu1 %vm9384_vm0, %v12653_v1 }
 0x20c   : > { %v2013_v20 = vpop.f32.mrb[136].mxu0  ;;  %v10729_v60 = vmax.f32 %v10641_v34, %v2272_v23 }
 0x20d   : > { %v2014_v6 = vadd.f32 %v10277_v42, %v2013_v20  ;;  %v8447_v24 = vpop.f32.mrb[137].mxu0  ;;  %v2244_v58 = vpop.f32.mrb[136].mxu1 }
 0x20e   : > { %v2016_v30 = vpop.f32.mrb[138].mxu0  ;;  %v2245_v48 = vadd.f32 %v10277_v42, %v2244_v58  ;;  %v8487_v51 = vpop.f32.mrb[137].mxu1 }
 0x20f   : > { %v2042_v17 = vmax.f32 %v2014_v6, 0.0  ;;  %v2017_v15 = vadd.f32 %v10277_v42, %v2016_v30  ;;  %v8448_v37 = vpop.f32.mrb[139].mxu0  ;;  %v2247_v59 = vpop.f32.mrb[138].mxu1  ;;  %v10752_v30 = vld [vmem:[#allocation2 + $0x8] sm:$0xff] }
 0x210   : > { %v2273_v36 = vmax.f32 %v2245_v48, 0.0  ;;  %v2248_v21 = vadd.f32 %v10277_v42, %v2247_v59  ;;  %v8488_v34 = vpop.f32.mrb[139].mxu1 }
 0x211   : > { %v2054_v40 = vmax.f32 %v10664_v22, %v2042_v17  ;;  %v2043_v32 = vmax.f32 %v2017_v15, 0.0  ;;  %8686 = vmatmul.mubr.msk.bf16.gmra.mrb[244].mxu0 %vm508_vm1, %v9076_v27  ;;  %v4051_v22 = vpop.permute.xlu0 %4050  ;;  %v9082_v27 = vld [vmem:[%s9532_s29 + $0x3a0] sm:$0xff]  }
 0x212   : > { %v2285_v46 = vmax.f32 %v10673_v3, %v2273_v36  ;;  %8726 = vmatmul.mubr.msk.bf16.gmra.mrb[244].mxu1 %vm508_vm1, %v9077_v2  ;;  %v2274_v14 = vmax.f32 %v2248_v21, 0.0  ;;  %8689 = vmatprep.mubr.msk.bf16.mxu0 %vm9384_vm0, %v12653_v1 }
 0x213   : > { %v2058_v12 = vmax.f32 %v10714_v56, %v2054_v40  ;;  %v2055_v31 = vmax.f32 %v10677_v9, %v2043_v32  ;;  %8729 = vmatprep.mubr.msk.bf16.mxu1 %vm9384_vm0, %v12653_v1  ;;  %v4042_v56 = vrot.slane %v3995_v8, 1  ;;  %v4043_v9 = vrot.slane %v10752_v30, 1 }
 0x214   : > { %v2289_v25 = vmax.f32 %v10719_v26, %v2285_v46  ;;  %v2286_v3 = vmax.f32 %v10683_v4, %v2274_v14  ;;  %v2021_v23 = vpop.f32.mrb[140].mxu0  ;;  %v9083_v4 = vld [vmem:[%s9532_s29 + $0x3e8] sm:$0xff]  }
 0x215   : > { %v2059_v20 = vmax.f32 %v10724_v7, %v2055_v31  ;;  %v2252_v6 = vpop.f32.mrb[140].mxu1  ;;  %v2022_v24 = vadd.f32 %v10277_v42, %v2021_v23  ;;  %v8451_v58 = vpop.f32.mrb[141].mxu0 }
 0x216   : > { %v2290_v48 = vmax.f32 %v10729_v60, %v2286_v3  ;;  %v2253_v51 = vadd.f32 %v10277_v42, %v2252_v6  ;;  %v8491_v26 = vpop.f32.mrb[141].mxu1  ;;  %v2024_v2 = vpop.f32.mrb[142].mxu0  ;;  %v4044_v60 = vsel %vm4041_vm4, %v4042_v56, %v4043_v9  ;;  %v9088_v58 = vld [vmem:[%s9532_s29 + $0x3f0] sm:$0xff]  }
 0x217   : > { %v2044_v17 = vmax.f32 %v2022_v24, 0.0  ;;  %v2025_v7 = vadd.f32 %v10277_v42, %v2024_v2  ;;  %v2255_v15 = vpop.f32.mrb[142].mxu1  ;;  %v8452_v37 = vpop.f32.mrb[143].mxu0  ;;  %v4122_v14 = vsel %vm676_vm2, %v4044_v60, %v4051_v22  ;;  %v4608_v60 = vshrl.u32 %v10516_v0, 16 }
 0x218   : > { %v2275_v59 = vmax.f32 %v2253_v51, 0.0  ;;  %v2256_v36 = vadd.f32 %v10277_v42, %v2255_v15  ;;  %v8492_v21 = vpop.f32.mrb[143].mxu1  ;;  %v4032_v42 = vpop.permute.xlu0 %4031  ;;  %v10802_v37 = vld [vmem:[%s12643_s3 + $0x88] sm:$0xff]  }
 0x219   : > { %v2056_v34 = vmax.f32 %v10693_v28, %v2044_v17  ;;  %v2045_v40 = vmax.f32 %v2025_v7, 0.0  ;;  %8690 = vmatmul.mubr.msk.bf16.gmra.mrb[248].mxu0 %vm508_vm1, %v9082_v27  ;;  %v4053_v31 = vpop.permute.xlu1 %4052  ;;  %v4046_v17 = vsel %vm4041_vm4, %v4043_v9, %v10260_v35  ;;  %v10810_v35 = vld [vmem:[%s12643_s3 + $0xd0] sm:$0xff]   ;;  %v9093_v21 = vld [vmem:[%s9532_s29 + $0x3f8] sm:$0xff]  }
 0x21a   : > { %v2287_v32 = vmax.f32 %v10697_v29, %v2275_v59  ;;  %v2276_v46 = vmax.f32 %v2256_v36, 0.0  ;;  %8730 = vmatmul.mubr.msk.bf16.gmra.mrb[248].mxu1 %vm508_vm1, %v9083_v4  ;;  %8737 = vmatprep.mubr.msk.bf16.mxu0 %vm9384_vm0, %v12653_v1  ;;  %v4126_v7 = vsel %vm676_vm2, %v4046_v17, %v4053_v31 }
 0x21b   : > { %v2060_v8 = vmax.f32 %v2058_v12, %v2056_v34  ;;  %v2057_v28 = vmax.f32 %v10701_v61, %v2045_v40  ;;  %4410 = vmatprep.mubr.bf16.mxu1 %v4122_v14  ;;  %v10780_v61 = vld [vmem:[%s12643_s3 + $0x80] sm:$0xff]   ;;  %v10824_v14 = vld [vmem:[%s12643_s3 + $0x90] sm:$0xff]  }
 0x21c   : > { %v2291_v3 = vmax.f32 %v2289_v25, %v2287_v32  ;;  %v2288_v23 = vmax.f32 %v10705_v63, %v2276_v46  ;;  %v10770_v6 = vpop.f32.mrb[144].mxu0  ;;  %v4055_v15 = vpop.permute.xlu0 %4054 }
 0x21d   : > { %v2061_v29 = vmax.f32 %v2059_v20, %v2057_v28  ;;  %v8499_v24 = vpop.f32.mrb[145].mxu0  ;;  %v10773_v27 = vpop.f32.mrb[144].mxu1  ;;  %v10787_v20 = vld [vmem:[%s12643_s3 + $0xc8] sm:$0xff]  }
 0x21e   : > { %v2292_v22 = vmax.f32 %v2290_v48, %v2288_v23  ;;  %v10775_v56 = vpop.f32.mrb[146].mxu0  ;;  %v8539_v51 = vpop.f32.mrb[145].mxu1  ;;  %v9234_v48 = vld [vmem:[#allocation2] sm:$0xff]  ;;  %v4130_v24 = vsel %vm676_vm2, %v10283_v43, %v4055_v15 }
 0x21f   : > { %v2062_v26 = vpack.c.bf16 %v2061_v29, %v2060_v8  ;;  %v8500_v12 = vpop.f32.mrb[147].mxu0  ;;  %v10782_v25 = vpop.f32.mrb[146].mxu1  ;;  %v4112_v4 = vsel %vm676_vm2, %v9234_v48, %v4032_v42  ;;  %v9098_v15 = vld [vmem:[%s9532_s29 + $0x400] sm:$0xff]  }
 0x220   : > { %v2293_v63 = vpack.c.bf16 %v2292_v22, %v2291_v3  ;;  %v8540_v2 = vpop.f32.mrb[147].mxu1  ;;  %v4034_v59 = vpop.permute.xlu1 %4033 }
 0x221   : > { %2063 = vst.msk [vmem:[#allocation2 + $0x30] sm:$0xff] %vm676_vm2, %v2062_v26  ;;  %8738 = vmatmul.mubr.msk.bf16.vlgmr.msra.gmra.mrb[252].mxu0 %vm508_vm1, %v9088_v58  ;;  %v4115_v31 = vsel %vm676_vm2, %v10752_v30, %v4034_v59  ;;  %v4097_v30 = vpop.permute.xlu0 %4096  ;;  %v10857_v58 = vld [vmem:[%s12643_s3 + $0x98] sm:$0xff]   ;;  %v4584_v2 = vld [vmem:[#allocation2 + $0x20] sm:$0xfe] }
 0x222   : > { %2294 = vst.msk [vmem:[#allocation2 + $0x38] sm:$0xff] %vm676_vm2, %v2293_v63  ;;  %4411 = vmatmul.mubr.bf16.vlgmr.msra.gmra.mrb[252].mxu1 %v4112_v4  ;;  %8741 = vmatprep.mubr.msk.bf16.mxu0 %vm9384_vm0, %v12653_v1  ;;  %v10867_v63 = vld [vmem:[%s12643_s3 + $0xe0] sm:$0xff]  }
 0x223   : > { %7758 = vmatpush3.bf16.msra.mxu1 %v10780_v61  ;;  %4418 = vmatprep.mubr.bf16.mxu1 %v4126_v7 }
 0x224   : > { %v10804_v36 = vpop.f32.mrb[148].mxu0  ;;  %7759 = vmatprep.subr.bf16.mxu1 %v10787_v20  ;;  %7799 = vmatpush3.bf16.msra.mxu0 %v10454_v62 }
 0x225   : > { %v8503_v9 = vpop.f32.mrb[149].mxu0  ;;  %v10814_v34 = vpop.f32.mrb[148].mxu1  ;;  %7800 = vmatprep.subr.bf16.mxu0 %v10461_v18  ;;  %v10834_v18 = vld [vmem:[%s12643_s3 + $0xd8] sm:$0xff]  }
 0x226   : > { %v10817_v40 = vpop.f32.mrb[150].mxu0  ;;  %v8543_v32 = vpop.f32.mrb[149].mxu1 }
 0x227   : > { %7760 = vmatpush3.bf16.msra.mxu1 %v10802_v37  ;;  %v8504_v46 = vpop.f32.mrb[151].mxu0  ;;  %v10826_v62 = vpop.f32.mrb[150].mxu1 }
 0x228   : > { %7761 = vmatprep.subr.bf16.mxu1 %v10810_v35  ;;  %v10829_v42 = vld [vmem:[#allocation2 + $0x30] sm:$0xff]  ;;  %v8544_v28 = vpop.f32.mrb[151].mxu1  ;;  %7801 = vmatpush3.bf16.msra.mxu0 %v10477_v5  ;;  %v4610_v5 = vor.u32 %v4608_v60, %v10558_v52  ;;  %v4036_v52 = vpop.permute.xlu1 %4035  ;;  %v10890_v46 = vld [vmem:[%s12643_s3 + $0xa0] sm:$0xff]  }
 0x229   : > { %v10836_v8 = vld [vmem:[#allocation2 + $0x30] sm:$0x1]  ;;  %8742 = vmatmul.mubr.msk.bf16.gmra.mrb[0].mxu0 %vm508_vm1, %v9093_v21  ;;  %4638 = vrot.lane.b32.xlu0 %v10829_v42, %s12670_s26  ;;  %v4641_v3 = vshll.u32 %v10829_v42, 16  ;;  %v10846_v29 = vld [vmem:[#allocation2 + $0x38] sm:$0xff]  ;;  %v4645_v26 = vshrl.u32 %v10829_v42, 16 }
 0x22a   : > { %v4612_v23 = vshll.u32 %v10836_v8, 16  ;;  %4419 = vmatmul.mubr.bf16.gmra.mrb[0].mxu1 %v4115_v31  ;;  %8745 = vmatprep.mubr.msk.bf16.mxu0 %vm9384_vm0, %v12653_v1  ;;  %v4668_v43 = vshll.u32 %v10846_v29, 16  ;;  %v10869_v48 = vld [vmem:[#allocation2 + $0x38] sm:$0x1]  ;;  %v4655_v31 = vrot.slane %v4584_v2, 1 }
 0x22b   : > { %7762 = vmatpush3.bf16.msra.mxu1 %v10824_v14  ;;  %4426 = vmatprep.mubr.bf16.mxu1 %v4130_v24  ;;  %v4643_v22 = vrot.slane %v4641_v3, 1  ;;  %v4649_v9 = vshll.u32 %v10869_v48, 16 }
 0x22c   : > { %v4614_v51 = vrot.slane %v4612_v23, 1  ;;  %v10861_v12 = vpop.f32.mrb[152].mxu0  ;;  %7763 = vmatprep.subr.bf16.mxu1 %v10834_v18  ;;  %7802 = vmatprep.subr.bf16.mxu0 %v10486_v53  ;;  %v10892_v28 = vrot.slane %v4668_v43, 1  ;;  %v10904_v23 = vld [vmem:[%s12643_s3 + $0xe8] sm:$0xff]  }
 0x22d   : > { %v8507_v4 = vpop.f32.mrb[153].mxu0  ;;  %v10873_v17 = vsel %vm4002_vm3, %v4610_v5, %v4643_v22  ;;  %v4647_v59 = vor.u32 %v4645_v26, %v4643_v22  ;;  %v10878_v21 = vpop.f32.mrb[152].mxu1  ;;  %7803 = vmatpush3.bf16.msra.mxu0 %v10502_v11  ;;  %v10895_v11 = vrot.slane %v10516_v0, 1 }
 0x22e   : > { %v4615_v7 = vsel %vm4002_vm3, %v4610_v5, %v4614_v51  ;;  %4680 = vrot.lane.b32.xlu0 %v10873_v17, %s12670_s26  ;;  %v10884_v53 = vpop.f32.mrb[154].mxu0  ;;  %v8547_v60 = vpop.f32.mrb[153].mxu1  ;;  %7804 = vmatprep.subr.bf16.mxu0 %v10510_v13  ;;  %v9235_v5 = vld [vmem:[#allocation2 + $0x10] sm:$0xff]  ;;  %v4651_v51 = vrot.slane %v4649_v9, 1  ;;  %v10915_v13 = vld [vmem:[%s12684_s2] ss:$0 sm:$0xff] }
 0x22f   : > { %4620 = vrot.lane.b32.xlu1 %v4615_v7, %s12670_s26  ;;  %7764 = vmatpush3.bf16.msra.mxu1 %v10857_v58  ;;  %v8508_v32 = vpop.f32.mrb[155].mxu0  ;;  %v10897_v3 = vpop.f32.mrb[154].mxu1  ;;  %v4118_v22 = vsel %vm676_vm2, %v9235_v5, %v4036_v52  ;;  %v10910_v0 = vsel %vm4002_vm3, %v4647_v59, %v10892_v28  ;;  %v2420_v26 = vadd.f32 %v10915_v13, %v10770_v6  ;;  %v10930_v6 = vld [vmem:[%s12643_s3 + $0xa8] sm:$0xff]   ;;  %v10943_v7 = vld [vmem:[%s12643_s3 + $0xf0] sm:$0xff]  }
 0x230   : > { %7765 = vmatprep.subr.bf16.mxu1 %v10867_v63  ;;  %v8548_v24 = vpop.f32.mrb[155].mxu1  ;;  %v4145_v43 = vsel %vm676_vm2, %v9235_v5, %v4097_v30  ;;  %v2651_v52 = vadd.f32 %v10915_v13, %v10773_v27  ;;  %v4656_v2 = vsel %vm4041_vm4, %v4655_v31, %v10895_v11  ;;  %v10933_v30 = vrot.slane %v10829_v42, 1  ;;  %v9103_v60 = vld [vmem:[%s9532_s29 + $0x408] sm:$0xff]  }
 0x231   : > { %8746 = vmatmul.mubr.msk.bf16.gmra.mrb[4].mxu0 %vm508_vm1, %v9098_v15  ;;  %v10936_v4 = vsel %vm4002_vm3, %v4647_v59, %v4651_v51  ;;  %v2654_v15 = vadd.f32 %v10915_v13, %v10782_v25  ;;  %v2423_v42 = vadd.f32 %v10915_v13, %v10775_v56  ;;  %v2490_v31 = vmax.f32 %v2420_v26, 0.0 }
 0x232   : > { %4427 = vmatmul.mubr.bf16.gmra.mrb[4].mxu1 %v4118_v22  ;;  %4682 = vrot.lane.b32.xlu0 %v10910_v0, %s12670_s26  ;;  %v2721_v5 = vmax.f32 %v2651_v52, 0.0  ;;  %v4658_v56 = vsel %vm4041_vm4, %v10895_v11, %v10933_v30  ;;  %v4659_v26 = vrot.slane %v10869_v48, 1  ;;  %v2428_v48 = vadd.f32 %v10915_v13, %v10804_v36  ;;  %v10995_v36 = vld [vmem:[%s12643_s3 + $0xb8] sm:$0xff]  }
 0x233   : > { %7766 = vmatpush3.bf16.msra.mxu1 %v10890_v46  ;;  %4467 = vmatprep.mubr.bf16.mxu1 %v4145_v43 }
 0x234   : > { %4661 = vrot.lane.b32.xlu1 %v4656_v2, %s12670_s26  ;;  %v2443_v27 = vpop.f32.mrb[156].mxu0  ;;  %7767 = vmatprep.subr.bf16.mxu1 %v10904_v23 }
 0x235   : > { %v2444_v9 = vadd.f32 %v10915_v13, %v2443_v27  ;;  %v8511_v59 = vpop.f32.mrb[157].mxu0  ;;  %8749 = vmatprep.mubr.msk.bf16.mxu0 %vm9384_vm0, %v12653_v1  ;;  %v2674_v32 = vpop.f32.mrb[156].mxu1  ;;  %7805 = vmatpush3.bf16.msra.mxu0 %v10530_v55  ;;  %v10964_v55 = vld [vmem:[%s12643_s3 + $0xb0] sm:$0xff]   ;;  %v2722_v27 = vmax.f32 %v2654_v15, 0.0 }
 0x236   : > { %v2446_v24 = vpop.f32.mrb[158].mxu0  ;;  %v2675_v22 = vadd.f32 %v10915_v13, %v2674_v32  ;;  %v8551_v51 = vpop.f32.mrb[157].mxu1  ;;  %7806 = vmatprep.subr.bf16.mxu0 %v10541_v19  ;;  %v10972_v19 = vld [vmem:[%s12643_s3 + $0xf8] sm:$0xff]  }
 0x237   : > { %v2496_v25 = vmax.f32 %v2444_v9, 0.0  ;;  %7768 = vmatpush3.bf16.msra.mxu1 %v10930_v6  ;;  %v2447_v43 = vadd.f32 %v10915_v13, %v2446_v24  ;;  %v8512_v2 = vpop.f32.mrb[159].mxu0  ;;  %v2677_v52 = vpop.f32.mrb[158].mxu1  ;;  %v2491_v24 = vmax.f32 %v2423_v42, 0.0 }
 0x238   : > { %4663 = vrot.lane.b32.xlu1 %v4658_v56, %s12670_s26  ;;  %7769 = vmatprep.subr.bf16.mxu1 %v10943_v7  ;;  %v2727_v9 = vmax.f32 %v2675_v22, 0.0  ;;  %v2678_v59 = vadd.f32 %v10915_v13, %v2677_v52  ;;  %v8552_v32 = vpop.f32.mrb[159].mxu1  ;;  %v2659_v56 = vadd.f32 %v10915_v13, %v10814_v34  ;;  %v4078_v34 = vpop.permute.xlu1 %4077  ;;  %v9107_v52 = vld [vmem:[%s9532_s29 + $0x410] sm:$0xff]  }
 0x239   : > { %v10975_v51 = vmax.f32 %v2490_v31, %v2496_v25  ;;  %v2497_v2 = vmax.f32 %v2447_v43, 0.0  ;;  %8750 = vmatmul.mubr.msk.bf16.gmra.mrb[8].mxu0 %vm508_vm1, %v9103_v60  ;;  %v4660_v60 = vsel %vm4041_vm4, %v10933_v30, %v4659_v26  ;;  %v2431_v25 = vadd.f32 %v10915_v13, %v10817_v40 }
 0x23a   : > { %8753 = vmatprep.mubr.msk.bf16.mxu0 %vm9384_vm0, %v12653_v1  ;;  %v10984_v15 = vmax.f32 %v2721_v5, %v2727_v9  ;;  %v2728_v22 = vmax.f32 %v2678_v59, 0.0  ;;  %7807 = vmatpush3.bf16.msra.mxu0 %v10554_v33  ;;  %v2662_v33 = vadd.f32 %v10915_v13, %v10826_v62  ;;  %v2723_v59 = vmax.f32 %v2659_v56, 0.0 }
 0x23b   : > { %v10987_v42 = vmax.f32 %v2491_v24, %v2497_v2  ;;  %7770 = vmatpush3.bf16.msra.mxu1 %v10964_v55  ;;  %7808 = vmatprep.subr.bf16.mxu0 %v10564_v54  ;;  %v2492_v2 = vmax.f32 %v2428_v48, 0.0 }
 0x23c   : > { %4665 = vrot.lane.b32.xlu1 %v4660_v60, %s12670_s26  ;;  %v2451_v31 = vpop.f32.mrb[160].mxu0  ;;  %7771 = vmatprep.subr.bf16.mxu1 %v10972_v19  ;;  %v11002_v5 = vmax.f32 %v2722_v27, %v2728_v22  ;;  %v11015_v22 = vld [vmem:[%s12643_s3 + $0x100] sm:$0xff]   ;;  %v2724_v56 = vmax.f32 %v2662_v33, 0.0 }
 0x23d   : > { %v2452_v43 = vadd.f32 %v10915_v13, %v2451_v31  ;;  %v8515_v26 = vpop.f32.mrb[161].mxu0  ;;  %v2682_v9 = vpop.f32.mrb[160].mxu1 }
 0x23e   : > { %v2454_v54 = vpop.f32.mrb[162].mxu0  ;;  %v2683_v32 = vadd.f32 %v10915_v13, %v2682_v9  ;;  %v8555_v24 = vpop.f32.mrb[161].mxu1  ;;  %7809 = vmatpush3.bf16.msra.mxu0 %v10591_v45  ;;  %v2493_v26 = vmax.f32 %v2431_v25, 0.0  ;;  %v11041_v25 = vld [vmem:[%s12643_s3 + $0x108] sm:$0xff]  }
 0x23f   : > { %v2498_v60 = vmax.f32 %v2452_v43, 0.0  ;;  %7772 = vmatpush3.bf16.msra.mxu1 %v10995_v36  ;;  %v2455_v62 = vadd.f32 %v10915_v13, %v2454_v54  ;;  %v8516_v27 = vpop.f32.mrb[163].mxu0  ;;  %v2685_v40 = vpop.f32.mrb[162].mxu1  ;;  %7810 = vmatprep.subr.bf16.mxu0 %v10601_v57  ;;  %v4134_v43 = vsel %vm676_vm2, %v10248_v49, %v4078_v34  ;;  %v2667_v57 = vadd.f32 %v10915_v13, %v10878_v21 }
 0x240   : > { %4984 = vrot.lane.b32.xlu1 %v10910_v0, %s12670_s26  ;;  %v2729_v45 = vmax.f32 %v2683_v32, 0.0  ;;  %v2686_v48 = vadd.f32 %v10915_v13, %v2685_v40  ;;  %v8556_v31 = vpop.f32.mrb[163].mxu1  ;;  %8773 = vmatprep.subr.bf16.mxu1 %v12653_v1  ;;  %v2436_v49 = vadd.f32 %v10915_v13, %v10861_v12  ;;  %v2439_v12 = vadd.f32 %v10915_v13, %v10884_v53 }
 0x241   : > { %v11024_v9 = vmax.f32 %v2492_v2, %v2498_v60  ;;  %v2499_v54 = vmax.f32 %v2455_v62, 0.0  ;;  %8754 = vmatmul.mubr.msk.bf16.gmra.mrb[12].mxu0 %vm508_vm1, %v9107_v52  ;;  %v2670_v52 = vadd.f32 %v10915_v13, %v10897_v3  ;;  %v9108_v2 = vld [vmem:[%s9532_s29 + $0x418] sm:$0xff]   ;;  %v2725_v62 = vmax.f32 %v2667_v57, 0.0 }
 0x242   : > { %4468 = vmatmul.mubr.bf16.vlgmr.msra.gmra.mrb[8].mxu1 %v4134_v43  ;;  %8757 = vmatprep.mubr.msk.bf16.mxu0 %vm9384_vm0, %v12653_v1  ;;  %v11031_v0 = vmax.f32 %v2723_v59, %v2729_v45  ;;  %v2730_v33 = vmax.f32 %v2686_v48, 0.0  ;;  %v2494_v3 = vmax.f32 %v2436_v49, 0.0  ;;  %v2495_v57 = vmax.f32 %v2439_v12, 0.0 }
 0x243   : > { %v11035_v34 = vmax.f32 %v2493_v26, %v2499_v54  ;;  %8774 = vmatpush3.bf16.msra.mxu1 %v11015_v22  ;;  %7811 = vmatpush3.bf16.msra.mxu0 %v10613_v16  ;;  %v2726_v53 = vmax.f32 %v2670_v52, 0.0 }
 0x244   : > { %v2459_v21 = vpop.f32.mrb[164].mxu0  ;;  %v11046_v59 = vmax.f32 %v2724_v56, %v2730_v33  ;;  %8775 = vmatprep.subr.bf16.mxu1 %v12653_v1  ;;  %7812 = vmatprep.subr.bf16.mxu0 %v10622_v41  ;;  %v11060_v41 = vld [vmem:[%s12643_s3 + $0x110] sm:$0xff]  }
 0x245   : > { %v2460_v32 = vadd.f32 %v10915_v13, %v2459_v21  ;;  %v8519_v24 = vpop.f32.mrb[165].mxu0  ;;  %v2690_v60 = vpop.f32.mrb[164].mxu1 }
 0x246   : > { %v2462_v16 = vpop.f32.mrb[166].mxu0  ;;  %v2691_v27 = vadd.f32 %v10915_v13, %v2690_v60  ;;  %v8559_v40 = vpop.f32.mrb[165].mxu1 }
 0x247   : > { %v2500_v56 = vmax.f32 %v2460_v32, 0.0  ;;  %v2463_v45 = vadd.f32 %v10915_v13, %v2462_v16  ;;  %v8520_v48 = vpop.f32.mrb[167].mxu0  ;;  %v2693_v31 = vpop.f32.mrb[166].mxu1  ;;  %8776 = vmatpush3.bf16.msra.mxu1 %v11041_v25  ;;  %7813 = vmatpush3.bf16.msra.mxu0 %v10647_v10  ;;  %v11079_v32 = vld [vmem:[%s12643_s3 + $0x118] sm:$0xff]  }
 0x248   : > { %v2731_v43 = vmax.f32 %v2691_v27, 0.0  ;;  %v2694_v26 = vadd.f32 %v10915_v13, %v2693_v31  ;;  %v8560_v54 = vpop.f32.mrb[167].mxu1  ;;  %8777 = vmatprep.subr.bf16.mxu1 %v12653_v1  ;;  %8793 = vmatprep.subr.bf16.mxu0 %v12653_v1 }
 0x249   : > { %v11066_v33 = vmax.f32 %v2494_v3, %v2500_v56  ;;  %v2501_v49 = vmax.f32 %v2463_v45, 0.0  ;;  %8758 = vmatmul.mubr.msk.bf16.gmra.mrb[16].mxu0 %vm508_vm1, %v9108_v2 }
 0x24a   : > { %v11069_v21 = vmax.f32 %v2725_v62, %v2731_v43  ;;  %8761 = vmatprep.mubr.msk.bf16.mxu0 %vm9384_vm0, %v12653_v1  ;;  %v2732_v10 = vmax.f32 %v2694_v26, 0.0  ;;  %v9109_v62 = vld [vmem:[%s9532_s29 + $0x420] sm:$0xff]  }
 0x24b   : > { %v11073_v52 = vmax.f32 %v2495_v57, %v2501_v49  ;;  %8778 = vmatpush3.bf16.msra.mxu1 %v11060_v41 }
 0x24c   : > { %v2467_v12 = vpop.f32.mrb[168].mxu0  ;;  %v11081_v24 = vmax.f32 %v2726_v53, %v2732_v10  ;;  %8779 = vmatprep.subr.bf16.mxu1 %v12653_v1 }
 0x24d   : > { %v2468_v2 = vadd.f32 %v10915_v13, %v2467_v12  ;;  %v8523_v60 = vpop.f32.mrb[169].mxu0  ;;  %v2698_v16 = vpop.f32.mrb[168].mxu1 }
 0x24e   : > { %v2470_v27 = vpop.f32.mrb[170].mxu0  ;;  %v2699_v40 = vadd.f32 %v10915_v13, %v2698_v16  ;;  %v8563_v3 = vpop.f32.mrb[169].mxu1 }
 0x24f   : > { %v2502_v56 = vmax.f32 %v2468_v2, 0.0  ;;  %v2471_v45 = vadd.f32 %v10915_v13, %v2470_v27  ;;  %v8524_v48 = vpop.f32.mrb[171].mxu0  ;;  %v2701_v31 = vpop.f32.mrb[170].mxu1  ;;  %8780 = vmatpush3.bf16.msra.mxu1 %v11079_v32  ;;  %v9110_v27 = vld [vmem:[%s9532_s29 + $0x428] sm:$0xff]  }
 0x250   : > { %v2733_v53 = vmax.f32 %v2699_v40, 0.0  ;;  %v2702_v43 = vadd.f32 %v10915_v13, %v2701_v31  ;;  %v8564_v26 = vpop.f32.mrb[171].mxu1  ;;  %7832 = vmatprep.subr.bf16.mxu1 %v10657_v44 }
 0x251   : > { %v11092_v54 = vmax.f32 %v10975_v51, %v2502_v56  ;;  %v2503_v57 = vmax.f32 %v2471_v45, 0.0  ;;  %8762 = vmatmul.mubr.msk.bf16.gmra.mrb[20].mxu0 %vm508_vm1, %v9109_v62  ;;  %v4080_v62 = vpop.permute.xlu1 %4079 }
 0x252   : > { %v11096_v49 = vmax.f32 %v10984_v15, %v2733_v53  ;;  %v2734_v10 = vmax.f32 %v2702_v43, 0.0  ;;  %8765 = vmatprep.mubr.msk.bf16.mxu0 %vm9384_vm0, %v12653_v1 }
 0x253   : > { %v11101_v12 = vmax.f32 %v10987_v42, %v2503_v57  ;;  %v11113_v57 = vld [vmem:[#allocation2 + $0x18] sm:$0xff] }
 0x254   : > { %v2475_v2 = vpop.f32.mrb[172].mxu0  ;;  %v11104_v60 = vmax.f32 %v11002_v5, %v2734_v10 }
 0x255   : > { %v2476_v44 = vadd.f32 %v10915_v13, %v2475_v2  ;;  %v8527_v51 = vpop.f32.mrb[173].mxu0  ;;  %v2706_v16 = vpop.f32.mrb[172].mxu1 }
 0x256   : > { %v2478_v40 = vpop.f32.mrb[174].mxu0  ;;  %v2707_v15 = vadd.f32 %v10915_v13, %v2706_v16  ;;  %v8567_v48 = vpop.f32.mrb[173].mxu1 }
 0x257   : > { %v2504_v3 = vmax.f32 %v2476_v44, 0.0  ;;  %v2479_v56 = vadd.f32 %v10915_v13, %v2478_v40  ;;  %v8528_v45 = vpop.f32.mrb[175].mxu0  ;;  %v2709_v53 = vpop.f32.mrb[174].mxu1  ;;  %v4138_v44 = vsel %vm676_vm2, %v10264_v38, %v4080_v62  ;;  %v11125_v38 = vld [vmem:[#allocation2 + $0x20] sm:$0xff] }
 0x258   : > { %v2735_v42 = vmax.f32 %v2707_v15, 0.0  ;;  %v2710_v26 = vadd.f32 %v10915_v13, %v2709_v53  ;;  %v8568_v2 = vpop.f32.mrb[175].mxu1  ;;  %v4082_v16 = vpop.permute.xlu1 %4081  ;;  %v4581_v15 = vld [vmem:[#allocation2 + $0x18] sm:$0xfe]  ;;  %v9113_v53 = vld [vmem:[%s9532_s29 + $0x430] sm:$0xff]  }
 0x259   : > { %v4099_v31 = vpop.permute.xlu0 %4098  ;;  %v2516_v5 = vmax.f32 %v11024_v9, %v2504_v3  ;;  %v2505_v43 = vmax.f32 %v2479_v56, 0.0  ;;  %8766 = vmatmul.mubr.msk.bf16.gmra.mrb[24].mxu0 %vm508_vm1, %v9110_v27 }
 0x25a   : > { %v4148_v10 = vsel %vm676_vm2, %v11113_v57, %v4099_v31  ;;  %v2747_v51 = vmax.f32 %v11031_v0, %v2735_v42  ;;  %8769 = vmatprep.mubr.msk.bf16.mxu0 %vm9384_vm0, %v12653_v1  ;;  %v2736_v40 = vmax.f32 %v2710_v26, 0.0  ;;  %v11128_v0 = vrot.slane %v11125_v38, 1 }
 0x25b   : > { %4475 = vmatprep.mubr.bf16.mxu1 %v4148_v10  ;;  %v2520_v9 = vmax.f32 %v11092_v54, %v2516_v5  ;;  %v2517_v27 = vmax.f32 %v11035_v34, %v2505_v43  ;;  %v4626_v43 = vrot.slane %v4581_v15, 1 }
 0x25c   : > { %4476 = vmatmul.mubr.bf16.gmra.mrb[12].mxu1 %v4138_v44  ;;  %v2751_v3 = vmax.f32 %v11096_v49, %v2747_v51  ;;  %v2483_v45 = vpop.f32.mrb[176].mxu0  ;;  %v2748_v54 = vmax.f32 %v11046_v59, %v2736_v40 }
 0x25d   : > { %v4101_v56 = vpop.permute.xlu0 %4100  ;;  %v2521_v62 = vmax.f32 %v11101_v12, %v2517_v27  ;;  %v2714_v48 = vpop.f32.mrb[176].mxu1  ;;  %v2484_v42 = vadd.f32 %v10915_v13, %v2483_v45 }
 0x25e   : > { %v8531_v34 = vpop.f32.mrb[177].mxu0  ;;  %v4151_v31 = vsel %vm676_vm2, %v11125_v38, %v4101_v56  ;;  %v2715_v49 = vadd.f32 %v10915_v13, %v2714_v48  ;;  %v8571_v5 = vpop.f32.mrb[177].mxu1  ;;  %v2752_v26 = vmax.f32 %v11104_v60, %v2748_v54  ;;  %v4628_v56 = vsel %vm4041_vm4, %v4626_v43, %v11128_v0 }
 0x25f   : > { %4483 = vmatprep.mubr.bf16.mxu1 %v4151_v31  ;;  %v2506_v10 = vmax.f32 %v2484_v42, 0.0  ;;  %v2717_v2 = vpop.f32.mrb[178].mxu1  ;;  %v2486_v12 = vpop.f32.mrb[178].mxu0  ;;  %v4142_v54 = vsel %vm676_vm2, %v10567_v39, %v4082_v16  ;;  %v4001_v31 = vld [vmem:[#allocation2 + $0x10] sm:$0xfe] }
 0x260   : > { %v2737_v44 = vmax.f32 %v2715_v49, 0.0  ;;  %v2718_v59 = vadd.f32 %v10915_v13, %v2717_v2  ;;  %v2487_v51 = vadd.f32 %v10915_v13, %v2486_v12  ;;  %v8532_v27 = vpop.f32.mrb[179].mxu0  ;;  %v8572_v60 = vpop.f32.mrb[179].mxu1  ;;  %v4105_v16 = vrot.slane %v4001_v31, 1 }
 0x261   : > { %v4635_v40 = vpop.permute.xlu0 %4634  ;;  %v2518_v45 = vmax.f32 %v11066_v33, %v2506_v10  ;;  %8770 = vmatmul.mubr.msk.bf16.gmra.mrb[28].mxu0 %vm508_vm1, %v9113_v53  ;;  %v4617_v49 = vpop.permute.xlu1 %4616 }
 0x262   : > { %v4706_v15 = vsel %vm676_vm2, %v4628_v56, %v4635_v40  ;;  %v2749_v48 = vmax.f32 %v11069_v21, %v2737_v44  ;;  %v2738_v42 = vmax.f32 %v2718_v59, 0.0  ;;  %v2507_v34 = vmax.f32 %v2487_v51, 0.0 }
 0x263   : > { %4778 = vmatprep.mubr.bf16.mxu0 %v4706_v15  ;;  %v2522_v5 = vmax.f32 %v2520_v9, %v2518_v45  ;;  %v4630_v40 = vsel %vm4041_vm4, %v11128_v0, %v10895_v11 }
 0x264   : > { %4484 = vmatmul.mubr.bf16.gmra.mrb[16].mxu1 %v4142_v54  ;;  %v2753_v43 = vmax.f32 %v2751_v3, %v2749_v48  ;;  %v2750_v33 = vmax.f32 %v11081_v24, %v2738_v42  ;;  %v2519_v53 = vmax.f32 %v11073_v52, %v2507_v34  ;;  %v11150_v2 = vpop.f32.mrb[180].mxu0  ;;  %v4696_v52 = vsel %vm676_vm2, %v11113_v57, %v4617_v49  ;;  %v4952_v42 = vld [vmem:[#allocation2 + $0x38] sm:$0xfe] }
 0x265   : > { %v4637_v10 = vpop.permute.xlu0 %4636  ;;  %8781 = vmatprep.mubr.msk.bf16.mxu1 %vm9384_vm0, %v12653_v1  ;;  %v8579_v39 = vpop.f32.mrb[181].mxu0  ;;  %v4672_v34 = vshrl.u32 %v10846_v29, 16 }
 0x266   : > { %v11154_v21 = vpop.f32.mrb[180].mxu1  ;;  %v2754_v12 = vmax.f32 %v2752_v26, %v2750_v33  ;;  %v2523_v44 = vmax.f32 %v2521_v62, %v2519_v53  ;;  %v11156_v59 = vpop.f32.mrb[182].mxu0  ;;  %v4710_v26 = vsel %vm676_vm2, %v4630_v40, %v4637_v10  ;;  %v4106_v62 = vsel %vm4041_vm4, %v4105_v16, %v10300_v50 }
 0x267   : > { %v8619_v9 = vpop.f32.mrb[181].mxu1  ;;  %v8580_v3 = vpop.f32.mrb[183].mxu0  ;;  %v5023_v33 = vrot.slane %v4952_v42, 1 }
 0x268   : > { %v11158_v51 = vpop.f32.mrb[182].mxu1  ;;  %v2755_v24 = vpack.c.bf16 %v2754_v12, %v2753_v43  ;;  %v2524_v27 = vpack.c.bf16 %v2523_v44, %v2522_v5  ;;  %v4619_v57 = vpop.permute.xlu1 %4618  ;;  %v9239_v9 = vld [vmem:[#allocation2 + $0x28] sm:$0x1] }
 0x269   : > { %v8620_v56 = vpop.f32.mrb[183].mxu1  ;;  %4779 = vmatmul.mubr.bf16.vlgmr.msra.gmra.mrb[32].mxu0 %v4696_v52  ;;  %v4109_v3 = vrot.slane %v9239_v9, 1 }
 0x26a   : > { %2756 = vst.msk [vmem:[#allocation2 + $0x48] sm:$0xff] %vm676_vm2, %v2755_v24  ;;  %2525 = vst.msk [vmem:[#allocation2 + $0x40] sm:$0xff] %vm676_vm2, %v2524_v27  ;;  %4786 = vmatprep.mubr.bf16.mxu0 %v4710_v26  ;;  %8794 = vmatpush3.bf16.msra.mxu0 %v11015_v22 }
 0x26b   : > { %8795 = vmatprep.subr.bf16.mxu0 %v12653_v1 }
 0x26c   : > { %8782 = vmatmul.mubr.msk.bf16.vlgmr.msra.gmra.mrb[20].mxu1 %vm676_vm2, %v4106_v62  ;;  %v11173_v45 = vpop.f32.mrb[184].mxu0 }
 0x26d   : > { %8785 = vmatprep.mubr.msk.bf16.mxu1 %vm9384_vm0, %v12653_v1  ;;  %7833 = vmatpush3.bf16.msra.mxu1 %v10780_v61  ;;  %v8583_v15 = vpop.f32.mrb[185].mxu0  ;;  %v11178_v60 = vpop.f32.mrb[184].mxu1  ;;  %v4699_v61 = vsel %vm676_vm2, %v11125_v38, %v4619_v57 }
 0x26e   : > { %7834 = vmatprep.subr.bf16.mxu1 %v10787_v20  ;;  %v11181_v54 = vpop.f32.mrb[186].mxu0  ;;  %v8623_v22 = vpop.f32.mrb[185].mxu1  ;;  %8796 = vmatpush3.bf16.msra.mxu0 %v11041_v25  ;;  %v4108_v20 = vsel %vm4041_vm4, %v10300_v50, %v11128_v0  ;;  %v4674_v50 = vor.u32 %v4672_v34, %v10892_v28  ;;  %v2882_v34 = vadd.f32 %v10915_v13, %v11150_v2 }
 0x26f   : > { %v8584_v48 = vpop.f32.mrb[187].mxu0  ;;  %v11185_v31 = vpop.f32.mrb[186].mxu1  ;;  %8797 = vmatprep.subr.bf16.mxu0 %v12653_v1 }
 0x270   : > { %v8624_v49 = vpop.f32.mrb[187].mxu1  ;;  %v3113_v48 = vadd.f32 %v10915_v13, %v11154_v21 }
 0x271   : > { %7835 = vmatpush3.bf16.msra.mxu1 %v10802_v37  ;;  %4787 = vmatmul.mubr.bf16.gmra.mrb[36].mxu0 %v4699_v61  ;;  %v11194_v25 = vld [vmem:[#allocation2 + $0x40] sm:$0xff]  ;;  %v4948_v37 = vld [vmem:[#allocation2 + $0x48] sm:$0x1] }
 0x272   : > { %v11196_v5 = vld [vmem:[#allocation2 + $0x40] sm:$0x1]  ;;  %7836 = vmatprep.subr.bf16.mxu1 %v10810_v35  ;;  %v11200_v43 = vrot.slane %v11194_v25, 1  ;;  %v4972_v53 = vshll.u32 %v11194_v25, 16  ;;  %8798 = vmatpush3.bf16.msra.mxu0 %v11060_v41  ;;  %v4980_v12 = vshll.u32 %v4948_v37, 16  ;;  %v11216_v28 = vld [vmem:[#allocation2 + $0x48] sm:$0xff] }
 0x273   : > { %v4676_v38 = vshll.u32 %v11196_v5, 16  ;;  %8799 = vmatprep.subr.bf16.mxu0 %v12653_v1  ;;  %v4976_v27 = vshrl.u32 %v11194_v25, 16  ;;  %v5009_v15 = vshll.u32 %v11216_v28, 16  ;;  %v4999_v42 = vrot.slane %v4948_v37, 1 }
 0x274   : > { %8786 = vmatmul.mubr.msk.bf16.gmra.mrb[24].mxu1 %vm676_vm2, %v4108_v20  ;;  %v5024_v35 = vsel %vm4041_vm4, %v5023_v33, %v11200_v43  ;;  %v11210_v10 = vpop.f32.mrb[188].mxu0  ;;  %v4974_v16 = vrot.slane %v4972_v53, 1  ;;  %v4982_v57 = vrot.slane %v4980_v12, 1  ;;  %v2952_v37 = vmax.f32 %v2882_v34, 0.0 }
 0x275   : > { %v4678_v39 = vrot.slane %v4676_v38, 1  ;;  %8789 = vmatprep.mubr.msk.bf16.mxu1 %vm9384_vm0, %v12653_v1  ;;  %7837 = vmatpush3.bf16.msra.mxu1 %v10824_v14  ;;  %v8587_v41 = vpop.f32.mrb[189].mxu0  ;;  %v11218_v44 = vpop.f32.mrb[188].mxu1  ;;  %v11252_v49 = vrot.slane %v5009_v15, 1  ;;  %v11260_v2 = vsel %vm4041_vm4, %v11200_v43, %v4999_v42  ;;  %v3183_v38 = vmax.f32 %v3113_v48, 0.0 }
 0x276   : > { %5029 = vrot.lane.b32.xlu1 %v5024_v35, %s12670_s26  ;;  %7838 = vmatprep.subr.bf16.mxu1 %v10834_v18  ;;  %v11222_v24 = vpop.f32.mrb[190].mxu0  ;;  %v8627_v40 = vpop.f32.mrb[189].mxu1  ;;  %v9240_v18 = vld [vmem:[%s12643_s3 + $0xc0] sm:$0xff]   ;;  %v11233_v26 = vsel %vm4002_vm3, %v4674_v50, %v4974_v16  ;;  %v4978_v62 = vor.u32 %v4976_v27, %v4974_v16 }
 0x277   : > { %v4679_v52 = vsel %vm4002_vm3, %v4674_v50, %v4678_v39  ;;  %8800 = vmatpush3.bf16.msra.mxu0 %v11079_v32  ;;  %v8588_v14 = vpop.f32.mrb[191].mxu0  ;;  %v11227_v56 = vpop.f32.mrb[190].mxu1  ;;  %v4110_v32 = vsel %vm4041_vm4, %v11128_v0, %v4109_v3  ;;  %v11255_v0 = vrot.slane %v11216_v28, 1 }
 0x278   : > { %4684 = vrot.lane.b32.xlu0 %v4679_v52, %s12670_s26  ;;  %7907 = vmatprep.subr.bf16.mxu0 %v9240_v18  ;;  %v8628_v22 = vpop.f32.mrb[191].mxu1  ;;  %v11269_v33 = vsel %vm4002_vm3, %v4978_v62, %v11252_v49  ;;  %v3121_v14 = vadd.f32 %v10915_v13, %v11178_v60 }
 0x279   : > { %7839 = vmatpush3.bf16.msra.mxu1 %v10857_v58  ;;  %v3116_v58 = vadd.f32 %v10915_v13, %v11158_v51  ;;  %12685 = vst [vmem:[#allocation9_spill] sm:$0xff] %v11269_v33  ;;  %v3124_v22 = vadd.f32 %v10915_v13, %v11185_v31 }
 0x27a   : > { %4986 = vrot.lane.b32.xlu1 %v11233_v26, %s12670_s26  ;;  %7840 = vmatprep.subr.bf16.mxu1 %v10867_v63  ;;  %v4983_v63 = vsel %vm4002_vm3, %v4978_v62, %v4982_v57  ;;  %v2890_v57 = vadd.f32 %v10915_v13, %v11173_v45  ;;  %v3185_v34 = vmax.f32 %v3121_v14, 0.0 }
 0x27b   : > { %v3184_v12 = vmax.f32 %v3116_v58, 0.0 }
 0x27c   : > { %5002 = vrot.lane.b32.xlu0 %v10846_v29, %s12670_s26  ;;  %8790 = vmatmul.mubr.msk.bf16.gmra.mrb[28].mxu1 %vm676_vm2, %v4110_v32  ;;  %v2905_v61 = vpop.f32.mrb[192].mxu0  ;;  %v2885_v29 = vadd.f32 %v10915_v13, %v11156_v59 }
 0x27d   : > { %7841 = vmatpush3.bf16.msra.mxu1 %v10890_v46  ;;  %v2906_v21 = vadd.f32 %v10915_v13, %v2905_v61  ;;  %v8591_v51 = vpop.f32.mrb[193].mxu0  ;;  %v3136_v20 = vpop.f32.mrb[192].mxu1  ;;  %v2954_v61 = vmax.f32 %v2890_v57, 0.0 }
 0x27e   : > { %4988 = vrot.lane.b32.xlu1 %v4983_v63, %s12670_s26  ;;  %7842 = vmatprep.subr.bf16.mxu1 %v10904_v23  ;;  %v2908_v46 = vpop.f32.mrb[194].mxu0  ;;  %v3137_v53 = vadd.f32 %v10915_v13, %v3136_v20  ;;  %v8631_v50 = vpop.f32.mrb[193].mxu1  ;;  %v5026_v23 = vsel %vm4041_vm4, %v11200_v43, %v11255_v0  ;;  %v2953_v52 = vmax.f32 %v2885_v29, 0.0 }
 0x27f   : > { %v2958_v35 = vmax.f32 %v2906_v21, 0.0  ;;  %v2909_v59 = vadd.f32 %v10915_v13, %v2908_v46  ;;  %v8592_v39 = vpop.f32.mrb[195].mxu0  ;;  %v3139_v16 = vpop.f32.mrb[194].mxu1  ;;  %v3186_v21 = vmax.f32 %v3124_v22, 0.0  ;;  %v11314_v50 = vld [vmem:[%s12643_s3 + $0x40] sm:$0xff]  }
 0x280   : > { %5048 = vrot.lane.b32.xlu0 %v11269_v33, %s12670_s26  ;;  %v3189_v41 = vmax.f32 %v3137_v53, 0.0  ;;  %v3140_v9 = vadd.f32 %v10915_v13, %v3139_v16  ;;  %v8632_v3 = vpop.f32.mrb[195].mxu1 }
 0x281   : > { %7843 = vmatpush3.bf16.msra.mxu1 %v10930_v6  ;;  %v11280_v27 = vmax.f32 %v2952_v37, %v2958_v35  ;;  %v2959_v40 = vmax.f32 %v2909_v59, 0.0  ;;  %v3129_v37 = vadd.f32 %v10915_v13, %v11218_v44 }
 0x282   : > { %5031 = vrot.lane.b32.xlu1 %v5026_v23, %s12670_s26  ;;  %7844 = vmatprep.subr.bf16.mxu1 %v10943_v7  ;;  %v11286_v18 = vmax.f32 %v3183_v38, %v3189_v41  ;;  %v3190_v62 = vmax.f32 %v3140_v9, 0.0  ;;  %v2893_v7 = vadd.f32 %v10915_v13, %v11181_v54  ;;  %v3132_v23 = vadd.f32 %v10915_v13, %v11227_v56 }
 0x283   : > { %v11290_v15 = vmax.f32 %v2953_v52, %v2959_v40  ;;  %v2901_v41 = vadd.f32 %v10915_v13, %v11222_v24  ;;  %v3187_v52 = vmax.f32 %v3129_v37, 0.0 }
 0x284   : > { %5004 = vrot.lane.b32.xlu0 %v11194_v25, %s12670_s26  ;;  %v2913_v6 = vpop.f32.mrb[196].mxu0  ;;  %v11296_v32 = vmax.f32 %v3184_v12, %v3190_v62 }
 0x285   : > { %7845 = vmatpush3.bf16.msra.mxu1 %v10964_v55  ;;  %v2914_v60 = vadd.f32 %v10915_v13, %v2913_v6  ;;  %v8595_v48 = vpop.f32.mrb[197].mxu0  ;;  %v3144_v45 = vpop.f32.mrb[196].mxu1 }
 0x286   : > { %7846 = vmatprep.subr.bf16.mxu1 %v10972_v19  ;;  %v2916_v42 = vpop.f32.mrb[198].mxu0  ;;  %v3145_v58 = vadd.f32 %v10915_v13, %v3144_v45  ;;  %v8635_v63 = vpop.f32.mrb[197].mxu1  ;;  %v2955_v19 = vmax.f32 %v2893_v7, 0.0  ;;  %v3188_v7 = vmax.f32 %v3132_v23, 0.0  ;;  %v2957_v45 = vmax.f32 %v2901_v41, 0.0 }
 0x287   : > { %v2960_v31 = vmax.f32 %v2914_v60, 0.0  ;;  %v2917_v55 = vadd.f32 %v10915_v13, %v2916_v42  ;;  %v8596_v29 = vpop.f32.mrb[199].mxu0  ;;  %v3147_v54 = vpop.f32.mrb[198].mxu1 }
 0x288   : > { %5006 = vrot.lane.b32.xlu0 %v11216_v28, %s12670_s26  ;;  %v3191_v51 = vmax.f32 %v3145_v58, 0.0  ;;  %v3148_v20 = vadd.f32 %v10915_v13, %v3147_v54  ;;  %v8636_v46 = vpop.f32.mrb[199].mxu1 }
 0x289   : > { %7847 = vmatpush3.bf16.msra.mxu1 %v10995_v36  ;;  %v11309_v38 = vmax.f32 %v2954_v61, %v2960_v31  ;;  %v2961_v53 = vmax.f32 %v2917_v55, 0.0  ;;  %v2898_v36 = vadd.f32 %v10915_v13, %v11210_v10 }
 0x28a   : > { %7873 = vmatprep.subr.bf16.mxu1 %v11314_v50  ;;  %v11319_v35 = vmax.f32 %v3185_v34, %v3191_v51  ;;  %v3192_v59 = vmax.f32 %v3148_v20, 0.0 }
 0x28b   : > { %v11323_v39 = vmax.f32 %v2955_v19, %v2961_v53  ;;  %v2956_v62 = vmax.f32 %v2898_v36, 0.0 }
 0x28c   : > { %v2921_v16 = vpop.f32.mrb[200].mxu0  ;;  %v11327_v12 = vmax.f32 %v3186_v21, %v3192_v59  ;;  %v4631_v59 = vrot.slane %v10836_v8, 1 }
 0x28d   : > { %v2922_v9 = vadd.f32 %v10915_v13, %v2921_v16  ;;  %v8599_v44 = vpop.f32.mrb[201].mxu0  ;;  %v3152_v3 = vpop.f32.mrb[200].mxu1 }
 0x28e   : > { %v2924_v40 = vpop.f32.mrb[202].mxu0  ;;  %v3153_v14 = vadd.f32 %v10915_v13, %v3152_v3  ;;  %v8639_v10 = vpop.f32.mrb[201].mxu1  ;;  %v4632_v8 = vsel %vm4041_vm4, %v10895_v11, %v4631_v59 }
 0x28f   : > { %v2962_v57 = vmax.f32 %v2922_v9, 0.0  ;;  %v2925_v6 = vadd.f32 %v10915_v13, %v2924_v40  ;;  %v8600_v22 = vpop.f32.mrb[203].mxu0  ;;  %v3155_v56 = vpop.f32.mrb[202].mxu1 }
 0x290   : > { %v3193_v60 = vmax.f32 %v3153_v14, 0.0  ;;  %v3156_v48 = vadd.f32 %v10915_v13, %v3155_v56  ;;  %v8640_v24 = vpop.f32.mrb[203].mxu1 }
 0x291   : > { %v11335_v42 = vmax.f32 %v2956_v62, %v2962_v57  ;;  %v2963_v34 = vmax.f32 %v2925_v6, 0.0 }
 0x292   : > { %v11337_v58 = vmax.f32 %v3187_v52, %v3193_v60  ;;  %v3194_v63 = vmax.f32 %v3156_v48, 0.0 }
 0x293   : > { %v11339_v61 = vmax.f32 %v2957_v45, %v2963_v34 }
 0x294   : > { %v2929_v31 = vpop.f32.mrb[204].mxu0  ;;  %v11341_v55 = vmax.f32 %v3188_v7, %v3194_v63 }
 0x295   : > { %v2930_v29 = vadd.f32 %v10915_v13, %v2929_v31  ;;  %v8603_v54 = vpop.f32.mrb[205].mxu0  ;;  %v3160_v21 = vpop.f32.mrb[204].mxu1 }
 0x296   : > { %v2932_v51 = vpop.f32.mrb[206].mxu0  ;;  %v3161_v20 = vadd.f32 %v10915_v13, %v3160_v21  ;;  %v8643_v46 = vpop.f32.mrb[205].mxu1 }
 0x297   : > { %v2964_v19 = vmax.f32 %v2930_v29, 0.0  ;;  %v2933_v53 = vadd.f32 %v10915_v13, %v2932_v51  ;;  %v8604_v37 = vpop.f32.mrb[207].mxu0  ;;  %v3163_v36 = vpop.f32.mrb[206].mxu1  ;;  %v9242_v29 = vld [vmem:[#allocation2 + $0x28] sm:$0xff] }
 0x298   : > { %v3195_v16 = vmax.f32 %v3161_v20, 0.0  ;;  %v3164_v23 = vadd.f32 %v10915_v13, %v3163_v36  ;;  %v8644_v41 = vpop.f32.mrb[207].mxu1 }
 0x299   : > { %v11349_v9 = vmax.f32 %v11280_v27, %v2964_v19  ;;  %v2965_v44 = vmax.f32 %v2933_v53, 0.0 }
 0x29a   : > { %v11352_v3 = vmax.f32 %v11286_v18, %v3195_v16  ;;  %v3196_v52 = vmax.f32 %v3164_v23, 0.0 }
 0x29b   : > { %v11355_v40 = vmax.f32 %v11290_v15, %v2965_v44  ;;  %v4639_v14 = vpop.permute.xlu0 %4638 }
 0x29c   : > { %v2937_v10 = vpop.f32.mrb[208].mxu0  ;;  %v4714_v62 = vsel %vm676_vm2, %v4632_v8, %v4639_v14  ;;  %v11361_v57 = vmax.f32 %v11296_v32, %v3196_v52  ;;  %v11381_v8 = vld [vmem:[#allocation2 + $0x30] sm:$0xff] }
 0x29d   : > { %v2938_v27 = vadd.f32 %v10915_v13, %v2937_v10  ;;  %v8607_v6 = vpop.f32.mrb[209].mxu0  ;;  %4794 = vmatprep.mubr.bf16.mxu0 %v4714_v62  ;;  %v3168_v18 = vpop.f32.mrb[208].mxu1 }
 0x29e   : > { %v2940_v22 = vpop.f32.mrb[210].mxu0  ;;  %v3169_v56 = vadd.f32 %v10915_v13, %v3168_v18  ;;  %v8647_v15 = vpop.f32.mrb[209].mxu1 }
 0x29f   : > { %v2966_v7 = vmax.f32 %v2938_v27, 0.0  ;;  %v2941_v60 = vadd.f32 %v10915_v13, %v2940_v22  ;;  %v8608_v48 = vpop.f32.mrb[211].mxu0  ;;  %v3171_v11 = vpop.f32.mrb[210].mxu1 }
 0x2a0   : > { %v3197_v24 = vmax.f32 %v3169_v56, 0.0  ;;  %v4681_v45 = vpop.permute.xlu0 %4680  ;;  %v3172_v32 = vadd.f32 %v10915_v13, %v3171_v11  ;;  %v8648_v51 = vpop.f32.mrb[211].mxu1 }
 0x2a1   : > { %v4621_v34 = vpop.permute.xlu1 %4620  ;;  %v2978_v63 = vmax.f32 %v11309_v38, %v2966_v7  ;;  %v2967_v31 = vmax.f32 %v2941_v60, 0.0  ;;  %v4729_v21 = vsel %vm676_vm2, %v9242_v29, %v4681_v45  ;;  %v4587_v38 = vld [vmem:[#allocation2 + $0x28] sm:$0xfe]  ;;  %v11416_v45 = vld [vmem:[%s12643_s3 + $0x80] sm:$0xff]  }
 0x2a2   : > { %v4702_v54 = vsel %vm676_vm2, %v9242_v29, %v4621_v34  ;;  %v3209_v20 = vmax.f32 %v11319_v35, %v3197_v24  ;;  %v3198_v46 = vmax.f32 %v3172_v32, 0.0  ;;  %4835 = vmatprep.mubr.bf16.mxu1 %v4729_v21  ;;  %v11408_v24 = vld [vmem:[%s12643_s3 + $0x48] sm:$0xff]  }
 0x2a3   : > { %4795 = vmatmul.mubr.bf16.gmra.mrb[40].mxu0 %v4702_v54  ;;  %v2982_v19 = vmax.f32 %v11349_v9, %v2978_v63  ;;  %v2979_v53 = vmax.f32 %v11323_v39, %v2967_v31  ;;  %v11426_v29 = vld [vmem:[%s12643_s3 + $0xc8] sm:$0xff]   ;;  %v11429_v54 = vld [vmem:[#allocation2 + $0x38] sm:$0xff] }
 0x2a4   : > { %8801 = vmatprep.mubr.msk.bf16.mxu0 %vm9384_vm0, %v12653_v1  ;;  %v3213_v37 = vmax.f32 %v11352_v3, %v3209_v20  ;;  %v3210_v59 = vmax.f32 %v11327_v12, %v3198_v46  ;;  %v4683_v36 = vpop.permute.xlu0 %4682  ;;  %v2945_v16 = vpop.f32.mrb[212].mxu0  ;;  %v4689_v12 = vrot.slane %v4587_v38, 1  ;;  %v11432_v21 = vrot.slane %v11429_v54, 1 }
 0x2a5   : > { %v2983_v23 = vmax.f32 %v11355_v40, %v2979_v53  ;;  %v3176_v35 = vpop.f32.mrb[212].mxu1  ;;  %v2946_v41 = vadd.f32 %v10915_v13, %v2945_v16  ;;  %v8611_v44 = vpop.f32.mrb[213].mxu0  ;;  %v4732_v3 = vsel %vm676_vm2, %v11381_v8, %v4683_v36  ;;  %v11447_v53 = vld [vmem:[%s12643_s3 + $0x50] sm:$0xff]   ;;  %v11455_v36 = vld [vmem:[%s12643_s3 + $0x88] sm:$0xff]  }
 0x2a6   : > { %v3214_v9 = vmax.f32 %v11361_v57, %v3210_v59  ;;  %v3177_v39 = vadd.f32 %v10915_v13, %v3176_v35  ;;  %v4662_v52 = vpop.permute.xlu1 %4661  ;;  %v8651_v14 = vpop.f32.mrb[213].mxu1  ;;  %v11391_v57 = vld [vmem:[%s12684_s2] ss:$0 sm:$0xff]  ;;  %v4690_v7 = vsel %vm4041_vm4, %v4689_v12, %v10933_v30 }
 0x2a7   : > { %v4718_v10 = vsel %vm676_vm2, %v10577_v47, %v4662_v52  ;;  %v2968_v40 = vmax.f32 %v2946_v41, 0.0  ;;  %v2948_v62 = vpop.f32.mrb[214].mxu0  ;;  %v3179_v27 = vpop.f32.mrb[214].mxu1  ;;  %v11463_v41 = vld [vmem:[%s12643_s3 + $0xd0] sm:$0xff]   ;;  %v11497_v14 = vld [vmem:[%s12643_s3 + $0xd8] sm:$0xff]  }
 0x2a8   : > { %v3199_v6 = vmax.f32 %v3177_v39, 0.0  ;;  %v2949_v18 = vadd.f32 %v10915_v13, %v2948_v62  ;;  %v3180_v22 = vadd.f32 %v11391_v57, %v3179_v27  ;;  %4836 = vmatmul.mubr.bf16.vlgmr.msra.gmra.mrb[32].mxu1 %v4718_v10  ;;  %v8612_v56 = vpop.f32.mrb[215].mxu0  ;;  %v8652_v15 = vpop.f32.mrb[215].mxu1  ;;  %v11400_v13 = vld [vmem:[%s12643_s3] sm:$0xff]   ;;  %12686 = vst [vmem:[#allocation10_spill] sm:$0xff] %v11463_v41  ;;  %v11481_v39 = vld [vmem:[%s12643_s3 + $0x58] sm:$0xff]  }
 0x2a9   : > { %v2980_v47 = vmax.f32 %v11335_v42, %v2968_v40  ;;  %4843 = vmatprep.mubr.bf16.mxu1 %v4732_v3  ;;  %7874 = vmatpush3.bf16.msra.mxu1 %v11400_v13  ;;  %12688 = vst [vmem:[#allocation12_spill] sm:$0xff] %v11497_v14  ;;  %v4693_v3 = vrot.slane %v11196_v5, 1  ;;  %v11506_v40 = vld [vmem:[%s12643_s3 + $0x18] sm:$0xff]   ;;  %v5013_v56 = vshrl.u32 %v11216_v28, 16 }
 0x2aa   : > { %v3211_v60 = vmax.f32 %v11337_v58, %v3199_v6  ;;  %v2969_v48 = vmax.f32 %v2949_v18, 0.0  ;;  %v3200_v11 = vmax.f32 %v3180_v22, 0.0  ;;  %7875 = vmatprep.subr.bf16.mxu1 %v11408_v24  ;;  %v4664_v63 = vpop.permute.xlu1 %4663  ;;  %v11514_v6 = vld [vmem:[%s12643_s3 + $0x60] sm:$0xff]   ;;  %v11522_v22 = vld [vmem:[%s12643_s3 + $0x98] sm:$0xff]  }
 0x2ab   : > { %8802 = vmatmul.mubr.msk.bf16.vlgmr.msra.gmra.mrb[44].mxu0 %vm676_vm2, %v4690_v7  ;;  %v2984_v42 = vmax.f32 %v2982_v19, %v2980_v47  ;;  %v4722_v38 = vsel %vm676_vm2, %v10873_v17, %v4664_v63  ;;  %v4692_v17 = vsel %vm4041_vm4, %v10933_v30, %v11432_v21  ;;  %v11489_v30 = vld [vmem:[%s12643_s3 + $0x90] sm:$0xff]   ;;  %12689 = vst [vmem:[#allocation13_spill] sm:$0xff] %v11522_v22  ;;  %v11529_v7 = vld [vmem:[%s12643_s3 + $0xe0] sm:$0xff]  }
 0x2ac   : > { %8805 = vmatprep.mubr.msk.bf16.mxu0 %vm9384_vm0, %v12653_v1  ;;  %7908 = vmatpush3.bf16.msra.mxu0 %v11416_v45  ;;  %v3215_v58 = vmax.f32 %v3213_v37, %v3211_v60  ;;  %v2981_v34 = vmax.f32 %v11339_v61, %v2969_v48  ;;  %v3212_v32 = vmax.f32 %v11341_v55, %v3200_v11  ;;  %v11421_v31 = vpop.f32.mrb[216].mxu0  ;;  %v11439_v61 = vld [vmem:[%s12643_s3 + $0x8] sm:$0xff]   ;;  %v11539_v11 = vld [vmem:[%s12643_s3 + $0x20] sm:$0xff]  }
 0x2ad   : > { %7909 = vmatprep.subr.bf16.mxu0 %v11426_v29  ;;  %v8659_v51 = vpop.f32.mrb[217].mxu0  ;;  %v11434_v20 = vpop.f32.mrb[216].mxu1  ;;  %7876 = vmatpush3.bf16.msra.mxu1 %v11439_v61  ;;  %12687 = vst [vmem:[#allocation11_spill] sm:$0xff] %v11489_v30  ;;  %12690 = vst [vmem:[#allocation14_spill] sm:$0xff] %v11529_v7  ;;  %v4694_v47 = vsel %vm4041_vm4, %v11432_v21, %v4693_v3 }
 0x2ae   : > { %v2985_v55 = vmax.f32 %v2983_v23, %v2981_v34  ;;  %v3216_v46 = vmax.f32 %v3214_v9, %v3212_v32  ;;  %v11442_v19 = vpop.f32.mrb[218].mxu0  ;;  %7877 = vmatprep.subr.bf16.mxu1 %v11447_v53  ;;  %v8699_v59 = vpop.f32.mrb[217].mxu1  ;;  %v11472_v9 = vld [vmem:[%s12643_s3 + $0x10] sm:$0xff]   ;;  %v11549_v34 = vld [vmem:[%s12643_s3 + $0x68] sm:$0xff]   ;;  %v11558_v51 = vld [vmem:[%s12643_s3 + $0xa0] sm:$0xff]  }
 0x2af   : > { %v8660_v37 = vpop.f32.mrb[219].mxu0  ;;  %v11458_v35 = vpop.f32.mrb[218].mxu1  ;;  %12692 = vst [vmem:[#allocation16_spill] sm:$0xff] %v11558_v51 }
 0x2b0   : > { %7910 = vmatpush3.bf16.msra.mxu0 %v11455_v36  ;;  %v2986_v16 = vpack.c.bf16 %v2985_v55, %v2984_v42  ;;  %v3217_v23 = vpack.c.bf16 %v3216_v46, %v3215_v58  ;;  %4844 = vmatmul.mubr.bf16.gmra.mrb[36].mxu1 %v4722_v38  ;;  %v8700_v44 = vpop.f32.mrb[219].mxu1  ;;  %v5015_v38 = vor.u32 %v5013_v56, %v11252_v49  ;;  %v11579_v49 = vld [vmem:[%s12643_s3 + $0x28] sm:$0xff]  }
 0x2b1   : > { %7911 = vmatprep.subr.bf16.mxu0 %v11463_v41  ;;  %7878 = vmatpush3.bf16.msra.mxu1 %v11472_v9 }
 0x2b2   : > { %2987 = vst.msk [vmem:[#allocation2 + $0x50] sm:$0xff] %vm676_vm2, %v2986_v16  ;;  %3218 = vst.msk [vmem:[#allocation2 + $0x58] sm:$0xff] %vm676_vm2, %v3217_v23  ;;  %7879 = vmatprep.subr.bf16.mxu1 %v11481_v39  ;;  %v11570_v16 = vld [vmem:[%s12643_s3 + $0xe8] sm:$0xff]  }
 0x2b3   : > { %8806 = vmatmul.mubr.msk.bf16.gmra.mrb[48].mxu0 %vm676_vm2, %v4692_v17  ;;  %12693 = vst [vmem:[#allocation17_spill] sm:$0xff] %v11570_v16 }
 0x2b4   : > { %8809 = vmatprep.mubr.msk.bf16.mxu0 %vm9384_vm0, %v12653_v1  ;;  %7912 = vmatpush3.bf16.msra.mxu0 %v11489_v30  ;;  %v11492_v52 = vpop.f32.mrb[220].mxu0  ;;  %v3347_v1 = vadd.f32 %v11391_v57, %v11442_v19  ;;  %v12700_v19 = vmov 0.0  }
 0x2b5   : > { %7913 = vmatprep.subr.bf16.mxu0 %v11497_v14  ;;  %v8663_v12 = vpop.f32.mrb[221].mxu0  ;;  %v11501_v10 = vpop.f32.mrb[220].mxu1  ;;  %7880 = vmatpush3.bf16.msra.mxu1 %v11506_v40 }
 0x2b6   : > { %v11509_v62 = vpop.f32.mrb[222].mxu0  ;;  %v8703_v27 = vpop.f32.mrb[221].mxu1  ;;  %7881 = vmatprep.subr.bf16.mxu1 %v11514_v6 }
 0x2b7   : > { %v8664_v5 = vpop.f32.mrb[223].mxu0  ;;  %v11517_v18 = vpop.f32.mrb[222].mxu1 }
 0x2b8   : > { %7914 = vmatpush3.bf16.msra.mxu0 %v11522_v22  ;;  %v8704_v15 = vpop.f32.mrb[223].mxu1 }
 0x2b9   : > { %7915 = vmatprep.subr.bf16.mxu0 %v11529_v7  ;;  %v4951_v60 = vld [vmem:[#allocation2 + $0x50] sm:$0x1]  ;;  %7882 = vmatpush3.bf16.msra.mxu1 %v11539_v11  ;;  %v11544_v58 = vld [vmem:[#allocation2 + $0x58] sm:$0x1] }
 0x2ba   : > { %v11534_v48 = vld [vmem:[#allocation2 + $0x50] sm:$0xff]  ;;  %v5027_v28 = vrot.slane %v4951_v60, 1  ;;  %12691 = vst [vmem:[#allocation15_spill] sm:$0xff] %v11544_v58  ;;  %7883 = vmatprep.subr.bf16.mxu1 %v11549_v34  ;;  %v5044_v32 = vshll.u32 %v11544_v58, 16  ;;  %v11553_v63 = vld [vmem:[#allocation2 + $0x58] sm:$0xff]  ;;  %v5017_v23 = vshll.u32 %v4951_v60, 16 }
 0x2bb   : > { %8810 = vmatmul.mubr.msk.bf16.gmra.mrb[52].mxu0 %vm676_vm2, %v4694_v47  ;;  %v5036_v42 = vshll.u32 %v11534_v48, 16  ;;  %v5040_v59 = vshrl.u32 %v11534_v48, 16  ;;  %v5340_v56 = vshll.u32 %v11553_v63, 16  ;;  %v11589_v47 = vld [vmem:[%s12643_s3 + $0x70] sm:$0xff]  }
 0x2bc   : > { %7916 = vmatpush3.bf16.msra.mxu0 %v11558_v51  ;;  %v5028_v55 = vsel %vm4041_vm4, %v11255_v0, %v5027_v28  ;;  %v11563_v46 = vpop.f32.mrb[224].mxu0  ;;  %v5046_v5 = vrot.slane %v5044_v32, 1 }
 0x2bd   : > { %v5038_v37 = vrot.slane %v5036_v42, 1  ;;  %7917 = vmatprep.subr.bf16.mxu0 %v11570_v16  ;;  %5033 = vrot.lane.b32.xlu1 %v5028_v55, %s12670_s26  ;;  %v8667_v17 = vpop.f32.mrb[225].mxu0  ;;  %v11574_v44 = vpop.f32.mrb[224].mxu1  ;;  %v11598_v42 = vld [vmem:[%s12643_s3 + $0xa8] sm:$0xff]   ;;  %v11604_v55 = vld [vmem:[%s12643_s3 + $0xf0] sm:$0xff]   ;;  %v11668_v16 = vld [vmem:[%s12643_s3 + $0xb8] sm:$0xff]  }
 0x2be   : > { %7884 = vmatpush3.bf16.msra.mxu1 %v11579_v49  ;;  %v11583_v12 = vpop.f32.mrb[226].mxu0  ;;  %v8707_v15 = vpop.f32.mrb[225].mxu1  ;;  %12694 = vst [vmem:[#allocation18_spill] sm:$0xff] %v11598_v42  ;;  %12695 = vst [vmem:[#allocation19_spill] sm:$0xff] %v11604_v55  ;;  %v11615_v17 = vrot.slane %v5340_v56, 1 }
 0x2bf   : > { %v5039_v3 = vsel %vm4002_vm3, %v5015_v38, %v5038_v37  ;;  %v5042_v27 = vor.u32 %v5040_v59, %v5038_v37  ;;  %7885 = vmatprep.subr.bf16.mxu1 %v11589_v47  ;;  %v8668_v60 = vpop.f32.mrb[227].mxu0  ;;  %v11593_v28 = vpop.f32.mrb[226].mxu1  ;;  %v11611_v37 = vld [vmem:[%s12643_s3 + $0x30] sm:$0xff]   ;;  %v3575_v15 = vadd.f32 %v11391_v57, %v11434_v20  ;;  %12701 = vst [vmem:[#allocation24_spill] sm:$0xff] %v11668_v16 }
 0x2c0   : > { %5050 = vrot.lane.b32.xlu0 %v5039_v3, %s12670_s26  ;;  %7918 = vmatpush3.bf16.msra.mxu0 %v11598_v42  ;;  %v8708_v32 = vpop.f32.mrb[227].mxu1  ;;  %v11622_v60 = vld [vmem:[%s12643_s3 + $0x78] sm:$0xff]  }
 0x2c1   : > { %7919 = vmatprep.subr.bf16.mxu0 %v11604_v55  ;;  %5352 = vrot.lane.b32.xlu1 %v5039_v3, %s12670_s26  ;;  %v5047_v59 = vsel %vm4002_vm3, %v5042_v27, %v5046_v5  ;;  %v5019_v3 = vrot.slane %v5017_v23, 1  ;;  %v3344_v32 = vadd.f32 %v11391_v57, %v11421_v31  ;;  %v11631_v5 = vld [vmem:[%s12643_s3 + $0xb0] sm:$0xff]   ;;  %v11636_v20 = vsel %vm4002_vm3, %v5042_v27, %v11615_v17  ;;  %v11643_v31 = vld [vmem:[%s12643_s3 + $0xf8] sm:$0xff]  }
 0x2c2   : > { %7886 = vmatpush3.bf16.msra.mxu1 %v11611_v37  ;;  %12696 = vst [vmem:[#allocation20_spill] sm:$0xff] %v11631_v5  ;;  %12697 = vst [vmem:[#allocation21_spill] sm:$0xff] %v11636_v20  ;;  %v3578_v23 = vadd.f32 %v11391_v57, %v11458_v35 }
 0x2c3   : > { %7887 = vmatprep.subr.bf16.mxu1 %v11622_v60  ;;  %12698 = vst [vmem:[#allocation22_spill] sm:$0xff] %v11643_v31  ;;  %v3414_v55 = vmax.f32 %v3344_v32, 0.0 }
 0x2c4   : > { %5052 = vrot.lane.b32.xlu0 %v5047_v59, %s12670_s26  ;;  %7920 = vmatpush3.bf16.msra.mxu0 %v11631_v5  ;;  %v3367_v56 = vpop.f32.mrb[228].mxu0  ;;  %v11647_v59 = vsel %vm4002_vm3, %v5015_v38, %v5019_v3  ;;  %v11657_v5 = vld [vmem:[%s12643_s3 + $0x38] sm:$0xff]   ;;  %v3645_v38 = vmax.f32 %v3575_v15, 0.0  ;;  %v3646_v15 = vmax.f32 %v3578_v23, 0.0 }
 0x2c5   : > { %7921 = vmatprep.subr.bf16.mxu0 %v11643_v31  ;;  %12699 = vst [vmem:[#allocation23_spill] sm:$0xff] %v11647_v59  ;;  %5354 = vrot.lane.b32.xlu1 %v11636_v20, %s12670_s26  ;;  %v3368_v27 = vadd.f32 %v11391_v57, %v3367_v56  ;;  %v8671_v33 = vpop.f32.mrb[229].mxu0  ;;  %v3598_v35 = vpop.f32.mrb[228].mxu1 }
 0x2c6   : > { %7888 = vmatpush3.bf16.msra.mxu1 %v11657_v5  ;;  %v3370_v31 = vpop.f32.mrb[230].mxu0  ;;  %v3599_v3 = vadd.f32 %v11391_v57, %v3598_v35  ;;  %v8711_v59 = vpop.f32.mrb[229].mxu1 }
 0x2c7   : > { %8813 = vmatprep.subr.bf16.mxu1 %v12700_v19  ;;  %v3420_v20 = vmax.f32 %v3368_v27, 0.0  ;;  %v3371_v33 = vadd.f32 %v11391_v57, %v3370_v31  ;;  %v8672_v56 = vpop.f32.mrb[231].mxu0  ;;  %v3601_v42 = vpop.f32.mrb[230].mxu1  ;;  %v3415_v27 = vmax.f32 %v3347_v1, 0.0  ;;  %v3586_v1 = vadd.f32 %v11391_v57, %v11517_v18 }
 0x2c8   : > { %5370 = vrot.lane.b32.xlu0 %v11534_v48, %s12670_s26  ;;  %7922 = vmatpush3.bf16.msra.mxu0 %v11668_v16  ;;  %v3651_v59 = vmax.f32 %v3599_v3, 0.0  ;;  %v3602_v35 = vadd.f32 %v11391_v57, %v3601_v42  ;;  %v8712_v32 = vpop.f32.mrb[231].mxu1  ;;  %v3583_v56 = vadd.f32 %v11391_v57, %v11501_v10  ;;  %v3352_v16 = vadd.f32 %v11391_v57, %v11492_v52 }
 0x2c9   : > { %7948 = vmatprep.subr.bf16.mxu0 %v11314_v50  ;;  %v11673_v51 = vmax.f32 %v3414_v55, %v3420_v20  ;;  %v3421_v31 = vmax.f32 %v3371_v33, 0.0  ;;  %v3355_v10 = vadd.f32 %v11391_v57, %v11509_v62 }
 0x2ca   : > { %v11677_v7 = vmax.f32 %v3645_v38, %v3651_v59  ;;  %v3652_v22 = vmax.f32 %v3602_v35, 0.0  ;;  %v3647_v52 = vmax.f32 %v3583_v56, 0.0  ;;  %v3416_v35 = vmax.f32 %v3352_v16, 0.0 }
 0x2cb   : > { %v11681_v23 = vmax.f32 %v3415_v27, %v3421_v31  ;;  %v3417_v58 = vmax.f32 %v3355_v10, 0.0  ;;  %v3591_v56 = vadd.f32 %v11391_v57, %v11574_v44  ;;  %v3363_v10 = vadd.f32 %v11391_v57, %v11583_v12 }
 0x2cc   : > { %5372 = vrot.lane.b32.xlu0 %v11553_v63, %s12670_s26  ;;  %v3375_v42 = vpop.f32.mrb[232].mxu0  ;;  %v11687_v50 = vmax.f32 %v3646_v15, %v3652_v22  ;;  %v3648_v22 = vmax.f32 %v3586_v1, 0.0 }
 0x2cd   : > { %v3376_v55 = vadd.f32 %v11391_v57, %v3375_v42  ;;  %v8675_v20 = vpop.f32.mrb[233].mxu0  ;;  %v3606_v38 = vpop.f32.mrb[232].mxu1 }
 0x2ce   : > { %v3378_v3 = vpop.f32.mrb[234].mxu0  ;;  %v3607_v33 = vadd.f32 %v11391_v57, %v3606_v38  ;;  %v8715_v59 = vpop.f32.mrb[233].mxu1 }
 0x2cf   : > { %v3422_v32 = vmax.f32 %v3376_v55, 0.0  ;;  %v3379_v27 = vadd.f32 %v11391_v57, %v3378_v3  ;;  %v8676_v31 = vpop.f32.mrb[235].mxu0  ;;  %v3609_v18 = vpop.f32.mrb[234].mxu1  ;;  %v3360_v55 = vadd.f32 %v11391_v57, %v11563_v46 }
 0x2d0   : > { %v3653_v15 = vmax.f32 %v3607_v33, 0.0  ;;  %v3610_v14 = vadd.f32 %v11391_v57, %v3609_v18  ;;  %v8716_v62 = vpop.f32.mrb[235].mxu1  ;;  %v3594_v33 = vadd.f32 %v11391_v57, %v11593_v28 }
 0x2d1   : > { %v11695_v42 = vmax.f32 %v3416_v35, %v3422_v32  ;;  %v3423_v20 = vmax.f32 %v3379_v27, 0.0  ;;  %v3649_v32 = vmax.f32 %v3591_v56, 0.0 }
 0x2d2   : > { %v11699_v38 = vmax.f32 %v3647_v52, %v3653_v15  ;;  %v3654_v16 = vmax.f32 %v3610_v14, 0.0 }
 0x2d3   : > { %v11703_v3 = vmax.f32 %v3417_v58, %v3423_v20  ;;  %v3418_v58 = vmax.f32 %v3360_v55, 0.0 }
 0x2d4   : > { %v3383_v1 = vpop.f32.mrb[236].mxu0  ;;  %v11707_v59 = vmax.f32 %v3648_v22, %v3654_v16  ;;  %v3650_v22 = vmax.f32 %v3594_v33, 0.0  ;;  %v3419_v16 = vmax.f32 %v3363_v10, 0.0 }
 0x2d5   : > { %v3384_v35 = vadd.f32 %v11391_v57, %v3383_v1  ;;  %v8679_v44 = vpop.f32.mrb[237].mxu0  ;;  %v3614_v52 = vpop.f32.mrb[236].mxu1 }
 0x2d6   : > { %v3386_v14 = vpop.f32.mrb[238].mxu0  ;;  %v3615_v27 = vadd.f32 %v11391_v57, %v3614_v52  ;;  %v8719_v46 = vpop.f32.mrb[237].mxu1 }
 0x2d7   : > { %v3424_v31 = vmax.f32 %v3384_v35, 0.0  ;;  %v3387_v18 = vadd.f32 %v11391_v57, %v3386_v14  ;;  %v8680_v15 = vpop.f32.mrb[239].mxu0  ;;  %v3617_v28 = vpop.f32.mrb[238].mxu1 }
 0x2d8   : > { %v3655_v62 = vmax.f32 %v3615_v27, 0.0  ;;  %v3618_v20 = vadd.f32 %v11391_v57, %v3617_v28  ;;  %v8720_v12 = vpop.f32.mrb[239].mxu1 }
 0x2d9   : > { %v11715_v1 = vmax.f32 %v3418_v58, %v3424_v31  ;;  %v3425_v44 = vmax.f32 %v3387_v18, 0.0  ;;  %v4666_v12 = vpop.permute.xlu1 %4665 }
 0x2da   : > { %v11717_v56 = vmax.f32 %v3649_v32, %v3655_v62  ;;  %v3656_v30 = vmax.f32 %v3618_v20, 0.0 }
 0x2db   : > { %v11719_v52 = vmax.f32 %v3419_v16, %v3425_v44 }
 0x2dc   : > { %v3391_v55 = vpop.f32.mrb[240].mxu0  ;;  %v11721_v35 = vmax.f32 %v3650_v22, %v3656_v30 }
 0x2dd   : > { %v3392_v14 = vadd.f32 %v11391_v57, %v3391_v55  ;;  %v8683_v46 = vpop.f32.mrb[241].mxu0  ;;  %v3622_v33 = vpop.f32.mrb[240].mxu1 }
 0x2de   : > { %v3394_v27 = vpop.f32.mrb[242].mxu0  ;;  %v3623_v15 = vadd.f32 %v11391_v57, %v3622_v33  ;;  %v8723_v28 = vpop.f32.mrb[241].mxu1 }
 0x2df   : > { %v3426_v10 = vmax.f32 %v3392_v14, 0.0  ;;  %v3395_v58 = vadd.f32 %v11391_v57, %v3394_v27  ;;  %v8684_v31 = vpop.f32.mrb[243].mxu0  ;;  %v3625_v32 = vpop.f32.mrb[242].mxu1 }
 0x2e0   : > { %v3657_v18 = vmax.f32 %v3623_v15, 0.0  ;;  %v3626_v62 = vadd.f32 %v11391_v57, %v3625_v32  ;;  %v8724_v20 = vpop.f32.mrb[243].mxu1 }
 0x2e1   : > { %v11728_v30 = vmax.f32 %v11673_v51, %v3426_v10  ;;  %v3427_v22 = vmax.f32 %v3395_v58, 0.0  ;;  %v4949_v58 = vld [vmem:[#allocation2 + $0x30] sm:$0xfe] }
 0x2e2   : > { %v11731_v16 = vmax.f32 %v11677_v7, %v3657_v18  ;;  %v3658_v44 = vmax.f32 %v3626_v62, 0.0  ;;  %v4985_v18 = vpop.permute.xlu1 %4984 }
 0x2e3   : > { %v11734_v55 = vmax.f32 %v11681_v23, %v3427_v22 }
 0x2e4   : > { %v3399_v14 = vpop.f32.mrb[244].mxu0  ;;  %v11737_v46 = vmax.f32 %v11687_v50, %v3658_v44 }
 0x2e5   : > { %v3400_v33 = vadd.f32 %v11391_v57, %v3399_v14  ;;  %v8687_v27 = vpop.f32.mrb[245].mxu0  ;;  %v3630_v15 = vpop.f32.mrb[244].mxu1 }
 0x2e6   : > { %v3402_v28 = vpop.f32.mrb[246].mxu0  ;;  %v3631_v51 = vadd.f32 %v11391_v57, %v3630_v15  ;;  %v8727_v10 = vpop.f32.mrb[245].mxu1  ;;  %v4994_v27 = vrot.slane %v4949_v58, 1 }
 0x2e7   : > { %v3428_v31 = vmax.f32 %v3400_v33, 0.0  ;;  %v3403_v7 = vadd.f32 %v11391_v57, %v3402_v28  ;;  %v8688_v32 = vpop.f32.mrb[247].mxu0  ;;  %v3633_v62 = vpop.f32.mrb[246].mxu1  ;;  %v4726_v33 = vsel %vm676_vm2, %v10936_v4, %v4666_v12 }
 0x2e8   : > { %v3659_v23 = vmax.f32 %v3631_v51, 0.0  ;;  %v3634_v44 = vadd.f32 %v11391_v57, %v3633_v62  ;;  %v8728_v14 = vpop.f32.mrb[247].mxu1  ;;  %v4996_v4 = vsel %vm4041_vm4, %v4994_v27, %v11432_v21 }
 0x2e9   : > { %v3440_v20 = vmax.f32 %v11695_v42, %v3428_v31  ;;  %v3429_v50 = vmax.f32 %v3403_v7, 0.0  ;;  %v5030_v42 = vpop.permute.xlu1 %5029 }
 0x2ea   : > { %v4685_v22 = vpop.permute.xlu0 %4684  ;;  %v3671_v41 = vmax.f32 %v11699_v38, %v3659_v23  ;;  %v3660_v10 = vmax.f32 %v3634_v44, 0.0 }
 0x2eb   : > { %v4735_v15 = vsel %vm676_vm2, %v11429_v54, %v4685_v22  ;;  %v3444_v28 = vmax.f32 %v11728_v30, %v3440_v20  ;;  %v3441_v51 = vmax.f32 %v11703_v3, %v3429_v50 }
 0x2ec   : > { %4851 = vmatprep.mubr.bf16.mxu1 %v4735_v15  ;;  %v3675_v31 = vmax.f32 %v11731_v16, %v3671_v41  ;;  %v3407_v7 = vpop.f32.mrb[248].mxu0  ;;  %v3672_v38 = vmax.f32 %v11707_v59, %v3660_v10 }
 0x2ed   : > { %4852 = vmatmul.mubr.bf16.gmra.mrb[40].mxu1 %v4726_v33  ;;  %v3445_v58 = vmax.f32 %v11734_v55, %v3441_v51  ;;  %v3638_v32 = vpop.f32.mrb[248].mxu1  ;;  %v3408_v62 = vadd.f32 %v11391_v57, %v3407_v7  ;;  %v8691_v30 = vpop.f32.mrb[249].mxu0  ;;  %v5064_v7 = vsel %vm676_vm2, %v11381_v8, %v4985_v18  ;;  %v4998_v8 = vsel %vm4041_vm4, %v11432_v21, %v11200_v43 }
 0x2ee   : > { %v5003_v23 = vpop.permute.xlu0 %5002  ;;  %v3639_v3 = vadd.f32 %v11391_v57, %v3638_v32  ;;  %v8731_v12 = vpop.f32.mrb[249].mxu1  ;;  %v3676_v41 = vmax.f32 %v11737_v46, %v3672_v38  ;;  %v5086_v38 = vsel %vm676_vm2, %v11233_v26, %v5030_v42  ;;  %v11780_v26 = vld [vmem:[%s12643_s3 + $0x100] sm:$0xff]  }
 0x2ef   : > { %v5074_v20 = vsel %vm676_vm2, %v4996_v4, %v5003_v23  ;;  %v3430_v16 = vmax.f32 %v3408_v62, 0.0  ;;  %v3641_v50 = vpop.f32.mrb[250].mxu1  ;;  %v3410_v22 = vpop.f32.mrb[250].mxu0 }
 0x2f0   : > { %5146 = vmatprep.mubr.bf16.mxu1 %v5074_v20  ;;  %v3661_v55 = vmax.f32 %v3639_v3, 0.0  ;;  %v3642_v59 = vadd.f32 %v11391_v57, %v3641_v50  ;;  %v8732_v44 = vpop.f32.mrb[251].mxu1  ;;  %v3411_v27 = vadd.f32 %v11391_v57, %v3410_v22  ;;  %v8692_v15 = vpop.f32.mrb[251].mxu0 }
 0x2f1   : > { %v3442_v14 = vmax.f32 %v11715_v1, %v3430_v16  ;;  %v4987_v1 = vpop.permute.xlu1 %4986  ;;  %v11813_v44 = vld [vmem:[%s12643_s3 + $0x110] sm:$0xff]  }
 0x2f2   : > { %v5049_v33 = vpop.permute.xlu0 %5048  ;;  %v3673_v51 = vmax.f32 %v11717_v56, %v3661_v55  ;;  %v3662_v10 = vmax.f32 %v3642_v59, 0.0  ;;  %v3431_v23 = vmax.f32 %v3411_v27, 0.0  ;;  %v11796_v55 = vld [vmem:[%s12643_s3 + $0x108] sm:$0xff]  }
 0x2f3   : > { %v5097_v46 = vsel %vm676_vm2, %v11194_v25, %v5049_v33  ;;  %v3446_v32 = vmax.f32 %v3444_v28, %v3442_v14 }
 0x2f4   : > { %5203 = vmatprep.mubr.bf16.mxu0 %v5097_v46  ;;  %v3677_v62 = vmax.f32 %v3675_v31, %v3673_v51  ;;  %v3674_v4 = vmax.f32 %v11721_v35, %v3662_v10  ;;  %v11771_v56 = vpop.f32.mrb[252].mxu0  ;;  %v3443_v3 = vmax.f32 %v11719_v52, %v3431_v23  ;;  %v5344_v10 = vshrl.u32 %v11553_v63, 16  ;;  %v11829_v46 = vld [vmem:[%s12643_s3 + $0x118] sm:$0xff]  }
 0x2f5   : > { %5147 = vmatmul.mubr.bf16.vlgmr.msra.gmra.mrb[44].mxu1 %v5064_v7  ;;  %5204 = vmatmul.mubr.bf16.vlgmr.msra.gmra.mrb[56].mxu0 %v5086_v38  ;;  %v7739_v25 = vpop.f32.mrb[252].mxu1  ;;  %v8739_v18 = vpop.f32.mrb[253].mxu0 }
 0x2f6   : > { %v5005_v30 = vpop.permute.xlu0 %5004  ;;  %8814 = vmatpush3.bf16.msra.mxu1 %v11780_v26  ;;  %7949 = vmatpush3.bf16.msra.mxu0 %v11400_v13  ;;  %v3678_v35 = vmax.f32 %v3676_v41, %v3674_v4  ;;  %v7740_v28 = vpop.f32.mrb[253].mxu1  ;;  %v3447_v42 = vmax.f32 %v3445_v58, %v3443_v3  ;;  %v5346_v18 = vor.u32 %v5344_v10, %v11615_v17 }
 0x2f7   : > { %v5078_v52 = vsel %vm676_vm2, %v4998_v8, %v5005_v30  ;;  %8815 = vmatprep.subr.bf16.mxu1 %v12700_v19  ;;  %7950 = vmatprep.subr.bf16.mxu0 %v11408_v24  ;;  %v11787_v43 = vadd.f32 %v7740_v28, %v7739_v25  ;;  %v11789_v21 = vpop.f32.mrb[254].mxu0  ;;  %v7742_v31 = vpop.f32.mrb[254].mxu1  ;;  %v5067_v24 = vsel %vm676_vm2, %v11429_v54, %v4987_v1  ;;  %v5320_v25 = vld [vmem:[#allocation2 + $0x50] sm:$0xfe] }
 0x2f8   : > { %5154 = vmatprep.mubr.bf16.mxu1 %v5078_v52  ;;  %v3679_v12 = vpack.c.bf16 %v3678_v35, %v3677_v62  ;;  %v8740_v20 = vpop.f32.mrb[255].mxu0  ;;  %v7743_v16 = vpop.f32.mrb[255].mxu1  ;;  %v3448_v13 = vpack.c.bf16 %v3447_v42, %v3446_v32  ;;  %v9281_v32 = vld [vmem:[#allocation2 + $0x40] sm:$0xff] }
 0x2f9   : > { %v11791_v41 = vadd.f32 %v7743_v16, %v7742_v31  ;;  %v4989_v15 = vpop.permute.xlu1 %4988  ;;  %v11861_v20 = vrot.slane %v11553_v63, 1 }
 0x2fa   : > { %v5007_v50 = vpop.permute.xlu0 %5006  ;;  %8816 = vmatpush3.bf16.msra.mxu1 %v11796_v55  ;;  %7951 = vmatpush3.bf16.msra.mxu0 %v11439_v61  ;;  %3680 = vst.msk [vmem:[#allocation2 + $0x68] sm:$0xff] %vm676_vm2, %v3679_v12  ;;  %3449 = vst.msk [vmem:[#allocation2 + $0x60] sm:$0xff] %vm676_vm2, %v3448_v13  ;;  %v5070_v23 = vsel %vm676_vm2, %v9281_v32, %v4989_v15 }
 0x2fb   : > { %8817 = vmatprep.subr.bf16.mxu1 %v12700_v19  ;;  %7952 = vmatprep.subr.bf16.mxu0 %v11447_v53  ;;  %v5082_v59 = vsel %vm676_vm2, %v11260_v2, %v5007_v50 }
 0x2fc   : > { %v11806_v58 = vpop.f32.mrb[0].mxu0 }
 0x2fd   : > { %5155 = vmatmul.mubr.bf16.gmra.mrb[48].mxu1 %v5067_v24  ;;  %v7745_v22 = vpop.f32.mrb[0].mxu1  ;;  %v8743_v61 = vpop.f32.mrb[1].mxu0 }
 0x2fe   : > { %5162 = vmatprep.mubr.bf16.mxu1 %v5082_v59  ;;  %8818 = vmatpush3.bf16.msra.mxu1 %v11813_v44  ;;  %v7746_v53 = vpop.f32.mrb[1].mxu1  ;;  %v11816_v54 = vpop.f32.mrb[2].mxu0  ;;  %v5391_v59 = vrot.slane %v5320_v25, 1 }
 0x2ff   : > { %8819 = vmatprep.subr.bf16.mxu1 %v12700_v19  ;;  %7953 = vmatpush3.bf16.msra.mxu0 %v11472_v9  ;;  %v11820_v14 = vadd.f32 %v7746_v53, %v7745_v22  ;;  %v7748_v2 = vpop.f32.mrb[2].mxu1  ;;  %v8744_v27 = vpop.f32.mrb[3].mxu0 }
 0x300   : > { %7954 = vmatprep.subr.bf16.mxu0 %v11481_v39  ;;  %v7749_v33 = vpop.f32.mrb[3].mxu1  ;;  %v9280_v39 = vld [vmem:[%s12643_s3 + $0xc0] sm:$0xff]   ;;  %v3806_v27 = vadd.f32 %v11391_v57, %v11771_v56  ;;  %v3809_v56 = vadd.f32 %v11391_v57, %v11789_v21 }
 0x301   : > { %v11823_v51 = vadd.f32 %v7749_v33, %v7748_v2  ;;  %v11832_v9 = vld [vmem:[#allocation2 + $0x60] sm:$0xff]  ;;  %v11836_v38 = vld [vmem:[#allocation2 + $0x68] sm:$0xff]  ;;  %v5392_v33 = vsel %vm4041_vm4, %v5391_v59, %v11861_v20 }
 0x302   : > { %8820 = vmatpush3.bf16.msra.mxu1 %v11829_v46  ;;  %v11834_v7 = vld [vmem:[#allocation2 + $0x60] sm:$0x1]  ;;  %5374 = vrot.lane.b32.xlu0 %v11832_v9, %s12670_s26  ;;  %v5377_v1 = vshll.u32 %v11832_v9, 16  ;;  %v11847_v4 = vld [vmem:[#allocation2 + $0x68] sm:$0x1]  ;;  %v5404_v42 = vshll.u32 %v11836_v38, 16 }
 0x303   : > { %7955 = vmatpush3.bf16.msra.mxu0 %v11506_v40  ;;  %7982 = vmatprep.subr.bf16.mxu1 %v9280_v39  ;;  %v5348_v62 = vshll.u32 %v11834_v7, 16  ;;  %v4955_v40 = vld [vmem:[#allocation2 + $0x40] sm:$0xfe]  ;;  %v5385_v30 = vshll.u32 %v11847_v4, 16  ;;  %v5381_v12 = vshrl.u32 %v11832_v9, 16  ;;  %v11889_v10 = vrot.slane %v11832_v9, 1 }
 0x304   : > { %7956 = vmatprep.subr.bf16.mxu0 %v11514_v6  ;;  %v11850_v3 = vpop.f32.mrb[4].mxu0  ;;  %v5379_v28 = vrot.slane %v5377_v1, 1  ;;  %v5057_v22 = vrot.slane %v4955_v40, 1  ;;  %v11876_v2 = vrot.slane %v5404_v42, 1  ;;  %v3876_v1 = vmax.f32 %v3806_v27, 0.0 }
 0x305   : > { %5163 = vmatmul.mubr.bf16.gmra.mrb[52].mxu1 %v5070_v23  ;;  %v7751_v8 = vpop.f32.mrb[4].mxu1  ;;  %v8747_v35 = vpop.f32.mrb[5].mxu0  ;;  %v5350_v52 = vrot.slane %v5348_v62, 1  ;;  %v5387_v61 = vrot.slane %v5385_v30, 1  ;;  %v5394_v40 = vsel %vm4041_vm4, %v11861_v20, %v11889_v10  ;;  %v5395_v30 = vrot.slane %v11847_v4, 1 }
 0x306   : > { %8821 = vmatprep.mubr.msk.bf16.mxu1 %vm9384_vm0, %v12700_v19  ;;  %v7752_v31 = vpop.f32.mrb[5].mxu1  ;;  %v11857_v6 = vpop.f32.mrb[6].mxu0  ;;  %v11867_v13 = vsel %vm4002_vm3, %v5346_v18, %v5379_v28  ;;  %v5058_v39 = vsel %vm4041_vm4, %v5057_v22, %v11255_v0  ;;  %v11921_v4 = vld [vmem:[%s12644_s4] ss:$0 sm:$0xff] }
 0x307   : > { %7957 = vmatpush3.bf16.msra.mxu0 %v11539_v11  ;;  %v11864_v16 = vadd.f32 %v7752_v31, %v7751_v8  ;;  %v7754_v17 = vpop.f32.mrb[6].mxu1  ;;  %v5351_v50 = vsel %vm4002_vm3, %v5346_v18, %v5350_v52  ;;  %v8748_v24 = vpop.f32.mrb[7].mxu0  ;;  %5416 = vrot.lane.b32.xlu0 %v11867_v13, %s12670_s26  ;;  %v5383_v11 = vor.u32 %v5381_v12, %v5379_v28  ;;  %v11911_v8 = vrot.slane %v11534_v48, 1 }
 0x308   : > { %7958 = vmatprep.subr.bf16.mxu0 %v11549_v34  ;;  %5356 = vrot.lane.b32.xlu1 %v5351_v50, %s12670_s26  ;;  %v7755_v63 = vpop.f32.mrb[7].mxu1  ;;  %v5396_v28 = vsel %vm4041_vm4, %v11889_v10, %v5395_v30  ;;  %v4413_v12 = vadd.f32 %v11787_v43, %v11921_v4  ;;  %v3825_v30 = vadd.f32 %v11391_v57, %v11857_v6 }
 0x309   : > { %v11874_v53 = vadd.f32 %v7755_v63, %v7754_v17  ;;  %v11882_v34 = vsel %vm4002_vm3, %v5383_v11, %v5387_v61  ;;  %v5407_v15 = vsel %vm4002_vm3, %v5383_v11, %v11876_v2  ;;  %v12703_v11 = vld [vmem:[#allocation11_spill] sm:$0xff] }
 0x30a   : > { %v12704_v61 = vld [vmem:[#allocation15_spill] sm:$0xff] }
 0x30b   : > { %7959 = vmatpush3.bf16.msra.mxu0 %v11579_v49  ;;  %5418 = vrot.lane.b32.xlu0 %v5407_v15, %s12670_s26  ;;  %v5061_v27 = vrot.slane %v12704_v61, 1  ;;  %v4416_v15 = vadd.f32 %v11791_v41, %v11921_v4  ;;  %v12713_v61 = vld [vmem:[#allocation22_spill] sm:$0xff] }
 0x30c   : > { %7960 = vmatprep.subr.bf16.mxu0 %v11589_v47  ;;  %5397 = vrot.lane.b32.xlu1 %v5392_v33, %s12670_s26  ;;  %v3829_v49 = vpop.f32.mrb[8].mxu0 }
 0x30d   : > { %8822 = vmatmul.mubr.msk.bf16.vlgmr.msra.gmra.mrb[56].mxu1 %vm676_vm2, %v5058_v39  ;;  %v3830_v32 = vadd.f32 %v11391_v57, %v3829_v49  ;;  %v8751_v23 = vpop.f32.mrb[9].mxu0  ;;  %v12705_v39 = vld [vmem:[#allocation12_spill] sm:$0xff]  ;;  %v5062_v41 = vsel %vm4041_vm4, %v11911_v8, %v5061_v27  ;;  %v9116_v27 = vld [vmem:[%s12645_s5 + $0x40] sm:$0xff]  }
 0x30e   : > { %v3832_v62 = vpop.f32.mrb[10].mxu0  ;;  %8825 = vmatprep.mubr.msk.bf16.mxu1 %vm9384_vm0, %v12700_v19  ;;  %7983 = vmatpush3.bf16.msra.mxu1 %v11416_v45  ;;  %v3814_v45 = vadd.f32 %v11391_v57, %v11806_v58  ;;  %v12702_v58 = vld [vmem:[#allocation10_spill] sm:$0xff] }
 0x30f   : > { %7961 = vmatpush3.bf16.msra.mxu0 %v11611_v37  ;;  %v3882_v47 = vmax.f32 %v3830_v32, 0.0  ;;  %v3833_v25 = vadd.f32 %v11391_v57, %v3832_v62  ;;  %v8752_v21 = vpop.f32.mrb[11].mxu0  ;;  %7984 = vmatprep.subr.bf16.mxu1 %v11426_v29  ;;  %v3877_v37 = vmax.f32 %v3809_v56, 0.0  ;;  %v3817_v29 = vadd.f32 %v11391_v57, %v11816_v54 }
 0x310   : > { %7962 = vmatprep.subr.bf16.mxu0 %v11622_v60  ;;  %5399 = vrot.lane.b32.xlu1 %v5394_v40, %s12670_s26  ;;  %v3878_v50 = vmax.f32 %v3814_v45, 0.0  ;;  %v12706_v40 = vld [vmem:[#allocation13_spill] sm:$0xff]  ;;  %v12707_v21 = vld [vmem:[#allocation14_spill] sm:$0xff] }
 0x311   : > { %v11915_v35 = vmax.f32 %v3876_v1, %v3882_v47  ;;  %v3883_v18 = vmax.f32 %v3833_v25, 0.0  ;;  %v3879_v43 = vmax.f32 %v3817_v29, 0.0  ;;  %v3822_v1 = vadd.f32 %v11391_v57, %v11850_v3 }
 0x312   : > { %7985 = vmatpush3.bf16.msra.mxu1 %v11455_v36 }
 0x313   : > { %7963 = vmatpush3.bf16.msra.mxu0 %v11657_v5  ;;  %v11925_v60 = vmax.f32 %v3877_v37, %v3883_v18  ;;  %v5060_v5 = vsel %vm4041_vm4, %v11255_v0, %v11911_v8  ;;  %7986 = vmatprep.subr.bf16.mxu1 %v12702_v58  ;;  %v3880_v45 = vmax.f32 %v3822_v1, 0.0  ;;  %v12709_v58 = vld [vmem:[#allocation17_spill] sm:$0xff] }
 0x314   : > { %8833 = vmatprep.subr.bf16.mxu0 %v12700_v19  ;;  %5401 = vrot.lane.b32.xlu1 %v5396_v28, %s12670_s26  ;;  %v3837_v52 = vpop.f32.mrb[12].mxu0 }
 0x315   : > { %v7773_v42 = vpop.f32.mrb[8].mxu1  ;;  %8826 = vmatmul.mubr.msk.bf16.gmra.mrb[60].mxu1 %vm676_vm2, %v5060_v5  ;;  %v3838_v31 = vadd.f32 %v11391_v57, %v3837_v52  ;;  %v8755_v36 = vpop.f32.mrb[13].mxu0  ;;  %v12708_v52 = vld [vmem:[#allocation16_spill] sm:$0xff] }
 0x316   : > { %v7774_v17 = vpop.f32.mrb[9].mxu1  ;;  %v3840_v54 = vpop.f32.mrb[14].mxu0  ;;  %8829 = vmatprep.mubr.msk.bf16.mxu1 %vm9384_vm0, %v12700_v19  ;;  %7987 = vmatpush3.bf16.msra.mxu1 %v12703_v11  ;;  %v12712_v11 = vld [vmem:[#allocation20_spill] sm:$0xff] }
 0x317   : > { %v3884_v24 = vmax.f32 %v3838_v31, 0.0  ;;  %v7775_v0 = vadd.f32 %v7774_v17, %v7773_v42  ;;  %v7776_v59 = vpop.f32.mrb[10].mxu1  ;;  %v3841_v22 = vadd.f32 %v11391_v57, %v3840_v54  ;;  %v8756_v63 = vpop.f32.mrb[15].mxu0  ;;  %7988 = vmatprep.subr.bf16.mxu1 %v12705_v39  ;;  %v3881_v42 = vmax.f32 %v3825_v30, 0.0  ;;  %v12711_v54 = vld [vmem:[#allocation19_spill] sm:$0xff]  ;;  %v12714_v39 = vld [vmem:[#allocation24_spill] sm:$0xff] }
 0x318   : > { %v7777_v33 = vpop.f32.mrb[11].mxu1 }
 0x319   : > { %v3896_v49 = vmax.f32 %v3878_v50, %v3884_v24  ;;  %v3885_v56 = vmax.f32 %v3841_v22, 0.0  ;;  %v7778_v32 = vadd.f32 %v7777_v33, %v7776_v59  ;;  %v11950_v23 = vadd.f32 %v7775_v0, %v4413_v12  ;;  %v12710_v12 = vld [vmem:[#allocation18_spill] sm:$0xff] }
 0x31a   : > { %7989 = vmatpush3.bf16.msra.mxu1 %v12706_v40 }
 0x31b   : > { %v3897_v62 = vmax.f32 %v3879_v43, %v3885_v56  ;;  %v11954_v47 = vadd.f32 %v7778_v32, %v4416_v15  ;;  %7990 = vmatprep.subr.bf16.mxu1 %v12707_v21 }
 0x31c   : > { %v3845_v25 = vpop.f32.mrb[16].mxu0 }
 0x31d   : > { %8830 = vmatmul.mubr.msk.bf16.gmra.mrb[64].mxu1 %vm676_vm2, %v5062_v41  ;;  %v3846_v37 = vadd.f32 %v11391_v57, %v3845_v25  ;;  %v8759_v18 = vpop.f32.mrb[17].mxu0  ;;  %v5032_v25 = vpop.permute.xlu1 %5031 }
 0x31e   : > { %v3848_v3 = vpop.f32.mrb[18].mxu0  ;;  %7991 = vmatpush3.bf16.msra.mxu1 %v12708_v52 }
 0x31f   : > { %v3886_v28 = vmax.f32 %v3846_v37, 0.0  ;;  %v3849_v29 = vadd.f32 %v11391_v57, %v3848_v3  ;;  %v8760_v5 = vpop.f32.mrb[19].mxu0  ;;  %7992 = vmatprep.subr.bf16.mxu1 %v12709_v58  ;;  %v4424_v58 = vadd.f32 %v11823_v51, %v11921_v4 }
 0x320   : > { %v12715_v5 = vld [vmem:[#allocation9_spill] sm:$0xff] }
 0x321   : > { %v11967_v31 = vmax.f32 %v3880_v45, %v3886_v28  ;;  %v3887_v36 = vmax.f32 %v3849_v29, 0.0  ;;  %v5090_v52 = vsel %vm676_vm2, %v12715_v5, %v5032_v25 }
 0x322   : > { %7993 = vmatpush3.bf16.msra.mxu1 %v12710_v12 }
 0x323   : > { %v11969_v6 = vmax.f32 %v3881_v42, %v3887_v36  ;;  %7994 = vmatprep.subr.bf16.mxu1 %v12711_v54  ;;  %v9282_v36 = vld [vmem:[#allocation2 + $0x48] sm:$0xff] }
 0x324   : > { %v3853_v17 = vpop.f32.mrb[20].mxu0 }
 0x325   : > { %v3854_v50 = vadd.f32 %v11391_v57, %v3853_v17  ;;  %v8763_v24 = vpop.f32.mrb[21].mxu0 }
 0x326   : > { %v3856_v0 = vpop.f32.mrb[22].mxu0  ;;  %7995 = vmatpush3.bf16.msra.mxu1 %v12712_v11 }
 0x327   : > { %v3888_v59 = vmax.f32 %v3854_v50, 0.0  ;;  %v3857_v22 = vadd.f32 %v11391_v57, %v3856_v0  ;;  %v8764_v63 = vpop.f32.mrb[23].mxu0  ;;  %7996 = vmatprep.subr.bf16.mxu1 %v12713_v61  ;;  %v9283_v0 = vld [vmem:[%s12684_s2] ss:$0 sm:$0xff] }
 0x329   : > { %v3900_v15 = vmax.f32 %v11915_v35, %v3888_v59  ;;  %v3889_v43 = vmax.f32 %v3857_v22, 0.0  ;;  %v4421_v35 = vadd.f32 %v11820_v14, %v11921_v4  ;;  %v5317_v22 = vld [vmem:[#allocation2 + $0x48] sm:$0xfe] }
 0x32a   : > { %7997 = vmatpush3.bf16.msra.mxu1 %v12714_v39 }
 0x32b   : > { %v11982_v33 = vmax.f32 %v11925_v60, %v3889_v43  ;;  %8023 = vmatprep.subr.bf16.mxu1 %v9116_v27 }
 0x32c   : > { %v3861_v56 = vpop.f32.mrb[24].mxu0 }
 0x32d   : > { %v3862_v32 = vadd.f32 %v11391_v57, %v3861_v56  ;;  %v8767_v1 = vpop.f32.mrb[25].mxu0  ;;  %v5362_v56 = vrot.slane %v5317_v22, 1  ;;  %v5366_v22 = vsel %vm4041_vm4, %v11911_v8, %v11861_v20 }
 0x32e   : > { %v3864_v41 = vpop.f32.mrb[26].mxu0 }
 0x32f   : > { %v7779_v40 = vpop.f32.mrb[12].mxu1  ;;  %v3890_v21 = vmax.f32 %v3862_v32, 0.0  ;;  %v3865_v30 = vadd.f32 %v11391_v57, %v3864_v41  ;;  %v8768_v37 = vpop.f32.mrb[27].mxu0  ;;  %v4429_v32 = vadd.f32 %v11864_v16, %v11921_v4 }
 0x330   : > { %v7780_v18 = vpop.f32.mrb[13].mxu1  ;;  %v5034_v27 = vpop.permute.xlu1 %5033 }
 0x331   : > { %v3902_v60 = vmax.f32 %v3896_v49, %v3890_v21  ;;  %v3891_v3 = vmax.f32 %v3865_v30, 0.0  ;;  %v7781_v45 = vadd.f32 %v7780_v18, %v7779_v40  ;;  %v7782_v28 = vpop.f32.mrb[14].mxu1  ;;  %v12716_v30 = vld [vmem:[#allocation23_spill] sm:$0xff] }
 0x332   : > { %v5051_v29 = vpop.permute.xlu0 %5050  ;;  %v7783_v42 = vpop.f32.mrb[15].mxu1  ;;  %v5094_v37 = vsel %vm676_vm2, %v12716_v30, %v5034_v27 }
 0x333   : > { %v5100_v57 = vsel %vm676_vm2, %v9282_v36, %v5051_v29  ;;  %v3906_v12 = vmax.f32 %v3900_v15, %v3902_v60  ;;  %v3903_v17 = vmax.f32 %v3897_v62, %v3891_v3  ;;  %v7784_v54 = vadd.f32 %v7783_v42, %v7782_v28 }
 0x334   : > { %5211 = vmatprep.mubr.bf16.mxu0 %v5100_v57  ;;  %v11994_v14 = vadd.f32 %v7781_v45, %v4421_v35  ;;  %v3869_v49 = vpop.f32.mrb[28].mxu0  ;;  %v5364_v35 = vsel %vm4041_vm4, %v5362_v56, %v11911_v8  ;;  %v5353_v29 = vpop.permute.xlu1 %5352 }
 0x335   : > { %5212 = vmatmul.mubr.bf16.gmra.mrb[60].mxu0 %v5090_v52  ;;  %v3907_v50 = vmax.f32 %v11982_v33, %v3903_v17  ;;  %v3870_v51 = vadd.f32 %v9283_v0, %v3869_v49  ;;  %v8771_v59 = vpop.f32.mrb[29].mxu0  ;;  %v12000_v63 = vadd.f32 %v7784_v54, %v4424_v58 }
 0x336   : > { %v5053_v24 = vpop.permute.xlu0 %5052  ;;  %v3872_v61 = vpop.f32.mrb[30].mxu0  ;;  %v5432_v59 = vsel %vm676_vm2, %v9282_v36, %v5353_v29 }
 0x337   : > { %v7785_v11 = vpop.f32.mrb[16].mxu1  ;;  %v5103_v62 = vsel %vm676_vm2, %v11534_v48, %v5053_v24  ;;  %v3892_v15 = vmax.f32 %v3870_v51, 0.0  ;;  %v3873_v43 = vadd.f32 %v9283_v0, %v3872_v61  ;;  %v8772_v33 = vpop.f32.mrb[31].mxu0  ;;  %v4432_v48 = vadd.f32 %v11874_v53, %v11921_v4 }
 0x338   : > { %5219 = vmatprep.mubr.bf16.mxu0 %v5103_v62  ;;  %v7786_v39 = vpop.f32.mrb[17].mxu1  ;;  %v5355_v62 = vpop.permute.xlu1 %5354 }
 0x339   : > { %v3904_v1 = vmax.f32 %v11967_v31, %v3892_v15  ;;  %v3893_v40 = vmax.f32 %v3873_v43, 0.0  ;;  %v7787_v41 = vadd.f32 %v7786_v39, %v7785_v11  ;;  %v7788_v25 = vpop.f32.mrb[18].mxu1  ;;  %v5408_v43 = vshrl.u32 %v11836_v38, 16 }
 0x33a   : > { %v5371_v21 = vpop.permute.xlu0 %5370  ;;  %v7789_v18 = vpop.f32.mrb[19].mxu1 }
 0x33b   : > { %v3908_v60 = vmax.f32 %v3906_v12, %v3904_v1  ;;  %v3905_v3 = vmax.f32 %v11969_v6, %v3893_v40  ;;  %v7790_v16 = vadd.f32 %v7789_v18, %v7788_v25  ;;  %v12014_v45 = vadd.f32 %v7787_v41, %v4429_v32 }
 0x33c   : > { %v7814_v31 = vpop.f32.mrb[32].mxu0  ;;  %v5442_v28 = vsel %vm676_vm2, %v5364_v35, %v5371_v21  ;;  %v9284_v21 = vld [vmem:[#allocation2 + $0x50] sm:$0xff] }
 0x33d   : > { %5220 = vmatmul.mubr.bf16.gmra.mrb[64].mxu0 %v5094_v37  ;;  %v3909_v5 = vmax.f32 %v3907_v50, %v3905_v3  ;;  %v7815_v53 = vpop.f32.mrb[33].mxu0  ;;  %v4489_v52 = vadd.f32 %v7790_v16, %v4432_v48  ;;  %v5435_v48 = vsel %vm676_vm2, %v9284_v21, %v5355_v62 }
 0x33e   : > { %5514 = vmatprep.mubr.bf16.mxu0 %v5442_v28  ;;  %v12017_v58 = vadd.f32 %v7815_v53, %v7814_v31  ;;  %v7817_v57 = vpop.f32.mrb[34].mxu0  ;;  %v5373_v0 = vpop.permute.xlu0 %5372 }
 0x33f   : > { %v4526_v42 = vpop.f32.mrb[20].mxu1  ;;  %v3910_v17 = vpack.c.bf16 %v3909_v5, %v3908_v60  ;;  %v7818_v54 = vpop.f32.mrb[35].mxu0 }
 0x340   : > { %v4527_v12 = vadd.f32 %v4526_v42, %v11950_v23  ;;  %v8783_v6 = vpop.f32.mrb[21].mxu1  ;;  %v12020_v49 = vadd.f32 %v7818_v54, %v7817_v57  ;;  %v5446_v23 = vsel %vm676_vm2, %v5366_v22, %v5373_v0 }
 0x341   : > { %v4529_v24 = vpop.f32.mrb[22].mxu1  ;;  %3911 = vst.msk [vmem:[#allocation2 + $0x70] sm:$0xff] %vm676_vm2, %v3910_v17 }
 0x342   : > { %v4530_v50 = vadd.f32 %v4529_v24, %v11954_v47  ;;  %v8784_v51 = vpop.f32.mrb[23].mxu1  ;;  %v4549_v1 = vmax.f32 %v4527_v12, 0.0 }
 0x344   : > { %v7820_v11 = vpop.f32.mrb[36].mxu0  ;;  %v4550_v30 = vmax.f32 %v4530_v50, 0.0 }
 0x345   : > { %5515 = vmatmul.mubr.bf16.vlgmr.msra.gmra.mrb[68].mxu0 %v5432_v59  ;;  %v7821_v61 = vpop.f32.mrb[37].mxu0 }
 0x346   : > { %5522 = vmatprep.mubr.bf16.mxu0 %v5446_v23  ;;  %8834 = vmatpush3.bf16.msra.mxu0 %v11780_v26  ;;  %v12030_v27 = vadd.f32 %v7821_v61, %v7820_v11  ;;  %v7823_v47 = vpop.f32.mrb[38].mxu0  ;;  %v5367_v23 = vrot.slane %v11834_v7, 1 }
 0x347   : > { %v4534_v15 = vpop.f32.mrb[24].mxu1  ;;  %8835 = vmatprep.subr.bf16.mxu0 %v12700_v19  ;;  %v7824_v33 = vpop.f32.mrb[39].mxu0 }
 0x348   : > { %v4535_v36 = vadd.f32 %v4534_v15, %v11994_v14  ;;  %v8787_v8 = vpop.f32.mrb[25].mxu1  ;;  %v12035_v39 = vadd.f32 %v7824_v33, %v7823_v47  ;;  %v12037_v32 = vld [vmem:[#allocation2 + $0x70] sm:$0x1]  ;;  %v5410_v14 = vor.u32 %v5408_v43, %v11876_v2  ;;  %v5368_v15 = vsel %vm4041_vm4, %v11861_v20, %v5367_v23 }
 0x349   : > { %v4537_v56 = vpop.f32.mrb[26].mxu1  ;;  %v5412_v25 = vshll.u32 %v12037_v32, 16  ;;  %v4781_v20 = vadd.f32 %v12017_v58, %v11921_v4 }
 0x34a   : > { %v4551_v40 = vmax.f32 %v4535_v36, 0.0  ;;  %v4538_v26 = vadd.f32 %v4537_v56, %v12000_v63  ;;  %v8788_v41 = vpop.f32.mrb[27].mxu1  ;;  %8836 = vmatpush3.bf16.msra.mxu0 %v11796_v55  ;;  %v4792_v23 = vadd.f32 %v12035_v39, %v11921_v4  ;;  %v9123_v39 = vld [vmem:[%s12645_s5 + $0x18] sm:$0xff]  }
 0x34b   : > { %8837 = vmatprep.subr.bf16.mxu0 %v12700_v19  ;;  %v5414_v35 = vrot.slane %v5412_v25, 1 }
 0x34c   : > { %v4555_v37 = vmax.f32 %v4549_v1, %v4551_v40  ;;  %v4552_v18 = vmax.f32 %v4538_v26, 0.0  ;;  %v9285_v26 = vld [vmem:[#allocation2 + $0x58] sm:$0xff] }
 0x34d   : > { %5523 = vmatmul.mubr.bf16.gmra.mrb[72].mxu0 %v5435_v48  ;;  %v5415_v63 = vsel %vm4002_vm3, %v5410_v14, %v5414_v35 }
 0x34e   : > { %v4556_v60 = vmax.f32 %v4550_v30, %v4552_v18  ;;  %8838 = vmatpush3.bf16.msra.mxu0 %v11813_v44  ;;  %5420 = vrot.lane.b32.xlu0 %v5415_v63, %s12670_s26  ;;  %v4784_v63 = vadd.f32 %v12020_v49, %v11921_v4 }
 0x34f   : > { %v4542_v3 = vpop.f32.mrb[28].mxu1  ;;  %8839 = vmatprep.subr.bf16.mxu0 %v12700_v19 }
 0x350   : > { %v4543_v55 = vadd.f32 %v4542_v3, %v12014_v45  ;;  %v8791_v2 = vpop.f32.mrb[29].mxu1 }
 0x351   : > { %v4545_v16 = vpop.f32.mrb[30].mxu1 }
 0x352   : > { %v4553_v31 = vmax.f32 %v4543_v55, 0.0  ;;  %v4546_v28 = vadd.f32 %v4545_v16, %v4489_v52  ;;  %v8792_v29 = vpop.f32.mrb[31].mxu1  ;;  %8840 = vmatpush3.bf16.msra.mxu0 %v11829_v46 }
 0x354   : > { %v4557_v5 = vmax.f32 %v4555_v37, %v4553_v31  ;;  %v4554_v53 = vmax.f32 %v4546_v28, 0.0  ;;  %v5323_v37 = vld [vmem:[#allocation2 + $0x58] sm:$0xfe]  ;;  %v9118_v31 = vld [vmem:[%s12645_s5 + $0x48] sm:$0xff]  }
 0x355   : > { %v12717_v28 = vld [vmem:[#allocation21_spill] sm:$0xff] }
 0x356   : > { %v4560_v42 = vrot.slane %v4557_v5, 1  ;;  %v4558_v57 = vmax.f32 %v4556_v60, %v4554_v53  ;;  %v4563_v17 = vrot.slane %v4557_v5, 2  ;;  %v9117_v60 = vld [vmem:[%s12645_s5] sm:$0xff]   ;;  %v5425_v53 = vrot.slane %v5323_v37, 1 }
 0x358   : > { %v4572_v44 = vrot.slane %v4558_v57, 1  ;;  %v4562_v12 = vmax.f32 %v4557_v5, %v4560_v42  ;;  %v4568_v6 = vrot.slane %v4558_v57, 2 }
 0x35a   : > { %v4570_v54 = vmax.f32 %v4562_v12, %v4568_v6  ;;  %v4565_v24 = vmax.f32 %v4562_v12, %v4563_v17  ;;  %v4574_v0 = vmax.f32 %v4558_v57, %v4572_v44  ;;  %v9119_v17 = vld [vmem:[%s12645_s5 + $0x8] sm:$0xff]  }
 0x35c   : > { %v4571_v50 = vpack.c.bf16 %v4570_v54, %v4570_v54  ;;  %v12051_v45 = vpack.c.bf16 %v4565_v24, %v4565_v24  ;;  %v4575_v51 = vmax.f32 %v4574_v0, %v4568_v6  ;;  %v9120_v6 = vld [vmem:[%s12645_s5 + $0x50] sm:$0xff]   ;;  %v4789_v0 = vadd.f32 %v12030_v27, %v11921_v4 }
 0x35e   : > { %v5688_v59 = vrot.slane %v4571_v50, 3  ;;  %v5682_v52 = vshrl.u32 %v12051_v45, 16  ;;  %v4576_v22 = vpack.c.bf16 %v4575_v51, %v4575_v51 }
 0x360   : > { %5689 = vrot.lane.b32.xlu1 %v5688_v59, %s12670_s26  ;;  %v5684_v46 = vrot.slane %v5682_v52, 1  ;;  %v5692_v11 = vshrl.u32 %v4576_v22, 16  ;;  %s9388_s26 = smov [#allocation5]  }
 0x362   : > { %5685 = vrot.lane.b32.xlu0 %v5684_v46, %s12672_s18  ;;  %v9121_v46 = vld [vmem:[%s12645_s5 + $0x10] sm:$0xff]   ;;  %s9291_s18 = sshll.u32 %s9388_s26, 4  ;;  %s9292_s18 = int_to_ptr.vmem [resolvable:$false] %s9291_s18 }
 0x363   : > { %s9293_s2 = scalar_lea.vmem %s9292_s18, 32 }
 0x364   : > { %5694 = vrot.lane.b32.xlu1 %v5692_v11, %s12674_s19  ;;  %v5427_v11 = vrot.slane %v11836_v38, 1  ;;  %s7007_s19 = scalar_lea.sflag [#allocation6], %s12549_s0 }
 0x374   : > { %v5375_v62 = vpop.permute.xlu0 %5374 }
 0x375   : > { %v5450_v47 = vsel %vm676_vm2, %v5368_v15, %v5375_v62  ;;  %v9122_v15 = vld [vmem:[%s12645_s5 + $0x58] sm:$0xff]  }
 0x376   : > { %v7826_v61 = vpop.f32.mrb[40].mxu0  ;;  %5530 = vmatprep.mubr.bf16.mxu0 %v5450_v47 }
 0x377   : > { %v7827_v43 = vpop.f32.mrb[41].mxu0 }
 0x378   : > { %v12061_v36 = vadd.f32 %v7827_v43, %v7826_v61  ;;  %v7829_v8 = vpop.f32.mrb[42].mxu0 }
 0x379   : > { %v7830_v33 = vpop.f32.mrb[43].mxu0  ;;  %v5417_v1 = vpop.permute.xlu0 %5416 }
 0x37a   : > { %v12063_v56 = vadd.f32 %v7830_v33, %v7829_v8  ;;  %v5357_v40 = vpop.permute.xlu1 %5356  ;;  %v5465_v25 = vsel %vm676_vm2, %v9285_v26, %v5417_v1 }
 0x37b   : > { %v5438_v7 = vsel %vm676_vm2, %v9285_v26, %v5357_v40  ;;  %v7848_v41 = vpop.f32.mrb[32].mxu1  ;;  %5571 = vmatprep.mubr.bf16.mxu1 %v5465_v25 }
 0x37c   : > { %v7849_v21 = vpop.f32.mrb[33].mxu1  ;;  %5531 = vmatmul.mubr.bf16.gmra.mrb[76].mxu0 %v5438_v7  ;;  %v5428_v7 = vsel %vm4041_vm4, %v11889_v10, %v5427_v11 }
 0x37d   : > { %v7850_v48 = vadd.f32 %v7849_v21, %v7848_v41  ;;  %v7851_v14 = vpop.f32.mrb[34].mxu1  ;;  %8841 = vmatprep.mubr.msk.bf16.mxu0 %vm9384_vm0, %v12700_v19  ;;  %v5419_v35 = vpop.permute.xlu0 %5418 }
 0x37e   : > { %v4894_v30 = vpop.f32.mrb[44].mxu0  ;;  %v7852_v18 = vpop.f32.mrb[35].mxu1  ;;  %v5468_v16 = vsel %vm676_vm2, %v11832_v9, %v5419_v35  ;;  %v5426_v9 = vsel %vm4041_vm4, %v5425_v53, %v11889_v10  ;;  %v9125_v10 = vld [vmem:[%s12645_s5 + $0x20] sm:$0xff]   ;;  %v9140_v53 = vld [vmem:[%s12645_s5 + $0x90] sm:$0xff]  }
 0x37f   : > { %v7853_v3 = vadd.f32 %v7852_v18, %v7851_v14  ;;  %v5398_v55 = vpop.permute.xlu1 %5397  ;;  %v4838_v2 = vadd.f32 %v7850_v48, %v4781_v20  ;;  %v8803_v58 = vpop.f32.mrb[45].mxu0  ;;  %v5429_v14 = vrot.slane %v12037_v32, 1  ;;  %v9126_v18 = vld [vmem:[%s12645_s5 + $0x68] sm:$0xff]   ;;  %v9128_v32 = vld [vmem:[%s12645_s5 + $0x70] sm:$0xff]  }
 0x380   : > { %v5454_v29 = vsel %vm676_vm2, %v12717_v28, %v5398_v55  ;;  %v4897_v5 = vpop.f32.mrb[46].mxu0  ;;  %v9130_v55 = vld [vmem:[%s12645_s5 + $0x78] sm:$0xff]   ;;  %v9132_v58 = vld [vmem:[%s12645_s5 + $0xc0] sm:$0xff]  }
 0x381   : > { %v4895_v42 = vadd.f32 %v4894_v30, %v4838_v2  ;;  %5572 = vmatmul.mubr.bf16.vlgmr.msra.gmra.mrb[68].mxu1 %v5454_v29  ;;  %v4841_v57 = vadd.f32 %v7853_v3, %v4784_v63  ;;  %v8804_v49 = vpop.f32.mrb[47].mxu0  ;;  %v5430_v63 = vsel %vm4041_vm4, %v5427_v11, %v5429_v14  ;;  %v9129_v3 = vld [vmem:[%s12645_s5 + $0x30] sm:$0xff]   ;;  %v9131_v2 = vld [vmem:[%s12645_s5 + $0x38] sm:$0xff]   ;;  %v9135_v28 = vld [vmem:[%s12645_s5 + $0x140] sm:$0xff]   ;;  %8045 = vmatprep.subr.bf16.mxu0 %v9132_v58 }
 0x382   : > { %5579 = vmatprep.mubr.bf16.mxu1 %v5468_v16  ;;  %8024 = vmatpush3.bf16.msra.mxu1 %v9117_v60  ;;  %v9127_v60 = vld [vmem:[%s12645_s5 + $0x28] sm:$0xff]   ;;  %v9133_v16 = vld [vmem:[%s12645_s5 + $0x80] sm:$0xff]  }
 0x383   : > { %v4898_v44 = vadd.f32 %v4897_v5, %v4841_v57  ;;  %v7854_v12 = vpop.f32.mrb[36].mxu1  ;;  %8025 = vmatprep.subr.bf16.mxu1 %v9118_v31  ;;  %v5400_v54 = vpop.permute.xlu1 %5399  ;;  %v4917_v1 = vmax.f32 %v4895_v42, 0.0  ;;  %v9134_v31 = vld [vmem:[%s12645_s5 + $0xc8] sm:$0xff]   ;;  %v9138_v5 = vld [vmem:[%s12645_s5 + $0xd0] sm:$0xff]   ;;  %v9142_v42 = vld [vmem:[%s12645_s5 + $0xd8] sm:$0xff]  }
 0x384   : > { %v7855_v24 = vpop.f32.mrb[37].mxu1  ;;  %8842 = vmatmul.mubr.msk.bf16.vlgmr.msra.gmra.mrb[80].mxu0 %vm676_vm2, %v5426_v9  ;;  %v5458_v47 = vsel %vm676_vm2, %v11867_v13, %v5400_v54  ;;  %v9124_v13 = vld [vmem:[%s12645_s5 + $0x60] sm:$0xff]   ;;  %v9136_v29 = vld [vmem:[%s12645_s5 + $0x88] sm:$0xff]   ;;  %v9144_v57 = vld [vmem:[%s12645_s5 + $0x98] sm:$0xff]  }
 0x385   : > { %v7856_v50 = vadd.f32 %v7855_v24, %v7854_v12  ;;  %v7857_v51 = vpop.f32.mrb[38].mxu1  ;;  %8845 = vmatprep.mubr.msk.bf16.mxu0 %vm9384_vm0, %v12700_v19  ;;  %v4918_v41 = vmax.f32 %v4898_v44, 0.0  ;;  %8046 = vmatpush3.bf16.msra.mxu0 %v9133_v16  ;;  %v9146_v49 = vld [vmem:[%s12645_s5 + $0xe0] sm:$0xff]   ;;  %v9150_v9 = vld [vmem:[%s12645_s5 + $0xe8] sm:$0xff]   ;;  %v9154_v12 = vld [vmem:[%s12645_s5 + $0xf0] sm:$0xff]  }
 0x386   : > { %v4902_v59 = vpop.f32.mrb[48].mxu0  ;;  %v7858_v52 = vpop.f32.mrb[39].mxu1  ;;  %8026 = vmatpush3.bf16.msra.mxu1 %v9119_v17  ;;  %8047 = vmatprep.subr.bf16.mxu0 %v9134_v31  ;;  %v9148_v17 = vld [vmem:[%s12645_s5 + $0xa0] sm:$0xff]   ;;  %v9152_v44 = vld [vmem:[%s12645_s5 + $0xa8] sm:$0xff]  }
 0x387   : > { %v8807_v22 = vpop.f32.mrb[49].mxu0  ;;  %v7859_v62 = vadd.f32 %v7858_v52, %v7857_v51  ;;  %v4846_v27 = vadd.f32 %v7856_v50, %v4789_v0  ;;  %8027 = vmatprep.subr.bf16.mxu1 %v9120_v6  ;;  %v5402_v6 = vpop.permute.xlu1 %5401  ;;  %v9156_v50 = vld [vmem:[%s12645_s5 + $0xb0] sm:$0xff]   ;;  %v4797_v51 = vadd.f32 %v12061_v36, %v11921_v4 }
 0x388   : > { %v4905_v61 = vpop.f32.mrb[50].mxu0  ;;  %v5462_v11 = vsel %vm676_vm2, %v11882_v34, %v5402_v6 }
 0x389   : > { %v8808_v43 = vpop.f32.mrb[51].mxu0  ;;  %v4903_v8 = vadd.f32 %v4902_v59, %v4846_v27  ;;  %5580 = vmatmul.mubr.bf16.gmra.mrb[72].mxu1 %v5458_v47  ;;  %v4849_v33 = vadd.f32 %v7859_v62, %v4792_v23  ;;  %8048 = vmatpush3.bf16.msra.mxu0 %v9136_v29  ;;  %v4800_v62 = vadd.f32 %v12063_v56, %v11921_v4 }
 0x38a   : > { %8028 = vmatpush3.bf16.msra.mxu1 %v9121_v46  ;;  %8049 = vmatprep.subr.bf16.mxu0 %v9138_v5  ;;  %v9158_v46 = vld [vmem:[%s12645_s5 + $0xf8] sm:$0xff]  }
 0x38b   : > { %v4919_v40 = vmax.f32 %v4903_v8, 0.0  ;;  %v4906_v26 = vadd.f32 %v4905_v61, %v4849_v33  ;;  %8029 = vmatprep.subr.bf16.mxu1 %v9122_v15 }
 0x38c   : > { %8846 = vmatmul.mubr.msk.bf16.gmra.mrb[84].mxu0 %vm676_vm2, %v5428_v7 }
 0x38d   : > { %v12116_v25 = vmax.f32 %v4917_v1, %v4919_v40  ;;  %v4920_v21 = vmax.f32 %v4906_v26, 0.0  ;;  %8849 = vmatprep.mubr.msk.bf16.mxu0 %vm9384_vm0, %v12700_v19  ;;  %8050 = vmatpush3.bf16.msra.mxu0 %v9140_v53 }
 0x38e   : > { %v12118_v20 = vpop.f32.mrb[52].mxu0  ;;  %8030 = vmatpush3.bf16.msra.mxu1 %v9123_v39  ;;  %8051 = vmatprep.subr.bf16.mxu0 %v9142_v42 }
 0x38f   : > { %v8811_v48 = vpop.f32.mrb[53].mxu0  ;;  %v12126_v30 = vmax.f32 %v4918_v41, %v4920_v21  ;;  %8031 = vmatprep.subr.bf16.mxu1 %v9124_v13 }
 0x390   : > { %v12128_v37 = vpop.f32.mrb[54].mxu0 }
 0x391   : > { %v8812_v35 = vpop.f32.mrb[55].mxu0  ;;  %8052 = vmatpush3.bf16.msra.mxu0 %v9144_v57 }
 0x392   : > { %8032 = vmatpush3.bf16.msra.mxu1 %v9125_v10  ;;  %8053 = vmatprep.subr.bf16.mxu0 %v9146_v49 }
 0x393   : > { %8033 = vmatprep.subr.bf16.mxu1 %v9126_v18 }
 0x394   : > { %8850 = vmatmul.mubr.msk.bf16.gmra.mrb[88].mxu0 %vm676_vm2, %v5430_v63 }
 0x395   : > { %8054 = vmatpush3.bf16.msra.mxu0 %v9148_v17 }
 0x396   : > { %8034 = vmatpush3.bf16.msra.mxu1 %v9127_v60  ;;  %8055 = vmatprep.subr.bf16.mxu0 %v9150_v9  ;;  %v9137_v9 = vld [vmem:[%s12645_s5 + $0x100] sm:$0xff]  }
 0x397   : > { %8035 = vmatprep.subr.bf16.mxu1 %v9128_v32 }
 0x399   : > { %8056 = vmatpush3.bf16.msra.mxu0 %v9152_v44 }
 0x39a   : > { %8036 = vmatpush3.bf16.msra.mxu1 %v9129_v3  ;;  %8057 = vmatprep.subr.bf16.mxu0 %v9154_v12 }
 0x39b   : > { %8037 = vmatprep.subr.bf16.mxu1 %v9130_v55 }
 0x39d   : > { %8058 = vmatpush3.bf16.msra.mxu0 %v9156_v50 }
 0x39e   : > { %8038 = vmatpush3.bf16.msra.mxu1 %v9131_v2  ;;  %8059 = vmatprep.subr.bf16.mxu0 %v9158_v46 }
 0x39f   : > { %8067 = vmatprep.subr.bf16.mxu1 %v9135_v28 }
 0x3c0   : > { %v7860_v54 = vpop.f32.mrb[40].mxu1  ;;  %v5421_v0 = vpop.permute.xlu0 %5420 }
 0x3c1   : > { %v7861_v24 = vpop.f32.mrb[41].mxu1  ;;  %v5471_v22 = vsel %vm676_vm2, %v11836_v38, %v5421_v0  ;;  %v9160_v38 = vld [vmem:[%s12645_s5 + $0xb8] sm:$0xff]  }
 0x3c2   : > { %v7862_v59 = vadd.f32 %v7861_v24, %v7860_v54  ;;  %v7863_v52 = vpop.f32.mrb[42].mxu1  ;;  %5587 = vmatprep.mubr.bf16.mxu1 %v5471_v22  ;;  %8060 = vmatpush3.bf16.msra.mxu0 %v9160_v38  ;;  %v9139_v54 = vld [vmem:[%s12645_s5 + $0x148] sm:$0xff]   ;;  %v9149_v38 = vld [vmem:[%s12645_s5 + $0x118] sm:$0xff]  }
 0x3c3   : > { %v7864_v23 = vpop.f32.mrb[43].mxu1  ;;  %5588 = vmatmul.mubr.bf16.gmra.mrb[76].mxu1 %v5462_v11 }
 0x3c4   : > { %v4854_v27 = vadd.f32 %v7862_v59, %v4797_v51  ;;  %v7865_v36 = vadd.f32 %v7864_v23, %v7863_v52  ;;  %v9143_v52 = vld [vmem:[%s12645_s5 + $0x150] sm:$0xff]  }
 0x3c6   : > { %v4911_v61 = vadd.f32 %v12118_v20, %v4854_v27  ;;  %v4857_v15 = vadd.f32 %v7865_v36, %v4800_v62  ;;  %v9145_v27 = vld [vmem:[%s12645_s5 + $0x110] sm:$0xff]   ;;  %v9147_v36 = vld [vmem:[%s12645_s5 + $0x158] sm:$0xff]  }
 0x3c8   : > { %v4921_v47 = vmax.f32 %v4911_v61, 0.0  ;;  %v4914_v34 = vadd.f32 %v12128_v37, %v4857_v15  ;;  %v7889_v43 = vpop.f32.mrb[44].mxu1  ;;  %v7923_v8 = vpop.f32.mrb[56].mxu0  ;;  %v9151_v15 = vld [vmem:[%s12645_s5 + $0x160] sm:$0xff]  }
 0x3c9   : > { %v7890_v33 = vpop.f32.mrb[45].mxu1  ;;  %v7924_v39 = vpop.f32.mrb[57].mxu0 }
 0x3ca   : > { %v4925_v56 = vmax.f32 %v12116_v25, %v4921_v47  ;;  %v4922_v1 = vmax.f32 %v4914_v34, 0.0  ;;  %v7891_v40 = vadd.f32 %v7890_v33, %v7889_v43  ;;  %v7925_v26 = vadd.f32 %v7924_v39, %v7923_v8  ;;  %v7892_v7 = vpop.f32.mrb[46].mxu1  ;;  %v7926_v13 = vpop.f32.mrb[58].mxu0  ;;  %v9153_v39 = vld [vmem:[%s12645_s5 + $0x120] sm:$0xff]  }
 0x3cb   : > { %v7893_v41 = vpop.f32.mrb[47].mxu1  ;;  %v7927_v21 = vpop.f32.mrb[59].mxu0 }
 0x3cc   : > { %v4926_v20 = vmax.f32 %v12126_v30, %v4922_v1  ;;  %v5149_v48 = vadd.f32 %v7891_v40, %v11921_v4  ;;  %v7894_v10 = vadd.f32 %v7893_v41, %v7892_v7  ;;  %v7928_v14 = vadd.f32 %v7927_v21, %v7926_v13  ;;  %v9157_v1 = vld [vmem:[%s12645_s5 + $0x128] sm:$0xff]   ;;  %v9164_v41 = vld [vmem:[%s12645_s5 + $0x1c0] sm:$0xff]  }
 0x3cd   : > { %v4928_v37 = vrot.slane %v4925_v56, 1  ;;  %v4931_v32 = vrot.slane %v4925_v56, 2  ;;  %8089 = vmatprep.subr.bf16.mxu0 %v9164_v41 }
 0x3ce   : > { %v5152_v18 = vadd.f32 %v7894_v10, %v11921_v4  ;;  %v4936_v35 = vrot.slane %v4926_v20, 2  ;;  %v4940_v60 = vrot.slane %v4926_v20, 1  ;;  %v5206_v63 = vadd.f32 %v7925_v26, %v5149_v48  ;;  %v9159_v26 = vld [vmem:[%s12645_s5 + $0x170] sm:$0xff]   ;;  %v9162_v48 = vld [vmem:[%s12645_s5 + $0x178] sm:$0xff]  }
 0x3cf   : > { %v4930_v25 = vmax.f32 %v4925_v56, %v4928_v37  ;;  %v9155_v56 = vld [vmem:[%s12645_s5 + $0x168] sm:$0xff]   ;;  %v9163_v10 = vld [vmem:[%s12645_s5 + $0x138] sm:$0xff]  }
 0x3d0   : > { %v7895_v3 = vpop.f32.mrb[48].mxu1  ;;  %v4942_v55 = vmax.f32 %v4926_v20, %v4940_v60  ;;  %v5209_v2 = vadd.f32 %v7928_v14, %v5152_v18  ;;  %v9161_v20 = vld [vmem:[%s12645_s5 + $0x130] sm:$0xff]  }
 0x3d1   : > { %v7896_v58 = vpop.f32.mrb[49].mxu1  ;;  %v4933_v16 = vmax.f32 %v4930_v25, %v4931_v32  ;;  %v4938_v31 = vmax.f32 %v4930_v25, %v4936_v35 }
 0x3d2   : > { %v12215_v28 = vadd.f32 %v7896_v58, %v7895_v3  ;;  %v7898_v30 = vpop.f32.mrb[50].mxu1  ;;  %v4943_v29 = vmax.f32 %v4942_v55, %v4936_v35  ;;  %v12221_v57 = vpop.permute.xlu1 %5689 }
 0x3d3   : > { %v7899_v5 = vpop.f32.mrb[51].mxu1  ;;  %v12217_v53 = vpack.c.bf16 %v4933_v16, %v4933_v16  ;;  %v4939_v50 = vpack.c.bf16 %v4938_v31, %v4938_v31 }
 0x3d4   : > { %v12219_v42 = vadd.f32 %v7899_v5, %v7898_v30  ;;  %v5686_v49 = vpop.permute.xlu0 %5685  ;;  %v4944_v17 = vpack.c.bf16 %v4943_v29, %v4943_v29  ;;  %v5157_v25 = vadd.f32 %v12215_v28, %v11921_v4 }
 0x3d5   : > { %v5743_v44 = vsel %vm5741_vm5, %v12051_v45, %v5686_v49  ;;  %v5746_v12 = vsel %vm676_vm2, %v5686_v49, %v12221_v57  ;;  %v5697_v6 = vshrl.u32 %v12217_v53, 16  ;;  %v9141_v45 = vld [vmem:[%s12645_s5 + $0x108] sm:$0xff]   ;;  %v5703_v23 = vrot.slane %v4939_v50, 3 }
 0x3d6   : > { %6579 = vmatprep.mubr.bf16.mxu1 %v5746_v12  ;;  %v5707_v24 = vshrl.u32 %v4944_v17, 16 }
 0x3d7   : > { %6580 = vmatmul.mubr.bf16.vlgmr.msra.gmra.mrb[80].mxu1 %v5743_v44  ;;  %v5699_v0 = vrot.slane %v5697_v6, 1 }
 0x3d8   : > { %v7901_v51 = vpop.f32.mrb[52].mxu1  ;;  %5709 = vrot.lane.b32.xlu1 %v5707_v24, %s12718_s15  ;;  %8068 = vmatpush3.bf16.msra.mxu1 %v9137_v9 }
 0x3d9   : > { %5700 = vrot.lane.b32.xlu0 %v5699_v0, %s12719_s17  ;;  %v7902_v59 = vpop.f32.mrb[53].mxu1  ;;  %8069 = vmatprep.subr.bf16.mxu1 %v9139_v54 }
 0x3da   : > { %v7903_v22 = vadd.f32 %v7902_v59, %v7901_v51  ;;  %v7904_v46 = vpop.f32.mrb[54].mxu1 }
 0x3db   : > { %v7905_v11 = vpop.f32.mrb[55].mxu1 }
 0x3dc   : > { %v12242_v62 = vadd.f32 %v7905_v11, %v7904_v46  ;;  %8070 = vmatpush3.bf16.msra.mxu1 %v9141_v45  ;;  %v5165_v9 = vadd.f32 %v7903_v22, %v11921_v4 }
 0x3dd   : > { %5704 = vrot.lane.b32.xlu0 %v5703_v23, %s12720_s20  ;;  %8071 = vmatprep.subr.bf16.mxu1 %v9143_v52 }
 0x3e0   : > { %8072 = vmatpush3.bf16.msra.mxu1 %v9145_v27  ;;  %v5262_v61 = vpop.f32.mrb[56].mxu1 }
 0x3e1   : > { %8073 = vmatprep.subr.bf16.mxu1 %v9147_v36  ;;  %v5263_v47 = vadd.f32 %v5262_v61, %v5206_v63  ;;  %v8823_v34 = vpop.f32.mrb[57].mxu1 }
 0x3e2   : > { %v5265_v43 = vpop.f32.mrb[58].mxu1 }
 0x3e3   : > { %v5266_v8 = vadd.f32 %v5265_v43, %v5209_v2  ;;  %v8824_v33 = vpop.f32.mrb[59].mxu1  ;;  %v5160_v2 = vadd.f32 %v12219_v42, %v11921_v4  ;;  %v5285_v29 = vmax.f32 %v5263_v47, 0.0  ;;  %v12289_v42 = vld [vmem:[%s12644_s4] ss:$0 sm:$0xff] }
 0x3e4   : > { %8074 = vmatpush3.bf16.msra.mxu1 %v9149_v38  ;;  %v5168_v50 = vadd.f32 %v12289_v42, %v12242_v62 }
 0x3e5   : > { %8075 = vmatprep.subr.bf16.mxu1 %v9151_v15  ;;  %v5286_v12 = vmax.f32 %v5266_v8, 0.0 }
 0x3e8   : > { %8076 = vmatpush3.bf16.msra.mxu1 %v9153_v39  ;;  %v5270_v40 = vpop.f32.mrb[60].mxu1 }
 0x3e9   : > { %8077 = vmatprep.subr.bf16.mxu1 %v9155_v56  ;;  %v8827_v7 = vpop.f32.mrb[61].mxu1 }
 0x3ea   : > { %v5273_v13 = vpop.f32.mrb[62].mxu1 }
 0x3eb   : > { %v8828_v21 = vpop.f32.mrb[63].mxu1 }
 0x3ec   : > { %8078 = vmatpush3.bf16.msra.mxu1 %v9157_v1 }
 0x3ed   : > { %8079 = vmatprep.subr.bf16.mxu1 %v9159_v26 }
 0x3f0   : > { %8080 = vmatpush3.bf16.msra.mxu1 %v9161_v20  ;;  %v5278_v14 = vpop.f32.mrb[64].mxu1 }
 0x3f1   : > { %8081 = vmatprep.subr.bf16.mxu1 %v9162_v48  ;;  %v8831_v37 = vpop.f32.mrb[65].mxu1 }
 0x3f2   : > { %v5281_v18 = vpop.f32.mrb[66].mxu1 }
 0x3f3   : > { %v8832_v35 = vpop.f32.mrb[67].mxu1 }
 0x3f4   : > { %8082 = vmatpush3.bf16.msra.mxu1 %v9163_v10 }
 0x408   : > { %v7929_v60 = vpop.f32.mrb[60].mxu0 }
 0x409   : > { %v7930_v63 = vpop.f32.mrb[61].mxu0 }
 0x40a   : > { %v7931_v32 = vadd.f32 %v7930_v63, %v7929_v60  ;;  %v7932_v3 = vpop.f32.mrb[62].mxu0 }
 0x40b   : > { %v7933_v55 = vpop.f32.mrb[63].mxu0 }
 0x40c   : > { %v5214_v58 = vadd.f32 %v7931_v32, %v5157_v25  ;;  %v7934_v16 = vadd.f32 %v7933_v55, %v7932_v3  ;;  %v9180_v25 = vld [vmem:[%s12645_s5 + $0x240] sm:$0xff]   ;;  %v5695_v32 = vpop.permute.xlu1 %5694 }
 0x40d   : > { %8111 = vmatprep.subr.bf16.mxu1 %v9180_v25  ;;  %v9165_v55 = vld [vmem:[%s12645_s5 + $0x180] sm:$0xff]  }
 0x40e   : > { %v5271_v31 = vadd.f32 %v5270_v40, %v5214_v58  ;;  %v5217_v30 = vadd.f32 %v7934_v16, %v5160_v2  ;;  %v9166_v58 = vld [vmem:[%s12645_s5 + $0x1c8] sm:$0xff]   ;;  %v5749_v16 = vsel %vm508_vm1, %v12221_v57, %v5695_v32  ;;  %v9168_v57 = vld [vmem:[%s12645_s5 + $0x1d0] sm:$0xff]  }
 0x410   : > { %v5287_v5 = vmax.f32 %v5271_v31, 0.0  ;;  %v5274_v49 = vadd.f32 %v5273_v13, %v5217_v30  ;;  %v7935_v17 = vpop.f32.mrb[64].mxu0 }
 0x411   : > { %v7936_v44 = vpop.f32.mrb[65].mxu0 }
 0x412   : > { %v5291_v6 = vmax.f32 %v5285_v29, %v5287_v5  ;;  %v5288_v28 = vmax.f32 %v5274_v49, 0.0  ;;  %v7937_v54 = vadd.f32 %v7936_v44, %v7935_v17  ;;  %v7938_v24 = vpop.f32.mrb[66].mxu0  ;;  %v9167_v29 = vld [vmem:[%s12645_s5 + $0x188] sm:$0xff]  }
 0x413   : > { %v7939_v0 = vpop.f32.mrb[67].mxu0 }
 0x414   : > { %v5292_v51 = vmax.f32 %v5286_v12, %v5288_v28  ;;  %v5222_v45 = vadd.f32 %v7937_v54, %v5165_v9  ;;  %v7940_v59 = vadd.f32 %v7939_v0, %v7938_v24  ;;  %v9182_v9 = vld [vmem:[%s12645_s5 + $0x248] sm:$0xff]   ;;  %v9169_v54 = vld [vmem:[%s12645_s5 + $0x190] sm:$0xff]  }
 0x415   : > { %v9184_v24 = vld [vmem:[%s12645_s5 + $0x208] sm:$0xff]  }
 0x416   : > { %v5279_v52 = vadd.f32 %v5278_v14, %v5222_v45  ;;  %v5225_v4 = vadd.f32 %v7940_v59, %v5168_v50  ;;  %v9170_v50 = vld [vmem:[%s12645_s5 + $0x1d8] sm:$0xff]  }
 0x418   : > { %v5289_v22 = vmax.f32 %v5279_v52, 0.0  ;;  %v5282_v46 = vadd.f32 %v5281_v18, %v5225_v4  ;;  %v7964_v11 = vpop.f32.mrb[68].mxu0 }
 0x419   : > { %v7965_v23 = vpop.f32.mrb[69].mxu0 }
 0x41a   : > { %v5293_v27 = vmax.f32 %v5291_v6, %v5289_v22  ;;  %v5290_v36 = vmax.f32 %v5282_v46, 0.0  ;;  %v12293_v38 = vadd.f32 %v7965_v23, %v7964_v11  ;;  %v7967_v61 = vpop.f32.mrb[70].mxu0  ;;  %v9171_v46 = vld [vmem:[%s12645_s5 + $0x198] sm:$0xff]   ;;  %v9188_v11 = vld [vmem:[%s12645_s5 + $0x210] sm:$0xff]  }
 0x41b   : > { %v7968_v15 = vpop.f32.mrb[71].mxu0 }
 0x41c   : > { %v5294_v47 = vmax.f32 %v5292_v51, %v5290_v36  ;;  %v12295_v34 = vadd.f32 %v7968_v15, %v7967_v61  ;;  %v5296_v43 = vrot.slane %v5293_v27, 1  ;;  %v5299_v33 = vrot.slane %v5293_v27, 2  ;;  %v9186_v51 = vld [vmem:[%s12645_s5 + $0x250] sm:$0xff]   ;;  %v9172_v36 = vld [vmem:[%s12645_s5 + $0x1e0] sm:$0xff]  }
 0x41d   : > { %v5517_v52 = vadd.f32 %v12289_v42, %v12293_v38  ;;  %v9190_v38 = vld [vmem:[%s12645_s5 + $0x258] sm:$0xff]  }
 0x41e   : > { %v5298_v62 = vmax.f32 %v5293_v27, %v5296_v43  ;;  %v5304_v8 = vrot.slane %v5294_v47, 2  ;;  %v5308_v39 = vrot.slane %v5294_v47, 1  ;;  %v5520_v61 = vadd.f32 %v12289_v42, %v12295_v34  ;;  %v9174_v34 = vld [vmem:[%s12645_s5 + $0x1e8] sm:$0xff]  }
 0x420   : > { %v7970_v56 = vpop.f32.mrb[72].mxu0  ;;  %v5306_v1 = vmax.f32 %v5298_v62, %v5304_v8  ;;  %v5301_v40 = vmax.f32 %v5298_v62, %v5299_v33  ;;  %v5310_v26 = vmax.f32 %v5294_v47, %v5308_v39 }
 0x421   : > { %v7971_v7 = vpop.f32.mrb[73].mxu0 }
 0x422   : > { %v12297_v13 = vadd.f32 %v7971_v7, %v7970_v56  ;;  %v7973_v41 = vpop.f32.mrb[74].mxu0  ;;  %v5307_v21 = vpack.c.bf16 %v5306_v1, %v5306_v1  ;;  %v12299_v20 = vpack.c.bf16 %v5301_v40, %v5301_v40  ;;  %v5311_v48 = vmax.f32 %v5310_v26, %v5304_v8  ;;  %v9173_v56 = vld [vmem:[%s12645_s5 + $0x1a0] sm:$0xff]   ;;  %v9192_v1 = vld [vmem:[%s12645_s5 + $0x218] sm:$0xff]  }
 0x423   : > { %v7974_v10 = vpop.f32.mrb[75].mxu0  ;;  %v9194_v40 = vld [vmem:[%s12645_s5 + $0x260] sm:$0xff]  }
 0x424   : > { %v12301_v14 = vadd.f32 %v7974_v10, %v7973_v41  ;;  %v5718_v37 = vrot.slane %v5307_v21, 3  ;;  %v5712_v18 = vshrl.u32 %v12299_v20, 16  ;;  %v5312_v35 = vpack.c.bf16 %v5311_v48, %v5311_v48 }
 0x425   : > { %v5525_v21 = vadd.f32 %v12289_v42, %v12297_v13  ;;  %v9198_v13 = vld [vmem:[%s12645_s5 + $0x268] sm:$0xff]  }
 0x426   : > { %5719 = vrot.lane.b32.xlu1 %v5718_v37, %s12720_s20  ;;  %v5714_v60 = vrot.slane %v5712_v18, 1  ;;  %v5722_v63 = vshrl.u32 %v5312_v35, 16  ;;  %v9175_v37 = vld [vmem:[%s12645_s5 + $0x1a8] sm:$0xff]   ;;  %v9196_v18 = vld [vmem:[%s12645_s5 + $0x220] sm:$0xff]   ;;  %v5528_v25 = vadd.f32 %v12289_v42, %v12301_v14  ;;  %v9178_v14 = vld [vmem:[%s12645_s5 + $0x1f8] sm:$0xff]  }
 0x428   : > { %5715 = vrot.lane.b32.xlu0 %v5714_v60, %s12719_s17 }
 0x42a   : > { %5724 = vrot.lane.b32.xlu1 %v5722_v63, %s12718_s15  ;;  %v9176_v63 = vld [vmem:[%s12645_s5 + $0x1f0] sm:$0xff]  }
 0x44a   : > { %v5710_v31 = vpop.permute.xlu1 %5709 }
 0x44b   : > { %v5701_v3 = vpop.permute.xlu0 %5700 }
 0x44c   : > { %v5752_v2 = vsel %vm5741_vm5, %v12217_v53, %v5701_v3  ;;  %v9181_v53 = vld [vmem:[%s12645_s5 + $0x200] sm:$0xff]  }
 0x44d   : > { %6619 = vmatprep.mubr.bf16.mxu0 %v5752_v2 }
 0x44e   : > { %6620 = vmatmul.mubr.bf16.vlgmr.msra.gmra.mrb[92].mxu0 %v5749_v16 }
 0x44f   : > { %v5705_v30 = vpop.permute.xlu0 %5704  ;;  %8090 = vmatpush3.bf16.msra.mxu0 %v9165_v55  ;;  %v7976_v49 = vpop.f32.mrb[76].mxu0 }
 0x450   : > { %v5755_v5 = vsel %vm676_vm2, %v5701_v3, %v5705_v30  ;;  %v5758_v17 = vsel %vm508_vm1, %v5705_v30, %v5710_v31  ;;  %8091 = vmatprep.subr.bf16.mxu0 %v9166_v58  ;;  %v7977_v44 = vpop.f32.mrb[77].mxu0  ;;  %v9177_v30 = vld [vmem:[%s12645_s5 + $0x1b0] sm:$0xff]  }
 0x451   : > { %6659 = vmatprep.mubr.bf16.mxu1 %v5758_v17  ;;  %v12334_v12 = vadd.f32 %v7977_v44, %v7976_v49  ;;  %v7979_v6 = vpop.f32.mrb[78].mxu0 }
 0x452   : > { %6660 = vmatmul.mubr.bf16.vlgmr.msra.gmra.mrb[84].mxu1 %v5755_v5  ;;  %v7980_v28 = vpop.f32.mrb[79].mxu0 }
 0x453   : > { %8092 = vmatpush3.bf16.msra.mxu0 %v9167_v29  ;;  %8112 = vmatpush3.bf16.msra.mxu1 %v9181_v53  ;;  %v12342_v0 = vadd.f32 %v7980_v28, %v7979_v6  ;;  %v9200_v29 = vld [vmem:[%s12645_s5 + $0x228] sm:$0xff]   ;;  %v9202_v53 = vld [vmem:[%s12645_s5 + $0x270] sm:$0xff]   ;;  %v9179_v6 = vld [vmem:[%s12645_s5 + $0x1b8] sm:$0xff]  }
 0x454   : > { %8093 = vmatprep.subr.bf16.mxu0 %v9168_v57  ;;  %8113 = vmatprep.subr.bf16.mxu1 %v9182_v9  ;;  %v7998_v45 = vpop.f32.mrb[68].mxu1  ;;  %v9204_v28 = vld [vmem:[%s12645_s5 + $0x230] sm:$0xff]  }
 0x455   : > { %v7999_v59 = vpop.f32.mrb[69].mxu1 }
 0x456   : > { %v8000_v4 = vadd.f32 %v7999_v59, %v7998_v45  ;;  %v8001_v22 = vpop.f32.mrb[70].mxu1 }
 0x457   : > { %8094 = vmatpush3.bf16.msra.mxu0 %v9169_v54  ;;  %8114 = vmatpush3.bf16.msra.mxu1 %v9184_v24  ;;  %v8002_v23 = vpop.f32.mrb[71].mxu1  ;;  %v5630_v27 = vpop.f32.mrb[80].mxu0  ;;  %v9183_v24 = vld [vmem:[%s12645_s5 + $0x2c0] sm:$0xff]  }
 0x458   : > { %8095 = vmatprep.subr.bf16.mxu0 %v9170_v50  ;;  %8115 = vmatprep.subr.bf16.mxu1 %v9186_v51  ;;  %v8003_v15 = vadd.f32 %v8002_v23, %v8001_v22  ;;  %v5574_v47 = vadd.f32 %v8000_v4, %v5517_v52  ;;  %v8843_v43 = vpop.f32.mrb[81].mxu0  ;;  %v5533_v22 = vadd.f32 %v12289_v42, %v12334_v12 }
 0x459   : > { %v5633_v62 = vpop.f32.mrb[82].mxu0 }
 0x45a   : > { %v5631_v8 = vadd.f32 %v5630_v27, %v5574_v47  ;;  %v5577_v33 = vadd.f32 %v8003_v15, %v5520_v61  ;;  %v8844_v39 = vpop.f32.mrb[83].mxu0  ;;  %v5536_v27 = vadd.f32 %v12289_v42, %v12342_v0  ;;  %v9185_v61 = vld [vmem:[%s12645_s5 + $0x280] sm:$0xff]  }
 0x45b   : > { %8096 = vmatpush3.bf16.msra.mxu0 %v9171_v46  ;;  %8116 = vmatpush3.bf16.msra.mxu1 %v9188_v11 }
 0x45c   : > { %8097 = vmatprep.subr.bf16.mxu0 %v9172_v36  ;;  %8117 = vmatprep.subr.bf16.mxu1 %v9190_v38  ;;  %v5634_v26 = vadd.f32 %v5633_v62, %v5577_v33  ;;  %v8004_v7 = vpop.f32.mrb[72].mxu1  ;;  %v5653_v5 = vmax.f32 %v5631_v8, 0.0  ;;  %v9187_v62 = vld [vmem:[%s12645_s5 + $0x2c8] sm:$0xff]  }
 0x45d   : > { %v8005_v41 = vpop.f32.mrb[73].mxu1  ;;  %v9189_v8 = vld [vmem:[%s12645_s5 + $0x288] sm:$0xff]  }
 0x45e   : > { %v8006_v48 = vadd.f32 %v8005_v41, %v8004_v7  ;;  %v8007_v10 = vpop.f32.mrb[74].mxu1  ;;  %v5654_v57 = vmax.f32 %v5634_v26, 0.0  ;;  %v9195_v7 = vld [vmem:[%s12645_s5 + $0x2d8] sm:$0xff]  }
 0x45f   : > { %8098 = vmatpush3.bf16.msra.mxu0 %v9173_v56  ;;  %8118 = vmatpush3.bf16.msra.mxu1 %v9192_v1  ;;  %v8008_v35 = vpop.f32.mrb[75].mxu1  ;;  %v5638_v60 = vpop.f32.mrb[84].mxu0 }
 0x460   : > { %8099 = vmatprep.subr.bf16.mxu0 %v9174_v34  ;;  %8119 = vmatprep.subr.bf16.mxu1 %v9194_v40  ;;  %v8009_v32 = vadd.f32 %v8008_v35, %v8007_v10  ;;  %v5582_v3 = vadd.f32 %v8006_v48, %v5525_v21  ;;  %v8847_v55 = vpop.f32.mrb[85].mxu0  ;;  %v9193_v34 = vld [vmem:[%s12645_s5 + $0x290] sm:$0xff]   ;;  %v9197_v35 = vld [vmem:[%s12645_s5 + $0x298] sm:$0xff]  }
 0x461   : > { %v5641_v2 = vpop.f32.mrb[86].mxu0 }
 0x462   : > { %v5639_v58 = vadd.f32 %v5638_v60, %v5582_v3  ;;  %v5585_v16 = vadd.f32 %v8009_v32, %v5528_v25  ;;  %v8848_v31 = vpop.f32.mrb[87].mxu0  ;;  %v9199_v25 = vld [vmem:[%s12645_s5 + $0x2e0] sm:$0xff]  }
 0x463   : > { %8100 = vmatpush3.bf16.msra.mxu0 %v9175_v37  ;;  %8120 = vmatpush3.bf16.msra.mxu1 %v9196_v18  ;;  %v9206_v37 = vld [vmem:[%s12645_s5 + $0x278] sm:$0xff]  }
 0x464   : > { %8101 = vmatprep.subr.bf16.mxu0 %v9176_v63  ;;  %8121 = vmatprep.subr.bf16.mxu1 %v9198_v13  ;;  %v5655_v49 = vmax.f32 %v5639_v58, 0.0  ;;  %v5642_v17 = vadd.f32 %v5641_v2, %v5585_v16  ;;  %v9208_v18 = vld [vmem:[%s12645_s5 + $0x238] sm:$0xff]   ;;  %v9201_v2 = vld [vmem:[%s12645_s5 + $0x2a0] sm:$0xff]  }
 0x466   : > { %v5659_v9 = vmax.f32 %v5653_v5, %v5655_v49  ;;  %v5656_v44 = vmax.f32 %v5642_v17, 0.0 }
 0x467   : > { %8102 = vmatpush3.bf16.msra.mxu0 %v9177_v30  ;;  %8122 = vmatpush3.bf16.msra.mxu1 %v9200_v29  ;;  %v5646_v54 = vpop.f32.mrb[88].mxu0 }
 0x468   : > { %8103 = vmatprep.subr.bf16.mxu0 %v9178_v14  ;;  %8123 = vmatprep.subr.bf16.mxu1 %v9202_v53  ;;  %v5660_v50 = vmax.f32 %v5654_v57, %v5656_v44  ;;  %v8851_v51 = vpop.f32.mrb[89].mxu0  ;;  %v9203_v14 = vld [vmem:[%s12645_s5 + $0x2e8] sm:$0xff]  }
 0x469   : > { %v5649_v45 = vpop.f32.mrb[90].mxu0  ;;  %v9205_v57 = vld [vmem:[%s12645_s5 + $0x2a8] sm:$0xff]  }
 0x46a   : > { %v8852_v59 = vpop.f32.mrb[91].mxu0 }
 0x46b   : > { %8104 = vmatpush3.bf16.msra.mxu0 %v9179_v6  ;;  %8124 = vmatpush3.bf16.msra.mxu1 %v9204_v28  ;;  %v9209_v6 = vld [vmem:[%s12645_s5 + $0x2b0] sm:$0xff]   ;;  %v9210_v28 = vld [vmem:[%s12645_s5 + $0x2f8] sm:$0xff]  }
 0x46c   : > { %8133 = vmatprep.subr.bf16.mxu0 %v9183_v24  ;;  %8125 = vmatprep.subr.bf16.mxu1 %v9206_v37  ;;  %v5970_v24 = vld [vmem:[%s12646_s6] sm:$0x1] }
 0x46d   : > { %v9220_v37 = vld [vmem:[%s12649_s9] sm:$0xff]  }
 0x46f   : > { %8126 = vmatpush3.bf16.msra.mxu1 %v9208_v18  ;;  %v9221_v18 = vld [vmem:[%s12649_s9 + $0x8] sm:$0xff]  }
 0x470   : > { %8853 = vmatprep.subr.bf16.mxu1 %v12700_v19 }
 0x496   : > { %v8010_v52 = vpop.f32.mrb[76].mxu1 }
 0x497   : > { %v8011_v4 = vpop.f32.mrb[77].mxu1 }
 0x498   : > { %v12417_v46 = vpop.permute.xlu1 %5719  ;;  %v8012_v11 = vadd.f32 %v8011_v4, %v8010_v52  ;;  %v8013_v23 = vpop.f32.mrb[78].mxu1  ;;  %v9212_v52 = vld [vmem:[%s12647_s7] sm:$0xff]  }
 0x499   : > { %v8014_v38 = vpop.f32.mrb[79].mxu1 }
 0x49a   : > { %v5716_v36 = vpop.permute.xlu0 %5715  ;;  %v5590_v15 = vadd.f32 %v8012_v11, %v5533_v22  ;;  %v8015_v43 = vadd.f32 %v8014_v38, %v8013_v23 }
 0x49b   : > { %v5761_v47 = vsel %vm5741_vm5, %v12299_v20, %v5716_v36  ;;  %v5764_v12 = vsel %vm676_vm2, %v5716_v36, %v12417_v46  ;;  %v9191_v20 = vld [vmem:[%s12645_s5 + $0x2d0] sm:$0xff]  }
 0x49c   : > { %6699 = vmatprep.mubr.bf16.mxu0 %v5764_v12  ;;  %v5647_v42 = vadd.f32 %v5646_v54, %v5590_v15  ;;  %v5593_v0 = vadd.f32 %v8015_v43, %v5536_v27  ;;  %v9211_v54 = vld [vmem:[%s12645_s5 + $0x2b8] sm:$0xff]   ;;  %v9213_v12 = vld [vmem:[%s12647_s7 + $0x8] sm:$0xff]  }
 0x49d   : > { %6700 = vmatmul.mubr.bf16.vlgmr.msra.gmra.mrb[96].mxu0 %v5761_v47 }
 0x49e   : > { %8134 = vmatpush3.bf16.msra.mxu0 %v9185_v61  ;;  %v5657_v33 = vmax.f32 %v5647_v42, 0.0  ;;  %v5650_v39 = vadd.f32 %v5649_v45, %v5593_v0 }
 0x49f   : > { %8135 = vmatprep.subr.bf16.mxu0 %v9187_v62 }
 0x4a0   : > { %v5661_v56 = vmax.f32 %v5659_v9, %v5657_v33  ;;  %v5658_v1 = vmax.f32 %v5650_v39, 0.0  ;;  %v9207_v9 = vld [vmem:[%s12645_s5 + $0x2f0] sm:$0xff]  }
 0x4a1   : > { %v9214_v39 = vld [vmem:[%s12647_s7 + $0x10] sm:$0xff]  }
 0x4a2   : > { %8136 = vmatpush3.bf16.msra.mxu0 %v9189_v8  ;;  %v5662_v40 = vmax.f32 %v5660_v50, %v5658_v1  ;;  %v5664_v26 = vrot.slane %v5661_v56, 1  ;;  %v5667_v10 = vrot.slane %v5661_v56, 2  ;;  %v5725_v50 = vpop.permute.xlu1 %5724 }
 0x4a3   : > { %8137 = vmatprep.subr.bf16.mxu0 %v9191_v20  ;;  %v5767_v27 = vsel %vm508_vm1, %v12417_v46, %v5725_v50  ;;  %v9215_v20 = vld [vmem:[%s12647_s7 + $0x18] sm:$0xff]  }
 0x4a4   : > { %v5672_v41 = vrot.slane %v5662_v40, 2  ;;  %v5676_v21 = vrot.slane %v5662_v40, 1  ;;  %v5666_v48 = vmax.f32 %v5661_v56, %v5664_v26  ;;  %v9216_v56 = vld [vmem:[%s12647_s7 + $0x20] sm:$0xff]  }
 0x4a6   : > { %8138 = vmatpush3.bf16.msra.mxu0 %v9193_v34  ;;  %v5678_v60 = vmax.f32 %v5662_v40, %v5676_v21  ;;  %v5669_v63 = vmax.f32 %v5666_v48, %v5667_v10  ;;  %v5674_v13 = vmax.f32 %v5666_v48, %v5672_v41  ;;  %v9217_v21 = vld [vmem:[%s12647_s7 + $0x28] sm:$0xff]   ;;  %v9218_v48 = vld [vmem:[%s12647_s7 + $0x30] sm:$0xff]   ;;  %v9219_v10 = vld [vmem:[%s12647_s7 + $0x38] sm:$0xff]  }
 0x4a7   : > { %8139 = vmatprep.subr.bf16.mxu0 %v9195_v7 }
 0x4a8   : > { %v5679_v32 = vmax.f32 %v5678_v60, %v5672_v41  ;;  %v5670_v3 = vpack.c.bf16 %v5669_v63, %v5669_v63  ;;  %v5675_v17 = vpack.c.bf16 %v5674_v13, %v5674_v13  ;;  %v9223_v60 = vld [vmem:[%s12649_s9 + $0x18] sm:$0xff]   ;;  %v9224_v63 = vld [vmem:[%s12649_s9 + $0x20] sm:$0xff]   ;;  %v9225_v13 = vld [vmem:[%s12649_s9 + $0x28] sm:$0xff]  }
 0x4aa   : > { %v8039_v55 = vpop.f32.mrb[80].mxu1  ;;  %8140 = vmatpush3.bf16.msra.mxu0 %v9197_v35  ;;  %v5680_v16 = vpack.c.bf16 %v5679_v32, %v5679_v32  ;;  %v5727_v31 = vshrl.u32 %v5670_v3, 16  ;;  %v5733_v44 = vrot.slane %v5675_v17, 3  ;;  %v9222_v35 = vld [vmem:[%s12649_s9 + $0x10] sm:$0xff]   ;;  %v9227_v17 = vld [vmem:[%s12649_s9 + $0x38] sm:$0xff]  }
 0x4ab   : > { %v8040_v58 = vpop.f32.mrb[81].mxu1  ;;  %8141 = vmatprep.subr.bf16.mxu0 %v9199_v25 }
 0x4ac   : > { %v8041_v30 = vadd.f32 %v8040_v58, %v8039_v55  ;;  %v8042_v29 = vpop.f32.mrb[82].mxu1  ;;  %v5737_v5 = vshrl.u32 %v5680_v16, 16  ;;  %v5729_v49 = vrot.slane %v5727_v31, 1 }
 0x4ad   : > { %v8043_v53 = vpop.f32.mrb[83].mxu1 }
 0x4ae   : > { %8142 = vmatpush3.bf16.msra.mxu0 %v9201_v2  ;;  %5739 = vrot.lane.b32.xlu1 %v5737_v5, %s12718_s15  ;;  %v6582_v4 = vadd.f32 %v8041_v30, %v5970_v24  ;;  %s415_s15 = scalar_lea.vmem [#allocation5], %s12549_s0 }
 0x4af   : > { %5730 = vrot.lane.b32.xlu0 %v5729_v49, %s12719_s17  ;;  %8143 = vmatprep.subr.bf16.mxu0 %v9203_v14  ;;  %v9226_v49 = vld [vmem:[%s12649_s9 + $0x30] sm:$0xff]   ;;  %s12568_s17 = scalar_lea.hbm %s12652_s12, %s12676_s28  ;;  %s7032_s1 = sshll.u32 %s415_s15, 4  ;;  %s7033_s1 = int_to_ptr.vmem [resolvable:$true] %s7032_s1 }
 0x4b0   : > { %p9294_p0 = scmp.lt.s32.totalorder %s7033_s1, %s9292_s18 }
 0x4b2   : > { %8144 = vmatpush3.bf16.msra.mxu0 %v9205_v57  ;;  %v6805_v57 = vld [vmem:[%s12648_s8] sm:$0x1] }
 0x4b3   : > { %5734 = vrot.lane.b32.xlu0 %v5733_v44, %s12720_s20  ;;  %8145 = vmatprep.subr.bf16.mxu0 %v9207_v9  ;;  %s9287_s20 = scalar_lea.vmem %s7033_s1, 16 }
 0x4b4   : > { %p9288_p11 = scmp.ne.s32.totalorder %s7033_s1, %s9287_s20  ;;  %p9295_p1 = scmp.lt.s32.totalorder %s9293_s2, %s9287_s20 }
 0x4b6   : > { %8146 = vmatpush3.bf16.msra.mxu0 %v9209_v6  ;;  %p9289_p12 = pnand %p9288_p11, %p9493_p5  ;;  %p9296_p2 = por %p9295_p1, %p9294_p0 }
 0x4b7   : > { %8147 = vmatprep.subr.bf16.mxu0 %v9210_v28 }
 0x4b8   : > { %p9290_p13 = pneg %p9289_p12 }
 0x4ba   : > { %8148 = vmatpush3.bf16.msra.mxu0 %v9211_v54  ;;  %p9297_p3 = pnand %p9296_p2, %p9290_p13 }
 0x4bb   : > { %8873 = vmatprep.subr.bf16.mxu0 %v12700_v19 }
 0x520   : > { %v5740_v61 = vpop.permute.xlu1 %5739 }
 0x521   : > { %v8061_v51 = vpop.f32.mrb[92].mxu0  ;;  %v5731_v59 = vpop.permute.xlu0 %5730 }
 0x522   : > { %v8062_v45 = vpop.f32.mrb[93].mxu0  ;;  %v5770_v23 = vsel %vm5741_vm5, %v5670_v3, %v5731_v59 }
 0x523   : > { %v8063_v22 = vadd.f32 %v8062_v45, %v8061_v51  ;;  %v8064_v11 = vpop.f32.mrb[94].mxu0  ;;  %6739 = vmatprep.mubr.bf16.mxu1 %v5770_v23 }
 0x524   : > { %v8065_v36 = vpop.f32.mrb[95].mxu0  ;;  %6740 = vmatmul.mubr.bf16.vlgmr.msra.gmra.mrb[88].mxu1 %v5767_v27 }
 0x525   : > { %v6622_v38 = vadd.f32 %v8063_v22, %v6582_v4  ;;  %v8083_v15 = vpop.f32.mrb[84].mxu1  ;;  %v5735_v43 = vpop.permute.xlu0 %5734  ;;  %8854 = vmatpush3.bf16.msra.mxu1 %v9212_v52  ;;  %8869 = vmatprep.mubr.msk.bf16.mxu1 %vm9384_vm0, %v12700_v19 }
 0x526   : > { %v8084_v47 = vpop.f32.mrb[85].mxu1  ;;  %v5773_v46 = vsel %vm676_vm2, %v5731_v59, %v5735_v43  ;;  %v5776_v0 = vsel %vm508_vm1, %v5735_v43, %v5740_v61  ;;  %8855 = vmatprep.subr.bf16.mxu1 %v12700_v19 }
 0x527   : > { %v8085_v62 = vadd.f32 %v8084_v47, %v8083_v15  ;;  %v8086_v42 = vpop.f32.mrb[86].mxu1  ;;  %6779 = vmatprep.mubr.bf16.mxu0 %v5776_v0 }
 0x528   : > { %v8087_v8 = vpop.f32.mrb[87].mxu1  ;;  %6780 = vmatmul.mubr.bf16.vlgmr.msra.gmra.mrb[100].mxu0 %v5773_v46 }
 0x529   : > { %v6662_v33 = vadd.f32 %v8085_v62, %v6622_v38  ;;  %8856 = vmatpush3.bf16.msra.mxu1 %v9213_v12  ;;  %8889 = vmatprep.mubr.msk.bf16.mxu0 %vm9384_vm0, %v12700_v19 }
 0x52a   : > { %8857 = vmatprep.subr.bf16.mxu1 %v12700_v19  ;;  %8874 = vmatpush3.bf16.msra.mxu0 %v9220_v37 }
 0x52b   : > { %8875 = vmatprep.subr.bf16.mxu0 %v12700_v19 }
 0x52d   : > { %8858 = vmatpush3.bf16.msra.mxu1 %v9214_v39 }
 0x52e   : > { %8859 = vmatprep.subr.bf16.mxu1 %v12700_v19  ;;  %8876 = vmatpush3.bf16.msra.mxu0 %v9221_v18 }
 0x52f   : > { %8877 = vmatprep.subr.bf16.mxu0 %v12700_v19 }
 0x531   : > { %8860 = vmatpush3.bf16.msra.mxu1 %v9215_v20 }
 0x532   : > { %8861 = vmatprep.subr.bf16.mxu1 %v12700_v19  ;;  %8878 = vmatpush3.bf16.msra.mxu0 %v9222_v35 }
 0x533   : > { %8879 = vmatprep.subr.bf16.mxu0 %v12700_v19 }
 0x535   : > { %8862 = vmatpush3.bf16.msra.mxu1 %v9216_v56 }
 0x536   : > { %8863 = vmatprep.subr.bf16.mxu1 %v12700_v19  ;;  %8880 = vmatpush3.bf16.msra.mxu0 %v9223_v60 }
 0x537   : > { %8881 = vmatprep.subr.bf16.mxu0 %v12700_v19 }
 0x539   : > { %8864 = vmatpush3.bf16.msra.mxu1 %v9217_v21 }
 0x53a   : > { %8865 = vmatprep.subr.bf16.mxu1 %v12700_v19  ;;  %8882 = vmatpush3.bf16.msra.mxu0 %v9224_v63 }
 0x53b   : > { %8883 = vmatprep.subr.bf16.mxu0 %v12700_v19 }
 0x53d   : > { %8866 = vmatpush3.bf16.msra.mxu1 %v9218_v48 }
 0x53e   : > { %8867 = vmatprep.subr.bf16.mxu1 %v12700_v19  ;;  %8884 = vmatpush3.bf16.msra.mxu0 %v9225_v13 }
 0x53f   : > { %8885 = vmatprep.subr.bf16.mxu0 %v12700_v19 }
 0x541   : > { %8868 = vmatpush3.bf16.msra.mxu1 %v9219_v10 }
 0x542   : > { %8886 = vmatpush3.bf16.msra.mxu0 %v9226_v49 }
 0x543   : > { %8887 = vmatprep.subr.bf16.mxu0 %v12700_v19 }
 0x546   : > { %8888 = vmatpush3.bf16.msra.mxu0 %v9227_v17 }
 0x570   : > { %v8105_v1 = vpop.f32.mrb[96].mxu0 }
 0x571   : > { %v8106_v34 = vpop.f32.mrb[97].mxu0 }
 0x572   : > { %v8107_v40 = vadd.f32 %v8106_v34, %v8105_v1  ;;  %v8108_v26 = vpop.f32.mrb[98].mxu0 }
 0x573   : > { %v8109_v7 = vpop.f32.mrb[99].mxu0 }
 0x574   : > { %v6702_v41 = vadd.f32 %v8107_v40, %v6662_v33 }
 0x5f7   : > { %v8127_v25 = vpop.f32.mrb[88].mxu1 }
 0x5f8   : > { %v8128_v32 = vpop.f32.mrb[89].mxu1 }
 0x5f9   : > { %v8129_v3 = vadd.f32 %v8128_v32, %v8127_v25  ;;  %v8130_v55 = vpop.f32.mrb[90].mxu1 }
 0x5fa   : > { %v8131_v2 = vpop.f32.mrb[91].mxu1 }
 0x5fb   : > { %v6742_v58 = vadd.f32 %v8129_v3, %v6702_v41  ;;  %v8149_v16 = vpop.f32.mrb[100].mxu0 }
 0x5fc   : > { %v8150_v31 = vpop.f32.mrb[101].mxu0 }
 0x5fd   : > { %v8151_v30 = vadd.f32 %v8150_v31, %v8149_v16  ;;  %v8152_v29 = vpop.f32.mrb[102].mxu0 }
 0x5fe   : > { %v8153_v14 = vpop.f32.mrb[103].mxu0 }
 0x5ff   : > { %v6782_v53 = vadd.f32 %v8151_v30, %v6742_v58 }
 0x601   : > { %v6788_v5 = vpack.c.bf16 %v6782_v53, %v6782_v53  ;;  %6787 = vst [vmem:[%s415_s15] sm:$0x1] %v6782_v53 }
 0x603   : > { %8870 = vmatmul.mubr.bf16.vlgmr.msra.gmra.mrb[92].mxu1 %v6788_v5 }
 0x6d6   : > { %v6888_v9 = vpop.f32.mrb[92].mxu1 }
 0x6d7   : > { %v6889_v44 = vadd.f32 %v6888_v9, %v6805_v57  ;;  %v8871_v6 = vpop.f32.mrb[93].mxu1 }
 0x6d8   : > { %v6891_v28 = vpop.f32.mrb[94].mxu1 }
 0x6d9   : > { %v6894_v54 = vmax.f32 %v6889_v44, 0.0  ;;  %v8872_v24 = vpop.f32.mrb[95].mxu1 }
 0x6db   : > { %v6895_v50 = vpack.c.bf16 %v6894_v54, %v6894_v54 }
 0x6dd   : > { %8890 = vmatmul.mubr.bf16.vlgmr.msra.gmra.mrb[104].mxu0 %v6895_v50 }
 0x6de   : > { %9300 = shalt.err (!%p9297_p3)
}
 0x6df   : > { %s9301_s15 = scalar_lea.hbm %s12568_s17, 16  ;;  %s9305_s26 = scalar_lea.hbm %s12652_s12, 32 }
 0x6e0   : > { %p9302_p4 = scmp.ne.s32.totalorder %s12568_s17, %s9301_s15  ;;  %p9306_p9 = scmp.lt.u32.totalorder %s12568_s17, %s12652_s12 }
 0x6e1   : > { %p9307_p10 = scmp.lt.u32.totalorder %s9305_s26, %s9301_s15  ;;  %p9309_p12 = scmp.lt.u32.totalorder %s9301_s15, %s12568_s17 }
 0x6e2   : > { %p9303_p7 = pnand %p9302_p4, %p9493_p5 }
 0x6e3   : > { %p9308_p11 = por %p9307_p10, %p9306_p9 }
 0x6e4   : > { %p9304_p8 = pneg %p9303_p7 }
 0x6e5   : > { %p9310_p13 = por %p9309_p12, %p9308_p11 }
 0x6e7   : > { %p9311_p0 = pnand %p9310_p13, %p9304_p8 }
 0x6e9   : > { %9314 = shalt.err (!%p9311_p0)
}
 0x6ea   : > { %8895 = dma.vmem_to_hbm [thread:$0]  (%p9493_p5), %s7033_s1, 16, %s12568_s17, %s7007_s19   ;;  %v6912_v19 = vld [vmem:[%s12650_s10] sm:$0x1] }
 0x6eb   : > { %s409_s28 = scalar_lea.vmem [#allocation3], %s12549_s0  ;;  %s12721_s15 = sshll.u32 %s9476_s25, 4 }
 0x6ec   : > { %s7019_s16 = sshll.u32 %s409_s28, 4  ;;  %s12597_s18 = scalar_lea.hbm %s12651_s11, %s12721_s15  ;;  %s12599_s16 = int_to_ptr.vmem [resolvable:$true] %s7019_s16 }
 0x6ed   : > { %s7003_s17 = scalar_lea.sflag [#allocation4], %s12549_s0  ;;  %s9315_s1 = scalar_lea.vmem %s12599_s16, 16 }
 0x6ee   : > { %p9316_p1 = scmp.ne.s32.totalorder %s12599_s16, %s9315_s1  ;;  %s9389_s25 = smov [#allocation3]  }
 0x6ef   : > { %s9319_s19 = sshll.u32 %s9389_s25, 4  ;;  %s9320_s19 = int_to_ptr.vmem [resolvable:$false] %s9319_s19 }
 0x6f0   : > { %p9317_p2 = pnand %p9316_p1, %p9493_p5  ;;  %s9321_s2 = scalar_lea.vmem %s9320_s19, 32 }
 0x6f1   : > { %p9322_p4 = scmp.lt.s32.totalorder %s12599_s16, %s9320_s19  ;;  %p9323_p7 = scmp.lt.s32.totalorder %s9321_s2, %s9315_s1 }
 0x6f2   : > { %p9318_p3 = pneg %p9317_p2 }
 0x6f3   : > { %p9324_p8 = por %p9323_p7, %p9322_p4 }
 0x6f5   : > { %p9325_p9 = pnand %p9324_p8, %p9318_p3 }
 0x7b0   : > { %v6995_v51 = vpop.f32.mrb[104].mxu0 }
 0x7b1   : > { %v6996_v45 = vadd.f32 %v6995_v51, %v6912_v19  ;;  %v8891_v59 = vpop.f32.mrb[105].mxu0 }
 0x7b2   : > { %v6998_v52 = vpop.f32.mrb[106].mxu0 }
 0x7b3   : > { %7001 = vst [vmem:[%s409_s28] sm:$0x1] %v6996_v45  ;;  %v8892_v4 = vpop.f32.mrb[107].mxu0 }
 0x7b4   : > { %9328 = shalt.err (!%p9325_p9)
}
 0x7b5   : > { %s9329_s0 = scalar_lea.hbm %s12597_s18, 16  ;;  %s9333_s15 = scalar_lea.hbm %s12651_s11, 32 }
 0x7b6   : > { %p9330_p10 = scmp.ne.s32.totalorder %s12597_s18, %s9329_s0  ;;  %p9334_p13 = scmp.lt.u32.totalorder %s12597_s18, %s12651_s11 }
 0x7b7   : > { %p9335_p0 = scmp.lt.u32.totalorder %s9333_s15, %s9329_s0  ;;  %p9337_p2 = scmp.lt.u32.totalorder %s9329_s0, %s12597_s18 }
 0x7b8   : > { %p9331_p11 = pnand %p9330_p10, %p9493_p5 }
 0x7b9   : > { %p9336_p1 = por %p9335_p0, %p9334_p13 }
 0x7ba   : > { %p9332_p12 = pneg %p9331_p11 }
 0x7bb   : > { %p9338_p3 = por %p9337_p2, %p9336_p1 }
 0x7bd   : > { %p9339_p4 = pnand %p9338_p3, %p9332_p12 }
 0x7bf   : > { %9342 = shalt.err (!%p9339_p4)
}
 0x7c0   : > { %8894 = dma.vmem_to_hbm [thread:$0]  (%p9493_p5), %s12599_s16, 16, %s12597_s18, %s7003_s17  }
 0x7c1 PF: > { %p8905_p7 = scmp.ge.s32.totalorder %s9381_s24, 2  ;;  %s7044_s1 = sand.u32 1, %s9369_s21  }
 0x7c2   : > { %s7045_s25 = scalar_lea.sflag [#allocation4], %s7044_s1 }
 0x7c3   : > { %p8899_p8 = pnand %p8905_p7, %p9497_p6 }
 0x7c5   : > { %9360 = dma.done.wait (!%p8899_p8), %s7045_s25, 16  }
 0x7c6   : > { %9362 = vsyncadd (!%p8899_p8), %s7045_s25, 4294967280  ;;  %s7053_s19 = scalar_lea.sflag [#allocation6], %s7044_s1 }
 0x7c7   : > { %9364 = dma.done.wait (!%p8899_p8), %s7053_s19, 16  }
 0x7c8   : > { %9366 = vsyncadd (!%p8899_p8), %s7053_s19, 4294967280  ;;  %p26_p5 = scmp.ge.s32.totalorder %s9480_s27, 4   ;;  %s12722_s21 = smov %s9373_s22 }
 0x7c9   : > { %s12723_s22 = smov %s9377_s23  ;;  %s12724_s23 = smov %s9491_s30 }
 0x7ca   : > { %s12725_s24 = smov %s9480_s27  ;;  %28 = sbr.rel (!%p26_p5) target bundleno = 9 (0x9), region = 116 }
 0x7d1   :  { %7057 = vsyncpa [#allocation4], 1 }
 0x7d2   :  { %7059 = vsyncpa [#allocation4 + $0x1], 1 }
 0x7d3   :  { %7060 = vsyncpa [#allocation6], 1 }
 0x7d4   :  { %7062 = vsyncpa [#allocation6 + $0x1], 1 }

</bundles_post_ra>
